<compile_context>
chip_gen: v5e
topology: v5e:2x2
jax: 0.10.0
libtpu: 0.0.40
codegen_flags: <defaults>
</compile_context>

<pallas_src>
import jax
import jax.numpy as jnp
from jax.experimental import pallas as pl
from jax.experimental.pallas import tpu as pltpu

SEQ_LEN = 8     # timesteps after pooling/reshape
FEAT    = 64    # lstm1 input_size
HIDDEN1 = 256   # lstm1 hidden_size
HIDDEN2 = 128   # lstm2 hidden_size
BLOCK_B = 128   # batch rows per grid step (multiple of 8)


def _gate_update(gates, c, hid):
    """PyTorch LSTM gate order (i, f, g, o); all elementwise math in float32."""
    i = jax.nn.sigmoid(gates[:, 0 * hid:1 * hid])
    f = jax.nn.sigmoid(gates[:, 1 * hid:2 * hid])
    g = jnp.tanh(gates[:, 2 * hid:3 * hid])
    o = jax.nn.sigmoid(gates[:, 3 * hid:4 * hid])
    c_new = f * c + i * g
    h_new = o * jnp.tanh(c_new)
    return h_new, c_new


def _lstm_branch_kernel(seq_ref, wih1_ref, b1_ref, whh1_ref,
                        wih2_ref, b2_ref, whh2_ref, out_ref,
                        gx1_scr, h1_scr, gx2_scr):
    """Two stacked LSTM layers; writes lstm2's last-timestep hidden state.

    seq_ref:  (T*BB, 64)   bf16  pooled sequence, rows ordered (t, batch-row)
    wih1_ref: (64, 1024)   bf16  == weight_ih_l0.T
    b1_ref:   (1, 1024)    f32   == b_ih_l0 + b_hh_l0
    whh1_ref: (256, 1024)  bf16  == weight_hh_l0.T
    wih2_ref: (256, 512)   bf16  == weight_ih_l1.T
    b2_ref:   (1, 512)     f32   == b_ih_l1 + b_hh_l1
    whh2_ref: (128, 512)   bf16  == weight_hh_l1.T
    out_ref:  (BB, 128)    f32
    """
    TB = seq_ref.shape[0]                 # SEQ_LEN * BB
    BB = TB // SEQ_LEN

    # ---- layer-1 input projection + bias: ONE batched MXU matmul ----
    # (independent of the recurrence; fills sublanes; no f32 gx1 HBM trip)
    gx1_scr[...] = (
        jnp.dot(seq_ref[...], wih1_ref[...], preferred_element_type=jnp.float32)
        + jnp.broadcast_to(b1_ref[...], (TB, 4 * HIDDEN1)))

    # TODO(synk): on v5e/v6e inspect the bundle dump for per-step RHS re-push
    # of whh1/whh2; if present, drive the MXU explicitly
    # (pltpu.matmul_push_rhs / matmul_acc_lhs / matmul_pop) to keep the
    # recurrent weights staged across the 8 timesteps.
    whh1 = whh1_ref[...]                                   # (256, 1024) bf16

    # ---- lstm1 recurrence: only h @ Whh1 is serial ----
    h1 = jnp.zeros((BB, HIDDEN1), jnp.float32)
    c1 = jnp.zeros((BB, HIDDEN1), jnp.float32)
    for t in range(SEQ_LEN):                               # static -> unrolled
        rows = pl.ds(t * BB, BB)
        gates1 = gx1_scr[rows, :] + jnp.dot(
            h1.astype(jnp.bfloat16), whh1, preferred_element_type=jnp.float32)
        h1, c1 = _gate_update(gates1, c1, HIDDEN1)
        h1_scr[rows, :] = h1          # spill to VMEM: frees vregs, feeds lstm2
    # lstm_dropout between the layers is identity in eval mode.

    # ---- lstm2 input projection + bias, batched over all timesteps ----
    # one (T*BB, 256)@(256, 512) matmul replaces 8 per-step concats + K=384 dots
    gx2_scr[...] = (
        jnp.dot(h1_scr[...].astype(jnp.bfloat16), wih2_ref[...],
                preferred_element_type=jnp.float32)
        + jnp.broadcast_to(b2_ref[...], (TB, 4 * HIDDEN2)))

    whh2 = whh2_ref[...]                                   # (128, 512) bf16
    h2 = jnp.zeros((BB, HIDDEN2), jnp.float32)
    c2 = jnp.zeros((BB, HIDDEN2), jnp.float32)
    for t in range(SEQ_LEN):
        rows = pl.ds(t * BB, BB)
        gates2 = gx2_scr[rows, :] + jnp.dot(
            h2.astype(jnp.bfloat16), whh2, preferred_element_type=jnp.float32)
        h2, c2 = _gate_update(gates2, c2, HIDDEN2)

    out_ref[...] = h2                                      # last_time_step


def _pool_to_sequence(x):
    """AdaptiveAvgPool2d((8,8)) + view -> (B, 8, 64); exact for H,W % 8 == 0."""
    B, C, H, W = x.shape
    assert C * 8 * 8 == SEQ_LEN * FEAT, "channels must yield an (8, 64) sequence"
    assert H % 8 == 0 and W % 8 == 0, "demo uses divisible spatial dims"
    pooled = x.reshape(B, C, 8, H // 8, 8, W // 8).mean(axis=(3, 5))   # (B,C,8,8)
    return pooled.reshape(B, SEQ_LEN, FEAT).astype(jnp.float32)


def lstm_branch_forward(x, params, block_b=BLOCK_B):
    """x: (B, C, H, W) NCHW float32 with C*8*8 == 8*64 (C=8 here)."""
    B = x.shape[0]
    seq = _pool_to_sequence(x)                                  # (B, 8, 64) f32

    # Batch blocking: pad to a multiple of 8, pick a block size, pad to a
    # multiple of the block.  Padded rows are independent and sliced off below.
    b_pad0 = max(8, -(-B // 8) * 8)
    bb = min(block_b, b_pad0)
    nblk = -(-b_pad0 // bb)
    b_pad = nblk * bb
    if b_pad != B:
        seq = jnp.pad(seq, ((0, b_pad - B), (0, 0), (0, 0)))

    # Lane-dense 2-D slab with rows ordered (batch_block, timestep, row-in-block)
    # so each grid step gets a contiguous (T*bb, 64) tile (pure layout plumbing).
    seq_2d = (seq.transpose(1, 0, 2)                            # (T, b_pad, F)
                 .reshape(SEQ_LEN, nblk, bb, FEAT)
                 .transpose(1, 0, 2, 3)                         # (nblk, T, bb, F)
                 .reshape(nblk * SEQ_LEN * bb, FEAT)
                 .astype(jnp.bfloat16))

    wih1 = params["wih1"].astype(jnp.bfloat16)                  # (64, 1024)
    whh1 = params["whh1"].astype(jnp.bfloat16)                  # (256, 1024)
    wih2 = params["wih2"].astype(jnp.bfloat16)                  # (256, 512)
    whh2 = params["whh2"].astype(jnp.bfloat16)                  # (128, 512)
    b1 = params["b1"].reshape(1, 4 * HIDDEN1).astype(jnp.float32)
    b2 = params["b2"].reshape(1, 4 * HIDDEN2).astype(jnp.float32)

    tb = SEQ_LEN * bb
    const = lambda shape: pl.BlockSpec(shape, lambda i: (0, 0))  # resident weights

    out = pl.pallas_call(
        _lstm_branch_kernel,
        out_shape=jax.ShapeDtypeStruct((b_pad, HIDDEN2), jnp.float32),
        grid=(nblk,),
        in_specs=[
            pl.BlockSpec((tb, FEAT), lambda i: (i, 0)),          # seq block
            const((FEAT, 4 * HIDDEN1)),                          # wih1
            const((1, 4 * HIDDEN1)),                             # b1
            const((HIDDEN1, 4 * HIDDEN1)),                       # whh1
            const((HIDDEN1, 4 * HIDDEN2)),                       # wih2
            const((1, 4 * HIDDEN2)),                             # b2
            const((HIDDEN2, 4 * HIDDEN2)),                       # whh2
        ],
        out_specs=pl.BlockSpec((bb, HIDDEN2), lambda i: (i, 0)),
        scratch_shapes=[
            pltpu.VMEM((tb, 4 * HIDDEN1), jnp.float32),          # gx1 pre-acts
            pltpu.VMEM((tb, HIDDEN1), jnp.float32),              # h1 sequence
            pltpu.VMEM((tb, 4 * HIDDEN2), jnp.float32),          # gx2 pre-acts
        ],
        compiler_params=pltpu.CompilerParams(
            dimension_semantics=("parallel",)),
    )(seq_2d, wih1, b1, whh1, wih2, b2, whh2)
    return out[:B]


def lstm_branch_reference(x, params):
    """Pure-JAX reference with the kernel's precision choices (bf16 matmul
    operands, f32 accumulation and gate math) and the same decomposition."""
    seq = _pool_to_sequence(x).astype(jnp.bfloat16)
    B = seq.shape[0]
    wih1 = params["wih1"].astype(jnp.bfloat16)
    whh1 = params["whh1"].astype(jnp.bfloat16)
    wih2 = params["wih2"].astype(jnp.bfloat16)
    whh2 = params["whh2"].astype(jnp.bfloat16)

    h1 = jnp.zeros((B, HIDDEN1), jnp.float32)
    c1 = jnp.zeros((B, HIDDEN1), jnp.float32)
    h1_seq = []
    for t in range(SEQ_LEN):
        gx = jnp.dot(seq[:, t, :], wih1,
                     preferred_element_type=jnp.float32) + params["b1"]
        gates1 = gx + jnp.dot(h1.astype(jnp.bfloat16), whh1,
                              preferred_element_type=jnp.float32)
        h1, c1 = _gate_update(gates1, c1, HIDDEN1)
        h1_seq.append(h1)

    h2 = jnp.zeros((B, HIDDEN2), jnp.float32)
    c2 = jnp.zeros((B, HIDDEN2), jnp.float32)
    for t in range(SEQ_LEN):
        gx2 = jnp.dot(h1_seq[t].astype(jnp.bfloat16), wih2,
                      preferred_element_type=jnp.float32) + params["b2"]
        gates2 = gx2 + jnp.dot(h2.astype(jnp.bfloat16), whh2,
                               preferred_element_type=jnp.float32)
        h2, c2 = _gate_update(gates2, c2, HIDDEN2)
    return h2


def lstm_branch_reference_f32(x, params):
    """Full-f32 (PyTorch-semantics) reference to bound the bf16 divergence."""
    hp = jax.lax.Precision.HIGHEST
    seq = _pool_to_sequence(x)
    B = seq.shape[0]
    h1 = jnp.zeros((B, HIDDEN1), jnp.float32)
    c1 = jnp.zeros((B, HIDDEN1), jnp.float32)
    h1_seq = []
    for t in range(SEQ_LEN):
        gates1 = (jnp.dot(seq[:, t, :], params["wih1"], precision=hp)
                  + jnp.dot(h1, params["whh1"], precision=hp) + params["b1"])
        h1, c1 = _gate_update(gates1, c1, HIDDEN1)
        h1_seq.append(h1)
    h2 = jnp.zeros((B, HIDDEN2), jnp.float32)
    c2 = jnp.zeros((B, HIDDEN2), jnp.float32)
    for t in range(SEQ_LEN):
        gates2 = (jnp.dot(h1_seq[t], params["wih2"], precision=hp)
                  + jnp.dot(h2, params["whh2"], precision=hp) + params["b2"])
        h2, c2 = _gate_update(gates2, c2, HIDDEN2)
    return h2


def init_params(key):
    """Deterministic PyTorch-style LSTM init: U(-1/sqrt(H), 1/sqrt(H))."""
    ks = jax.random.split(key, 8)
    k1 = 1.0 / jnp.sqrt(jnp.float32(HIDDEN1))
    k2 = 1.0 / jnp.sqrt(jnp.float32(HIDDEN2))
    u = lambda k, shape, lim: jax.random.uniform(k, shape, jnp.float32, -lim, lim)

    wih1 = u(ks[0], (FEAT, 4 * HIDDEN1), k1)        # == weight_ih_l0.T
    whh1 = u(ks[1], (HIDDEN1, 4 * HIDDEN1), k1)     # == weight_hh_l0.T
    b1 = u(ks[2], (4 * HIDDEN1,), k1) + u(ks[3], (4 * HIDDEN1,), k1)

    wih2 = u(ks[4], (HIDDEN1, 4 * HIDDEN2), k2)     # == weight_ih_l1.T
    whh2 = u(ks[5], (HIDDEN2, 4 * HIDDEN2), k2)     # == weight_hh_l1.T
    b2 = u(ks[6], (4 * HIDDEN2,), k2) + u(ks[7], (4 * HIDDEN2,), k2)

    return {"wih1": wih1, "whh1": whh1, "b1": b1,
            "wih2": wih2, "whh2": whh2, "b2": b2}


if __name__ == "__main__":
    key = jax.random.PRNGKey(0)
    pkey, xkey = jax.random.split(key)
    params = init_params(pkey)

    # small deterministic example: batch=2, channels=8, spatial=16x16
    x = jax.random.normal(xkey, (2, 8, 16, 16), dtype=jnp.float32)

    out = jax.block_until_ready(jax.jit(lstm_branch_forward)(x, params))
    assert out.shape == (2, HIDDEN2) and out.dtype == jnp.float32
    assert bool(jnp.all(jnp.isfinite(out)))

    # matched-precision reference (same bf16/f32 decomposition as the kernel)
    ref = jax.block_until_ready(jax.jit(lstm_branch_reference)(x, params))
    assert bool(jnp.max(jnp.abs(out - ref)) < 1e-2)

    # full-f32 reference: bounds real divergence from PyTorch-semantics math
    ref32 = jax.block_until_ready(jax.jit(lstm_branch_reference_f32)(x, params))
    assert bool(jnp.max(jnp.abs(out - ref32)) < 5e-2)

    print("KERNEL_OK")
</pallas_src>

<mosaic_0001>
module attributes {stable_mosaic.version = 11 : i64} {
  func.func @_lstm_branch_kernel(%arg0: i32, %arg1: memref<64x64xbf16, #tpu.memory_space<vmem>>, %arg2: memref<64x1024xbf16, #tpu.memory_space<vmem>>, %arg3: memref<1x1024xf32, #tpu.memory_space<vmem>>, %arg4: memref<256x1024xbf16, #tpu.memory_space<vmem>>, %arg5: memref<256x512xbf16, #tpu.memory_space<vmem>>, %arg6: memref<1x512xf32, #tpu.memory_space<vmem>>, %arg7: memref<128x512xbf16, #tpu.memory_space<vmem>>, %arg8: memref<8x128xf32, #tpu.memory_space<vmem>>, %arg9: memref<64x1024xf32, #tpu.memory_space<vmem>>, %arg10: memref<64x256xf32, #tpu.memory_space<vmem>>, %arg11: memref<64x512xf32, #tpu.memory_space<vmem>>) attributes {dimension_semantics = [#tpu.dimension_semantics<parallel>], iteration_bounds = array<i64: 1>, scalar_prefetch = 0 : i64, scratch_operands = 3 : i64, tpu.core_type = #tpu.core_type<tc>, window_params = [{transform_indices = @transform_0, window_bounds = array<i64: 64, 64>}, {pipeline_mode = #tpu.pipeline_mode<synchronous>, transform_indices = @transform_1, window_bounds = array<i64: 64, 1024>}, {pipeline_mode = #tpu.pipeline_mode<synchronous>, transform_indices = @transform_2, window_bounds = array<i64: 1, 1024>}, {pipeline_mode = #tpu.pipeline_mode<synchronous>, transform_indices = @transform_3, window_bounds = array<i64: 256, 1024>}, {pipeline_mode = #tpu.pipeline_mode<synchronous>, transform_indices = @transform_4, window_bounds = array<i64: 256, 512>}, {pipeline_mode = #tpu.pipeline_mode<synchronous>, transform_indices = @transform_5, window_bounds = array<i64: 1, 512>}, {pipeline_mode = #tpu.pipeline_mode<synchronous>, transform_indices = @transform_6, window_bounds = array<i64: 128, 512>}, {transform_indices = @transform_7, window_bounds = array<i64: 8, 128>}]} {
    %c0 = arith.constant 0 : index
    %c0_0 = arith.constant 0 : index
    %0 = vector.load %arg1[%c0, %c0_0] : memref<64x64xbf16, #tpu.memory_space<vmem>>, vector<64x64xbf16>
    %c0_1 = arith.constant 0 : index
    %c0_2 = arith.constant 0 : index
    %1 = vector.load %arg2[%c0_1, %c0_2] : memref<64x1024xbf16, #tpu.memory_space<vmem>>, vector<64x1024xbf16>
    %cst = arith.constant dense<0.000000e+00> : vector<64x1024xf32>
    %2 = tpu.matmul %0, %1, %cst {dimension_numbers = #tpu.dot_dimension_numbers<[1], [0], [0], [1], [0, 0, 1, 1], [], []>} : vector<64x64xbf16>, vector<64x1024xbf16>, vector<64x1024xf32> -> vector<64x1024xf32>
    %c0_3 = arith.constant 0 : index
    %c0_4 = arith.constant 0 : index
    %3 = vector.load %arg3[%c0_3, %c0_4] : memref<1x1024xf32, #tpu.memory_space<vmem>>, vector<1x1024xf32>
    %4 = vector.shape_cast %3 : vector<1x1024xf32> to vector<1x1024xf32>
    %5 = vector.broadcast %4 : vector<1x1024xf32> to vector<64x1024xf32>
    %6 = arith.addf %2, %5 : vector<64x1024xf32>
    %c0_5 = arith.constant 0 : index
    %c0_6 = arith.constant 0 : index
    %7 = vector.load %arg9[%c0_5, %c0_6] : memref<64x1024xf32, #tpu.memory_space<vmem>>, vector<64x1024xf32>
    tpu.vector_store %arg9[%c0_5, %c0_6], %6 {strides = array<i32>} : memref<64x1024xf32, #tpu.memory_space<vmem>>, vector<64x1024xf32>,
    %c0_7 = arith.constant 0 : index
    %c0_8 = arith.constant 0 : index
    %8 = vector.load %arg4[%c0_7, %c0_8] : memref<256x1024xbf16, #tpu.memory_space<vmem>>, vector<256x1024xbf16>
    %cst_9 = arith.constant 0.000000e+00 : f32
    %9 = vector.broadcast %cst_9 : f32 to vector<8x256xf32>
    %cst_10 = arith.constant 0.000000e+00 : f32
    %10 = vector.broadcast %cst_10 : f32 to vector<8x256xf32>
    %c0_11 = arith.constant 0 : index
    %c0_12 = arith.constant 0 : index
    %11 = vector.load %arg9[%c0_11, %c0_12] : memref<64x1024xf32, #tpu.memory_space<vmem>>, vector<8x1024xf32>
    %12 = arith.truncf %9 : vector<8x256xf32> to vector<8x256xbf16>
    %cst_13 = arith.constant dense<0.000000e+00> : vector<8x1024xf32>
    %13 = tpu.matmul %12, %8, %cst_13 {dimension_numbers = #tpu.dot_dimension_numbers<[1], [0], [0], [1], [0, 0, 1, 1], [], []>} : vector<8x256xbf16>, vector<256x1024xbf16>, vector<8x1024xf32> -> vector<8x1024xf32>
    %14 = arith.addf %11, %13 : vector<8x1024xf32>
    %15 = vector.extract_strided_slice %14 {offsets = [0, 0], sizes = [8, 256], strides = [1, 1]} : vector<8x1024xf32> to vector<8x256xf32>
    %16 = arith.negf %15 : vector<8x256xf32>
    %17 = math.exp %16 : vector<8x256xf32>
    %cst_14 = arith.constant 1.000000e+00 : f32
    %18 = vector.broadcast %cst_14 : f32 to vector<8x256xf32>
    %19 = arith.addf %18, %17 : vector<8x256xf32>
    %20 = arith.divf %18, %19 : vector<8x256xf32>
    %21 = vector.extract_strided_slice %14 {offsets = [0, 256], sizes = [8, 256], strides = [1, 1]} : vector<8x1024xf32> to vector<8x256xf32>
    %22 = arith.negf %21 : vector<8x256xf32>
    %23 = math.exp %22 : vector<8x256xf32>
    %cst_15 = arith.constant 1.000000e+00 : f32
    %24 = vector.broadcast %cst_15 : f32 to vector<8x256xf32>
    %25 = arith.addf %24, %23 : vector<8x256xf32>
    %26 = arith.divf %24, %25 : vector<8x256xf32>
    %27 = vector.extract_strided_slice %14 {offsets = [0, 512], sizes = [8, 256], strides = [1, 1]} : vector<8x1024xf32> to vector<8x256xf32>
    %28 = math.tanh %27 : vector<8x256xf32>
    %29 = vector.extract_strided_slice %14 {offsets = [0, 768], sizes = [8, 256], strides = [1, 1]} : vector<8x1024xf32> to vector<8x256xf32>
    %30 = arith.negf %29 : vector<8x256xf32>
    %31 = math.exp %30 : vector<8x256xf32>
    %cst_16 = arith.constant 1.000000e+00 : f32
    %32 = vector.broadcast %cst_16 : f32 to vector<8x256xf32>
    %33 = arith.addf %32, %31 : vector<8x256xf32>
    %34 = arith.divf %32, %33 : vector<8x256xf32>
    %35 = arith.mulf %26, %10 : vector<8x256xf32>
    %36 = arith.mulf %20, %28 : vector<8x256xf32>
    %37 = arith.addf %35, %36 : vector<8x256xf32>
    %38 = math.tanh %37 : vector<8x256xf32>
    %39 = arith.mulf %34, %38 : vector<8x256xf32>
    %c0_17 = arith.constant 0 : index
    %c0_18 = arith.constant 0 : index
    %40 = vector.load %arg10[%c0_17, %c0_18] : memref<64x256xf32, #tpu.memory_space<vmem>>, vector<8x256xf32>
    tpu.vector_store %arg10[%c0_17, %c0_18], %39 {strides = array<i32>} : memref<64x256xf32, #tpu.memory_space<vmem>>, vector<8x256xf32>,
    %c8 = arith.constant 8 : index
    %c0_19 = arith.constant 0 : index
    %41 = vector.load %arg9[%c8, %c0_19] : memref<64x1024xf32, #tpu.memory_space<vmem>>, vector<8x1024xf32>
    %42 = arith.truncf %39 : vector<8x256xf32> to vector<8x256xbf16>
    %cst_20 = arith.constant dense<0.000000e+00> : vector<8x1024xf32>
    %43 = tpu.matmul %42, %8, %cst_20 {dimension_numbers = #tpu.dot_dimension_numbers<[1], [0], [0], [1], [0, 0, 1, 1], [], []>} : vector<8x256xbf16>, vector<256x1024xbf16>, vector<8x1024xf32> -> vector<8x1024xf32>
    %44 = arith.addf %41, %43 : vector<8x1024xf32>
    %45 = vector.extract_strided_slice %44 {offsets = [0, 0], sizes = [8, 256], strides = [1, 1]} : vector<8x1024xf32> to vector<8x256xf32>
    %46 = arith.negf %45 : vector<8x256xf32>
    %47 = math.exp %46 : vector<8x256xf32>
    %cst_21 = arith.constant 1.000000e+00 : f32
    %48 = vector.broadcast %cst_21 : f32 to vector<8x256xf32>
    %49 = arith.addf %48, %47 : vector<8x256xf32>
    %50 = arith.divf %48, %49 : vector<8x256xf32>
    %51 = vector.extract_strided_slice %44 {offsets = [0, 256], sizes = [8, 256], strides = [1, 1]} : vector<8x1024xf32> to vector<8x256xf32>
    %52 = arith.negf %51 : vector<8x256xf32>
    %53 = math.exp %52 : vector<8x256xf32>
    %cst_22 = arith.constant 1.000000e+00 : f32
    %54 = vector.broadcast %cst_22 : f32 to vector<8x256xf32>
    %55 = arith.addf %54, %53 : vector<8x256xf32>
    %56 = arith.divf %54, %55 : vector<8x256xf32>
    %57 = vector.extract_strided_slice %44 {offsets = [0, 512], sizes = [8, 256], strides = [1, 1]} : vector<8x1024xf32> to vector<8x256xf32>
    %58 = math.tanh %57 : vector<8x256xf32>
    %59 = vector.extract_strided_slice %44 {offsets = [0, 768], sizes = [8, 256], strides = [1, 1]} : vector<8x1024xf32> to vector<8x256xf32>
    %60 = arith.negf %59 : vector<8x256xf32>
    %61 = math.exp %60 : vector<8x256xf32>
    %cst_23 = arith.constant 1.000000e+00 : f32
    %62 = vector.broadcast %cst_23 : f32 to vector<8x256xf32>
    %63 = arith.addf %62, %61 : vector<8x256xf32>
    %64 = arith.divf %62, %63 : vector<8x256xf32>
    %65 = arith.mulf %56, %37 : vector<8x256xf32>
    %66 = arith.mulf %50, %58 : vector<8x256xf32>
    %67 = arith.addf %65, %66 : vector<8x256xf32>
    %68 = math.tanh %67 : vector<8x256xf32>
    %69 = arith.mulf %64, %68 : vector<8x256xf32>
    %c8_24 = arith.constant 8 : index
    %c0_25 = arith.constant 0 : index
    %70 = vector.load %arg10[%c8_24, %c0_25] : memref<64x256xf32, #tpu.memory_space<vmem>>, vector<8x256xf32>
    tpu.vector_store %arg10[%c8_24, %c0_25], %69 {strides = array<i32>} : memref<64x256xf32, #tpu.memory_space<vmem>>, vector<8x256xf32>,
    %c16 = arith.constant 16 : index
    %c0_26 = arith.constant 0 : index
    %71 = vector.load %arg9[%c16, %c0_26] : memref<64x1024xf32, #tpu.memory_space<vmem>>, vector<8x1024xf32>
    %72 = arith.truncf %69 : vector<8x256xf32> to vector<8x256xbf16>
    %cst_27 = arith.constant dense<0.000000e+00> : vector<8x1024xf32>
    %73 = tpu.matmul %72, %8, %cst_27 {dimension_numbers = #tpu.dot_dimension_numbers<[1], [0], [0], [1], [0, 0, 1, 1], [], []>} : vector<8x256xbf16>, vector<256x1024xbf16>, vector<8x1024xf32> -> vector<8x1024xf32>
    %74 = arith.addf %71, %73 : vector<8x1024xf32>
    %75 = vector.extract_strided_slice %74 {offsets = [0, 0], sizes = [8, 256], strides = [1, 1]} : vector<8x1024xf32> to vector<8x256xf32>
    %76 = arith.negf %75 : vector<8x256xf32>
    %77 = math.exp %76 : vector<8x256xf32>
    %cst_28 = arith.constant 1.000000e+00 : f32
    %78 = vector.broadcast %cst_28 : f32 to vector<8x256xf32>
    %79 = arith.addf %78, %77 : vector<8x256xf32>
    %80 = arith.divf %78, %79 : vector<8x256xf32>
    %81 = vector.extract_strided_slice %74 {offsets = [0, 256], sizes = [8, 256], strides = [1, 1]} : vector<8x1024xf32> to vector<8x256xf32>
    %82 = arith.negf %81 : vector<8x256xf32>
    %83 = math.exp %82 : vector<8x256xf32>
    %cst_29 = arith.constant 1.000000e+00 : f32
    %84 = vector.broadcast %cst_29 : f32 to vector<8x256xf32>
    %85 = arith.addf %84, %83 : vector<8x256xf32>
    %86 = arith.divf %84, %85 : vector<8x256xf32>
    %87 = vector.extract_strided_slice %74 {offsets = [0, 512], sizes = [8, 256], strides = [1, 1]} : vector<8x1024xf32> to vector<8x256xf32>
    %88 = math.tanh %87 : vector<8x256xf32>
    %89 = vector.extract_strided_slice %74 {offsets = [0, 768], sizes = [8, 256], strides = [1, 1]} : vector<8x1024xf32> to vector<8x256xf32>
    %90 = arith.negf %89 : vector<8x256xf32>
    %91 = math.exp %90 : vector<8x256xf32>
    %cst_30 = arith.constant 1.000000e+00 : f32
    %92 = vector.broadcast %cst_30 : f32 to vector<8x256xf32>
    %93 = arith.addf %92, %91 : vector<8x256xf32>
    %94 = arith.divf %92, %93 : vector<8x256xf32>
    %95 = arith.mulf %86, %67 : vector<8x256xf32>
    %96 = arith.mulf %80, %88 : vector<8x256xf32>
    %97 = arith.addf %95, %96 : vector<8x256xf32>
    %98 = math.tanh %97 : vector<8x256xf32>
    %99 = arith.mulf %94, %98 : vector<8x256xf32>
    %c16_31 = arith.constant 16 : index
    %c0_32 = arith.constant 0 : index
    %100 = vector.load %arg10[%c16_31, %c0_32] : memref<64x256xf32, #tpu.memory_space<vmem>>, vector<8x256xf32>
    tpu.vector_store %arg10[%c16_31, %c0_32], %99 {strides = array<i32>} : memref<64x256xf32, #tpu.memory_space<vmem>>, vector<8x256xf32>,
    %c24 = arith.constant 24 : index
    %c0_33 = arith.constant 0 : index
    %101 = vector.load %arg9[%c24, %c0_33] : memref<64x1024xf32, #tpu.memory_space<vmem>>, vector<8x1024xf32>
    %102 = arith.truncf %99 : vector<8x256xf32> to vector<8x256xbf16>
    %cst_34 = arith.constant dense<0.000000e+00> : vector<8x1024xf32>
    %103 = tpu.matmul %102, %8, %cst_34 {dimension_numbers = #tpu.dot_dimension_numbers<[1], [0], [0], [1], [0, 0, 1, 1], [], []>} : vector<8x256xbf16>, vector<256x1024xbf16>, vector<8x1024xf32> -> vector<8x1024xf32>
    %104 = arith.addf %101, %103 : vector<8x1024xf32>
    %105 = vector.extract_strided_slice %104 {offsets = [0, 0], sizes = [8, 256], strides = [1, 1]} : vector<8x1024xf32> to vector<8x256xf32>
    %106 = arith.negf %105 : vector<8x256xf32>
    %107 = math.exp %106 : vector<8x256xf32>
    %cst_35 = arith.constant 1.000000e+00 : f32
    %108 = vector.broadcast %cst_35 : f32 to vector<8x256xf32>
    %109 = arith.addf %108, %107 : vector<8x256xf32>
    %110 = arith.divf %108, %109 : vector<8x256xf32>
    %111 = vector.extract_strided_slice %104 {offsets = [0, 256], sizes = [8, 256], strides = [1, 1]} : vector<8x1024xf32> to vector<8x256xf32>
    %112 = arith.negf %111 : vector<8x256xf32>
    %113 = math.exp %112 : vector<8x256xf32>
    %cst_36 = arith.constant 1.000000e+00 : f32
    %114 = vector.broadcast %cst_36 : f32 to vector<8x256xf32>
    %115 = arith.addf %114, %113 : vector<8x256xf32>
    %116 = arith.divf %114, %115 : vector<8x256xf32>
    %117 = vector.extract_strided_slice %104 {offsets = [0, 512], sizes = [8, 256], strides = [1, 1]} : vector<8x1024xf32> to vector<8x256xf32>
    %118 = math.tanh %117 : vector<8x256xf32>
    %119 = vector.extract_strided_slice %104 {offsets = [0, 768], sizes = [8, 256], strides = [1, 1]} : vector<8x1024xf32> to vector<8x256xf32>
    %120 = arith.negf %119 : vector<8x256xf32>
    %121 = math.exp %120 : vector<8x256xf32>
    %cst_37 = arith.constant 1.000000e+00 : f32
    %122 = vector.broadcast %cst_37 : f32 to vector<8x256xf32>
    %123 = arith.addf %122, %121 : vector<8x256xf32>
    %124 = arith.divf %122, %123 : vector<8x256xf32>
    %125 = arith.mulf %116, %97 : vector<8x256xf32>
    %126 = arith.mulf %110, %118 : vector<8x256xf32>
    %127 = arith.addf %125, %126 : vector<8x256xf32>
    %128 = math.tanh %127 : vector<8x256xf32>
    %129 = arith.mulf %124, %128 : vector<8x256xf32>
    %c24_38 = arith.constant 24 : index
    %c0_39 = arith.constant 0 : index
    %130 = vector.load %arg10[%c24_38, %c0_39] : memref<64x256xf32, #tpu.memory_space<vmem>>, vector<8x256xf32>
    tpu.vector_store %arg10[%c24_38, %c0_39], %129 {strides = array<i32>} : memref<64x256xf32, #tpu.memory_space<vmem>>, vector<8x256xf32>,
    %c32 = arith.constant 32 : index
    %c0_40 = arith.constant 0 : index
    %131 = vector.load %arg9[%c32, %c0_40] : memref<64x1024xf32, #tpu.memory_space<vmem>>, vector<8x1024xf32>
    %132 = arith.truncf %129 : vector<8x256xf32> to vector<8x256xbf16>
    %cst_41 = arith.constant dense<0.000000e+00> : vector<8x1024xf32>
    %133 = tpu.matmul %132, %8, %cst_41 {dimension_numbers = #tpu.dot_dimension_numbers<[1], [0], [0], [1], [0, 0, 1, 1], [], []>} : vector<8x256xbf16>, vector<256x1024xbf16>, vector<8x1024xf32> -> vector<8x1024xf32>
    %134 = arith.addf %131, %133 : vector<8x1024xf32>
    %135 = vector.extract_strided_slice %134 {offsets = [0, 0], sizes = [8, 256], strides = [1, 1]} : vector<8x1024xf32> to vector<8x256xf32>
    %136 = arith.negf %135 : vector<8x256xf32>
    %137 = math.exp %136 : vector<8x256xf32>
    %cst_42 = arith.constant 1.000000e+00 : f32
    %138 = vector.broadcast %cst_42 : f32 to vector<8x256xf32>
    %139 = arith.addf %138, %137 : vector<8x256xf32>
    %140 = arith.divf %138, %139 : vector<8x256xf32>
    %141 = vector.extract_strided_slice %134 {offsets = [0, 256], sizes = [8, 256], strides = [1, 1]} : vector<8x1024xf32> to vector<8x256xf32>
    %142 = arith.negf %141 : vector<8x256xf32>
    %143 = math.exp %142 : vector<8x256xf32>
    %cst_43 = arith.constant 1.000000e+00 : f32
    %144 = vector.broadcast %cst_43 : f32 to vector<8x256xf32>
    %145 = arith.addf %144, %143 : vector<8x256xf32>
    %146 = arith.divf %144, %145 : vector<8x256xf32>
    %147 = vector.extract_strided_slice %134 {offsets = [0, 512], sizes = [8, 256], strides = [1, 1]} : vector<8x1024xf32> to vector<8x256xf32>
    %148 = math.tanh %147 : vector<8x256xf32>
    %149 = vector.extract_strided_slice %134 {offsets = [0, 768], sizes = [8, 256], strides = [1, 1]} : vector<8x1024xf32> to vector<8x256xf32>
    %150 = arith.negf %149 : vector<8x256xf32>
    %151 = math.exp %150 : vector<8x256xf32>
    %cst_44 = arith.constant 1.000000e+00 : f32
    %152 = vector.broadcast %cst_44 : f32 to vector<8x256xf32>
    %153 = arith.addf %152, %151 : vector<8x256xf32>
    %154 = arith.divf %152, %153 : vector<8x256xf32>
    %155 = arith.mulf %146, %127 : vector<8x256xf32>
    %156 = arith.mulf %140, %148 : vector<8x256xf32>
    %157 = arith.addf %155, %156 : vector<8x256xf32>
    %158 = math.tanh %157 : vector<8x256xf32>
    %159 = arith.mulf %154, %158 : vector<8x256xf32>
    %c32_45 = arith.constant 32 : index
    %c0_46 = arith.constant 0 : index
    %160 = vector.load %arg10[%c32_45, %c0_46] : memref<64x256xf32, #tpu.memory_space<vmem>>, vector<8x256xf32>
    tpu.vector_store %arg10[%c32_45, %c0_46], %159 {strides = array<i32>} : memref<64x256xf32, #tpu.memory_space<vmem>>, vector<8x256xf32>,
    %c40 = arith.constant 40 : index
    %c0_47 = arith.constant 0 : index
    %161 = vector.load %arg9[%c40, %c0_47] : memref<64x1024xf32, #tpu.memory_space<vmem>>, vector<8x1024xf32>
    %162 = arith.truncf %159 : vector<8x256xf32> to vector<8x256xbf16>
    %cst_48 = arith.constant dense<0.000000e+00> : vector<8x1024xf32>
    %163 = tpu.matmul %162, %8, %cst_48 {dimension_numbers = #tpu.dot_dimension_numbers<[1], [0], [0], [1], [0, 0, 1, 1], [], []>} : vector<8x256xbf16>, vector<256x1024xbf16>, vector<8x1024xf32> -> vector<8x1024xf32>
    %164 = arith.addf %161, %163 : vector<8x1024xf32>
    %165 = vector.extract_strided_slice %164 {offsets = [0, 0], sizes = [8, 256], strides = [1, 1]} : vector<8x1024xf32> to vector<8x256xf32>
    %166 = arith.negf %165 : vector<8x256xf32>
    %167 = math.exp %166 : vector<8x256xf32>
    %cst_49 = arith.constant 1.000000e+00 : f32
    %168 = vector.broadcast %cst_49 : f32 to vector<8x256xf32>
    %169 = arith.addf %168, %167 : vector<8x256xf32>
    %170 = arith.divf %168, %169 : vector<8x256xf32>
    %171 = vector.extract_strided_slice %164 {offsets = [0, 256], sizes = [8, 256], strides = [1, 1]} : vector<8x1024xf32> to vector<8x256xf32>
    %172 = arith.negf %171 : vector<8x256xf32>
    %173 = math.exp %172 : vector<8x256xf32>
    %cst_50 = arith.constant 1.000000e+00 : f32
    %174 = vector.broadcast %cst_50 : f32 to vector<8x256xf32>
    %175 = arith.addf %174, %173 : vector<8x256xf32>
    %176 = arith.divf %174, %175 : vector<8x256xf32>
    %177 = vector.extract_strided_slice %164 {offsets = [0, 512], sizes = [8, 256], strides = [1, 1]} : vector<8x1024xf32> to vector<8x256xf32>
    %178 = math.tanh %177 : vector<8x256xf32>
    %179 = vector.extract_strided_slice %164 {offsets = [0, 768], sizes = [8, 256], strides = [1, 1]} : vector<8x1024xf32> to vector<8x256xf32>
    %180 = arith.negf %179 : vector<8x256xf32>
    %181 = math.exp %180 : vector<8x256xf32>
    %cst_51 = arith.constant 1.000000e+00 : f32
    %182 = vector.broadcast %cst_51 : f32 to vector<8x256xf32>
    %183 = arith.addf %182, %181 : vector<8x256xf32>
    %184 = arith.divf %182, %183 : vector<8x256xf32>
    %185 = arith.mulf %176, %157 : vector<8x256xf32>
    %186 = arith.mulf %170, %178 : vector<8x256xf32>
    %187 = arith.addf %185, %186 : vector<8x256xf32>
    %188 = math.tanh %187 : vector<8x256xf32>
    %189 = arith.mulf %184, %188 : vector<8x256xf32>
    %c40_52 = arith.constant 40 : index
    %c0_53 = arith.constant 0 : index
    %190 = vector.load %arg10[%c40_52, %c0_53] : memref<64x256xf32, #tpu.memory_space<vmem>>, vector<8x256xf32>
    tpu.vector_store %arg10[%c40_52, %c0_53], %189 {strides = array<i32>} : memref<64x256xf32, #tpu.memory_space<vmem>>, vector<8x256xf32>,
    %c48 = arith.constant 48 : index
    %c0_54 = arith.constant 0 : index
    %191 = vector.load %arg9[%c48, %c0_54] : memref<64x1024xf32, #tpu.memory_space<vmem>>, vector<8x1024xf32>
    %192 = arith.truncf %189 : vector<8x256xf32> to vector<8x256xbf16>
    %cst_55 = arith.constant dense<0.000000e+00> : vector<8x1024xf32>
    %193 = tpu.matmul %192, %8, %cst_55 {dimension_numbers = #tpu.dot_dimension_numbers<[1], [0], [0], [1], [0, 0, 1, 1], [], []>} : vector<8x256xbf16>, vector<256x1024xbf16>, vector<8x1024xf32> -> vector<8x1024xf32>
    %194 = arith.addf %191, %193 : vector<8x1024xf32>
    %195 = vector.extract_strided_slice %194 {offsets = [0, 0], sizes = [8, 256], strides = [1, 1]} : vector<8x1024xf32> to vector<8x256xf32>
    %196 = arith.negf %195 : vector<8x256xf32>
    %197 = math.exp %196 : vector<8x256xf32>
    %cst_56 = arith.constant 1.000000e+00 : f32
    %198 = vector.broadcast %cst_56 : f32 to vector<8x256xf32>
    %199 = arith.addf %198, %197 : vector<8x256xf32>
    %200 = arith.divf %198, %199 : vector<8x256xf32>
    %201 = vector.extract_strided_slice %194 {offsets = [0, 256], sizes = [8, 256], strides = [1, 1]} : vector<8x1024xf32> to vector<8x256xf32>
    %202 = arith.negf %201 : vector<8x256xf32>
    %203 = math.exp %202 : vector<8x256xf32>
    %cst_57 = arith.constant 1.000000e+00 : f32
    %204 = vector.broadcast %cst_57 : f32 to vector<8x256xf32>
    %205 = arith.addf %204, %203 : vector<8x256xf32>
    %206 = arith.divf %204, %205 : vector<8x256xf32>
    %207 = vector.extract_strided_slice %194 {offsets = [0, 512], sizes = [8, 256], strides = [1, 1]} : vector<8x1024xf32> to vector<8x256xf32>
    %208 = math.tanh %207 : vector<8x256xf32>
    %209 = vector.extract_strided_slice %194 {offsets = [0, 768], sizes = [8, 256], strides = [1, 1]} : vector<8x1024xf32> to vector<8x256xf32>
    %210 = arith.negf %209 : vector<8x256xf32>
    %211 = math.exp %210 : vector<8x256xf32>
    %cst_58 = arith.constant 1.000000e+00 : f32
    %212 = vector.broadcast %cst_58 : f32 to vector<8x256xf32>
    %213 = arith.addf %212, %211 : vector<8x256xf32>
    %214 = arith.divf %212, %213 : vector<8x256xf32>
    %215 = arith.mulf %206, %187 : vector<8x256xf32>
    %216 = arith.mulf %200, %208 : vector<8x256xf32>
    %217 = arith.addf %215, %216 : vector<8x256xf32>
    %218 = math.tanh %217 : vector<8x256xf32>
    %219 = arith.mulf %214, %218 : vector<8x256xf32>
    %c48_59 = arith.constant 48 : index
    %c0_60 = arith.constant 0 : index
    %220 = vector.load %arg10[%c48_59, %c0_60] : memref<64x256xf32, #tpu.memory_space<vmem>>, vector<8x256xf32>
    tpu.vector_store %arg10[%c48_59, %c0_60], %219 {strides = array<i32>} : memref<64x256xf32, #tpu.memory_space<vmem>>, vector<8x256xf32>,
    %c56 = arith.constant 56 : index
    %c0_61 = arith.constant 0 : index
    %221 = vector.load %arg9[%c56, %c0_61] : memref<64x1024xf32, #tpu.memory_space<vmem>>, vector<8x1024xf32>
    %222 = arith.truncf %219 : vector<8x256xf32> to vector<8x256xbf16>
    %cst_62 = arith.constant dense<0.000000e+00> : vector<8x1024xf32>
    %223 = tpu.matmul %222, %8, %cst_62 {dimension_numbers = #tpu.dot_dimension_numbers<[1], [0], [0], [1], [0, 0, 1, 1], [], []>} : vector<8x256xbf16>, vector<256x1024xbf16>, vector<8x1024xf32> -> vector<8x1024xf32>
    %224 = arith.addf %221, %223 : vector<8x1024xf32>
    %225 = vector.extract_strided_slice %224 {offsets = [0, 0], sizes = [8, 256], strides = [1, 1]} : vector<8x1024xf32> to vector<8x256xf32>
    %226 = arith.negf %225 : vector<8x256xf32>
    %227 = math.exp %226 : vector<8x256xf32>
    %cst_63 = arith.constant 1.000000e+00 : f32
    %228 = vector.broadcast %cst_63 : f32 to vector<8x256xf32>
    %229 = arith.addf %228, %227 : vector<8x256xf32>
    %230 = arith.divf %228, %229 : vector<8x256xf32>
    %231 = vector.extract_strided_slice %224 {offsets = [0, 256], sizes = [8, 256], strides = [1, 1]} : vector<8x1024xf32> to vector<8x256xf32>
    %232 = arith.negf %231 : vector<8x256xf32>
    %233 = math.exp %232 : vector<8x256xf32>
    %cst_64 = arith.constant 1.000000e+00 : f32
    %234 = vector.broadcast %cst_64 : f32 to vector<8x256xf32>
    %235 = arith.addf %234, %233 : vector<8x256xf32>
    %236 = arith.divf %234, %235 : vector<8x256xf32>
    %237 = vector.extract_strided_slice %224 {offsets = [0, 512], sizes = [8, 256], strides = [1, 1]} : vector<8x1024xf32> to vector<8x256xf32>
    %238 = math.tanh %237 : vector<8x256xf32>
    %239 = vector.extract_strided_slice %224 {offsets = [0, 768], sizes = [8, 256], strides = [1, 1]} : vector<8x1024xf32> to vector<8x256xf32>
    %240 = arith.negf %239 : vector<8x256xf32>
    %241 = math.exp %240 : vector<8x256xf32>
    %cst_65 = arith.constant 1.000000e+00 : f32
    %242 = vector.broadcast %cst_65 : f32 to vector<8x256xf32>
    %243 = arith.addf %242, %241 : vector<8x256xf32>
    %244 = arith.divf %242, %243 : vector<8x256xf32>
    %245 = arith.mulf %236, %217 : vector<8x256xf32>
    %246 = arith.mulf %230, %238 : vector<8x256xf32>
    %247 = arith.addf %245, %246 : vector<8x256xf32>
    %248 = math.tanh %247 : vector<8x256xf32>
    %249 = arith.mulf %244, %248 : vector<8x256xf32>
    %c56_66 = arith.constant 56 : index
    %c0_67 = arith.constant 0 : index
    %250 = vector.load %arg10[%c56_66, %c0_67] : memref<64x256xf32, #tpu.memory_space<vmem>>, vector<8x256xf32>
    tpu.vector_store %arg10[%c56_66, %c0_67], %249 {strides = array<i32>} : memref<64x256xf32, #tpu.memory_space<vmem>>, vector<8x256xf32>,
    %c0_68 = arith.constant 0 : index
    %c0_69 = arith.constant 0 : index
    %251 = vector.load %arg10[%c0_68, %c0_69] : memref<64x256xf32, #tpu.memory_space<vmem>>, vector<64x256xf32>
    %252 = arith.truncf %251 : vector<64x256xf32> to vector<64x256xbf16>
    %c0_70 = arith.constant 0 : index
    %c0_71 = arith.constant 0 : index
    %253 = vector.load %arg5[%c0_70, %c0_71] : memref<256x512xbf16, #tpu.memory_space<vmem>>, vector<256x512xbf16>
    %cst_72 = arith.constant dense<0.000000e+00> : vector<64x512xf32>
    %254 = tpu.matmul %252, %253, %cst_72 {dimension_numbers = #tpu.dot_dimension_numbers<[1], [0], [0], [1], [0, 0, 1, 1], [], []>} : vector<64x256xbf16>, vector<256x512xbf16>, vector<64x512xf32> -> vector<64x512xf32>
    %c0_73 = arith.constant 0 : index
    %c0_74 = arith.constant 0 : index
    %255 = vector.load %arg6[%c0_73, %c0_74] : memref<1x512xf32, #tpu.memory_space<vmem>>, vector<1x512xf32>
    %256 = vector.shape_cast %255 : vector<1x512xf32> to vector<1x512xf32>
    %257 = vector.broadcast %256 : vector<1x512xf32> to vector<64x512xf32>
    %258 = arith.addf %254, %257 : vector<64x512xf32>
    %c0_75 = arith.constant 0 : index
    %c0_76 = arith.constant 0 : index
    %259 = vector.load %arg11[%c0_75, %c0_76] : memref<64x512xf32, #tpu.memory_space<vmem>>, vector<64x512xf32>
    tpu.vector_store %arg11[%c0_75, %c0_76], %258 {strides = array<i32>} : memref<64x512xf32, #tpu.memory_space<vmem>>, vector<64x512xf32>,
    %c0_77 = arith.constant 0 : index
    %c0_78 = arith.constant 0 : index
    %260 = vector.load %arg7[%c0_77, %c0_78] : memref<128x512xbf16, #tpu.memory_space<vmem>>, vector<128x512xbf16>
    %cst_79 = arith.constant 0.000000e+00 : f32
    %261 = vector.broadcast %cst_79 : f32 to vector<8x128xf32>
    %cst_80 = arith.constant 0.000000e+00 : f32
    %262 = vector.broadcast %cst_80 : f32 to vector<8x128xf32>
    %c0_81 = arith.constant 0 : index
    %c0_82 = arith.constant 0 : index
    %263 = vector.load %arg11[%c0_81, %c0_82] : memref<64x512xf32, #tpu.memory_space<vmem>>, vector<8x512xf32>
    %264 = arith.truncf %261 : vector<8x128xf32> to vector<8x128xbf16>
    %cst_83 = arith.constant dense<0.000000e+00> : vector<8x512xf32>
    %265 = tpu.matmul %264, %260, %cst_83 {dimension_numbers = #tpu.dot_dimension_numbers<[1], [0], [0], [1], [0, 0, 1, 1], [], []>} : vector<8x128xbf16>, vector<128x512xbf16>, vector<8x512xf32> -> vector<8x512xf32>
    %266 = arith.addf %263, %265 : vector<8x512xf32>
    %267 = vector.extract_strided_slice %266 {offsets = [0, 0], sizes = [8, 128], strides = [1, 1]} : vector<8x512xf32> to vector<8x128xf32>
    %268 = arith.negf %267 : vector<8x128xf32>
    %269 = math.exp %268 : vector<8x128xf32>
    %cst_84 = arith.constant 1.000000e+00 : f32
    %270 = vector.broadcast %cst_84 : f32 to vector<8x128xf32>
    %271 = arith.addf %270, %269 : vector<8x128xf32>
    %272 = arith.divf %270, %271 : vector<8x128xf32>
    %273 = vector.extract_strided_slice %266 {offsets = [0, 128], sizes = [8, 128], strides = [1, 1]} : vector<8x512xf32> to vector<8x128xf32>
    %274 = arith.negf %273 : vector<8x128xf32>
    %275 = math.exp %274 : vector<8x128xf32>
    %cst_85 = arith.constant 1.000000e+00 : f32
    %276 = vector.broadcast %cst_85 : f32 to vector<8x128xf32>
    %277 = arith.addf %276, %275 : vector<8x128xf32>
    %278 = arith.divf %276, %277 : vector<8x128xf32>
    %279 = vector.extract_strided_slice %266 {offsets = [0, 256], sizes = [8, 128], strides = [1, 1]} : vector<8x512xf32> to vector<8x128xf32>
    %280 = math.tanh %279 : vector<8x128xf32>
    %281 = vector.extract_strided_slice %266 {offsets = [0, 384], sizes = [8, 128], strides = [1, 1]} : vector<8x512xf32> to vector<8x128xf32>
    %282 = arith.negf %281 : vector<8x128xf32>
    %283 = math.exp %282 : vector<8x128xf32>
    %cst_86 = arith.constant 1.000000e+00 : f32
    %284 = vector.broadcast %cst_86 : f32 to vector<8x128xf32>
    %285 = arith.addf %284, %283 : vector<8x128xf32>
    %286 = arith.divf %284, %285 : vector<8x128xf32>
    %287 = arith.mulf %278, %262 : vector<8x128xf32>
    %288 = arith.mulf %272, %280 : vector<8x128xf32>
    %289 = arith.addf %287, %288 : vector<8x128xf32>
    %290 = math.tanh %289 : vector<8x128xf32>
    %291 = arith.mulf %286, %290 : vector<8x128xf32>
    %c8_87 = arith.constant 8 : index
    %c0_88 = arith.constant 0 : index
    %292 = vector.load %arg11[%c8_87, %c0_88] : memref<64x512xf32, #tpu.memory_space<vmem>>, vector<8x512xf32>
    %293 = arith.truncf %291 : vector<8x128xf32> to vector<8x128xbf16>
    %cst_89 = arith.constant dense<0.000000e+00> : vector<8x512xf32>
    %294 = tpu.matmul %293, %260, %cst_89 {dimension_numbers = #tpu.dot_dimension_numbers<[1], [0], [0], [1], [0, 0, 1, 1], [], []>} : vector<8x128xbf16>, vector<128x512xbf16>, vector<8x512xf32> -> vector<8x512xf32>
    %295 = arith.addf %292, %294 : vector<8x512xf32>
    %296 = vector.extract_strided_slice %295 {offsets = [0, 0], sizes = [8, 128], strides = [1, 1]} : vector<8x512xf32> to vector<8x128xf32>
    %297 = arith.negf %296 : vector<8x128xf32>
    %298 = math.exp %297 : vector<8x128xf32>
    %cst_90 = arith.constant 1.000000e+00 : f32
    %299 = vector.broadcast %cst_90 : f32 to vector<8x128xf32>
    %300 = arith.addf %299, %298 : vector<8x128xf32>
    %301 = arith.divf %299, %300 : vector<8x128xf32>
    %302 = vector.extract_strided_slice %295 {offsets = [0, 128], sizes = [8, 128], strides = [1, 1]} : vector<8x512xf32> to vector<8x128xf32>
    %303 = arith.negf %302 : vector<8x128xf32>
    %304 = math.exp %303 : vector<8x128xf32>
    %cst_91 = arith.constant 1.000000e+00 : f32
    %305 = vector.broadcast %cst_91 : f32 to vector<8x128xf32>
    %306 = arith.addf %305, %304 : vector<8x128xf32>
    %307 = arith.divf %305, %306 : vector<8x128xf32>
    %308 = vector.extract_strided_slice %295 {offsets = [0, 256], sizes = [8, 128], strides = [1, 1]} : vector<8x512xf32> to vector<8x128xf32>
    %309 = math.tanh %308 : vector<8x128xf32>
    %310 = vector.extract_strided_slice %295 {offsets = [0, 384], sizes = [8, 128], strides = [1, 1]} : vector<8x512xf32> to vector<8x128xf32>
    %311 = arith.negf %310 : vector<8x128xf32>
    %312 = math.exp %311 : vector<8x128xf32>
    %cst_92 = arith.constant 1.000000e+00 : f32
    %313 = vector.broadcast %cst_92 : f32 to vector<8x128xf32>
    %314 = arith.addf %313, %312 : vector<8x128xf32>
    %315 = arith.divf %313, %314 : vector<8x128xf32>
    %316 = arith.mulf %307, %289 : vector<8x128xf32>
    %317 = arith.mulf %301, %309 : vector<8x128xf32>
    %318 = arith.addf %316, %317 : vector<8x128xf32>
    %319 = math.tanh %318 : vector<8x128xf32>
    %320 = arith.mulf %315, %319 : vector<8x128xf32>
    %c16_93 = arith.constant 16 : index
    %c0_94 = arith.constant 0 : index
    %321 = vector.load %arg11[%c16_93, %c0_94] : memref<64x512xf32, #tpu.memory_space<vmem>>, vector<8x512xf32>
    %322 = arith.truncf %320 : vector<8x128xf32> to vector<8x128xbf16>
    %cst_95 = arith.constant dense<0.000000e+00> : vector<8x512xf32>
    %323 = tpu.matmul %322, %260, %cst_95 {dimension_numbers = #tpu.dot_dimension_numbers<[1], [0], [0], [1], [0, 0, 1, 1], [], []>} : vector<8x128xbf16>, vector<128x512xbf16>, vector<8x512xf32> -> vector<8x512xf32>
    %324 = arith.addf %321, %323 : vector<8x512xf32>
    %325 = vector.extract_strided_slice %324 {offsets = [0, 0], sizes = [8, 128], strides = [1, 1]} : vector<8x512xf32> to vector<8x128xf32>
    %326 = arith.negf %325 : vector<8x128xf32>
    %327 = math.exp %326 : vector<8x128xf32>
    %cst_96 = arith.constant 1.000000e+00 : f32
    %328 = vector.broadcast %cst_96 : f32 to vector<8x128xf32>
    %329 = arith.addf %328, %327 : vector<8x128xf32>
    %330 = arith.divf %328, %329 : vector<8x128xf32>
    %331 = vector.extract_strided_slice %324 {offsets = [0, 128], sizes = [8, 128], strides = [1, 1]} : vector<8x512xf32> to vector<8x128xf32>
    %332 = arith.negf %331 : vector<8x128xf32>
    %333 = math.exp %332 : vector<8x128xf32>
    %cst_97 = arith.constant 1.000000e+00 : f32
    %334 = vector.broadcast %cst_97 : f32 to vector<8x128xf32>
    %335 = arith.addf %334, %333 : vector<8x128xf32>
    %336 = arith.divf %334, %335 : vector<8x128xf32>
    %337 = vector.extract_strided_slice %324 {offsets = [0, 256], sizes = [8, 128], strides = [1, 1]} : vector<8x512xf32> to vector<8x128xf32>
    %338 = math.tanh %337 : vector<8x128xf32>
    %339 = vector.extract_strided_slice %324 {offsets = [0, 384], sizes = [8, 128], strides = [1, 1]} : vector<8x512xf32> to vector<8x128xf32>
    %340 = arith.negf %339 : vector<8x128xf32>
    %341 = math.exp %340 : vector<8x128xf32>
    %cst_98 = arith.constant 1.000000e+00 : f32
    %342 = vector.broadcast %cst_98 : f32 to vector<8x128xf32>
    %343 = arith.addf %342, %341 : vector<8x128xf32>
    %344 = arith.divf %342, %343 : vector<8x128xf32>
    %345 = arith.mulf %336, %318 : vector<8x128xf32>
    %346 = arith.mulf %330, %338 : vector<8x128xf32>
    %347 = arith.addf %345, %346 : vector<8x128xf32>
    %348 = math.tanh %347 : vector<8x128xf32>
    %349 = arith.mulf %344, %348 : vector<8x128xf32>
    %c24_99 = arith.constant 24 : index
    %c0_100 = arith.constant 0 : index
    %350 = vector.load %arg11[%c24_99, %c0_100] : memref<64x512xf32, #tpu.memory_space<vmem>>, vector<8x512xf32>
    %351 = arith.truncf %349 : vector<8x128xf32> to vector<8x128xbf16>
    %cst_101 = arith.constant dense<0.000000e+00> : vector<8x512xf32>
    %352 = tpu.matmul %351, %260, %cst_101 {dimension_numbers = #tpu.dot_dimension_numbers<[1], [0], [0], [1], [0, 0, 1, 1], [], []>} : vector<8x128xbf16>, vector<128x512xbf16>, vector<8x512xf32> -> vector<8x512xf32>
    %353 = arith.addf %350, %352 : vector<8x512xf32>
    %354 = vector.extract_strided_slice %353 {offsets = [0, 0], sizes = [8, 128], strides = [1, 1]} : vector<8x512xf32> to vector<8x128xf32>
    %355 = arith.negf %354 : vector<8x128xf32>
    %356 = math.exp %355 : vector<8x128xf32>
    %cst_102 = arith.constant 1.000000e+00 : f32
    %357 = vector.broadcast %cst_102 : f32 to vector<8x128xf32>
    %358 = arith.addf %357, %356 : vector<8x128xf32>
    %359 = arith.divf %357, %358 : vector<8x128xf32>
    %360 = vector.extract_strided_slice %353 {offsets = [0, 128], sizes = [8, 128], strides = [1, 1]} : vector<8x512xf32> to vector<8x128xf32>
    %361 = arith.negf %360 : vector<8x128xf32>
    %362 = math.exp %361 : vector<8x128xf32>
    %cst_103 = arith.constant 1.000000e+00 : f32
    %363 = vector.broadcast %cst_103 : f32 to vector<8x128xf32>
    %364 = arith.addf %363, %362 : vector<8x128xf32>
    %365 = arith.divf %363, %364 : vector<8x128xf32>
    %366 = vector.extract_strided_slice %353 {offsets = [0, 256], sizes = [8, 128], strides = [1, 1]} : vector<8x512xf32> to vector<8x128xf32>
    %367 = math.tanh %366 : vector<8x128xf32>
    %368 = vector.extract_strided_slice %353 {offsets = [0, 384], sizes = [8, 128], strides = [1, 1]} : vector<8x512xf32> to vector<8x128xf32>
    %369 = arith.negf %368 : vector<8x128xf32>
    %370 = math.exp %369 : vector<8x128xf32>
    %cst_104 = arith.constant 1.000000e+00 : f32
    %371 = vector.broadcast %cst_104 : f32 to vector<8x128xf32>
    %372 = arith.addf %371, %370 : vector<8x128xf32>
    %373 = arith.divf %371, %372 : vector<8x128xf32>
    %374 = arith.mulf %365, %347 : vector<8x128xf32>
    %375 = arith.mulf %359, %367 : vector<8x128xf32>
    %376 = arith.addf %374, %375 : vector<8x128xf32>
    %377 = math.tanh %376 : vector<8x128xf32>
    %378 = arith.mulf %373, %377 : vector<8x128xf32>
    %c32_105 = arith.constant 32 : index
    %c0_106 = arith.constant 0 : index
    %379 = vector.load %arg11[%c32_105, %c0_106] : memref<64x512xf32, #tpu.memory_space<vmem>>, vector<8x512xf32>
    %380 = arith.truncf %378 : vector<8x128xf32> to vector<8x128xbf16>
    %cst_107 = arith.constant dense<0.000000e+00> : vector<8x512xf32>
    %381 = tpu.matmul %380, %260, %cst_107 {dimension_numbers = #tpu.dot_dimension_numbers<[1], [0], [0], [1], [0, 0, 1, 1], [], []>} : vector<8x128xbf16>, vector<128x512xbf16>, vector<8x512xf32> -> vector<8x512xf32>
    %382 = arith.addf %379, %381 : vector<8x512xf32>
    %383 = vector.extract_strided_slice %382 {offsets = [0, 0], sizes = [8, 128], strides = [1, 1]} : vector<8x512xf32> to vector<8x128xf32>
    %384 = arith.negf %383 : vector<8x128xf32>
    %385 = math.exp %384 : vector<8x128xf32>
    %cst_108 = arith.constant 1.000000e+00 : f32
    %386 = vector.broadcast %cst_108 : f32 to vector<8x128xf32>
    %387 = arith.addf %386, %385 : vector<8x128xf32>
    %388 = arith.divf %386, %387 : vector<8x128xf32>
    %389 = vector.extract_strided_slice %382 {offsets = [0, 128], sizes = [8, 128], strides = [1, 1]} : vector<8x512xf32> to vector<8x128xf32>
    %390 = arith.negf %389 : vector<8x128xf32>
    %391 = math.exp %390 : vector<8x128xf32>
    %cst_109 = arith.constant 1.000000e+00 : f32
    %392 = vector.broadcast %cst_109 : f32 to vector<8x128xf32>
    %393 = arith.addf %392, %391 : vector<8x128xf32>
    %394 = arith.divf %392, %393 : vector<8x128xf32>
    %395 = vector.extract_strided_slice %382 {offsets = [0, 256], sizes = [8, 128], strides = [1, 1]} : vector<8x512xf32> to vector<8x128xf32>
    %396 = math.tanh %395 : vector<8x128xf32>
    %397 = vector.extract_strided_slice %382 {offsets = [0, 384], sizes = [8, 128], strides = [1, 1]} : vector<8x512xf32> to vector<8x128xf32>
    %398 = arith.negf %397 : vector<8x128xf32>
    %399 = math.exp %398 : vector<8x128xf32>
    %cst_110 = arith.constant 1.000000e+00 : f32
    %400 = vector.broadcast %cst_110 : f32 to vector<8x128xf32>
    %401 = arith.addf %400, %399 : vector<8x128xf32>
    %402 = arith.divf %400, %401 : vector<8x128xf32>
    %403 = arith.mulf %394, %376 : vector<8x128xf32>
    %404 = arith.mulf %388, %396 : vector<8x128xf32>
    %405 = arith.addf %403, %404 : vector<8x128xf32>
    %406 = math.tanh %405 : vector<8x128xf32>
    %407 = arith.mulf %402, %406 : vector<8x128xf32>
    %c40_111 = arith.constant 40 : index
    %c0_112 = arith.constant 0 : index
    %408 = vector.load %arg11[%c40_111, %c0_112] : memref<64x512xf32, #tpu.memory_space<vmem>>, vector<8x512xf32>
    %409 = arith.truncf %407 : vector<8x128xf32> to vector<8x128xbf16>
    %cst_113 = arith.constant dense<0.000000e+00> : vector<8x512xf32>
    %410 = tpu.matmul %409, %260, %cst_113 {dimension_numbers = #tpu.dot_dimension_numbers<[1], [0], [0], [1], [0, 0, 1, 1], [], []>} : vector<8x128xbf16>, vector<128x512xbf16>, vector<8x512xf32> -> vector<8x512xf32>
    %411 = arith.addf %408, %410 : vector<8x512xf32>
    %412 = vector.extract_strided_slice %411 {offsets = [0, 0], sizes = [8, 128], strides = [1, 1]} : vector<8x512xf32> to vector<8x128xf32>
    %413 = arith.negf %412 : vector<8x128xf32>
    %414 = math.exp %413 : vector<8x128xf32>
    %cst_114 = arith.constant 1.000000e+00 : f32
    %415 = vector.broadcast %cst_114 : f32 to vector<8x128xf32>
    %416 = arith.addf %415, %414 : vector<8x128xf32>
    %417 = arith.divf %415, %416 : vector<8x128xf32>
    %418 = vector.extract_strided_slice %411 {offsets = [0, 128], sizes = [8, 128], strides = [1, 1]} : vector<8x512xf32> to vector<8x128xf32>
    %419 = arith.negf %418 : vector<8x128xf32>
    %420 = math.exp %419 : vector<8x128xf32>
    %cst_115 = arith.constant 1.000000e+00 : f32
    %421 = vector.broadcast %cst_115 : f32 to vector<8x128xf32>
    %422 = arith.addf %421, %420 : vector<8x128xf32>
    %423 = arith.divf %421, %422 : vector<8x128xf32>
    %424 = vector.extract_strided_slice %411 {offsets = [0, 256], sizes = [8, 128], strides = [1, 1]} : vector<8x512xf32> to vector<8x128xf32>
    %425 = math.tanh %424 : vector<8x128xf32>
    %426 = vector.extract_strided_slice %411 {offsets = [0, 384], sizes = [8, 128], strides = [1, 1]} : vector<8x512xf32> to vector<8x128xf32>
    %427 = arith.negf %426 : vector<8x128xf32>
    %428 = math.exp %427 : vector<8x128xf32>
    %cst_116 = arith.constant 1.000000e+00 : f32
    %429 = vector.broadcast %cst_116 : f32 to vector<8x128xf32>
    %430 = arith.addf %429, %428 : vector<8x128xf32>
    %431 = arith.divf %429, %430 : vector<8x128xf32>
    %432 = arith.mulf %423, %405 : vector<8x128xf32>
    %433 = arith.mulf %417, %425 : vector<8x128xf32>
    %434 = arith.addf %432, %433 : vector<8x128xf32>
    %435 = math.tanh %434 : vector<8x128xf32>
    %436 = arith.mulf %431, %435 : vector<8x128xf32>
    %c48_117 = arith.constant 48 : index
    %c0_118 = arith.constant 0 : index
    %437 = vector.load %arg11[%c48_117, %c0_118] : memref<64x512xf32, #tpu.memory_space<vmem>>, vector<8x512xf32>
    %438 = arith.truncf %436 : vector<8x128xf32> to vector<8x128xbf16>
    %cst_119 = arith.constant dense<0.000000e+00> : vector<8x512xf32>
    %439 = tpu.matmul %438, %260, %cst_119 {dimension_numbers = #tpu.dot_dimension_numbers<[1], [0], [0], [1], [0, 0, 1, 1], [], []>} : vector<8x128xbf16>, vector<128x512xbf16>, vector<8x512xf32> -> vector<8x512xf32>
    %440 = arith.addf %437, %439 : vector<8x512xf32>
    %441 = vector.extract_strided_slice %440 {offsets = [0, 0], sizes = [8, 128], strides = [1, 1]} : vector<8x512xf32> to vector<8x128xf32>
    %442 = arith.negf %441 : vector<8x128xf32>
    %443 = math.exp %442 : vector<8x128xf32>
    %cst_120 = arith.constant 1.000000e+00 : f32
    %444 = vector.broadcast %cst_120 : f32 to vector<8x128xf32>
    %445 = arith.addf %444, %443 : vector<8x128xf32>
    %446 = arith.divf %444, %445 : vector<8x128xf32>
    %447 = vector.extract_strided_slice %440 {offsets = [0, 128], sizes = [8, 128], strides = [1, 1]} : vector<8x512xf32> to vector<8x128xf32>
    %448 = arith.negf %447 : vector<8x128xf32>
    %449 = math.exp %448 : vector<8x128xf32>
    %cst_121 = arith.constant 1.000000e+00 : f32
    %450 = vector.broadcast %cst_121 : f32 to vector<8x128xf32>
    %451 = arith.addf %450, %449 : vector<8x128xf32>
    %452 = arith.divf %450, %451 : vector<8x128xf32>
    %453 = vector.extract_strided_slice %440 {offsets = [0, 256], sizes = [8, 128], strides = [1, 1]} : vector<8x512xf32> to vector<8x128xf32>
    %454 = math.tanh %453 : vector<8x128xf32>
    %455 = vector.extract_strided_slice %440 {offsets = [0, 384], sizes = [8, 128], strides = [1, 1]} : vector<8x512xf32> to vector<8x128xf32>
    %456 = arith.negf %455 : vector<8x128xf32>
    %457 = math.exp %456 : vector<8x128xf32>
    %cst_122 = arith.constant 1.000000e+00 : f32
    %458 = vector.broadcast %cst_122 : f32 to vector<8x128xf32>
    %459 = arith.addf %458, %457 : vector<8x128xf32>
    %460 = arith.divf %458, %459 : vector<8x128xf32>
    %461 = arith.mulf %452, %434 : vector<8x128xf32>
    %462 = arith.mulf %446, %454 : vector<8x128xf32>
    %463 = arith.addf %461, %462 : vector<8x128xf32>
    %464 = math.tanh %463 : vector<8x128xf32>
    %465 = arith.mulf %460, %464 : vector<8x128xf32>
    %c56_123 = arith.constant 56 : index
    %c0_124 = arith.constant 0 : index
    %466 = vector.load %arg11[%c56_123, %c0_124] : memref<64x512xf32, #tpu.memory_space<vmem>>, vector<8x512xf32>
    %467 = arith.truncf %465 : vector<8x128xf32> to vector<8x128xbf16>
    %cst_125 = arith.constant dense<0.000000e+00> : vector<8x512xf32>
    %468 = tpu.matmul %467, %260, %cst_125 {dimension_numbers = #tpu.dot_dimension_numbers<[1], [0], [0], [1], [0, 0, 1, 1], [], []>} : vector<8x128xbf16>, vector<128x512xbf16>, vector<8x512xf32> -> vector<8x512xf32>
    %469 = arith.addf %466, %468 : vector<8x512xf32>
    %470 = vector.extract_strided_slice %469 {offsets = [0, 0], sizes = [8, 128], strides = [1, 1]} : vector<8x512xf32> to vector<8x128xf32>
    %471 = arith.negf %470 : vector<8x128xf32>
    %472 = math.exp %471 : vector<8x128xf32>
    %cst_126 = arith.constant 1.000000e+00 : f32
    %473 = vector.broadcast %cst_126 : f32 to vector<8x128xf32>
    %474 = arith.addf %473, %472 : vector<8x128xf32>
    %475 = arith.divf %473, %474 : vector<8x128xf32>
    %476 = vector.extract_strided_slice %469 {offsets = [0, 128], sizes = [8, 128], strides = [1, 1]} : vector<8x512xf32> to vector<8x128xf32>
    %477 = arith.negf %476 : vector<8x128xf32>
    %478 = math.exp %477 : vector<8x128xf32>
    %cst_127 = arith.constant 1.000000e+00 : f32
    %479 = vector.broadcast %cst_127 : f32 to vector<8x128xf32>
    %480 = arith.addf %479, %478 : vector<8x128xf32>
    %481 = arith.divf %479, %480 : vector<8x128xf32>
    %482 = vector.extract_strided_slice %469 {offsets = [0, 256], sizes = [8, 128], strides = [1, 1]} : vector<8x512xf32> to vector<8x128xf32>
    %483 = math.tanh %482 : vector<8x128xf32>
    %484 = vector.extract_strided_slice %469 {offsets = [0, 384], sizes = [8, 128], strides = [1, 1]} : vector<8x512xf32> to vector<8x128xf32>
    %485 = arith.negf %484 : vector<8x128xf32>
    %486 = math.exp %485 : vector<8x128xf32>
    %cst_128 = arith.constant 1.000000e+00 : f32
    %487 = vector.broadcast %cst_128 : f32 to vector<8x128xf32>
    %488 = arith.addf %487, %486 : vector<8x128xf32>
    %489 = arith.divf %487, %488 : vector<8x128xf32>
    %490 = arith.mulf %481, %463 : vector<8x128xf32>
    %491 = arith.mulf %475, %483 : vector<8x128xf32>
    %492 = arith.addf %490, %491 : vector<8x128xf32>
    %493 = math.tanh %492 : vector<8x128xf32>
    %494 = arith.mulf %489, %493 : vector<8x128xf32>
    %c0_129 = arith.constant 0 : index
    %c0_130 = arith.constant 0 : index
    %495 = vector.load %arg8[%c0_129, %c0_130] : memref<8x128xf32, #tpu.memory_space<vmem>>, vector<8x128xf32>
    tpu.vector_store %arg8[%c0_129, %c0_130], %494 {strides = array<i32>} : memref<8x128xf32, #tpu.memory_space<vmem>>, vector<8x128xf32>,
    return
  }
  func.func @transform_0(%arg0: i32) -> (i32, i32) {
    %c0_i32 = arith.constant 0 : i32
    %c0_i32_0 = arith.constant 0 : i32
    return %arg0, %c0_i32 : i32, i32
  }
  func.func @transform_1(%arg0: i32) -> (i32, i32) {
    %c0_i32 = arith.constant 0 : i32
    %c0_i32_0 = arith.constant 0 : i32
    %c0_i32_1 = arith.constant 0 : i32
    return %c0_i32, %c0_i32_0 : i32, i32
  }
  func.func @transform_2(%arg0: i32) -> (i32, i32) {
    %c0_i32 = arith.constant 0 : i32
    %c0_i32_0 = arith.constant 0 : i32
    %c0_i32_1 = arith.constant 0 : i32
    return %c0_i32, %c0_i32_0 : i32, i32
  }
  func.func @transform_3(%arg0: i32) -> (i32, i32) {
    %c0_i32 = arith.constant 0 : i32
    %c0_i32_0 = arith.constant 0 : i32
    %c0_i32_1 = arith.constant 0 : i32
    return %c0_i32, %c0_i32_0 : i32, i32
  }
  func.func @transform_4(%arg0: i32) -> (i32, i32) {
    %c0_i32 = arith.constant 0 : i32
    %c0_i32_0 = arith.constant 0 : i32
    %c0_i32_1 = arith.constant 0 : i32
    return %c0_i32, %c0_i32_0 : i32, i32
  }
  func.func @transform_5(%arg0: i32) -> (i32, i32) {
    %c0_i32 = arith.constant 0 : i32
    %c0_i32_0 = arith.constant 0 : i32
    %c0_i32_1 = arith.constant 0 : i32
    return %c0_i32, %c0_i32_0 : i32, i32
  }
  func.func @transform_6(%arg0: i32) -> (i32, i32) {
    %c0_i32 = arith.constant 0 : i32
    %c0_i32_0 = arith.constant 0 : i32
    %c0_i32_1 = arith.constant 0 : i32
    return %c0_i32, %c0_i32_0 : i32, i32
  }
  func.func @transform_7(%arg0: i32) -> (i32, i32) {
    %c0_i32 = arith.constant 0 : i32
    %c0_i32_0 = arith.constant 0 : i32
    return %arg0, %c0_i32 : i32, i32
  }
}

</mosaic_0001>

<bundles_post_ra>
// kernel: lstm_branch_forward.1
= control target key start
LH: loop header
LB: loop body
LE: loop exit
PB: predicated region body
PF: predicated region fallthrough
CT: control target
= control target key end

     0   :  { %vm265_vm0 = vcmask 523264   ;;  %s12282_s1 = inlined_call_operand.vmem [shape: bf16[64,1024], index: 1, kind: input, shape index: {}]   ;;  %s12283_s0 = inlined_call_operand.vmem [shape: bf16[64,64], index: 0, kind: input, shape index: {}]   ;;  %s12284_s3 = inlined_call_operand.vmem [shape: bf16[256,1024], index: 3, kind: input, shape index: {}]   ;;  %s12285_s2 = inlined_call_operand.vmem [shape: f32[1,1024], index: 2, kind: input, shape index: {}]   ;;  %s12286_s4 = inlined_call_operand.vmem [shape: bf16[256,512], index: 4, kind: input, shape index: {}]   ;;  %s12287_s5 = inlined_call_operand.vmem [shape: f32[1,512], index: 5, kind: input, shape index: {}]   ;;  %s12288_s6 = inlined_call_operand.vmem [shape: bf16[128,512], index: 6, kind: input, shape index: {}]   ;;  %s12289_s7 = inlined_call_operand.vmem [shape: f32[8,128], index: 7, kind: output, shape index: {}]  }
   0x1   :  { %v6156_v0 = vld [vmem:[%s12282_s1 + $0xc0] sm:$0xf]  ;;  %v7214_v2 = vld [vmem:[%s12282_s1 + $0xc4] sm:$0xf]  ;;  %v6164_v5 = vld [vmem:[%s12282_s1 + $0xc8] sm:$0xf] }
   0x2   :  { %v7218_v1 = vld [vmem:[%s12282_s1 + $0xdc] sm:$0xf0]  ;;  %v6158_v4 = vld [vmem:[%s12282_s1 + $0xe0] sm:$0xf0]  ;;  %v7219_v6 = vld [vmem:[%s12282_s1 + $0xe4] sm:$0xf0] }
   0x3   :  { %v6157_v3 = vor.u32 %v7218_v1, %v6156_v0  ;;  %v6161_v7 = vor.u32 %v7214_v2, %v6158_v4  ;;  %v6165_v8 = vor.u32 %v7219_v6, %v6164_v5  ;;  %v7215_v9 = vld [vmem:[%s12282_s1 + $0xcc] sm:$0xf]  ;;  %v6124_v11 = vld [vmem:[%s12282_s1 + $0x80] sm:$0xf]  ;;  %v7206_v14 = vld [vmem:[%s12282_s1 + $0x84] sm:$0xf] }
   0x4   :  { %v6166_v10 = vld [vmem:[%s12282_s1 + $0xe8] sm:$0xf0]  ;;  %v7210_v13 = vld [vmem:[%s12282_s1 + $0x9c] sm:$0xf0]  ;;  %v6126_v15 = vld [vmem:[%s12282_s1 + $0xa0] sm:$0xf0] }
   0x5   :  { %282 = vmatpush.bf16.msra.mxu0 %v6157_v3  ;;  %v6169_v12 = vor.u32 %v7215_v9, %v6166_v10  ;;  %311 = vmatpush.bf16.msra.mxu1 %v6161_v7  ;;  %v6125_v16 = vor.u32 %v7210_v13, %v6124_v11  ;;  %v6129_v17 = vor.u32 %v7206_v14, %v6126_v15  ;;  %v6132_v18 = vld [vmem:[%s12282_s1 + $0x88] sm:$0xf]  ;;  %v7207_v20 = vld [vmem:[%s12282_s1 + $0x8c] sm:$0xf]  ;;  %v6092_v23 = vld [vmem:[%s12282_s1 + $0x40] sm:$0xf] }
   0x6   :  { %340 = vmatpush.bf16.msra.mxu2 %v6165_v8  ;;  %v7211_v19 = vld [vmem:[%s12282_s1 + $0xa4] sm:$0xf0]  ;;  %v6134_v22 = vld [vmem:[%s12282_s1 + $0xa8] sm:$0xf0]  ;;  %v7202_v24 = vld [vmem:[%s12282_s1 + $0x5c] sm:$0xf0] }
   0x7   :  { %369 = vmatpush.bf16.msra.mxu3 %v6169_v12  ;;  %v6133_v21 = vor.u32 %v7211_v19, %v6132_v18  ;;  %v6137_v25 = vor.u32 %v7207_v20, %v6134_v22  ;;  %v7198_v26 = vld [vmem:[%s12282_s1 + $0x44] sm:$0xf]  ;;  %v6100_v28 = vld [vmem:[%s12282_s1 + $0x48] sm:$0xf]  ;;  %v6093_v29 = vor.u32 %v7202_v24, %v6092_v23  ;;  %v7199_v31 = vld [vmem:[%s12282_s1 + $0x4c] sm:$0xf] }
   0x8   :  { %v6094_v27 = vld [vmem:[%s12282_s1 + $0x60] sm:$0xf0]  ;;  %v7203_v30 = vld [vmem:[%s12282_s1 + $0x64] sm:$0xf0]  ;;  %v6102_v32 = vld [vmem:[%s12282_s1 + $0x68] sm:$0xf0] }
   0x9   :  { %283 = vmatpush.bf16.msra.mxu0 %v6125_v16  ;;  %312 = vmatpush.bf16.msra.mxu1 %v6129_v17  ;;  %v6097_v33 = vor.u32 %v7198_v26, %v6094_v27  ;;  %v6101_v34 = vor.u32 %v7203_v30, %v6100_v28  ;;  %v6060_v35 = vld [vmem:[%s12282_s1] sm:$0xf]  ;;  %v7190_v37 = vld [vmem:[%s12282_s1 + $0x4] sm:$0xf]  ;;  %v6105_v38 = vor.u32 %v7199_v31, %v6102_v32  ;;  %v6068_v40 = vld [vmem:[%s12282_s1 + $0x8] sm:$0xf] }
   0xa   :  { %341 = vmatpush.bf16.msra.mxu2 %v6133_v21  ;;  %v7194_v36 = vld [vmem:[%s12282_s1 + $0x1c] sm:$0xf0]  ;;  %v6062_v39 = vld [vmem:[%s12282_s1 + $0x20] sm:$0xf0]  ;;  %v7195_v41 = vld [vmem:[%s12282_s1 + $0x24] sm:$0xf0] }
   0xb   :  { %370 = vmatpush.bf16.msra.mxu3 %v6137_v25  ;;  %v7191_v42 = vld [vmem:[%s12282_s1 + $0xc] sm:$0xf]  ;;  %v6061_v44 = vor.u32 %v7194_v36, %v6060_v35  ;;  %v6065_v45 = vor.u32 %v7190_v37, %v6062_v39  ;;  %v6069_v46 = vor.u32 %v7195_v41, %v6068_v40  ;;  %v7971_v48 = vld [vmem:[%s12283_s0] sm:$0xff]  ;;  %v6172_v50 = vld [vmem:[%s12282_s1 + $0xd0] sm:$0xf] }
   0xc   :  { %v6070_v43 = vld [vmem:[%s12282_s1 + $0x28] sm:$0xf0]  ;;  %v7220_v51 = vld [vmem:[%s12282_s1 + $0xec] sm:$0xf0]  ;;  %v7216_v52 = vld [vmem:[%s12282_s1 + $0xd4] sm:$0xf] }
   0xd   :  { %284 = vmatpush.bf16.msra.mxu0 %v6093_v29  ;;  %313 = vmatpush.bf16.msra.mxu1 %v6097_v33  ;;  %v6073_v47 = vor.u32 %v7191_v42, %v6070_v43  ;;  %v7984_v49 = vld [vmem:[%s12283_s0 + $0x8] sm:$0xff]  ;;  %v6173_v53 = vor.u32 %v7220_v51, %v6172_v50  ;;  %v6174_v54 = vld [vmem:[%s12282_s1 + $0xf0] sm:$0xf0]  ;;  %v6180_v55 = vld [vmem:[%s12282_s1 + $0xd8] sm:$0xf] }
   0xe   :  { %342 = vmatpush.bf16.msra.mxu2 %v6101_v34  ;;  %v7221_v56 = vld [vmem:[%s12282_s1 + $0xf4] sm:$0xf0]  ;;  %v6177_v57 = vor.u32 %v7216_v52, %v6174_v54  ;;  %v7217_v59 = vld [vmem:[%s12282_s1 + $0xdc] sm:$0xf]  ;;  %v6140_v61 = vld [vmem:[%s12282_s1 + $0x90] sm:$0xf] }
   0xf   :  { %371 = vmatpush.bf16.msra.mxu3 %v6105_v38  ;;  %v6181_v58 = vor.u32 %v7221_v56, %v6180_v55  ;;  %v6182_v60 = vld [vmem:[%s12282_s1 + $0xf8] sm:$0xf0]  ;;  %v7212_v63 = vld [vmem:[%s12282_s1 + $0xac] sm:$0xf0]  ;;  %v7208_v0 = vld [vmem:[%s12282_s1 + $0x94] sm:$0xf] }
  0x10   :  { %v6185_v62 = vor.u32 %v7217_v59, %v6182_v60  ;;  %v6142_v1 = vld [vmem:[%s12282_s1 + $0xb0] sm:$0xf0]  ;;  %v6141_v2 = vor.u32 %v7212_v63, %v6140_v61  ;;  %v6148_v4 = vld [vmem:[%s12282_s1 + $0x98] sm:$0xf]  ;;  %v7209_v6 = vld [vmem:[%s12282_s1 + $0x9c] sm:$0xf] }
  0x11   :  { %285 = vmatpush.bf16.msra.mxu0 %v6061_v44  ;;  %314 = vmatpush.bf16.msra.mxu1 %v6065_v45  ;;  %v6145_v3 = vor.u32 %v7208_v0, %v6142_v1  ;;  %v7213_v5 = vld [vmem:[%s12282_s1 + $0xb4] sm:$0xf0]  ;;  %v6150_v8 = vld [vmem:[%s12282_s1 + $0xb8] sm:$0xf0]  ;;  %v6108_v9 = vld [vmem:[%s12282_s1 + $0x50] sm:$0xf] }
  0x12   :  { %343 = vmatpush.bf16.msra.mxu2 %v6069_v46  ;;  %v6149_v7 = vor.u32 %v7213_v5, %v6148_v4  ;;  %v7204_v10 = vld [vmem:[%s12282_s1 + $0x6c] sm:$0xf0]  ;;  %v6153_v11 = vor.u32 %v7209_v6, %v6150_v8  ;;  %v7200_v12 = vld [vmem:[%s12282_s1 + $0x54] sm:$0xf]  ;;  %v6116_v14 = vld [vmem:[%s12282_s1 + $0x58] sm:$0xf] }
  0x13   :  { %372 = vmatpush.bf16.msra.mxu3 %v6073_v47  ;;  %v6110_v13 = vld [vmem:[%s12282_s1 + $0x70] sm:$0xf0]  ;;  %v6109_v15 = vor.u32 %v7204_v10, %v6108_v9  ;;  %v7205_v16 = vld [vmem:[%s12282_s1 + $0x74] sm:$0xf0]  ;;  %v7201_v17 = vld [vmem:[%s12282_s1 + $0x5c] sm:$0xf] }
  0x14   :  { %6186 = vmatmul.msk.bf16.vlgmr.msra.gmra.mxu0 %vm265_vm0, %v7971_v48  ;;  %6190 = vmatmul.msk.bf16.vlgmr.msra.gmra.mxu1 %vm265_vm0, %v7971_v48  ;;  %v6118_v18 = vld [vmem:[%s12282_s1 + $0x78] sm:$0xf0]  ;;  %v6113_v19 = vor.u32 %v7200_v12, %v6110_v13  ;;  %v6117_v20 = vor.u32 %v7205_v16, %v6116_v14  ;;  %v6076_v21 = vld [vmem:[%s12282_s1 + $0x10] sm:$0xf]  ;;  %v7192_v24 = vld [vmem:[%s12282_s1 + $0x14] sm:$0xf] }
  0x15   :  { %6194 = vmatmul.msk.bf16.vlgmr.msra.gmra.mxu2 %vm265_vm0, %v7971_v48  ;;  %398 = vmatpush.bf16.msrb.mxu0 %v6173_v53  ;;  %v7196_v22 = vld [vmem:[%s12282_s1 + $0x2c] sm:$0xf0]  ;;  %v6121_v23 = vor.u32 %v7201_v17, %v6118_v18  ;;  %v6078_v25 = vld [vmem:[%s12282_s1 + $0x30] sm:$0xf0]  ;;  %v6084_v27 = vld [vmem:[%s12282_s1 + $0x18] sm:$0xf] }
  0x16   :  { %6198 = vmatmul.msk.bf16.vlgmr.msra.gmra.mxu3 %vm265_vm0, %v7971_v48  ;;  %427 = vmatpush.bf16.msrb.mxu1 %v6177_v57  ;;  %v6077_v26 = vor.u32 %v7196_v22, %v6076_v21  ;;  %v7197_v28 = vld [vmem:[%s12282_s1 + $0x34] sm:$0xf0]  ;;  %v8087_v29 = vld [vmem:[%s12283_s0 + $0x10] sm:$0xff]  ;;  %v6081_v30 = vor.u32 %v7192_v24, %v6078_v25  ;;  %v7193_v31 = vld [vmem:[%s12282_s1 + $0x1c] sm:$0xf] }
  0x17   :  { %456 = vmatpush.bf16.msrb.mxu2 %v6181_v58  ;;  %485 = vmatpush.bf16.msrb.mxu3 %v6185_v62  ;;  %v6086_v32 = vld [vmem:[%s12282_s1 + $0x38] sm:$0xf0]  ;;  %v6085_v33 = vor.u32 %v7197_v28, %v6084_v27  ;;  %v6444_v35 = vld [vmem:[%s12284_s3 + $0x1c0] sm:$0xf]  ;;  %v7278_v40 = vld [vmem:[%s12284_s3 + $0x1c4] sm:$0xf] }
  0x18   :  { %v6089_v34 = vor.u32 %v7193_v31, %v6086_v32  ;;  %v7282_v36 = vld [vmem:[%s12284_s3 + $0x1dc] sm:$0xf0]  ;;  %v6446_v41 = vld [vmem:[%s12284_s3 + $0x1e0] sm:$0xf0]  ;;  %v8210_v9 = vld [vmem:[%s12283_s0 + $0x18] sm:$0xff] }
  0x19   :  { %399 = vmatpush.bf16.msrb.mxu0 %v6141_v2  ;;  %v6700_v37 = vld [vmem:[%s12284_s3 + $0x3c0] sm:$0xf]  ;;  %v8112_v38 = vor.u32 %v7282_v36, %v6444_v35  ;;  %v8125_v43 = vor.u32 %v7278_v40, %v6446_v41  ;;  %v7342_v44 = vld [vmem:[%s12284_s3 + $0x3c4] sm:$0xf] }
  0x1a   :  { %428 = vmatpush.bf16.msrb.mxu1 %v6145_v3  ;;  %v7346_v39 = vld [vmem:[%s12284_s3 + $0x3dc] sm:$0xf0]  ;;  %v6702_v45 = vld [vmem:[%s12284_s3 + $0x3e0] sm:$0xf0] }
  0x1b   :  { %457 = vmatpush.bf16.msrb.mxu2 %v6149_v7  ;;  %486 = vmatpush.bf16.msrb.mxu3 %v6153_v11  ;;  %12590 = vst [vmem:[#allocation5_spill] sm:$0xff] %v8112_v38  ;;  %v8123_v42 = vor.u32 %v7346_v39, %v6700_v37  ;;  %v6412_v46 = vld [vmem:[%s12284_s3 + $0x180] sm:$0xf]  ;;  %v8137_v47 = vor.u32 %v7342_v44, %v6702_v45  ;;  %v7270_v55 = vld [vmem:[%s12284_s3 + $0x184] sm:$0xf] }
  0x1c   :  { %12592 = vst [vmem:[#allocation7_spill] sm:$0xff] %v8125_v43  ;;  %v7274_v50 = vld [vmem:[%s12284_s3 + $0x19c] sm:$0xf0]  ;;  %v6414_v56 = vld [vmem:[%s12284_s3 + $0x1a0] sm:$0xf0] }
  0x1d   :  { %400 = vmatpush.bf16.msrb.mxu0 %v6109_v15  ;;  %12591 = vst [vmem:[#allocation6_spill] sm:$0xff] %v8123_v42  ;;  %v6668_v51 = vld [vmem:[%s12284_s3 + $0x380] sm:$0xf]  ;;  %v8150_v53 = vor.u32 %v7274_v50, %v6412_v46  ;;  %v7334_v57 = vld [vmem:[%s12284_s3 + $0x384] sm:$0xf]  ;;  %v8164_v58 = vor.u32 %v7270_v55, %v6414_v56 }
  0x1e   :  { %429 = vmatpush.bf16.msrb.mxu1 %v6113_v19  ;;  %12593 = vst [vmem:[#allocation8_spill] sm:$0xff] %v8137_v47  ;;  %v7338_v52 = vld [vmem:[%s12284_s3 + $0x39c] sm:$0xf0]  ;;  %v6670_v59 = vld [vmem:[%s12284_s3 + $0x3a0] sm:$0xf0] }
  0x1f   :  { %458 = vmatpush.bf16.msrb.mxu2 %v6117_v20  ;;  %487 = vmatpush.bf16.msrb.mxu3 %v6121_v23  ;;  %12594 = vst [vmem:[#allocation9_spill] sm:$0xff] %v8150_v53  ;;  %v8152_v54 = vor.u32 %v7338_v52, %v6668_v51  ;;  %v6380_v60 = vld [vmem:[%s12284_s3 + $0x140] sm:$0xf]  ;;  %v8175_v62 = vor.u32 %v7334_v57, %v6670_v59  ;;  %v7262_v1 = vld [vmem:[%s12284_s3 + $0x144] sm:$0xf] }
  0x20   :  { %12596 = vst [vmem:[#allocation11_spill] sm:$0xff] %v8164_v58  ;;  %v7266_v61 = vld [vmem:[%s12284_s3 + $0x15c] sm:$0xf0]  ;;  %v6382_v3 = vld [vmem:[%s12284_s3 + $0x160] sm:$0xf0] }
  0x21   :  { %401 = vmatpush.bf16.msrb.mxu0 %v6077_v26  ;;  %12595 = vst [vmem:[#allocation10_spill] sm:$0xff] %v8152_v54  ;;  %v6636_v63 = vld [vmem:[%s12284_s3 + $0x340] sm:$0xf]  ;;  %v8187_v2 = vor.u32 %v7266_v61, %v6380_v60  ;;  %v7326_v4 = vld [vmem:[%s12284_s3 + $0x344] sm:$0xf]  ;;  %v8202_v7 = vor.u32 %v7262_v1, %v6382_v3 }
  0x22   :  { %430 = vmatpush.bf16.msrb.mxu1 %v6081_v30  ;;  %12597 = vst [vmem:[#allocation12_spill] sm:$0xff] %v8175_v62  ;;  %v7330_v0 = vld [vmem:[%s12284_s3 + $0x35c] sm:$0xf0]  ;;  %v6638_v5 = vld [vmem:[%s12284_s3 + $0x360] sm:$0xf0] }
  0x23   :  { %459 = vmatpush.bf16.msrb.mxu2 %v6085_v33  ;;  %488 = vmatpush.bf16.msrb.mxu3 %v6089_v34  ;;  %12598 = vst [vmem:[#allocation13_spill] sm:$0xff] %v8187_v2  ;;  %v8200_v6 = vor.u32 %v7330_v0, %v6636_v63  ;;  %v8205_v8 = vor.u32 %v7326_v4, %v6638_v5  ;;  %v6348_v10 = vld [vmem:[%s12284_s3 + $0x100] sm:$0xf]  ;;  %v7254_v15 = vld [vmem:[%s12284_s3 + $0x104] sm:$0xf] }
  0x24   :  { %6187 = vmatmul.msk.bf16.gmra.mxu0 %vm265_vm0, %v7984_v49  ;;  %6191 = vmatmul.msk.bf16.gmra.mxu1 %vm265_vm0, %v7984_v49  ;;  %12600 = vst [vmem:[#allocation15_spill] sm:$0xff] %v8202_v7  ;;  %v7258_v11 = vld [vmem:[%s12284_s3 + $0x11c] sm:$0xf0]  ;;  %v6350_v16 = vld [vmem:[%s12284_s3 + $0x120] sm:$0xf0] }
  0x25   :  { %6195 = vmatmul.msk.bf16.gmra.mxu2 %vm265_vm0, %v7984_v49  ;;  %1350 = vmatpush.bf16.msra.mxu0 %v8112_v38  ;;  %12599 = vst [vmem:[#allocation14_spill] sm:$0xff] %v8200_v6  ;;  %v6604_v12 = vld [vmem:[%s12284_s3 + $0x300] sm:$0xf]  ;;  %v8233_v13 = vor.u32 %v7258_v11, %v6348_v10  ;;  %v8246_v18 = vor.u32 %v7254_v15, %v6350_v16  ;;  %v7318_v19 = vld [vmem:[%s12284_s3 + $0x304] sm:$0xf] }
  0x26   :  { %6199 = vmatmul.msk.bf16.gmra.mxu3 %vm265_vm0, %v7984_v49  ;;  %1363 = vmatpush.bf16.msra.mxu1 %v8123_v42  ;;  %12601 = vst [vmem:[#allocation16_spill] sm:$0xff] %v8205_v8  ;;  %v7322_v14 = vld [vmem:[%s12284_s3 + $0x31c] sm:$0xf0]  ;;  %v6606_v20 = vld [vmem:[%s12284_s3 + $0x320] sm:$0xf0] }
  0x27   :  { %1376 = vmatpush.bf16.msra.mxu2 %v8125_v43  ;;  %1389 = vmatpush.bf16.msra.mxu3 %v8137_v47  ;;  %12602 = vst [vmem:[#allocation17_spill] sm:$0xff] %v8233_v13  ;;  %v8244_v17 = vor.u32 %v7322_v14, %v6604_v12  ;;  %v6316_v21 = vld [vmem:[%s12284_s3 + $0xc0] sm:$0xf]  ;;  %v8258_v22 = vor.u32 %v7318_v19, %v6606_v20  ;;  %v7246_v28 = vld [vmem:[%s12284_s3 + $0xc4] sm:$0xf] }
  0x28   :  { %12604 = vst [vmem:[#allocation19_spill] sm:$0xff] %v8246_v18  ;;  %v7250_v23 = vld [vmem:[%s12284_s3 + $0xdc] sm:$0xf0]  ;;  %v6318_v30 = vld [vmem:[%s12284_s3 + $0xe0] sm:$0xf0] }
  0x29   :  { %1351 = vmatpush.bf16.msra.mxu0 %v8150_v53  ;;  %12603 = vst [vmem:[#allocation18_spill] sm:$0xff] %v8244_v17  ;;  %v6572_v24 = vld [vmem:[%s12284_s3 + $0x2c0] sm:$0xf]  ;;  %v8271_v26 = vor.u32 %v7250_v23, %v6316_v21  ;;  %v7310_v31 = vld [vmem:[%s12284_s3 + $0x2c4] sm:$0xf]  ;;  %v8285_v32 = vor.u32 %v7246_v28, %v6318_v30 }
  0x2a   :  { %1364 = vmatpush.bf16.msra.mxu1 %v8152_v54  ;;  %12605 = vst [vmem:[#allocation20_spill] sm:$0xff] %v8258_v22  ;;  %v7314_v25 = vld [vmem:[%s12284_s3 + $0x2dc] sm:$0xf0]  ;;  %v6574_v33 = vld [vmem:[%s12284_s3 + $0x2e0] sm:$0xf0] }
  0x2b   :  { %1377 = vmatpush.bf16.msra.mxu2 %v8164_v58  ;;  %1390 = vmatpush.bf16.msra.mxu3 %v8175_v62  ;;  %12606 = vst [vmem:[#allocation21_spill] sm:$0xff] %v8271_v26  ;;  %v8273_v27 = vor.u32 %v7314_v25, %v6572_v24  ;;  %v6284_v34 = vld [vmem:[%s12284_s3 + $0x80] sm:$0xf]  ;;  %v8296_v36 = vor.u32 %v7310_v31, %v6574_v33  ;;  %v7238_v40 = vld [vmem:[%s12284_s3 + $0x84] sm:$0xf] }
  0x2c   :  { %12608 = vst [vmem:[#allocation23_spill] sm:$0xff] %v8285_v32  ;;  %v7242_v35 = vld [vmem:[%s12284_s3 + $0x9c] sm:$0xf0]  ;;  %v6286_v44 = vld [vmem:[%s12284_s3 + $0xa0] sm:$0xf0] }
  0x2d   :  { %1352 = vmatpush.bf16.msra.mxu0 %v8187_v2  ;;  %12607 = vst [vmem:[#allocation22_spill] sm:$0xff] %v8273_v27  ;;  %v6540_v37 = vld [vmem:[%s12284_s3 + $0x280] sm:$0xf]  ;;  %v8308_v41 = vor.u32 %v7242_v35, %v6284_v34  ;;  %v7302_v45 = vld [vmem:[%s12284_s3 + $0x284] sm:$0xf]  ;;  %v8323_v51 = vor.u32 %v7238_v40, %v6286_v44 }
  0x2e   :  { %1365 = vmatpush.bf16.msra.mxu1 %v8200_v6  ;;  %12609 = vst [vmem:[#allocation24_spill] sm:$0xff] %v8296_v36  ;;  %v7306_v39 = vld [vmem:[%s12284_s3 + $0x29c] sm:$0xf0]  ;;  %v6542_v46 = vld [vmem:[%s12284_s3 + $0x2a0] sm:$0xf0] }
  0x2f   :  { %1378 = vmatpush.bf16.msra.mxu2 %v8202_v7  ;;  %1391 = vmatpush.bf16.msra.mxu3 %v8205_v8  ;;  %12610 = vst [vmem:[#allocation25_spill] sm:$0xff] %v8308_v41  ;;  %v8321_v50 = vor.u32 %v7306_v39, %v6540_v37  ;;  %v8326_v52 = vor.u32 %v7302_v45, %v6542_v46  ;;  %v6252_v55 = vld [vmem:[%s12284_s3 + $0x40] sm:$0xf]  ;;  %v7230_v60 = vld [vmem:[%s12284_s3 + $0x44] sm:$0xf] }
  0x30   :  { %12612 = vst [vmem:[#allocation27_spill] sm:$0xff] %v8323_v51  ;;  %v7234_v56 = vld [vmem:[%s12284_s3 + $0x5c] sm:$0xf0]  ;;  %v6254_v61 = vld [vmem:[%s12284_s3 + $0x60] sm:$0xf0] }
  0x31   :  { %1353 = vmatpush.bf16.msra.mxu0 %v8233_v13  ;;  %12611 = vst [vmem:[#allocation26_spill] sm:$0xff] %v8321_v50  ;;  %v6508_v57 = vld [vmem:[%s12284_s3 + $0x240] sm:$0xf]  ;;  %v7294_v63 = vld [vmem:[%s12284_s3 + $0x244] sm:$0xf]  ;;  %v8356_v1 = vor.u32 %v7234_v56, %v6252_v55  ;;  %v8360_v4 = vor.u32 %v7230_v60, %v6254_v61 }
  0x32   :  { %1366 = vmatpush.bf16.msra.mxu1 %v8244_v17  ;;  %12613 = vst [vmem:[#allocation28_spill] sm:$0xff] %v8326_v52  ;;  %v7298_v59 = vld [vmem:[%s12284_s3 + $0x25c] sm:$0xf0]  ;;  %v6510_v0 = vld [vmem:[%s12284_s3 + $0x260] sm:$0xf0] }
  0x33   :  { %1379 = vmatpush.bf16.msra.mxu2 %v8246_v18  ;;  %1392 = vmatpush.bf16.msra.mxu3 %v8258_v22  ;;  %12614 = vst [vmem:[#allocation29_spill] sm:$0xff] %v8356_v1  ;;  %v8358_v3 = vor.u32 %v7298_v59, %v6508_v57  ;;  %v8364_v5 = vor.u32 %v7294_v63, %v6510_v0  ;;  %v6220_v10 = vld [vmem:[%s12284_s3] sm:$0xf]  ;;  %v7222_v16 = vld [vmem:[%s12284_s3 + $0x4] sm:$0xf] }
  0x34   :  { %6188 = vmatmul.msk.bf16.gmra.mxu0 %vm265_vm0, %v8087_v29  ;;  %6192 = vmatmul.msk.bf16.gmra.mxu1 %vm265_vm0, %v8087_v29  ;;  %12616 = vst [vmem:[#allocation31_spill] sm:$0xff] %v8360_v4  ;;  %v7226_v11 = vld [vmem:[%s12284_s3 + $0x1c] sm:$0xf0]  ;;  %v6222_v19 = vld [vmem:[%s12284_s3 + $0x20] sm:$0xf0] }
  0x35   :  { %6196 = vmatmul.msk.bf16.gmra.mxu2 %vm265_vm0, %v8087_v29  ;;  %1354 = vmatpush.bf16.msra.mxu0 %v8271_v26  ;;  %12615 = vst [vmem:[#allocation30_spill] sm:$0xff] %v8358_v3  ;;  %v6476_v12 = vld [vmem:[%s12284_s3 + $0x200] sm:$0xf]  ;;  %v8382_v14 = vor.u32 %v7226_v11, %v6220_v10  ;;  %v8397_v20 = vor.u32 %v7222_v16, %v6222_v19  ;;  %v7286_v21 = vld [vmem:[%s12284_s3 + $0x204] sm:$0xf] }
  0x36   :  { %6200 = vmatmul.msk.bf16.gmra.mxu3 %vm265_vm0, %v8087_v29  ;;  %1367 = vmatpush.bf16.msra.mxu1 %v8273_v27  ;;  %12617 = vst [vmem:[#allocation32_spill] sm:$0xff] %v8364_v5  ;;  %v7290_v15 = vld [vmem:[%s12284_s3 + $0x21c] sm:$0xf0]  ;;  %v6478_v23 = vld [vmem:[%s12284_s3 + $0x220] sm:$0xf0] }
  0x37   :  { %1380 = vmatpush.bf16.msra.mxu2 %v8285_v32  ;;  %1393 = vmatpush.bf16.msra.mxu3 %v8296_v36  ;;  %12618 = vst [vmem:[#allocation33_spill] sm:$0xff] %v8382_v14  ;;  %v6452_v24 = vld [vmem:[%s12284_s3 + $0x1c8] sm:$0xf]  ;;  %v8409_v25 = vor.u32 %v7286_v21, %v6478_v23  ;;  %v7279_v35 = vld [vmem:[%s12284_s3 + $0x1cc] sm:$0xf] }
  0x38   :  { %12620 = vst [vmem:[#allocation35_spill] sm:$0xff] %v8397_v20  ;;  %v7283_v28 = vld [vmem:[%s12284_s3 + $0x1e4] sm:$0xf0]  ;;  %v6454_v37 = vld [vmem:[%s12284_s3 + $0x1e8] sm:$0xf0] }
  0x39   :  { %1355 = vmatpush.bf16.msra.mxu0 %v8308_v41  ;;  %12621 = vst [vmem:[#allocation36_spill] sm:$0xff] %v8409_v25  ;;  %v6708_v30 = vld [vmem:[%s12284_s3 + $0x3c8] sm:$0xf]  ;;  %v8420_v33 = vor.u32 %v7283_v28, %v6452_v24  ;;  %v7343_v39 = vld [vmem:[%s12284_s3 + $0x3cc] sm:$0xf]  ;;  %v8434_v40 = vor.u32 %v7279_v35, %v6454_v37 }
  0x3a   :  { %1368 = vmatpush.bf16.msra.mxu1 %v8321_v50  ;;  %v7347_v31 = vld [vmem:[%s12284_s3 + $0x3e4] sm:$0xf0]  ;;  %v6710_v44 = vld [vmem:[%s12284_s3 + $0x3e8] sm:$0xf0] }
  0x3b   :  { %1381 = vmatpush.bf16.msra.mxu2 %v8323_v51  ;;  %1394 = vmatpush.bf16.msra.mxu3 %v8326_v52  ;;  %12622 = vst [vmem:[#allocation37_spill] sm:$0xff] %v8420_v33  ;;  %v8422_v34 = vor.u32 %v7347_v31, %v6708_v30  ;;  %v6420_v45 = vld [vmem:[%s12284_s3 + $0x188] sm:$0xf]  ;;  %v8447_v55 = vor.u32 %v7343_v39, %v6710_v44  ;;  %v7271_v59 = vld [vmem:[%s12284_s3 + $0x18c] sm:$0xf] }
  0x3c   :  { %12624 = vst [vmem:[#allocation39_spill] sm:$0xff] %v8434_v40  ;;  %v7275_v46 = vld [vmem:[%s12284_s3 + $0x1a4] sm:$0xf0]  ;;  %v6422_v61 = vld [vmem:[%s12284_s3 + $0x1a8] sm:$0xf0] }
  0x3d   :  { %1356 = vmatpush.bf16.msra.mxu0 %v8356_v1  ;;  %12623 = vst [vmem:[#allocation38_spill] sm:$0xff] %v8422_v34  ;;  %v6676_v56 = vld [vmem:[%s12284_s3 + $0x388] sm:$0xf]  ;;  %v8460_v60 = vor.u32 %v7275_v46, %v6420_v45  ;;  %v7335_v63 = vld [vmem:[%s12284_s3 + $0x38c] sm:$0xf]  ;;  %v8475_v11 = vor.u32 %v7271_v59, %v6422_v61 }
  0x3e   :  { %1369 = vmatpush.bf16.msra.mxu1 %v8358_v3  ;;  %12625 = vst [vmem:[#allocation40_spill] sm:$0xff] %v8447_v55  ;;  %v7339_v57 = vld [vmem:[%s12284_s3 + $0x3a4] sm:$0xf0]  ;;  %v6678_v0 = vld [vmem:[%s12284_s3 + $0x3a8] sm:$0xf0] }
  0x3f   :  { %1382 = vmatpush.bf16.msra.mxu2 %v8360_v4  ;;  %1395 = vmatpush.bf16.msra.mxu3 %v8364_v5  ;;  %12626 = vst [vmem:[#allocation41_spill] sm:$0xff] %v8460_v60  ;;  %v8473_v10 = vor.u32 %v7339_v57, %v6676_v56  ;;  %v7267_v16 = vld [vmem:[%s12284_s3 + $0x164] sm:$0xf0]  ;;  %v7263_v23 = vld [vmem:[%s12284_s3 + $0x14c] sm:$0xf] }
  0x40   :  { %12628 = vst [vmem:[#allocation43_spill] sm:$0xff] %v8475_v11  ;;  %v6644_v19 = vld [vmem:[%s12284_s3 + $0x348] sm:$0xf]  ;;  %v6390_v24 = vld [vmem:[%s12284_s3 + $0x168] sm:$0xf0] }
  0x41   :  { %1357 = vmatpush.bf16.msra.mxu0 %v8382_v14  ;;  %12627 = vst [vmem:[#allocation42_spill] sm:$0xff] %v8473_v10  ;;  %v7331_v21 = vld [vmem:[%s12284_s3 + $0x364] sm:$0xf0]  ;;  %v7327_v28 = vld [vmem:[%s12284_s3 + $0x34c] sm:$0xf]  ;;  %v8512_v37 = vor.u32 %v7263_v23, %v6390_v24 }
  0x42   :  { %v6646_v30 = vld [vmem:[%s12284_s3 + $0x368] sm:$0xf0]  ;;  %v8510_v35 = vor.u32 %v7331_v21, %v6644_v19  ;;  %v6356_v39 = vld [vmem:[%s12284_s3 + $0x108] sm:$0xf] }
  0x43   :  { %1383 = vmatpush.bf16.msra.mxu2 %v8397_v20  ;;  %1396 = vmatpush.bf16.msra.mxu3 %v8409_v25  ;;  %12632 = vst [vmem:[#allocation47_spill] sm:$0xff] %v8512_v37  ;;  %v7259_v44 = vld [vmem:[%s12284_s3 + $0x124] sm:$0xf0]  ;;  %v8525_v46 = vor.u32 %v7327_v28, %v6646_v30  ;;  %v7255_v57 = vld [vmem:[%s12284_s3 + $0x10c] sm:$0xf] }
  0x44   :  { %6189 = vmatmul.msk.bf16.gmra.mxu0 %vm265_vm0, %v8210_v9  ;;  %6193 = vmatmul.msk.bf16.gmra.mxu1 %vm265_vm0, %v8210_v9  ;;  %12631 = vst [vmem:[#allocation46_spill] sm:$0xff] %v8510_v35  ;;  %v6612_v45 = vld [vmem:[%s12284_s3 + $0x308] sm:$0xf]  ;;  %v6358_v59 = vld [vmem:[%s12284_s3 + $0x128] sm:$0xf0] }
  0x45   :  { %6197 = vmatmul.msk.bf16.gmra.mxu2 %vm265_vm0, %v8210_v9  ;;  %12633 = vst [vmem:[#allocation48_spill] sm:$0xff] %v8525_v46  ;;  %v7323_v56 = vld [vmem:[%s12284_s3 + $0x324] sm:$0xf0]  ;;  %v7319_v61 = vld [vmem:[%s12284_s3 + $0x30c] sm:$0xf] }
  0x46   :  { %6201 = vmatmul.msk.bf16.gmra.mxu3 %vm265_vm0, %v8210_v9  ;;  %v6324_v19 = vld [vmem:[%s12284_s3 + $0xc8] sm:$0xf]  ;;  %v7247_v28 = vld [vmem:[%s12284_s3 + $0xcc] sm:$0xf] }
  0x47   :  { %v6580_v21 = vld [vmem:[%s12284_s3 + $0x2c8] sm:$0xf]  ;;  %v6326_v30 = vld [vmem:[%s12284_s3 + $0xe8] sm:$0xf0] }
  0x48   :  { %v7315_v24 = vld [vmem:[%s12284_s3 + $0x2e4] sm:$0xf0] }
  0x54   :  { %6202 = vmatmul.msk.bf16.vlgmr.msrb.gmra.mxu0 %vm265_vm0, %v7971_v48  ;;  %6206 = vmatmul.msk.bf16.vlgmr.msrb.gmra.mxu1 %vm265_vm0, %v7971_v48 }
  0x55   :  { %6210 = vmatmul.msk.bf16.vlgmr.msrb.gmra.mxu2 %vm265_vm0, %v7971_v48  ;;  %1402 = vmatpush.bf16.msrb.mxu0 %v8420_v33 }
  0x56   :  { %6214 = vmatmul.msk.bf16.vlgmr.msrb.gmra.mxu3 %vm265_vm0, %v7971_v48  ;;  %v8395_v48 = vor.u32 %v7290_v15, %v6476_v12  ;;  %1428 = vmatpush.bf16.msrb.mxu2 %v8434_v40  ;;  %v8478_v12 = vor.u32 %v7335_v63, %v6678_v0  ;;  %v6388_v15 = vld [vmem:[%s12284_s3 + $0x148] sm:$0xf]  ;;  %v6614_v63 = vld [vmem:[%s12284_s3 + $0x328] sm:$0xf0]  ;;  %v8549_v0 = vor.u32 %v7259_v44, %v6356_v39 }
  0x57   :  { %1441 = vmatpush.bf16.msrb.mxu3 %v8447_v55  ;;  %v8508_v31 = vor.u32 %v7267_v16, %v6388_v15  ;;  %v8553_v15 = vor.u32 %v7323_v56, %v6612_v45  ;;  %v8555_v16 = vor.u32 %v7255_v57, %v6358_v59  ;;  %v8567_v23 = vor.u32 %v7319_v61, %v6614_v63  ;;  %v7311_v39 = vld [vmem:[%s12284_s3 + $0x2cc] sm:$0xf]  ;;  %v6292_v59 = vld [vmem:[%s12284_s3 + $0x88] sm:$0xf] }
  0x58   :  { %12619 = vst [vmem:[#allocation34_spill] sm:$0xff] %v8395_v48  ;;  %1370 = vmatpush.bf16.msra.mxu1 %v8395_v48  ;;  %v6582_v44 = vld [vmem:[%s12284_s3 + $0x2e8] sm:$0xf0]  ;;  %v8589_v56 = vor.u32 %v7315_v24, %v6580_v21  ;;  %v8591_v57 = vor.u32 %v7247_v28, %v6326_v30  ;;  %v7243_v61 = vld [vmem:[%s12284_s3 + $0xa4] sm:$0xf0] }
  0x59   :  { %12629 = vst [vmem:[#allocation44_spill] sm:$0xff] %v8478_v12  ;;  %1403 = vmatpush.bf16.msrb.mxu0 %v8460_v60  ;;  %v6548_v63 = vld [vmem:[%s12284_s3 + $0x288] sm:$0xf]  ;;  %v7239_v21 = vld [vmem:[%s12284_s3 + $0x8c] sm:$0xf] }
  0x5a   :  { %1429 = vmatpush.bf16.msrb.mxu2 %v8475_v11  ;;  %12630 = vst [vmem:[#allocation45_spill] sm:$0xff] %v8508_v31  ;;  %v6294_v24 = vld [vmem:[%s12284_s3 + $0xa8] sm:$0xf0] }
  0x5b   :  { %1442 = vmatpush.bf16.msrb.mxu3 %v8478_v12  ;;  %12634 = vst [vmem:[#allocation49_spill] sm:$0xff] %v8549_v0  ;;  %v7303_v28 = vld [vmem:[%s12284_s3 + $0x28c] sm:$0xf] }
  0x5c   :  { %1415 = vmatpush.bf16.msrb.mxu1 %v8422_v34  ;;  %12635 = vst [vmem:[#allocation50_spill] sm:$0xff] %v8553_v15  ;;  %v6550_v30 = vld [vmem:[%s12284_s3 + $0x2a8] sm:$0xf0] }
  0x5d   :  { %1404 = vmatpush.bf16.msrb.mxu0 %v8508_v31  ;;  %12636 = vst [vmem:[#allocation51_spill] sm:$0xff] %v8555_v16  ;;  %v6470_v31 = vld [vmem:[%s12284_s3 + $0x1f8] sm:$0xf0] }
  0x5e   :  { %1430 = vmatpush.bf16.msrb.mxu2 %v8512_v37  ;;  %12637 = vst [vmem:[#allocation52_spill] sm:$0xff] %v8567_v23  ;;  %v7236_v37 = vld [vmem:[%s12284_s3 + $0x6c] sm:$0xf0] }
  0x5f   :  { %1443 = vmatpush.bf16.msrb.mxu3 %v8525_v46  ;;  %12639 = vst [vmem:[#allocation54_spill] sm:$0xff] %v8589_v56 }
  0x60   :  { %1416 = vmatpush.bf16.msrb.mxu1 %v8473_v10  ;;  %12640 = vst [vmem:[#allocation55_spill] sm:$0xff] %v8591_v57 }
  0x61   :  { %1405 = vmatpush.bf16.msrb.mxu0 %v8549_v0 }
  0x62   :  { %1431 = vmatpush.bf16.msrb.mxu2 %v8555_v16  ;;  %v7235_v16 = vld [vmem:[%s12284_s3 + $0x64] sm:$0xf0] }
  0x63   :  { %1444 = vmatpush.bf16.msrb.mxu3 %v8567_v23  ;;  %v8627_v23 = vor.u32 %v7239_v21, %v6294_v24  ;;  %v6262_v21 = vld [vmem:[%s12284_s3 + $0x68] sm:$0xf0] }
  0x64   :  { %6203 = vmatmul.msk.bf16.gmra.mxu0 %vm265_vm0, %v7984_v49  ;;  %6207 = vmatmul.msk.bf16.gmra.mxu1 %vm265_vm0, %v7984_v49  ;;  %v7295_v24 = vld [vmem:[%s12284_s3 + $0x24c] sm:$0xf] }
  0x65   :  { %6211 = vmatmul.msk.bf16.gmra.mxu2 %vm265_vm0, %v7984_v49  ;;  %1417 = vmatpush.bf16.msrb.mxu1 %v8510_v35  ;;  %12644 = vst [vmem:[#allocation59_spill] sm:$0xff] %v8627_v23 }
  0x66   :  { %6215 = vmatmul.msk.bf16.gmra.mxu3 %vm265_vm0, %v7984_v49  ;;  %v7251_v49 = vld [vmem:[%s12284_s3 + $0xe4] sm:$0xf0]  ;;  %1432 = vmatpush.bf16.msrb.mxu2 %v8591_v57 }
  0x67   :  { %v8585_v45 = vor.u32 %v7251_v49, %v6324_v19  ;;  %v8603_v19 = vor.u32 %v7311_v39, %v6582_v44  ;;  %v7307_v49 = vld [vmem:[%s12284_s3 + $0x2a4] sm:$0xf0]  ;;  %v8621_v39 = vor.u32 %v7243_v61, %v6292_v59  ;;  %v8639_v61 = vor.u32 %v7303_v28, %v6550_v30  ;;  %v6518_v28 = vld [vmem:[%s12284_s3 + $0x268] sm:$0xf0] }
  0x68   :  { %v8625_v44 = vor.u32 %v7307_v49, %v6548_v63  ;;  %v6516_v59 = vld [vmem:[%s12284_s3 + $0x248] sm:$0xf]  ;;  %v7231_v49 = vld [vmem:[%s12284_s3 + $0x4c] sm:$0xf] }
  0x69   :  { %12638 = vst [vmem:[#allocation53_spill] sm:$0xff] %v8585_v45  ;;  %1418 = vmatpush.bf16.msrb.mxu1 %v8553_v15  ;;  %1406 = vmatpush.bf16.msrb.mxu0 %v8585_v45  ;;  %v6260_v15 = vld [vmem:[%s12284_s3 + $0x48] sm:$0xf] }
  0x6a   :  { %12641 = vst [vmem:[#allocation56_spill] sm:$0xff] %v8603_v19  ;;  %1445 = vmatpush.bf16.msrb.mxu3 %v8603_v19  ;;  %v7299_v63 = vld [vmem:[%s12284_s3 + $0x264] sm:$0xf0]  ;;  %v8657_v30 = vor.u32 %v7235_v16, %v6260_v15  ;;  %1433 = vmatpush.bf16.msrb.mxu2 %v8627_v23  ;;  %v8677_v16 = vor.u32 %v7295_v24, %v6518_v28  ;;  %v6486_v24 = vld [vmem:[%s12284_s3 + $0x228] sm:$0xf0] }
  0x6b   :  { %12642 = vst [vmem:[#allocation57_spill] sm:$0xff] %v8621_v39  ;;  %v8661_v19 = vor.u32 %v7299_v63, %v6516_v59  ;;  %v6228_v57 = vld [vmem:[%s12284_s3 + $0x8] sm:$0xf]  ;;  %v7223_v63 = vld [vmem:[%s12284_s3 + $0xc] sm:$0xf] }
  0x6c   :  { %12643 = vst [vmem:[#allocation58_spill] sm:$0xff] %v8625_v44  ;;  %v7227_v45 = vld [vmem:[%s12284_s3 + $0x24] sm:$0xf0] }
  0x6d   :  { %1419 = vmatpush.bf16.msrb.mxu1 %v8589_v56  ;;  %12645 = vst [vmem:[#allocation60_spill] sm:$0xff] %v8639_v61  ;;  %1407 = vmatpush.bf16.msrb.mxu0 %v8621_v39  ;;  %v8663_v56 = vor.u32 %v7231_v49, %v6262_v21  ;;  %v6484_v15 = vld [vmem:[%s12284_s3 + $0x208] sm:$0xf]  ;;  %v6230_v49 = vld [vmem:[%s12284_s3 + $0x28] sm:$0xf0]  ;;  %v8701_v28 = vor.u32 %v7227_v45, %v6228_v57 }
  0x6e   :  { %12646 = vst [vmem:[#allocation61_spill] sm:$0xff] %v8657_v30  ;;  %1446 = vmatpush.bf16.msrb.mxu3 %v8639_v61  ;;  %v7291_v59 = vld [vmem:[%s12284_s3 + $0x224] sm:$0xf0]  ;;  %v7287_v21 = vld [vmem:[%s12284_s3 + $0x20c] sm:$0xf] }
  0x6f   :  { %12647 = vst [vmem:[#allocation62_spill] sm:$0xff] %v8661_v19  ;;  %1434 = vmatpush.bf16.msrb.mxu2 %v8663_v56  ;;  %v8705_v61 = vor.u32 %v7291_v59, %v6484_v15  ;;  %v8710_v23 = vor.u32 %v7287_v21, %v6486_v24  ;;  %v7284_v45 = vld [vmem:[%s12284_s3 + $0x1ec] sm:$0xf0]  ;;  %v6462_v59 = vld [vmem:[%s12284_s3 + $0x1f0] sm:$0xf0] }
  0x70   :  { %12648 = vst [vmem:[#allocation63_spill] sm:$0xff] %v8663_v56  ;;  %v6716_v57 = vld [vmem:[%s12284_s3 + $0x3d0] sm:$0xf]  ;;  %v6718_v21 = vld [vmem:[%s12284_s3 + $0x3f0] sm:$0xf0] }
  0x71   :  { %1420 = vmatpush.bf16.msrb.mxu1 %v8625_v44  ;;  %12649 = vst [vmem:[#allocation64_spill] sm:$0xff] %v8677_v16  ;;  %1408 = vmatpush.bf16.msrb.mxu0 %v8657_v30  ;;  %v8707_v44 = vor.u32 %v7223_v63, %v6230_v49  ;;  %v7348_v15 = vld [vmem:[%s12284_s3 + $0x3ec] sm:$0xf0]  ;;  %v7344_v49 = vld [vmem:[%s12284_s3 + $0x3d4] sm:$0xf] }
  0x72   :  { %12650 = vst [vmem:[#allocation65_spill] sm:$0xff] %v8701_v28  ;;  %1447 = vmatpush.bf16.msrb.mxu3 %v8677_v16  ;;  %v7276_v16 = vld [vmem:[%s12284_s3 + $0x1ac] sm:$0xf0] }
  0x73   :  { %12651 = vst [vmem:[#allocation66_spill] sm:$0xff] %v8705_v61  ;;  %1435 = vmatpush.bf16.msrb.mxu2 %v8707_v44  ;;  %v6396_v56 = vld [vmem:[%s12284_s3 + $0x150] sm:$0xf] }
  0x74   :  { %6204 = vmatmul.msk.bf16.gmra.mxu0 %vm265_vm0, %v8087_v29  ;;  %6208 = vmatmul.msk.bf16.gmra.mxu1 %vm265_vm0, %v8087_v29  ;;  %12652 = vst [vmem:[#allocation67_spill] sm:$0xff] %v8707_v44  ;;  %v6364_v30 = vld [vmem:[%s12284_s3 + $0x110] sm:$0xf] }
  0x75   :  { %6212 = vmatmul.msk.bf16.gmra.mxu2 %vm265_vm0, %v8087_v29  ;;  %1421 = vmatpush.bf16.msrb.mxu1 %v8661_v19  ;;  %12653 = vst [vmem:[#allocation68_spill] sm:$0xff] %v8710_v23  ;;  %v12324_v19 = vmov 0   ;;  %v7252_v39 = vld [vmem:[%s12284_s3 + $0xec] sm:$0xf0] }
  0x76   :  { %6216 = vmatmul.msk.bf16.gmra.mxu3 %vm265_vm0, %v8087_v29  ;;  %1409 = vmatpush.bf16.msrb.mxu0 %v8701_v28  ;;  %v6460_v29 = vld [vmem:[%s12284_s3 + $0x1d0] sm:$0xf] }
  0x77   :  { %1448 = vmatpush.bf16.msrb.mxu3 %v8710_v23  ;;  %v8752_v23 = vor.u32 %v7284_v45, %v6460_v29  ;;  %v6684_v28 = vld [vmem:[%s12284_s3 + $0x390] sm:$0xf]  ;;  %v8768_v29 = vor.u32 %v7344_v49, %v6718_v21 }
  0x78   :  { %v7340_v45 = vld [vmem:[%s12284_s3 + $0x3ac] sm:$0xf0] }
  0x79   :  { %1422 = vmatpush.bf16.msrb.mxu1 %v8705_v61  ;;  %12656 = vst [vmem:[#allocation71_spill] sm:$0xff] %v8752_v23  ;;  %v8754_v61 = vor.u32 %v7348_v15, %v6716_v57  ;;  %v7272_v57 = vld [vmem:[%s12284_s3 + $0x194] sm:$0xf]  ;;  %v8793_v21 = vor.u32 %v7340_v45, %v6684_v28  ;;  %v7332_v45 = vld [vmem:[%s12284_s3 + $0x36c] sm:$0xf0] }
  0x7a   :  { %12659 = vst [vmem:[#allocation74_spill] sm:$0xff] %v8768_v29  ;;  %v6430_v15 = vld [vmem:[%s12284_s3 + $0x1b0] sm:$0xf0] }
  0x7b   :  { %12657 = vst [vmem:[#allocation72_spill] sm:$0xff] %v8754_v61 }
  0x7c   :  { %12661 = vst [vmem:[#allocation76_spill] sm:$0xff] %v8793_v21 }
  0x84   :  { %6205 = vmatmul.msk.bf16.gmra.mxu0 %vm265_vm0, %v8210_v9  ;;  %6209 = vmatmul.msk.bf16.gmra.mxu1 %vm265_vm0, %v8210_v9 }
  0x85   :  { %6213 = vmatmul.msk.bf16.gmra.mxu2 %vm265_vm0, %v8210_v9 }
  0x86   :  { %6217 = vmatmul.msk.bf16.gmra.mxu3 %vm265_vm0, %v8210_v9  ;;  %v7280_v9 = vld [vmem:[%s12284_s3 + $0x1d4] sm:$0xf] }
  0x87   :  { %v8756_v44 = vor.u32 %v7280_v9, %v6462_v59  ;;  %v7336_v9 = vld [vmem:[%s12284_s3 + $0x394] sm:$0xf] }
  0x88   :  { %v6686_v59 = vld [vmem:[%s12284_s3 + $0x3b0] sm:$0xf0] }
  0x89   :  { %12658 = vst [vmem:[#allocation73_spill] sm:$0xff] %v8756_v44  ;;  %v8809_v28 = vor.u32 %v7336_v9, %v6686_v59  ;;  %v7328_v9 = vld [vmem:[%s12284_s3 + $0x354] sm:$0xf] }
  0x8a   :  { %v6654_v59 = vld [vmem:[%s12284_s3 + $0x370] sm:$0xf0] }
  0x8b   :  { %12664 = vst [vmem:[#allocation79_spill] sm:$0xff] %v8809_v28 }
  0x91   :  { %v8742_v63 = vpop.f32.mrf.mxu0  ;;  %v8750_v24 = vpop.f32.mrf.mxu1 }
  0x92   :  { %12654 = vst [vmem:[#allocation69_spill] sm:$0xff] %v8742_v63  ;;  %v6428_v63 = vld [vmem:[%s12284_s3 + $0x190] sm:$0xf] }
  0x93   :  { %12655 = vst [vmem:[#allocation70_spill] sm:$0xff] %v8750_v24  ;;  %v8789_v49 = vor.u32 %v7276_v16, %v6428_v63  ;;  %v8795_v24 = vor.u32 %v7272_v57, %v6430_v15  ;;  %v6652_v16 = vld [vmem:[%s12284_s3 + $0x350] sm:$0xf]  ;;  %v7264_v57 = vld [vmem:[%s12284_s3 + $0x154] sm:$0xf] }
  0x94   :  { %1358 = vmatmul.bf16.vlgmr.msra.gmra.mxu0 %v12324_v19  ;;  %1371 = vmatmul.bf16.vlgmr.msra.gmra.mxu1 %v12324_v19  ;;  %v6398_v15 = vld [vmem:[%s12284_s3 + $0x170] sm:$0xf0] }
  0x95   :  { %1384 = vmatmul.bf16.vlgmr.msra.gmra.mxu2 %v12324_v19  ;;  %1454 = vmatpush.bf16.msra.mxu0 %v8752_v23  ;;  %12660 = vst [vmem:[#allocation75_spill] sm:$0xff] %v8789_v49 }
  0x96   :  { %1397 = vmatmul.bf16.vlgmr.msra.gmra.mxu3 %v12324_v19  ;;  %1467 = vmatpush.bf16.msra.mxu1 %v8754_v61  ;;  %12662 = vst [vmem:[#allocation77_spill] sm:$0xff] %v8795_v24  ;;  %v7268_v19 = vld [vmem:[%s12284_s3 + $0x16c] sm:$0xf0] }
  0x97   :  { %1480 = vmatpush.bf16.msra.mxu2 %v8756_v44  ;;  %1493 = vmatpush.bf16.msra.mxu3 %v8768_v29  ;;  %v8833_v29 = vld [vmem:[%s12285_s2] sm:$0xff] }
  0x98   :  { %v8807_v63 = vpop.f32.mrf.mxu2 }
  0x99   :  { %12663 = vst [vmem:[#allocation78_spill] sm:$0xff] %v8807_v63  ;;  %v8820_v61 = vpop.f32.mrf.mxu3  ;;  %v8822_v44 = vpop.f32.mrf.mxu0  ;;  %1455 = vmatpush.bf16.msra.mxu0 %v8789_v49  ;;  %v8844_v63 = vor.u32 %v7264_v57, %v6398_v15  ;;  %v7260_v49 = vld [vmem:[%s12284_s3 + $0x12c] sm:$0xf0]  ;;  %v6366_v57 = vld [vmem:[%s12284_s3 + $0x130] sm:$0xf0] }
  0x9a   :  { %12665 = vst [vmem:[#allocation80_spill] sm:$0xff] %v8820_v61  ;;  %v8836_v23 = vpop.f32.mrf.mxu1  ;;  %v8838_v61 = vor.u32 %v7268_v19, %v6396_v56  ;;  %1468 = vmatpush.bf16.msra.mxu1 %v8793_v21  ;;  %v6620_v56 = vld [vmem:[%s12284_s3 + $0x310] sm:$0xf]  ;;  %v8856_v19 = vor.u32 %v7328_v9, %v6654_v59  ;;  %v7320_v15 = vld [vmem:[%s12284_s3 + $0x314] sm:$0xf]  ;;  %v8874_v59 = vperm.slane %v8833_v29, 0 }
  0x9b   :  { %12666 = vst [vmem:[#allocation81_spill] sm:$0xff] %v8822_v44  ;;  %1481 = vmatpush.bf16.msra.mxu2 %v8795_v24  ;;  %v8842_v44 = vor.u32 %v7332_v45, %v6652_v16  ;;  %1494 = vmatpush.bf16.msra.mxu3 %v8809_v28  ;;  %v7324_v16 = vld [vmem:[%s12284_s3 + $0x32c] sm:$0xf0]  ;;  %v7256_v45 = vld [vmem:[%s12284_s3 + $0x114] sm:$0xf] }
  0x9c   :  { %12667 = vst [vmem:[#allocation82_spill] sm:$0xff] %v8836_v23  ;;  %v6622_v9 = vld [vmem:[%s12284_s3 + $0x330] sm:$0xf0]  ;;  %v8877_v23 = vor.u32 %v7260_v49, %v6364_v30  ;;  %v8881_v28 = vor.u32 %v7324_v16, %v6620_v56  ;;  %v8883_v21 = vor.u32 %v7256_v45, %v6366_v57  ;;  %v6332_v24 = vld [vmem:[%s12284_s3 + $0xd0] sm:$0xf] }
  0x9d   :  { %12668 = vst [vmem:[#allocation83_spill] sm:$0xff] %v8838_v61  ;;  %1456 = vmatpush.bf16.msra.mxu0 %v8838_v61  ;;  %v6588_v30 = vld [vmem:[%s12284_s3 + $0x2d0] sm:$0xf]  ;;  %v8897_v56 = vor.u32 %v7320_v15, %v6622_v9  ;;  %v7248_v45 = vld [vmem:[%s12284_s3 + $0xd4] sm:$0xf]  ;;  %v8923_v46 = vor.u32 %v7252_v39, %v6332_v24 }
  0x9e   :  { %12669 = vst [vmem:[#allocation84_spill] sm:$0xff] %v8842_v44  ;;  %1469 = vmatpush.bf16.msra.mxu1 %v8842_v44  ;;  %v7316_v16 = vld [vmem:[%s12284_s3 + $0x2ec] sm:$0xf0]  ;;  %v6334_v57 = vld [vmem:[%s12284_s3 + $0xf0] sm:$0xf0]  ;;  %v8909_v44 = vperm.slane %v8833_v29, 1 }
  0x9f   :  { %12670 = vst [vmem:[#allocation85_spill] sm:$0xff] %v8844_v63  ;;  %1482 = vmatpush.bf16.msra.mxu2 %v8844_v63  ;;  %1495 = vmatpush.bf16.msra.mxu3 %v8856_v19  ;;  %v7312_v15 = vld [vmem:[%s12284_s3 + $0x2d4] sm:$0xf]  ;;  %v8930_v0 = vor.u32 %v7316_v16, %v6588_v30  ;;  %v8932_v35 = vor.u32 %v7248_v45, %v6334_v57  ;;  %v7244_v39 = vld [vmem:[%s12284_s3 + $0xac] sm:$0xf0] }
  0xa0   :  { %12671 = vst [vmem:[#allocation86_spill] sm:$0xff] %v8856_v19  ;;  %v8895_v49 = vpop.f32.mrf.mxu2  ;;  %v6590_v9 = vld [vmem:[%s12284_s3 + $0x2f0] sm:$0xf0]  ;;  %v6556_v24 = vld [vmem:[%s12284_s3 + $0x290] sm:$0xf] }
  0xa1   :  { %12672 = vst [vmem:[#allocation87_spill] sm:$0xff] %v8874_v59  ;;  %v8911_v19 = vpop.f32.mrf.mxu3  ;;  %1457 = vmatpush.bf16.msra.mxu0 %v8877_v23  ;;  %v8945_v30 = vor.u32 %v7312_v15, %v6590_v9  ;;  %v7240_v16 = vld [vmem:[%s12284_s3 + $0x94] sm:$0xf]  ;;  %v8965_v9 = vperm.slane %v8833_v29, 2 }
  0xa2   :  { %12673 = vst [vmem:[#allocation88_spill] sm:$0xff] %v8877_v23  ;;  %v321_v61 = vpop.f32.mrf.mxu1  ;;  %1470 = vmatpush.bf16.msra.mxu1 %v8881_v28  ;;  %v6300_v23 = vld [vmem:[%s12284_s3 + $0x90] sm:$0xf]  ;;  %v6302_v45 = vld [vmem:[%s12284_s3 + $0xb0] sm:$0xf0] }
  0xa3   :  { %12674 = vst [vmem:[#allocation89_spill] sm:$0xff] %v8881_v28  ;;  %1483 = vmatpush.bf16.msra.mxu2 %v8883_v21  ;;  %1496 = vmatpush.bf16.msra.mxu3 %v8897_v56  ;;  %v7304_v57 = vld [vmem:[%s12284_s3 + $0x294] sm:$0xf]  ;;  %v8978_v28 = vor.u32 %v7240_v16, %v6302_v45 }
  0xa4   :  { %12675 = vst [vmem:[#allocation90_spill] sm:$0xff] %v8883_v21  ;;  %v6558_v15 = vld [vmem:[%s12284_s3 + $0x2b0] sm:$0xf0]  ;;  %v6268_v21 = vld [vmem:[%s12284_s3 + $0x50] sm:$0xf] }
  0xa5   :  { %12676 = vst [vmem:[#allocation91_spill] sm:$0xff] %v8895_v49  ;;  %v292_v49 = vpop.f32.mrf.mxu0  ;;  %1458 = vmatpush.bf16.msra.mxu0 %v8923_v46  ;;  %v6270_v16 = vld [vmem:[%s12284_s3 + $0x70] sm:$0xf0] }
  0xa6   :  { %12677 = vst [vmem:[#allocation92_spill] sm:$0xff] %v8897_v56  ;;  %v8921_v63 = vadd.f32 %v292_v49, %v8874_v59  ;;  %v7308_v49 = vld [vmem:[%s12284_s3 + $0x2ac] sm:$0xf0]  ;;  %1471 = vmatpush.bf16.msra.mxu1 %v8930_v0 }
  0xa7   :  { %12678 = vst [vmem:[#allocation93_spill] sm:$0xff] %v8909_v44  ;;  %1484 = vmatpush.bf16.msra.mxu2 %v8932_v35  ;;  %v8976_v56 = vor.u32 %v7308_v49, %v6556_v24  ;;  %1497 = vmatpush.bf16.msra.mxu3 %v8945_v30  ;;  %v7300_v24 = vld [vmem:[%s12284_s3 + $0x26c] sm:$0xf0]  ;;  %v7232_v49 = vld [vmem:[%s12284_s3 + $0x54] sm:$0xf] }
  0xa8   :  { %12679 = vst [vmem:[#allocation94_spill] sm:$0xff] %v8911_v19  ;;  %v8928_v19 = vadd.f32 %v321_v61, %v8909_v44  ;;  %v12685_v61 = vmov 0  }
  0xa9   :  { %12680 = vst [vmem:[#allocation95_spill] sm:$0xff] %v8921_v63  ;;  %1410 = vmatmul.bf16.vlgmr.msrb.gmra.mxu0 %v12685_v61  ;;  %1423 = vmatmul.bf16.vlgmr.msrb.gmra.mxu1 %v12685_v61  ;;  %v8972_v63 = vor.u32 %v7244_v39, %v6300_v23  ;;  %v6524_v23 = vld [vmem:[%s12284_s3 + $0x250] sm:$0xf]  ;;  %v350_v39 = vpop.f32.mrf.mxu2 }
  0xaa   :  { %12681 = vst [vmem:[#allocation96_spill] sm:$0xff] %v8923_v46  ;;  %1436 = vmatmul.bf16.vlgmr.msrb.gmra.mxu2 %v12685_v61  ;;  %1449 = vmatmul.bf16.vlgmr.msrb.gmra.mxu3 %v12685_v61  ;;  %v9002_v45 = vadd.f32 %v350_v39, %v8965_v9  ;;  %v9016_v12 = vpop.f32.mrf.mxu1  ;;  %v9018_v39 = vor.u32 %v7236_v37, %v6268_v21  ;;  %v6492_v37 = vld [vmem:[%s12284_s3 + $0x210] sm:$0xf] }
  0xab   :  { %12682 = vst [vmem:[#allocation97_spill] sm:$0xff] %v8928_v19  ;;  %v8968_v19 = vperm.slane %v8833_v29, 3  ;;  %1459 = vmatpush.bf16.msra.mxu0 %v8972_v63  ;;  %1472 = vmatpush.bf16.msra.mxu1 %v8976_v56  ;;  %v7292_v21 = vld [vmem:[%s12284_s3 + $0x22c] sm:$0xf0] }
  0xac   :  { %12683 = vst [vmem:[#allocation98_spill] sm:$0xff] %v8930_v0  ;;  %v8990_v0 = vor.u32 %v7304_v57, %v6558_v15  ;;  %v7296_v57 = vld [vmem:[%s12284_s3 + $0x254] sm:$0xf]  ;;  %1485 = vmatpush.bf16.msra.mxu2 %v8978_v28  ;;  %v9076_v10 = vor.u32 %v7292_v21, %v6492_v37 }
  0xad   :  { %12684 = vst [vmem:[#allocation99_spill] sm:$0xff] %v8932_v35  ;;  %v379_v35 = vpop.f32.mrf.mxu3  ;;  %v6526_v15 = vld [vmem:[%s12284_s3 + $0x270] sm:$0xf0] }
  0xae   :  { %12686 = vst [vmem:[#allocation100_spill] sm:$0xff] %v8945_v30  ;;  %v9004_v30 = vpop.f32.mrf.mxu0  ;;  %v9013_v46 = vadd.f32 %v379_v35, %v8968_v19  ;;  %v9028_v35 = vor.u32 %v7300_v24, %v6524_v23  ;;  %1498 = vmatpush.bf16.msra.mxu3 %v8990_v0  ;;  %v6238_v23 = vld [vmem:[%s12284_s3 + $0x30] sm:$0xf0] }
  0xaf   :  { %12687 = vst [vmem:[#allocation101_spill] sm:$0xff] %v8965_v9  ;;  %v7288_v24 = vld [vmem:[%s12284_s3 + $0x214] sm:$0xf]  ;;  %1460 = vmatpush.bf16.msra.mxu0 %v9018_v39 }
  0xb0   :  { %12688 = vst [vmem:[#allocation102_spill] sm:$0xff] %v8968_v19  ;;  %1473 = vmatpush.bf16.msra.mxu1 %v9028_v35 }
  0xb1   :  { %12689 = vst [vmem:[#allocation103_spill] sm:$0xff] %v8972_v63  ;;  %v7281_v63 = vld [vmem:[%s12284_s3 + $0x1dc] sm:$0xf]  ;;  %v9087_v11 = vpop.f32.mrf.mxu2 }
  0xb2   :  { %12690 = vst [vmem:[#allocation104_spill] sm:$0xff] %v8976_v56  ;;  %v9042_v56 = vor.u32 %v7296_v57, %v6526_v15  ;;  %v7285_v57 = vld [vmem:[%s12284_s3 + $0x1f4] sm:$0xf0] }
  0xb3   :  { %12691 = vst [vmem:[#allocation105_spill] sm:$0xff] %v8978_v28  ;;  %v6724_v15 = vld [vmem:[%s12284_s3 + $0x3d8] sm:$0xf] }
  0xb4   :  { %12692 = vst [vmem:[#allocation106_spill] sm:$0xff] %v8990_v0  ;;  %v7349_v28 = vld [vmem:[%s12284_s3 + $0x3f4] sm:$0xf0]  ;;  %1499 = vmatpush.bf16.msra.mxu3 %v9042_v56  ;;  %1474 = vmatpush.bf16.msra.mxu1 %v9076_v10 }
  0xb5   :  { %12693 = vst [vmem:[#allocation107_spill] sm:$0xff] %v9002_v45  ;;  %v7228_v45 = vld [vmem:[%s12284_s3 + $0x2c] sm:$0xf0]  ;;  %v9093_v37 = vpop.f32.mrf.mxu3  ;;  %v9095_v21 = vor.u32 %v7349_v28, %v6724_v15  ;;  %v326_v28 = vpop.f32.mrf.mxu1 }
  0xb6   :  { %12694 = vst [vmem:[#allocation108_spill] sm:$0xff] %v9004_v30  ;;  %v6236_v30 = vld [vmem:[%s12284_s3 + $0x10] sm:$0xf]  ;;  %v9126_v15 = vadd.f32 %v326_v28, %v8909_v44 }
  0xb7   :  { %12695 = vst [vmem:[#allocation109_spill] sm:$0xff] %v9013_v46  ;;  %v9030_v46 = vor.u32 %v7232_v49, %v6270_v16  ;;  %v6494_v49 = vld [vmem:[%s12284_s3 + $0x230] sm:$0xf0]  ;;  %v6468_v16 = vld [vmem:[%s12284_s3 + $0x1d8] sm:$0xf]  ;;  %v9063_v0 = vor.u32 %v7228_v45, %v6236_v30 }
  0xb8   :  { %12696 = vst [vmem:[#allocation110_spill] sm:$0xff] %v9016_v12  ;;  %v7224_v12 = vld [vmem:[%s12284_s3 + $0x14] sm:$0xf]  ;;  %v7345_v45 = vld [vmem:[%s12284_s3 + $0x3dc] sm:$0xf]  ;;  %v9089_v55 = vor.u32 %v7288_v24, %v6494_v49  ;;  %1519 = vmatpush.bf16.msrb.mxu1 %v9095_v21 }
  0xb9   :  { %12697 = vst [vmem:[#allocation111_spill] sm:$0xff] %v9018_v39  ;;  %1486 = vmatpush.bf16.msra.mxu2 %v9030_v46  ;;  %v9078_v30 = vor.u32 %v7224_v12, %v6238_v23  ;;  %v6726_v39 = vld [vmem:[%s12284_s3 + $0x3f8] sm:$0xf0]  ;;  %v297_v12 = vpop.f32.mrf.mxu0  ;;  %v9097_v23 = vor.u32 %v7281_v63, %v6470_v31  ;;  %v6692_v24 = vld [vmem:[%s12284_s3 + $0x398] sm:$0xf]  ;;  %1461 = vmatpush.bf16.msra.mxu0 %v9063_v0 }
  0xba   :  { %12698 = vst [vmem:[#allocation112_spill] sm:$0xff] %v9028_v35  ;;  %v9091_v35 = vor.u32 %v7285_v57, %v6468_v16  ;;  %v9110_v49 = vadd.f32 %v297_v12, %v8874_v59  ;;  %v9112_v31 = vor.u32 %v7345_v45, %v6726_v39  ;;  %v7341_v63 = vld [vmem:[%s12284_s3 + $0x3b4] sm:$0xf0]  ;;  %v7273_v16 = vld [vmem:[%s12284_s3 + $0x19c] sm:$0xf]  ;;  %1500 = vmatpush.bf16.msra.mxu3 %v9089_v55 }
  0xbb   :  { %12699 = vst [vmem:[#allocation113_spill] sm:$0xff] %v9030_v46  ;;  %v6436_v46 = vld [vmem:[%s12284_s3 + $0x198] sm:$0xf]  ;;  %v6438_v57 = vld [vmem:[%s12284_s3 + $0x1b8] sm:$0xf0]  ;;  %v9140_v28 = vor.u32 %v7341_v63, %v6692_v24  ;;  %1475 = vmatmul.bf16.vlgmr.msra.gmra.mxu1 %v12685_v61 }
  0xbc   :  { %12700 = vst [vmem:[#allocation114_spill] sm:$0xff] %v9042_v56  ;;  %v7277_v56 = vld [vmem:[%s12284_s3 + $0x1b4] sm:$0xf0]  ;;  %v7337_v39 = vld [vmem:[%s12284_s3 + $0x39c] sm:$0xf]  ;;  %1462 = vmatmul.bf16.vlgmr.msra.gmra.mxu0 %v12685_v61 }
  0xbd   :  { %12701 = vst [vmem:[#allocation115_spill] sm:$0xff] %v9063_v0  ;;  %1487 = vmatpush.bf16.msra.mxu2 %v9078_v30  ;;  %v6694_v45 = vld [vmem:[%s12284_s3 + $0x3b8] sm:$0xf0]  ;;  %1506 = vmatpush.bf16.msrb.mxu0 %v9091_v35  ;;  %v9136_v12 = vor.u32 %v7277_v56, %v6436_v46  ;;  %v6660_v46 = vld [vmem:[%s12284_s3 + $0x358] sm:$0xf] }
  0xbe   :  { %12702 = vst [vmem:[#allocation116_spill] sm:$0xff] %v9076_v10  ;;  %1545 = vmatpush.bf16.msrb.mxu3 %v9112_v31  ;;  %v9155_v56 = vor.u32 %v7337_v39, %v6694_v45  ;;  %v7333_v24 = vld [vmem:[%s12284_s3 + $0x374] sm:$0xf0]  ;;  %v7265_v63 = vld [vmem:[%s12284_s3 + $0x15c] sm:$0xf]  ;;  %v355_v45 = vpop.f32.mrf.mxu2  ;;  %1520 = vmatpush.bf16.msrb.mxu1 %v9140_v28 }
  0xbf   :  { %12703 = vst [vmem:[#allocation117_spill] sm:$0xff] %v9078_v30  ;;  %v6662_v39 = vld [vmem:[%s12284_s3 + $0x378] sm:$0xf0]  ;;  %1501 = vmatmul.bf16.vlgmr.msra.gmra.mxu3 %v12685_v61  ;;  %v9185_v10 = vor.u32 %v7333_v24, %v6660_v46  ;;  %v9202_v46 = vpop.f32.mrf.mxu1 }
  0xc0   :  { %12704 = vst [vmem:[#allocation118_spill] sm:$0xff] %v9087_v11  ;;  %1488 = vmatmul.bf16.vlgmr.msra.gmra.mxu2 %v12685_v61 }
  0xc1   :  { %12705 = vst [vmem:[#allocation119_spill] sm:$0xff] %v9089_v55  ;;  %1532 = vmatpush.bf16.msrb.mxu2 %v9097_v23  ;;  %1507 = vmatpush.bf16.msrb.mxu0 %v9136_v12  ;;  %v9183_v55 = vpop.f32.mrf.mxu0 }
  0xc2   :  { %12706 = vst [vmem:[#allocation120_spill] sm:$0xff] %v9091_v35  ;;  %1546 = vmatpush.bf16.msrb.mxu3 %v9155_v56  ;;  %1521 = vmatpush.bf16.msrb.mxu1 %v9185_v10 }
  0xc3   :  { %12707 = vst [vmem:[#allocation121_spill] sm:$0xff] %v9093_v37  ;;  %v7269_v37 = vld [vmem:[%s12284_s3 + $0x174] sm:$0xf0] }
  0xc4   :  { %12708 = vst [vmem:[#allocation122_spill] sm:$0xff] %v9095_v21  ;;  %v384_v21 = vpop.f32.mrf.mxu3 }
  0xc5   :  { %12709 = vst [vmem:[#allocation123_spill] sm:$0xff] %v9097_v23 }
  0xc6   :  { %12710 = vst [vmem:[#allocation124_spill] sm:$0xff] %v9110_v49  ;;  %v6404_v49 = vld [vmem:[%s12284_s3 + $0x158] sm:$0xf] }
  0xc7   :  { %12711 = vst [vmem:[#allocation125_spill] sm:$0xff] %v9112_v31  ;;  %v9176_v11 = vor.u32 %v7269_v37, %v6404_v49  ;;  %v9181_v31 = vadd.f32 %v355_v45, %v8965_v9  ;;  %v7261_v37 = vld [vmem:[%s12284_s3 + $0x134] sm:$0xf0]  ;;  %v9200_v45 = vadd.f32 %v384_v21, %v8968_v19  ;;  %v7321_v21 = vld [vmem:[%s12284_s3 + $0x31c] sm:$0xf] }
  0xc8   :  { %12712 = vst [vmem:[#allocation126_spill] sm:$0xff] %v9126_v15  ;;  %v9142_v15 = vor.u32 %v7273_v16, %v6438_v57  ;;  %v6406_v16 = vld [vmem:[%s12284_s3 + $0x178] sm:$0xf0]  ;;  %v6628_v49 = vld [vmem:[%s12284_s3 + $0x318] sm:$0xf] }
  0xc9   :  { %12713 = vst [vmem:[#allocation127_spill] sm:$0xff] %v9136_v12  ;;  %v7329_v57 = vld [vmem:[%s12284_s3 + $0x35c] sm:$0xf]  ;;  %v9187_v23 = vor.u32 %v7265_v63, %v6406_v16  ;;  %v6372_v12 = vld [vmem:[%s12284_s3 + $0x118] sm:$0xf]  ;;  %1508 = vmatpush.bf16.msrb.mxu0 %v9176_v11 }
  0xca   :  { %12714 = vst [vmem:[#allocation128_spill] sm:$0xff] %v9140_v28  ;;  %1533 = vmatpush.bf16.msrb.mxu2 %v9142_v15  ;;  %v9204_v24 = vor.u32 %v7329_v57, %v6662_v39  ;;  %v7325_v63 = vld [vmem:[%s12284_s3 + $0x334] sm:$0xf0]  ;;  %v7257_v16 = vld [vmem:[%s12284_s3 + $0x11c] sm:$0xf]  ;;  %v9222_v39 = vor.u32 %v7261_v37, %v6372_v12  ;;  %v302_v28 = vpop.f32.mrf.mxu0 }
  0xcb   :  { %12715 = vst [vmem:[#allocation129_spill] sm:$0xff] %v9142_v15  ;;  %v6630_v57 = vld [vmem:[%s12284_s3 + $0x338] sm:$0xf0]  ;;  %v6596_v12 = vld [vmem:[%s12284_s3 + $0x2d8] sm:$0xf] }
  0xcc   :  { %12716 = vst [vmem:[#allocation130_spill] sm:$0xff] %v9155_v56  ;;  %v7253_v56 = vld [vmem:[%s12284_s3 + $0xf4] sm:$0xf0]  ;;  %1547 = vmatpush.bf16.msrb.mxu3 %v9204_v24  ;;  %v9240_v37 = vor.u32 %v7321_v21, %v6630_v57  ;;  %v6598_v21 = vld [vmem:[%s12284_s3 + $0x2f8] sm:$0xf0]  ;;  %v9258_v57 = vpop.f32.mrf.mxu2 }
  0xcd   :  { %12717 = vst [vmem:[#allocation131_spill] sm:$0xff] %v9176_v11  ;;  %1509 = vmatpush.bf16.msrb.mxu0 %v9222_v39  ;;  %v6308_v15 = vld [vmem:[%s12284_s3 + $0x98] sm:$0xf] }
  0xce   :  { %12718 = vst [vmem:[#allocation132_spill] sm:$0xff] %v9181_v31  ;;  %1534 = vmatpush.bf16.msrb.mxu2 %v9187_v23  ;;  %v6340_v31 = vld [vmem:[%s12284_s3 + $0xd8] sm:$0xf] }
  0xcf   :  { %12719 = vst [vmem:[#allocation133_spill] sm:$0xff] %v9183_v55  ;;  %v6374_v55 = vld [vmem:[%s12284_s3 + $0x138] sm:$0xf0] }
  0xd0   :  { %12720 = vst [vmem:[#allocation134_spill] sm:$0xff] %v9185_v10  ;;  %v9264_v10 = vpop.f32.mrf.mxu3  ;;  %1548 = vmatpush.bf16.msrb.mxu3 %v9240_v37 }
  0xd1   :  { %12721 = vst [vmem:[#allocation135_spill] sm:$0xff] %v9187_v23 }
  0xd2   :  { %12722 = vst [vmem:[#allocation136_spill] sm:$0xff] %v9200_v45  ;;  %v9228_v45 = vor.u32 %v7257_v16, %v6374_v55  ;;  %v7317_v55 = vld [vmem:[%s12284_s3 + $0x2f4] sm:$0xf0]  ;;  %v7313_v16 = vld [vmem:[%s12284_s3 + $0x2dc] sm:$0xf] }
  0xd3   :  { %12723 = vst [vmem:[#allocation137_spill] sm:$0xff] %v9202_v46  ;;  %v9226_v46 = vor.u32 %v7325_v63, %v6628_v49  ;;  %v7249_v49 = vld [vmem:[%s12284_s3 + $0xdc] sm:$0xf]  ;;  %v9266_v23 = vor.u32 %v7317_v55, %v6596_v12  ;;  %v331_v12 = vpop.f32.mrf.mxu1  ;;  %v9283_v55 = vor.u32 %v7313_v16, %v6598_v21 }
  0xd4   :  { %12724 = vst [vmem:[#allocation138_spill] sm:$0xff] %v9204_v24  ;;  %v6342_v63 = vld [vmem:[%s12284_s3 + $0xf8] sm:$0xf0]  ;;  %v9260_v24 = vor.u32 %v7253_v56, %v6340_v31  ;;  %1535 = vmatpush.bf16.msrb.mxu2 %v9228_v45  ;;  %v7245_v31 = vld [vmem:[%s12284_s3 + $0xb4] sm:$0xf0] }
  0xd5   :  { %12725 = vst [vmem:[#allocation139_spill] sm:$0xff] %v9222_v39  ;;  %1522 = vmatpush.bf16.msrb.mxu1 %v9226_v46  ;;  %v9268_v11 = vor.u32 %v7249_v49, %v6342_v63  ;;  %v6564_v56 = vld [vmem:[%s12284_s3 + $0x298] sm:$0xf]  ;;  %v7241_v63 = vld [vmem:[%s12284_s3 + $0x9c] sm:$0xf]  ;;  %v9304_v21 = vor.u32 %v7245_v31, %v6308_v15  ;;  %1549 = vmatpush.bf16.msrb.mxu3 %v9283_v55 }
  0xd6   :  { %12726 = vst [vmem:[#allocation140_spill] sm:$0xff] %v9226_v46  ;;  %v7309_v49 = vld [vmem:[%s12284_s3 + $0x2b4] sm:$0xf0]  ;;  %v6566_v16 = vld [vmem:[%s12284_s3 + $0x2b8] sm:$0xf0]  ;;  %1510 = vmatpush.bf16.msrb.mxu0 %v9260_v24 }
  0xd7   :  { %12727 = vst [vmem:[#allocation141_spill] sm:$0xff] %v9228_v45  ;;  %v7237_v46 = vld [vmem:[%s12284_s3 + $0x74] sm:$0xf0] }
  0xd8   :  { %12728 = vst [vmem:[#allocation142_spill] sm:$0xff] %v9240_v37  ;;  %v9295_v37 = vadd.f32 %v331_v12, %v8909_v44  ;;  %1536 = vmatpush.bf16.msrb.mxu2 %v9268_v11  ;;  %v6532_v15 = vld [vmem:[%s12284_s3 + $0x258] sm:$0xf] }
  0xd9   :  { %12729 = vst [vmem:[#allocation143_spill] sm:$0xff] %v9258_v57  ;;  %v6310_v57 = vld [vmem:[%s12284_s3 + $0xb8] sm:$0xf0]  ;;  %1523 = vmatpush.bf16.msrb.mxu1 %v9266_v23 }
  0xda   :  { %12730 = vst [vmem:[#allocation144_spill] sm:$0xff] %v9260_v24  ;;  %v9310_v12 = vor.u32 %v7241_v63, %v6310_v57  ;;  %v7301_v57 = vld [vmem:[%s12284_s3 + $0x274] sm:$0xf0]  ;;  %v7297_v63 = vld [vmem:[%s12284_s3 + $0x25c] sm:$0xf]  ;;  %1511 = vmatpush.bf16.msrb.mxu0 %v9304_v21  ;;  %v9347_v24 = vpop.f32.mrf.mxu0 }
  0xdb   :  { %12731 = vst [vmem:[#allocation145_spill] sm:$0xff] %v9264_v10  ;;  %v9281_v10 = vadd.f32 %v302_v28, %v8874_v59  ;;  %v7305_v28 = vld [vmem:[%s12284_s3 + $0x29c] sm:$0xf]  ;;  %v9349_v45 = vor.u32 %v7301_v57, %v6532_v15  ;;  %v9366_v15 = vpop.f32.mrf.mxu1 }
  0xdc   :  { %12732 = vst [vmem:[#allocation146_spill] sm:$0xff] %v9266_v23  ;;  %v9322_v31 = vor.u32 %v7305_v28, %v6566_v16  ;;  %v6534_v28 = vld [vmem:[%s12284_s3 + $0x278] sm:$0xf0]  ;;  %v360_v16 = vpop.f32.mrf.mxu2  ;;  %1537 = vmatpush.bf16.msrb.mxu2 %v9310_v12 }
  0xdd   :  { %12733 = vst [vmem:[#allocation147_spill] sm:$0xff] %v9268_v11  ;;  %v9345_v23 = vadd.f32 %v360_v16, %v8965_v9  ;;  %v389_v11 = vpop.f32.mrf.mxu3  ;;  %v9368_v57 = vor.u32 %v7297_v63, %v6534_v28  ;;  %v6502_v63 = vld [vmem:[%s12284_s3 + $0x238] sm:$0xf0] }
  0xde   :  { %12734 = vst [vmem:[#allocation148_spill] sm:$0xff] %v9281_v10  ;;  %v9308_v10 = vor.u32 %v7309_v49, %v6564_v56  ;;  %v7233_v56 = vld [vmem:[%s12284_s3 + $0x5c] sm:$0xf]  ;;  %1550 = vmatpush.bf16.msrb.mxu3 %v9322_v31  ;;  %v9364_v16 = vadd.f32 %v389_v11, %v8968_v19 }
  0xdf   :  { %12735 = vst [vmem:[#allocation149_spill] sm:$0xff] %v9283_v55  ;;  %v6278_v49 = vld [vmem:[%s12284_s3 + $0x78] sm:$0xf0] }
  0xe0   :  { %12736 = vst [vmem:[#allocation150_spill] sm:$0xff] %v9295_v37  ;;  %v6276_v37 = vld [vmem:[%s12284_s3 + $0x58] sm:$0xf]  ;;  %1524 = vmatpush.bf16.msrb.mxu1 %v9308_v10  ;;  %v9351_v39 = vor.u32 %v7233_v56, %v6278_v49  ;;  %v7225_v49 = vld [vmem:[%s12284_s3 + $0x1c] sm:$0xf] }
  0xe1   :  { %12737 = vst [vmem:[#allocation151_spill] sm:$0xff] %v9304_v21  ;;  %v9340_v55 = vor.u32 %v7237_v46, %v6276_v37  ;;  %v6244_v21 = vld [vmem:[%s12284_s3 + $0x18] sm:$0xf]  ;;  %v7289_v11 = vld [vmem:[%s12284_s3 + $0x21c] sm:$0xf] }
  0xe2   :  { %12738 = vst [vmem:[#allocation152_spill] sm:$0xff] %v9308_v10  ;;  %v7229_v46 = vld [vmem:[%s12284_s3 + $0x34] sm:$0xf0]  ;;  %1538 = vmatpush.bf16.msrb.mxu2 %v9351_v39  ;;  %1551 = vmatpush.bf16.msrb.mxu3 %v9368_v57 }
  0xe3   :  { %12739 = vst [vmem:[#allocation153_spill] sm:$0xff] %v9310_v12  ;;  %v6500_v37 = vld [vmem:[%s12284_s3 + $0x218] sm:$0xf]  ;;  %1512 = vmatpush.bf16.msrb.mxu0 %v9340_v55  ;;  %v9386_v28 = vor.u32 %v7229_v46, %v6244_v21  ;;  %v9404_v46 = vpop.f32.mrf.mxu0 }
  0xe4   :  { %12740 = vst [vmem:[#allocation154_spill] sm:$0xff] %v9322_v31  ;;  %v7293_v56 = vld [vmem:[%s12284_s3 + $0x234] sm:$0xf0]  ;;  %1525 = vmatpush.bf16.msrb.mxu1 %v9349_v45  ;;  %v9398_v31 = vpop.f32.mrf.mxu2 }
  0xe5   :  { %12741 = vst [vmem:[#allocation155_spill] sm:$0xff] %v9340_v55  ;;  %v9402_v21 = vpop.f32.mrf.mxu3 }
  0xe6   :  { %12742 = vst [vmem:[#allocation156_spill] sm:$0xff] %v9345_v23  ;;  %v9395_v23 = vor.u32 %v7289_v11, %v6502_v63  ;;  %v9436_v63 = vperm.slane %v8833_v29, 4 }
  0xe7   :  { %12743 = vst [vmem:[#allocation157_spill] sm:$0xff] %v9347_v24  ;;  %v6246_v24 = vld [vmem:[%s12284_s3 + $0x38] sm:$0xf0]  ;;  %1513 = vmatpush.bf16.msrb.mxu0 %v9386_v28 }
  0xe8   :  { %12744 = vst [vmem:[#allocation158_spill] sm:$0xff] %v9349_v45  ;;  %1552 = vmatpush.bf16.msrb.mxu3 %v9395_v23 }
  0xe9   :  { %12745 = vst [vmem:[#allocation159_spill] sm:$0xff] %v9351_v39 }
  0xea   :  { %12746 = vst [vmem:[#allocation160_spill] sm:$0xff] %v9364_v16  ;;  %v9392_v16 = vor.u32 %v7225_v49, %v6246_v24  ;;  %v9407_v24 = vpop.f32.mrf.mxu1  ;;  %1514 = vmatmul.bf16.vlgmr.msrb.gmra.mxu0 %v12685_v61 }
  0xeb   :  { %12747 = vst [vmem:[#allocation161_spill] sm:$0xff] %v9366_v15  ;;  %v9390_v15 = vor.u32 %v7293_v56, %v6500_v37  ;;  %1704 = vmatpush.bf16.msra.mxu0 %v8112_v38  ;;  %1553 = vmatmul.bf16.vlgmr.msrb.gmra.mxu3 %v12685_v61  ;;  %v9423_v49 = vpop.f32.mrf.mxu0 }
  0xec   :  { %12748 = vst [vmem:[#allocation162_spill] sm:$0xff] %v9368_v57  ;;  %1539 = vmatpush.bf16.msrb.mxu2 %v9392_v16  ;;  %1743 = vmatpush.bf16.msra.mxu3 %v8137_v47  ;;  %v9419_v37 = vpop.f32.mrf.mxu2 }
  0xed   :  { %12749 = vst [vmem:[#allocation163_spill] sm:$0xff] %v9386_v28  ;;  %1526 = vmatpush.bf16.msrb.mxu1 %v9390_v15  ;;  %v9421_v56 = vpop.f32.mrf.mxu3 }
  0xee   :  { %12750 = vst [vmem:[#allocation164_spill] sm:$0xff] %v9390_v15 }
  0xef   :  { %12751 = vst [vmem:[#allocation165_spill] sm:$0xff] %v9392_v16  ;;  %1540 = vmatmul.bf16.vlgmr.msrb.gmra.mxu2 %v12685_v61  ;;  %1705 = vmatpush.bf16.msra.mxu0 %v8150_v53 }
  0xf0   :  { %12752 = vst [vmem:[#allocation166_spill] sm:$0xff] %v9395_v23  ;;  %1730 = vmatpush.bf16.msra.mxu2 %v8125_v43  ;;  %1527 = vmatmul.bf16.vlgmr.msrb.gmra.mxu1 %v12685_v61 }
  0xf1   :  { %12753 = vst [vmem:[#allocation167_spill] sm:$0xff] %v9398_v31  ;;  %1717 = vmatpush.bf16.msra.mxu1 %v8123_v42  ;;  %1744 = vmatpush.bf16.msra.mxu3 %v8175_v62 }
  0xf2   :  { %12754 = vst [vmem:[#allocation168_spill] sm:$0xff] %v9402_v21  ;;  %v9426_v11 = vpop.f32.mrf.mxu1  ;;  %v9441_v21 = vperm.slane %v8833_v29, 5 }
  0xf3   :  { %12755 = vst [vmem:[#allocation169_spill] sm:$0xff] %v9423_v49  ;;  %1706 = vmatpush.bf16.msra.mxu0 %v8187_v2 }
  0xf4   :  { %1731 = vmatpush.bf16.msra.mxu2 %v8164_v58  ;;  %12756 = vst [vmem:[#allocation170_spill] sm:$0xff] %v9426_v11  ;;  %v9438_v61 = vpop.f32.mrf.mxu2  ;;  %v408_v11 = vpop.f32.mrf.mxu0 }
  0xf5   :  { %1718 = vmatpush.bf16.msra.mxu1 %v8152_v54  ;;  %1745 = vmatpush.bf16.msra.mxu3 %v8205_v8  ;;  %12757 = vst [vmem:[#allocation171_spill] sm:$0xff] %v9436_v63  ;;  %v9443_v31 = vpop.f32.mrf.mxu3  ;;  %v9447_v49 = vadd.f32 %v408_v11, %v9436_v63  ;;  %v9463_v11 = vperm.slane %v8833_v29, 7 }
  0xf6   :  { %12758 = vst [vmem:[#allocation172_spill] sm:$0xff] %v9438_v61 }
  0xf7   :  { %1707 = vmatpush.bf16.msra.mxu0 %v8233_v13  ;;  %12759 = vst [vmem:[#allocation173_spill] sm:$0xff] %v9441_v21 }
  0xf8   :  { %1732 = vmatpush.bf16.msra.mxu2 %v8202_v7  ;;  %12760 = vst [vmem:[#allocation174_spill] sm:$0xff] %v9443_v31  ;;  %v9459_v31 = vperm.slane %v8833_v29, 6 }
  0xf9   :  { %1719 = vmatpush.bf16.msra.mxu1 %v8200_v6  ;;  %12761 = vst [vmem:[#allocation175_spill] sm:$0xff] %v9447_v49  ;;  %1746 = vmatpush.bf16.msra.mxu3 %v8258_v22 }
  0xfa   :  { %v437_v6 = vpop.f32.mrf.mxu1  ;;  %12763 = vst [vmem:[#allocation177_spill] sm:$0xff] %v9459_v31 }
  0xfb   :  { %1708 = vmatpush.bf16.msra.mxu0 %v8271_v26  ;;  %v9452_v8 = vadd.f32 %v437_v6, %v9441_v21  ;;  %12764 = vst [vmem:[#allocation178_spill] sm:$0xff] %v9463_v11 }
  0xfc   :  { %1733 = vmatpush.bf16.msra.mxu2 %v8246_v18  ;;  %v466_v49 = vpop.f32.mrf.mxu2  ;;  %v9468_v61 = vpop.f32.mrf.mxu0 }
  0xfd   :  { %1720 = vmatpush.bf16.msra.mxu1 %v8244_v17  ;;  %12762 = vst [vmem:[#allocation176_spill] sm:$0xff] %v9452_v8  ;;  %1747 = vmatpush.bf16.msra.mxu3 %v8296_v36  ;;  %v9466_v6 = vadd.f32 %v466_v49, %v9459_v31  ;;  %v495_v8 = vpop.f32.mrf.mxu3 }
  0xfe   :  { %12766 = vst [vmem:[#allocation180_spill] sm:$0xff] %v9468_v61 }
  0xff   :  { %1709 = vmatpush.bf16.msra.mxu0 %v8308_v41  ;;  %12765 = vst [vmem:[#allocation179_spill] sm:$0xff] %v9466_v6  ;;  %v12774_v6 = vld [vmem:[#allocation43_spill] sm:$0xff] }
 0x100   :  { %1734 = vmatpush.bf16.msra.mxu2 %v8285_v32 }
 0x101   :  { %1721 = vmatpush.bf16.msra.mxu1 %v8273_v27  ;;  %v9472_v27 = vadd.f32 %v495_v8, %v9463_v11  ;;  %1748 = vmatpush.bf16.msra.mxu3 %v8326_v52 }
 0x102   :  { %v9474_v36 = vpop.f32.mrf.mxu1 }
 0x103   :  { %12767 = vst [vmem:[#allocation181_spill] sm:$0xff] %v9472_v27  ;;  %1710 = vmatpush.bf16.msra.mxu0 %v8356_v1 }
 0x104   :  { %1735 = vmatpush.bf16.msra.mxu2 %v8323_v51  ;;  %12768 = vst [vmem:[#allocation182_spill] sm:$0xff] %v9474_v36  ;;  %v9484_v8 = vpop.f32.mrf.mxu2  ;;  %v413_v49 = vpop.f32.mrf.mxu0 }
 0x105   :  { %1722 = vmatpush.bf16.msra.mxu1 %v8321_v50  ;;  %1749 = vmatpush.bf16.msra.mxu3 %v8364_v5  ;;  %12769 = vst [vmem:[#allocation183_spill] sm:$0xff] %v9484_v8  ;;  %v9487_v29 = vpop.f32.mrf.mxu3  ;;  %v9491_v36 = vadd.f32 %v413_v49, %v9436_v63  ;;  %v12773_v8 = vld [vmem:[#allocation40_spill] sm:$0xff]  ;;  %v12778_v5 = vld [vmem:[#allocation47_spill] sm:$0xff] }
 0x106   :  { %12770 = vst [vmem:[#allocation184_spill] sm:$0xff] %v9487_v29  ;;  %v12775_v29 = vld [vmem:[#allocation42_spill] sm:$0xff]  ;;  %v12777_v49 = vld [vmem:[#allocation44_spill] sm:$0xff] }
 0x107   :  { %1711 = vmatpush.bf16.msra.mxu0 %v8382_v14  ;;  %12771 = vst [vmem:[#allocation185_spill] sm:$0xff] %v9491_v36 }
 0x108   :  { %1736 = vmatpush.bf16.msra.mxu2 %v8360_v4 }
 0x109   :  { %1723 = vmatpush.bf16.msra.mxu1 %v8358_v3  ;;  %1750 = vmatpush.bf16.msra.mxu3 %v8409_v25 }
 0x10a   :  { %v442_v61 = vpop.f32.mrf.mxu1 }
 0x10b   :  { %1756 = vmatpush.bf16.msrb.mxu0 %v8420_v33  ;;  %v9496_v27 = vadd.f32 %v442_v61, %v9441_v21 }
 0x10c   :  { %1737 = vmatpush.bf16.msra.mxu2 %v8397_v20  ;;  %v471_v36 = vpop.f32.mrf.mxu2 }
 0x10d   :  { %1724 = vmatpush.bf16.msra.mxu1 %v8395_v48  ;;  %12772 = vst [vmem:[#allocation186_spill] sm:$0xff] %v9496_v27  ;;  %1795 = vmatpush.bf16.msrb.mxu3 %v12773_v8  ;;  %v12776_v48 = vld [vmem:[#allocation45_spill] sm:$0xff]  ;;  %v500_v61 = vpop.f32.mrf.mxu3  ;;  %v9508_v27 = vpop.f32.mrf.mxu0 }
 0x10e   :  { %12780 = vst [vmem:[#allocation188_spill] sm:$0xff] %v9508_v27  ;;  %v9511_v25 = vadd.f32 %v500_v61, %v9463_v11  ;;  %v12791_v61 = vld [vmem:[#allocation55_spill] sm:$0xff] }
 0x10f   :  { %1757 = vmatpush.bf16.msrb.mxu0 %v8460_v60 }
 0x110   :  { %1782 = vmatpush.bf16.msrb.mxu2 %v8434_v40  ;;  %12781 = vst [vmem:[#allocation189_spill] sm:$0xff] %v9511_v25 }
 0x111   :  { %1769 = vmatpush.bf16.msrb.mxu1 %v8422_v34  ;;  %1796 = vmatpush.bf16.msrb.mxu3 %v12777_v49  ;;  %v9506_v34 = vadd.f32 %v471_v36, %v9459_v31  ;;  %v12786_v49 = vld [vmem:[#allocation51_spill] sm:$0xff]  ;;  %v12788_v36 = vld [vmem:[#allocation53_spill] sm:$0xff] }
 0x112   :  { %v9513_v8 = vpop.f32.mrf.mxu1 }
 0x113   :  { %1758 = vmatpush.bf16.msrb.mxu0 %v12776_v48  ;;  %12779 = vst [vmem:[#allocation187_spill] sm:$0xff] %v9506_v34  ;;  %v12785_v48 = vld [vmem:[#allocation48_spill] sm:$0xff] }
 0x114   :  { %1783 = vmatpush.bf16.msrb.mxu2 %v12774_v6  ;;  %12782 = vst [vmem:[#allocation190_spill] sm:$0xff] %v9513_v8  ;;  %v12783_v6 = vld [vmem:[#allocation46_spill] sm:$0xff]  ;;  %v12789_v34 = vld [vmem:[#allocation52_spill] sm:$0xff]  ;;  %v9522_v27 = vpop.f32.mrf.mxu2 }
 0x115   :  { %1770 = vmatpush.bf16.msrb.mxu1 %v12775_v29  ;;  %v12784_v29 = vld [vmem:[#allocation49_spill] sm:$0xff]  ;;  %1797 = vmatpush.bf16.msrb.mxu3 %v12785_v48  ;;  %12790 = vst [vmem:[#allocation191_spill] sm:$0xff] %v9522_v27  ;;  %v9525_v25 = vpop.f32.mrf.mxu3  ;;  %v418_v8 = vpop.f32.mrf.mxu0  ;;  %v12794_v48 = vld [vmem:[#allocation54_spill] sm:$0xff] }
 0x116   :  { %12792 = vst [vmem:[#allocation192_spill] sm:$0xff] %v9525_v25  ;;  %v12799_v27 = vld [vmem:[#allocation58_spill] sm:$0xff]  ;;  %v12801_v25 = vld [vmem:[#allocation60_spill] sm:$0xff] }
 0x117   :  { %1759 = vmatpush.bf16.msrb.mxu0 %v12784_v29 }
 0x118   :  { %1784 = vmatpush.bf16.msrb.mxu2 %v12778_v5  ;;  %v12787_v5 = vld [vmem:[#allocation50_spill] sm:$0xff] }
 0x119   :  { %1771 = vmatpush.bf16.msrb.mxu1 %v12783_v6  ;;  %1798 = vmatpush.bf16.msrb.mxu3 %v12789_v34  ;;  %v9528_v6 = vadd.f32 %v418_v8, %v9436_v63  ;;  %v12798_v34 = vld [vmem:[#allocation59_spill] sm:$0xff] }
 0x11a   :  { %v447_v29 = vpop.f32.mrf.mxu1 }
 0x11b   :  { %1760 = vmatpush.bf16.msrb.mxu0 %v12788_v36  ;;  %12793 = vst [vmem:[#allocation193_spill] sm:$0xff] %v9528_v6  ;;  %v12797_v36 = vld [vmem:[#allocation56_spill] sm:$0xff]  ;;  %v12802_v6 = vld [vmem:[#allocation63_spill] sm:$0xff] }
 0x11c   :  { %1785 = vmatpush.bf16.msrb.mxu2 %v12786_v49  ;;  %v9532_v49 = vadd.f32 %v447_v29, %v9441_v21  ;;  %v476_v8 = vpop.f32.mrf.mxu2 }
 0x11d   :  { %1772 = vmatpush.bf16.msrb.mxu1 %v12787_v5  ;;  %v12796_v5 = vld [vmem:[#allocation57_spill] sm:$0xff]  ;;  %1799 = vmatpush.bf16.msrb.mxu3 %v12797_v36  ;;  %v505_v29 = vpop.f32.mrf.mxu3 }
 0x11e   :  { %12795 = vst [vmem:[#allocation194_spill] sm:$0xff] %v9532_v49  ;;  %v9544_v49 = vpop.f32.mrf.mxu0 }
 0x11f   :  { %1761 = vmatpush.bf16.msrb.mxu0 %v12796_v5  ;;  %12804 = vst [vmem:[#allocation196_spill] sm:$0xff] %v9544_v49  ;;  %v9547_v5 = vadd.f32 %v505_v29, %v9463_v11 }
 0x120   :  { %1786 = vmatpush.bf16.msrb.mxu2 %v12791_v61  ;;  %v12800_v61 = vld [vmem:[#allocation61_spill] sm:$0xff] }
 0x121   :  { %1773 = vmatpush.bf16.msrb.mxu1 %v12794_v48  ;;  %1800 = vmatpush.bf16.msrb.mxu3 %v12801_v25  ;;  %v9542_v48 = vadd.f32 %v476_v8, %v9459_v31  ;;  %12805 = vst [vmem:[#allocation197_spill] sm:$0xff] %v9547_v5  ;;  %v12810_v25 = vld [vmem:[#allocation67_spill] sm:$0xff]  ;;  %v12812_v8 = vld [vmem:[#allocation68_spill] sm:$0xff] }
 0x122   :  { %v9549_v36 = vpop.f32.mrf.mxu1 }
 0x123   :  { %1762 = vmatpush.bf16.msrb.mxu0 %v12800_v61  ;;  %12803 = vst [vmem:[#allocation195_spill] sm:$0xff] %v9542_v48  ;;  %v12809_v61 = vld [vmem:[#allocation64_spill] sm:$0xff] }
 0x124   :  { %1787 = vmatpush.bf16.msrb.mxu2 %v12798_v34  ;;  %12806 = vst [vmem:[#allocation198_spill] sm:$0xff] %v9549_v36  ;;  %v12807_v34 = vld [vmem:[#allocation62_spill] sm:$0xff]  ;;  %v9557_v48 = vpop.f32.mrf.mxu2  ;;  %v12815_v36 = vld [vmem:[#allocation69_spill] sm:$0xff] }
 0x125   :  { %1774 = vmatpush.bf16.msrb.mxu1 %v12799_v27  ;;  %v12808_v27 = vld [vmem:[#allocation65_spill] sm:$0xff]  ;;  %1801 = vmatpush.bf16.msrb.mxu3 %v12809_v61  ;;  %12813 = vst [vmem:[#allocation199_spill] sm:$0xff] %v9557_v48  ;;  %v9559_v49 = vpop.f32.mrf.mxu3  ;;  %v288_v60 = vadd.f32 %v12815_v36, %v8874_v59 }
 0x126   :  { %12814 = vst [vmem:[#allocation200_spill] sm:$0xff] %v9559_v49  ;;  %v1359_v29 = vpop.f32.mrf.mxu0 }
 0x127   :  { %1763 = vmatpush.bf16.msrb.mxu0 %v12808_v27 }
 0x128   :  { %1788 = vmatpush.bf16.msrb.mxu2 %v12802_v6  ;;  %v12811_v6 = vld [vmem:[#allocation66_spill] sm:$0xff] }
 0x129   :  { %1775 = vmatpush.bf16.msrb.mxu1 %v12807_v34  ;;  %1802 = vmatpush.bf16.msrb.mxu3 %v12812_v8 }
 0x12a   :  { %v1372_v5 = vpop.f32.mrf.mxu1 }
 0x12b   :  { %v1373_v34 = vadd.f32 %v1372_v5, %v1359_v29 }
 0x12c   :  { %1789 = vmatpush.bf16.msrb.mxu2 %v12810_v25  ;;  %v1385_v40 = vpop.f32.mrf.mxu2 }
 0x12d   :  { %1776 = vmatpush.bf16.msrb.mxu1 %v12811_v6  ;;  %v1558_v3 = vadd.f32 %v1373_v34, %v288_v60  ;;  %v1398_v61 = vpop.f32.mrf.mxu3  ;;  %v12816_v6 = vld [vmem:[#allocation70_spill] sm:$0xff] }
 0x12e   :  { %v1361_v25 = vpop.f32.mrf.mxu0  ;;  %v317_v33 = vadd.f32 %v12816_v6, %v8909_v44  ;;  %v1399_v8 = vadd.f32 %v1398_v61, %v1385_v40 }
 0x12f   :  { %v6730_v27 = vmul.f32 -1.442695, %v1558_v3  ;;  %v12817_v3 = vld [vmem:[#allocation78_spill] sm:$0xff] }
 0x130   :  { %v1559_v48 = vadd.f32 %v1399_v8, %v317_v33 }
 0x131   :  { %7447 = vpow2.f32 %v6730_v27  ;;  %v346_v27 = vadd.f32 %v12817_v3, %v8965_v9 }
 0x132   :  { %v1374_v20 = vpop.f32.mrf.mxu1  ;;  %v6731_v14 = vmul.f32 -1.442695, %v1559_v48 }
 0x134   :  { %7449 = vpow2.f32 %v6731_v14  ;;  %v1387_v50 = vpop.f32.mrf.mxu2 }
 0x135   :  { %v1400_v36 = vpop.f32.mrf.mxu3 }
 0x136   :  { %v1411_v5 = vpop.f32.mrf.mxu0 }
 0x137   :  { %v7448_v49 = vpop.eup %7447 }
 0x138   :  { %v9565_v52 = vadd.f32 1.0, %v7448_v49  ;;  %v12818_v49 = vld [vmem:[#allocation80_spill] sm:$0xff] }
 0x139   :  { %v375_v61 = vadd.f32 %v12818_v49, %v8968_v19 }
 0x13a   :  { %v1424_v34 = vpop.f32.mrf.mxu1  ;;  %7451 = vrcp.f32 %v9565_v52  ;;  %v7450_v6 = vpop.eup %7449  ;;  %vm1579_vm2 = vweird.f32 %v9565_v52 }
 0x13b   :  { %v1425_v25 = vadd.f32 %v1424_v34, %v1411_v5  ;;  %v9570_v40 = vadd.f32 1.0, %v7450_v6 }
 0x13c   :  { %v1437_v48 = vpop.f32.mrf.mxu2 }
 0x13d   :  { %v1560_v60 = vadd.f32 %v1425_v25, %v346_v27  ;;  %7453 = vrcp.f32 %v9570_v40  ;;  %v1450_v14 = vpop.f32.mrf.mxu3  ;;  %vm1594_vm9 = vweird.f32 %v9570_v40 }
 0x13e   :  { %v1413_v50 = vpop.f32.mrf.mxu0  ;;  %v1451_v8 = vadd.f32 %v1450_v14, %v1437_v48  ;;  %v404_v14 = vadd.f32 %v9404_v46, %v9436_v63 }
 0x13f   :  { %v6732_v20 = vmul.f32 -1.442695, %v1560_v60 }
 0x140   :  { %v7452_v33 = vpop.eup %7451  ;;  %v1561_v5 = vadd.f32 %v1451_v8, %v375_v61 }
 0x141   :  { %7455 = vpow2.f32 %v6732_v20  ;;  %v1575_v36 = vmul.f32 %v7452_v33, %v9565_v52  ;;  %vm1580_vm1 = vweird.f32 %v7452_v33 }
 0x142   :  { %v1426_v29 = vpop.f32.mrf.mxu1  ;;  %v6733_v34 = vmul.f32 -1.442695, %v1561_v5  ;;  %vm9588_vm3 = vmor %vm1579_vm2, %vm1580_vm1 }
 0x143   :  { %v9576_v3 = vpop.eup %7453  ;;  %v1576_v25 = vsub.f32 1.0, %v1575_v36 }
 0x144   :  { %7457 = vpow2.f32 %v6733_v34  ;;  %v1439_v60 = vpop.f32.mrf.mxu2  ;;  %v1590_v50 = vmul.f32 %v9576_v3, %v9570_v40  ;;  %vm1595_vm6 = vweird.f32 %v9576_v3 }
 0x145   :  { %v1452_v9 = vpop.f32.mrf.mxu3  ;;  %v1577_v48 = vmul.f32 %v7452_v33, %v1576_v25  ;;  %v1585_v60 = vand.u32 2147483648, %v9565_v52  ;;  %vm9605_vm11 = vmor %vm1594_vm9, %vm1595_vm6 }
 0x146   :  { %v1463_v49 = vpop.f32.mrf.mxu0  ;;  %v1591_v29 = vsub.f32 1.0, %v1590_v50  ;;  %v1583_v9 = vand.u32 2147483647, %v9565_v52 }
 0x147   :  { %v7456_v27 = vpop.eup %7455  ;;  %v1578_v34 = vadd.f32 %v7452_v33, %v1577_v48  ;;  %v433_v48 = vadd.f32 %v9407_v24, %v9441_v21 }
 0x148   :  { %v1610_v6 = vadd.f32 1.0, %v7456_v27  ;;  %vm1584_vm4 = vcmp.eq.f32.partialorder %v1583_v9, 8.507059e+37 }
 0x14a   :  { %7459 = vrcp.f32 %v1610_v6  ;;  %v1476_v20 = vpop.f32.mrf.mxu1  ;;  %v7458_v8 = vpop.eup %7457  ;;  %v1623_v52 = vand.u32 2147483648, %v1610_v6  ;;  %v1621_v59 = vand.u32 2147483647, %v1610_v6  ;;  %vm1617_vm7 = vweird.f32 %v1610_v6 }
 0x14b   :  { %v1477_v61 = vadd.f32 %v1476_v20, %v1463_v49  ;;  %v9582_v5 = vadd.f32 1.0, %v7458_v8  ;;  %v1592_v49 = vmul.f32 %v9576_v3, %v1591_v29 }
 0x14c   :  { %v1489_v46 = vpop.f32.mrf.mxu2  ;;  %vm1622_vm10 = vcmp.eq.f32.partialorder %v1621_v59, 8.507059e+37 }
 0x14d   :  { %v1562_v36 = vadd.f32 %v1477_v61, %v404_v14  ;;  %7461 = vrcp.f32 %v9582_v5  ;;  %v1502_v50 = vpop.f32.mrf.mxu3  ;;  %v1582_v61 = vsel %vm9588_vm3, %v7452_v33, %v1578_v34  ;;  %v1593_v29 = vadd.f32 %v9576_v3, %v1592_v49 }
 0x14e   :  { %v1465_v20 = vpop.f32.mrf.mxu0  ;;  %v1503_v8 = vadd.f32 %v1502_v50, %v1489_v46  ;;  %v1624_v34 = vor.u32 1.1754944e-38, %v1623_v52  ;;  %v1636_v59 = vand.u32 2147483647, %v9582_v5  ;;  %vm1632_vm14 = vweird.f32 %v9582_v5 }
 0x14f   :  { %7463 = vtanh.f32 %v1562_v36  ;;  %v1586_v36 = vor.u32 1.1754944e-38, %v1585_v60  ;;  %v1598_v60 = vand.u32 2147483647, %v9570_v40 }
 0x150   :  { %v7460_v27 = vpop.eup %7459  ;;  %v1563_v4 = vadd.f32 %v1503_v8, %v433_v48  ;;  %vm1637_vm0 = vcmp.eq.f32.partialorder %v1636_v59, 8.507059e+37 }
 0x151   :  { %v1613_v19 = vmul.f32 %v7460_v27, %v1610_v6  ;;  %vm1618_vm5 = vweird.f32 %v7460_v27  ;;  %v1587_v51 = vsel %vm1584_vm4, %v1586_v36, %v1582_v61  ;;  %vm1599_vm13 = vcmp.eq.f32.partialorder %v1598_v60, 8.507059e+37 }
 0x152   :  { %v1478_v63 = vpop.f32.mrf.mxu1  ;;  %7465 = vtanh.f32 %v1563_v4  ;;  %vm1619_vm8 = vmor %vm1617_vm7, %vm1618_vm5 }
 0x153   :  { %v1614_v14 = vsub.f32 1.0, %v1613_v19  ;;  %v7462_v1 = vpop.eup %7461  ;;  %v1600_v19 = vand.u32 2147483648, %v9570_v40 }
 0x154   :  { %v1628_v33 = vmul.f32 %v7462_v1, %v9582_v5  ;;  %v1491_v6 = vpop.f32.mrf.mxu2  ;;  %vm1633_vm12 = vweird.f32 %v7462_v1 }
 0x155   :  { %v1615_v44 = vmul.f32 %v7460_v27, %v1614_v14  ;;  %v7464_v24 = vpop.eup %7463  ;;  %v1601_v49 = vor.u32 1.1754944e-38, %v1600_v19  ;;  %v1504_v20 = vpop.f32.mrf.mxu3  ;;  %vm1634_vm15 = vmor %vm1632_vm14, %vm1633_vm12 }
 0x156   :  { %v1684_v9 = vmul.f32 %v7464_v24, %v1587_v51  ;;  %v1629_v46 = vsub.f32 1.0, %v1628_v33  ;;  %v1597_v51 = vsel %vm9605_vm11, %v9576_v3, %v1593_v29 }
 0x157   :  { %v1616_v63 = vadd.f32 %v7460_v27, %v1615_v44  ;;  %v1638_v44 = vand.u32 2147483648, %v9582_v5  ;;  %v1602_v61 = vsel %vm1599_vm13, %v1601_v49, %v1597_v51 }
 0x158   :  { %v1630_v40 = vmul.f32 %v7462_v1, %v1629_v46 }
 0x159   :  { %v1620_v25 = vsel %vm1619_vm8, %v7460_v27, %v1616_v63  ;;  %v7466_v27 = vpop.eup %7465  ;;  %v1639_v52 = vor.u32 1.1754944e-38, %v1638_v44 }
 0x15a   :  { %v1625_v4 = vsel %vm1622_vm10, %v1624_v34, %v1620_v25  ;;  %v1631_v8 = vadd.f32 %v7462_v1, %v1630_v40  ;;  %v1685_v36 = vmul.f32 %v7466_v27, %v1602_v61  ;;  %v462_v34 = vadd.f32 %v9419_v37, %v9459_v31 }
 0x15b   :  { %v1682_v48 = vmul.f32 0.0, %v1625_v4 }
 0x15c   :  { %v1635_v24 = vsel %vm1634_vm15, %v7462_v1, %v1631_v8  ;;  %v491_v1 = vadd.f32 %v9421_v56, %v9463_v11 }
 0x15d   :  { %v9615_v14 = vadd.f32 %v1684_v9, %v1682_v48  ;;  %v1640_v3 = vsel %vm1637_vm0, %v1639_v52, %v1635_v24 }
 0x15e   :  { %v1683_v29 = vmul.f32 0.0, %v1640_v3 }
 0x160   :  { %v9617_v19 = vadd.f32 %v1685_v36, %v1683_v29 }
 0x167   :  { %v1515_v33 = vpop.f32.mrf.mxu0 }
 0x16d   :  { %v1528_v63 = vpop.f32.mrf.mxu1 }
 0x16e   :  { %v1529_v60 = vadd.f32 %v1528_v63, %v1515_v33  ;;  %v1554_v25 = vpop.f32.mrf.mxu3 }
 0x16f   :  { %v1517_v50 = vpop.f32.mrf.mxu0 }
 0x170   :  { %v1564_v5 = vadd.f32 %v1529_v60, %v462_v34 }
 0x172   :  { %v6734_v9 = vmul.f32 -1.442695, %v1564_v5  ;;  %v1541_v46 = vpop.f32.mrf.mxu2 }
 0x173   :  { %v1555_v6 = vadd.f32 %v1554_v25, %v1541_v46 }
 0x174   :  { %7467 = vpow2.f32 %v6734_v9 }
 0x175   :  { %v1530_v44 = vpop.f32.mrf.mxu1  ;;  %v1565_v4 = vadd.f32 %v1555_v6, %v491_v1 }
 0x176   :  { %v1556_v48 = vpop.f32.mrf.mxu3 }
 0x177   :  { %v6735_v51 = vmul.f32 -1.442695, %v1565_v4 }
 0x179   :  { %7469 = vpow2.f32 %v6735_v51  ;;  %v12824_v51 = vld [vmem:[#allocation71_spill] sm:$0xff] }
 0x17a   :  { %v7468_v49 = vpop.eup %7467  ;;  %v1543_v40 = vpop.f32.mrf.mxu2 }
 0x17b   :  { %v1650_v20 = vadd.f32 1.0, %v7468_v49  ;;  %v12825_v49 = vld [vmem:[#allocation73_spill] sm:$0xff] }
 0x17d   :  { %7471 = vrcp.f32 %v1650_v20  ;;  %v1663_v52 = vand.u32 2147483648, %v1650_v20  ;;  %v1661_v36 = vand.u32 2147483647, %v1650_v20  ;;  %vm1657_vm2 = vweird.f32 %v1650_v20 }
 0x17f   :  { %v7470_v37 = vpop.eup %7469  ;;  %v1664_v29 = vor.u32 1.1754944e-38, %v1663_v52  ;;  %vm1662_vm4 = vcmp.eq.f32.partialorder %v1661_v36, 8.507059e+37  ;;  %v12831_v52 = vld [vmem:[#allocation83_spill] sm:$0xff]  ;;  %v12833_v36 = vld [vmem:[#allocation76_spill] sm:$0xff] }
 0x180   :  { %v1651_v59 = vadd.f32 1.0, %v7470_v37 }
 0x182   :  { %7473 = vrcp.f32 %v1651_v59  ;;  %v1678_v46 = vand.u32 2147483648, %v1651_v59  ;;  %v1676_v50 = vand.u32 2147483647, %v1651_v59  ;;  %vm1672_vm6 = vweird.f32 %v1651_v59 }
 0x183   :  { %v7472_v27 = vpop.eup %7471  ;;  %7475 = vtanh.f32 %v9615_v14 }
 0x184   :  { %v1653_v61 = vmul.f32 %v7472_v27, %v1650_v20  ;;  %vm1658_vm1 = vweird.f32 %v7472_v27  ;;  %7477 = vtanh.f32 %v9617_v19  ;;  %v1679_v44 = vor.u32 1.1754944e-38, %v1678_v46  ;;  %v12842_v46 = vld [vmem:[#allocation92_spill] sm:$0xff] }
 0x185   :  { %vm1659_vm3 = vmor %vm1657_vm2, %vm1658_vm1  ;;  %vm1677_vm8 = vcmp.eq.f32.partialorder %v1676_v50, 8.507059e+37  ;;  %v12844_v50 = vld [vmem:[#allocation105_spill] sm:$0xff] }
 0x186   :  { %v1654_v8 = vsub.f32 1.0, %v1653_v61  ;;  %v12829_v61 = vld [vmem:[#allocation72_spill] sm:$0xff] }
 0x188   :  { %v1655_v56 = vmul.f32 %v7472_v27, %v1654_v8  ;;  %v7474_v24 = vpop.eup %7473  ;;  %v12830_v8 = vld [vmem:[#allocation74_spill] sm:$0xff] }
 0x189   :  { %v1668_v33 = vmul.f32 %v7474_v24, %v1651_v59  ;;  %v7476_v34 = vpop.eup %7475  ;;  %vm1673_vm5 = vweird.f32 %v7474_v24  ;;  %v12827_v59 = vld [vmem:[#allocation75_spill] sm:$0xff] }
 0x18a   :  { %v1656_v3 = vadd.f32 %v7472_v27, %v1655_v56  ;;  %vm1674_vm7 = vmor %vm1672_vm6, %vm1673_vm5  ;;  %v7478_v20 = vpop.eup %7477  ;;  %v12832_v56 = vld [vmem:[#allocation85_spill] sm:$0xff] }
 0x18b   :  { %v1669_v5 = vsub.f32 1.0, %v1668_v33  ;;  %v12837_v33 = vld [vmem:[#allocation84_spill] sm:$0xff] }
 0x18c   :  { %v1660_v63 = vsel %vm1659_vm3, %v7472_v27, %v1656_v3  ;;  %v12828_v27 = vld [vmem:[#allocation77_spill] sm:$0xff]  ;;  %v12835_v3 = vld [vmem:[#allocation88_spill] sm:$0xff] }
 0x18d   :  { %v1665_v60 = vsel %vm1662_vm4, %v1664_v29, %v1660_v63  ;;  %v1670_v25 = vmul.f32 %v7474_v24, %v1669_v5  ;;  %v12836_v29 = vld [vmem:[#allocation90_spill] sm:$0xff]  ;;  %v12841_v5 = vld [vmem:[#allocation89_spill] sm:$0xff] }
 0x18e   :  { %v9625_v9 = vmul.f32 %v7476_v34, %v1665_v60  ;;  %v12838_v63 = vld [vmem:[#allocation86_spill] sm:$0xff]  ;;  %v12839_v34 = vld [vmem:[#allocation96_spill] sm:$0xff]  ;;  %v12840_v60 = vld [vmem:[#allocation99_spill] sm:$0xff] }
 0x18f   :  { %v1671_v6 = vadd.f32 %v7474_v24, %v1670_v25  ;;  %v12843_v25 = vld [vmem:[#allocation103_spill] sm:$0xff] }
 0x190   :  { %12823 = vst [vmem:[#allocation69_spill] sm:$0xff] %v9625_v9  ;;  %v9629_v1 = vpack.c.bf16 %v9625_v9, %v9625_v9  ;;  %v12851_v9 = vld [vmem:[#allocation123_spill] sm:$0xff] }
 0x191   :  { %v1675_v4 = vsel %vm1674_vm7, %v7474_v24, %v1671_v6  ;;  %v12834_v24 = vld [vmem:[#allocation79_spill] sm:$0xff]  ;;  %v12845_v6 = vld [vmem:[#allocation98_spill] sm:$0xff] }
 0x192   :  { %1712 = vmatmul.bf16.vlgmr.msra.gmra.mxu0 %v9629_v1  ;;  %1738 = vmatmul.bf16.vlgmr.msra.gmra.mxu2 %v9629_v1  ;;  %v1680_v40 = vsel %vm1677_vm8, %v1679_v44, %v1675_v4  ;;  %v12846_v44 = vld [vmem:[#allocation100_spill] sm:$0xff]  ;;  %v12847_v4 = vld [vmem:[#allocation111_spill] sm:$0xff] }
 0x193   :  { %1808 = vmatpush.bf16.msra.mxu0 %v12824_v51  ;;  %1834 = vmatpush.bf16.msra.mxu2 %v12825_v49  ;;  %v9635_v48 = vmul.f32 %v7478_v20, %v1680_v40  ;;  %v12848_v20 = vld [vmem:[#allocation113_spill] sm:$0xff]  ;;  %v12849_v40 = vld [vmem:[#allocation104_spill] sm:$0xff] }
 0x195   :  { %12826 = vst [vmem:[#allocation70_spill] sm:$0xff] %v9635_v48  ;;  %v9639_v37 = vpack.c.bf16 %v9635_v48, %v9635_v48  ;;  %v12850_v48 = vld [vmem:[#allocation106_spill] sm:$0xff] }
 0x197   :  { %1809 = vmatpush.bf16.msra.mxu0 %v12827_v59  ;;  %1835 = vmatpush.bf16.msra.mxu2 %v12828_v27 }
 0x198   :  { %1725 = vmatmul.bf16.vlgmr.msra.gmra.mxu1 %v9639_v37  ;;  %1751 = vmatmul.bf16.vlgmr.msra.gmra.mxu3 %v9639_v37 }
 0x199   :  { %1821 = vmatpush.bf16.msra.mxu1 %v12829_v61  ;;  %1847 = vmatpush.bf16.msra.mxu3 %v12830_v8 }
 0x19b   :  { %1810 = vmatpush.bf16.msra.mxu0 %v12831_v52  ;;  %1836 = vmatpush.bf16.msra.mxu2 %v12832_v56 }
 0x19d   :  { %1822 = vmatpush.bf16.msra.mxu1 %v12833_v36  ;;  %1848 = vmatpush.bf16.msra.mxu3 %v12834_v24 }
 0x19f   :  { %1811 = vmatpush.bf16.msra.mxu0 %v12835_v3  ;;  %1837 = vmatpush.bf16.msra.mxu2 %v12836_v29 }
 0x1a1   :  { %1823 = vmatpush.bf16.msra.mxu1 %v12837_v33  ;;  %1849 = vmatpush.bf16.msra.mxu3 %v12838_v63 }
 0x1a2   :  { %1764 = vmatmul.bf16.vlgmr.msrb.gmra.mxu0 %v9629_v1  ;;  %1790 = vmatmul.bf16.vlgmr.msrb.gmra.mxu2 %v9629_v1 }
 0x1a3   :  { %1812 = vmatpush.bf16.msra.mxu0 %v12839_v34  ;;  %1838 = vmatpush.bf16.msra.mxu2 %v12840_v60 }
 0x1a5   :  { %1824 = vmatpush.bf16.msra.mxu1 %v12841_v5  ;;  %1850 = vmatpush.bf16.msra.mxu3 %v12842_v46 }
 0x1a7   :  { %1813 = vmatpush.bf16.msra.mxu0 %v12843_v25  ;;  %1839 = vmatpush.bf16.msra.mxu2 %v12844_v50  ;;  %v12852_v50 = vld [vmem:[#allocation112_spill] sm:$0xff] }
 0x1a8   :  { %1777 = vmatmul.bf16.vlgmr.msrb.gmra.mxu1 %v9639_v37  ;;  %1803 = vmatmul.bf16.vlgmr.msrb.gmra.mxu3 %v9639_v37 }
 0x1a9   :  { %1825 = vmatpush.bf16.msra.mxu1 %v12845_v6  ;;  %1851 = vmatpush.bf16.msra.mxu3 %v12846_v44  ;;  %v12853_v6 = vld [vmem:[#allocation114_spill] sm:$0xff]  ;;  %v12872_v44 = vld [vmem:[#allocation151_spill] sm:$0xff] }
 0x1ab   :  { %1814 = vmatpush.bf16.msra.mxu0 %v12847_v4  ;;  %1840 = vmatpush.bf16.msra.mxu2 %v12848_v20  ;;  %v12854_v20 = vld [vmem:[#allocation127_spill] sm:$0xff]  ;;  %v12871_v4 = vld [vmem:[#allocation142_spill] sm:$0xff] }
 0x1ad   :  { %1826 = vmatpush.bf16.msra.mxu1 %v12849_v40  ;;  %1852 = vmatpush.bf16.msra.mxu3 %v12850_v48  ;;  %v12855_v40 = vld [vmem:[#allocation129_spill] sm:$0xff]  ;;  %v12856_v48 = vld [vmem:[#allocation116_spill] sm:$0xff] }
 0x1af   :  { %1815 = vmatpush.bf16.msra.mxu0 %v9063_v0  ;;  %1841 = vmatpush.bf16.msra.mxu2 %v9078_v30  ;;  %v12857_v0 = vld [vmem:[#allocation119_spill] sm:$0xff]  ;;  %v12858_v30 = vld [vmem:[#allocation122_spill] sm:$0xff] }
 0x1b1   :  { %1827 = vmatpush.bf16.msra.mxu1 %v12852_v50  ;;  %1853 = vmatpush.bf16.msra.mxu3 %v12853_v6  ;;  %v12861_v50 = vld [vmem:[#allocation135_spill] sm:$0xff]  ;;  %v12862_v6 = vld [vmem:[#allocation128_spill] sm:$0xff] }
 0x1b2   :  { %1816 = vmatmul.bf16.vlgmr.msra.gmra.mxu0 %v9629_v1  ;;  %1842 = vmatmul.bf16.vlgmr.msra.gmra.mxu2 %v9629_v1 }
 0x1b3   :  { %1860 = vmatpush.bf16.msrb.mxu0 %v9091_v35  ;;  %1886 = vmatpush.bf16.msrb.mxu2 %v12851_v9  ;;  %v12859_v35 = vld [vmem:[#allocation125_spill] sm:$0xff]  ;;  %v12860_v9 = vld [vmem:[#allocation131_spill] sm:$0xff] }
 0x1b5   :  { %1828 = vmatpush.bf16.msra.mxu1 %v12856_v48  ;;  %1854 = vmatpush.bf16.msra.mxu3 %v12857_v0  ;;  %v12865_v48 = vld [vmem:[#allocation141_spill] sm:$0xff]  ;;  %v12866_v0 = vld [vmem:[#allocation134_spill] sm:$0xff] }
 0x1b7   :  { %1861 = vmatpush.bf16.msrb.mxu0 %v12854_v20  ;;  %1887 = vmatpush.bf16.msrb.mxu2 %v12855_v40  ;;  %v12863_v20 = vld [vmem:[#allocation130_spill] sm:$0xff]  ;;  %v12864_v40 = vld [vmem:[#allocation139_spill] sm:$0xff] }
 0x1b8   :  { %1829 = vmatmul.bf16.vlgmr.msra.gmra.mxu1 %v9639_v37  ;;  %1855 = vmatmul.bf16.vlgmr.msra.gmra.mxu3 %v9639_v37 }
 0x1b9   :  { %1873 = vmatpush.bf16.msrb.mxu1 %v12858_v30  ;;  %1899 = vmatpush.bf16.msrb.mxu3 %v12859_v35  ;;  %v12867_v30 = vld [vmem:[#allocation138_spill] sm:$0xff]  ;;  %v12868_v35 = vld [vmem:[#allocation144_spill] sm:$0xff] }
 0x1bb   :  { %1862 = vmatpush.bf16.msrb.mxu0 %v12860_v9  ;;  %1888 = vmatpush.bf16.msrb.mxu2 %v12861_v50  ;;  %v12869_v9 = vld [vmem:[#allocation147_spill] sm:$0xff]  ;;  %v12870_v50 = vld [vmem:[#allocation140_spill] sm:$0xff] }
 0x1bd   :  { %1874 = vmatpush.bf16.msrb.mxu1 %v12862_v6  ;;  %1900 = vmatpush.bf16.msrb.mxu3 %v12863_v20  ;;  %v12873_v20 = vld [vmem:[#allocation146_spill] sm:$0xff] }
 0x1bf   :  { %1863 = vmatpush.bf16.msrb.mxu0 %v12864_v40  ;;  %1889 = vmatpush.bf16.msrb.mxu2 %v12865_v48  ;;  %v12874_v40 = vld [vmem:[#allocation149_spill] sm:$0xff] }
 0x1c1   :  { %1875 = vmatpush.bf16.msrb.mxu1 %v12866_v0  ;;  %1901 = vmatpush.bf16.msrb.mxu3 %v12867_v30 }
 0x1c3   :  { %1864 = vmatpush.bf16.msrb.mxu0 %v12868_v35  ;;  %1890 = vmatpush.bf16.msrb.mxu2 %v12869_v9  ;;  %v12875_v35 = vld [vmem:[#allocation154_spill] sm:$0xff] }
 0x1c5   :  { %1876 = vmatpush.bf16.msrb.mxu1 %v12870_v50  ;;  %1902 = vmatpush.bf16.msrb.mxu3 %v12871_v4 }
 0x1c7   :  { %1865 = vmatpush.bf16.msrb.mxu0 %v12872_v44  ;;  %1891 = vmatpush.bf16.msrb.mxu2 %v9310_v12 }
 0x1c9   :  { %1877 = vmatpush.bf16.msrb.mxu1 %v12873_v20  ;;  %1903 = vmatpush.bf16.msrb.mxu3 %v12874_v40 }
 0x1cb   :  { %1866 = vmatpush.bf16.msrb.mxu0 %v9340_v55  ;;  %1892 = vmatpush.bf16.msrb.mxu2 %v9351_v39 }
 0x1cd   :  { %1878 = vmatpush.bf16.msrb.mxu1 %v9308_v10  ;;  %1904 = vmatpush.bf16.msrb.mxu3 %v12875_v35 }
 0x1cf   :  { %1867 = vmatpush.bf16.msrb.mxu0 %v9386_v28  ;;  %1893 = vmatpush.bf16.msrb.mxu2 %v9392_v16 }
 0x1d1   :  { %1879 = vmatpush.bf16.msrb.mxu1 %v9349_v45  ;;  %1905 = vmatpush.bf16.msrb.mxu3 %v9368_v57 }
 0x1d2   :  { %1868 = vmatmul.bf16.vlgmr.msrb.gmra.mxu0 %v9629_v1  ;;  %1894 = vmatmul.bf16.vlgmr.msrb.gmra.mxu2 %v9629_v1  ;;  %v12876_v1 = vld [vmem:[#allocation14_spill] sm:$0xff] }
 0x1d3   :  { %2058 = vmatpush.bf16.msra.mxu0 %v8112_v38  ;;  %2084 = vmatpush.bf16.msra.mxu2 %v8125_v43 }
 0x1d5   :  { %1880 = vmatpush.bf16.msrb.mxu1 %v9390_v15  ;;  %1906 = vmatpush.bf16.msrb.mxu3 %v9395_v23  ;;  %v12926_v15 = vld [vmem:[#allocation82_spill] sm:$0xff] }
 0x1d7   :  { %2059 = vmatpush.bf16.msra.mxu0 %v8150_v53  ;;  %2085 = vmatpush.bf16.msra.mxu2 %v8164_v58 }
 0x1d8   :  { %1881 = vmatmul.bf16.vlgmr.msrb.gmra.mxu1 %v9639_v37  ;;  %1907 = vmatmul.bf16.vlgmr.msrb.gmra.mxu3 %v9639_v37  ;;  %v12878_v37 = vld [vmem:[#allocation27_spill] sm:$0xff] }
 0x1d9   :  { %2071 = vmatpush.bf16.msra.mxu1 %v8123_v42  ;;  %2097 = vmatpush.bf16.msra.mxu3 %v8137_v47  ;;  %v12877_v42 = vld [vmem:[#allocation16_spill] sm:$0xff] }
 0x1db   :  { %2060 = vmatpush.bf16.msra.mxu0 %v8187_v2  ;;  %2086 = vmatpush.bf16.msra.mxu2 %v8202_v7  ;;  %v12924_v7 = vld [vmem:[#allocation81_spill] sm:$0xff] }
 0x1dd   :  { %2072 = vmatpush.bf16.msra.mxu1 %v8152_v54  ;;  %2098 = vmatpush.bf16.msra.mxu3 %v8175_v62  ;;  %v12879_v62 = vld [vmem:[#allocation22_spill] sm:$0xff] }
 0x1df   :  { %2061 = vmatpush.bf16.msra.mxu0 %v8233_v13  ;;  %2087 = vmatpush.bf16.msra.mxu2 %v8246_v18  ;;  %v12880_v13 = vld [vmem:[#allocation24_spill] sm:$0xff]  ;;  %v12881_v18 = vld [vmem:[#allocation29_spill] sm:$0xff] }
 0x1e1   :  { %2073 = vmatpush.bf16.msra.mxu1 %v12876_v1  ;;  %2099 = vmatpush.bf16.msra.mxu3 %v12877_v42  ;;  %v12882_v1 = vld [vmem:[#allocation31_spill] sm:$0xff]  ;;  %v12883_v42 = vld [vmem:[#allocation26_spill] sm:$0xff] }
 0x1e3   :  { %2062 = vmatpush.bf16.msra.mxu0 %v8271_v26  ;;  %2088 = vmatpush.bf16.msra.mxu2 %v8285_v32  ;;  %v12884_v26 = vld [vmem:[#allocation28_spill] sm:$0xff]  ;;  %v12885_v32 = vld [vmem:[#allocation33_spill] sm:$0xff] }
 0x1e5   :  { %2074 = vmatpush.bf16.msra.mxu1 %v8244_v17  ;;  %2100 = vmatpush.bf16.msra.mxu3 %v8258_v22  ;;  %v12886_v17 = vld [vmem:[#allocation35_spill] sm:$0xff]  ;;  %v12887_v22 = vld [vmem:[#allocation37_spill] sm:$0xff] }
 0x1e7   :  { %2063 = vmatpush.bf16.msra.mxu0 %v8308_v41  ;;  %2089 = vmatpush.bf16.msra.mxu2 %v12878_v37  ;;  %v12888_v41 = vld [vmem:[#allocation39_spill] sm:$0xff]  ;;  %v12889_v37 = vld [vmem:[#allocation30_spill] sm:$0xff] }
 0x1e9   :  { %2075 = vmatpush.bf16.msra.mxu1 %v12879_v62  ;;  %2101 = vmatpush.bf16.msra.mxu3 %v12880_v13  ;;  %v12890_v62 = vld [vmem:[#allocation32_spill] sm:$0xff]  ;;  %v12891_v13 = vld [vmem:[#allocation41_spill] sm:$0xff] }
 0x1eb   :  { %2064 = vmatpush.bf16.msra.mxu0 %v12881_v18  ;;  %2090 = vmatpush.bf16.msra.mxu2 %v12882_v1  ;;  %v12892_v18 = vld [vmem:[#allocation43_spill] sm:$0xff]  ;;  %v12893_v1 = vld [vmem:[#allocation34_spill] sm:$0xff] }
 0x1ed   :  { %2076 = vmatpush.bf16.msra.mxu1 %v12883_v42  ;;  %2102 = vmatpush.bf16.msra.mxu3 %v12884_v26  ;;  %v12894_v42 = vld [vmem:[#allocation36_spill] sm:$0xff]  ;;  %v12895_v26 = vld [vmem:[#allocation38_spill] sm:$0xff] }
 0x1ef   :  { %2065 = vmatpush.bf16.msra.mxu0 %v12885_v32  ;;  %2091 = vmatpush.bf16.msra.mxu2 %v12886_v17  ;;  %v12896_v32 = vld [vmem:[#allocation40_spill] sm:$0xff]  ;;  %v12897_v17 = vld [vmem:[#allocation45_spill] sm:$0xff] }
 0x1f1   :  { %2077 = vmatpush.bf16.msra.mxu1 %v12889_v37  ;;  %2103 = vmatpush.bf16.msra.mxu3 %v12890_v62  ;;  %v12900_v37 = vld [vmem:[#allocation44_spill] sm:$0xff]  ;;  %v12901_v62 = vld [vmem:[#allocation49_spill] sm:$0xff] }
 0x1f3   :  { %2110 = vmatpush.bf16.msrb.mxu0 %v12887_v22  ;;  %2136 = vmatpush.bf16.msrb.mxu2 %v12888_v41  ;;  %v12898_v22 = vld [vmem:[#allocation47_spill] sm:$0xff]  ;;  %v12899_v41 = vld [vmem:[#allocation42_spill] sm:$0xff] }
 0x1f5   :  { %2078 = vmatpush.bf16.msra.mxu1 %v12893_v1  ;;  %2104 = vmatpush.bf16.msra.mxu3 %v12894_v42  ;;  %v12904_v1 = vld [vmem:[#allocation48_spill] sm:$0xff]  ;;  %v12905_v42 = vld [vmem:[#allocation53_spill] sm:$0xff] }
 0x1f7   :  { %2111 = vmatpush.bf16.msrb.mxu0 %v12891_v13  ;;  %2137 = vmatpush.bf16.msrb.mxu2 %v12892_v18  ;;  %v12902_v13 = vld [vmem:[#allocation51_spill] sm:$0xff]  ;;  %v12903_v18 = vld [vmem:[#allocation46_spill] sm:$0xff] }
 0x1f9   :  { %2123 = vmatpush.bf16.msrb.mxu1 %v12895_v26  ;;  %2149 = vmatpush.bf16.msrb.mxu3 %v12896_v32  ;;  %v12906_v26 = vld [vmem:[#allocation55_spill] sm:$0xff]  ;;  %v12907_v32 = vld [vmem:[#allocation50_spill] sm:$0xff] }
 0x1fb   :  { %2112 = vmatpush.bf16.msrb.mxu0 %v12897_v17  ;;  %2138 = vmatpush.bf16.msrb.mxu2 %v12898_v22  ;;  %v12908_v17 = vld [vmem:[#allocation52_spill] sm:$0xff]  ;;  %v12909_v22 = vld [vmem:[#allocation57_spill] sm:$0xff] }
 0x1fd   :  { %2124 = vmatpush.bf16.msrb.mxu1 %v12899_v41  ;;  %2150 = vmatpush.bf16.msrb.mxu3 %v12900_v37  ;;  %v12910_v41 = vld [vmem:[#allocation59_spill] sm:$0xff]  ;;  %v12911_v37 = vld [vmem:[#allocation54_spill] sm:$0xff] }
 0x1ff   :  { %2113 = vmatpush.bf16.msrb.mxu0 %v12901_v62  ;;  %2139 = vmatpush.bf16.msrb.mxu2 %v12902_v13  ;;  %v12912_v62 = vld [vmem:[#allocation56_spill] sm:$0xff]  ;;  %v12913_v13 = vld [vmem:[#allocation61_spill] sm:$0xff] }
 0x201   :  { %2125 = vmatpush.bf16.msrb.mxu1 %v12903_v18  ;;  %2151 = vmatpush.bf16.msrb.mxu3 %v12904_v1  ;;  %v12914_v18 = vld [vmem:[#allocation63_spill] sm:$0xff]  ;;  %v12915_v1 = vld [vmem:[#allocation58_spill] sm:$0xff] }
 0x203   :  { %2114 = vmatpush.bf16.msrb.mxu0 %v12905_v42  ;;  %2140 = vmatpush.bf16.msrb.mxu2 %v12906_v26  ;;  %v12916_v42 = vld [vmem:[#allocation60_spill] sm:$0xff]  ;;  %v12917_v26 = vld [vmem:[#allocation65_spill] sm:$0xff] }
 0x205   :  { %2126 = vmatpush.bf16.msrb.mxu1 %v12907_v32  ;;  %2152 = vmatpush.bf16.msrb.mxu3 %v12908_v17  ;;  %v12918_v32 = vld [vmem:[#allocation67_spill] sm:$0xff]  ;;  %v12919_v17 = vld [vmem:[#allocation62_spill] sm:$0xff] }
 0x207   :  { %2115 = vmatpush.bf16.msrb.mxu0 %v12909_v22  ;;  %2141 = vmatpush.bf16.msrb.mxu2 %v12910_v41  ;;  %v12920_v22 = vld [vmem:[#allocation64_spill] sm:$0xff]  ;;  %v12921_v41 = vld [vmem:[#allocation66_spill] sm:$0xff] }
 0x209   :  { %2127 = vmatpush.bf16.msrb.mxu1 %v12911_v37  ;;  %2153 = vmatpush.bf16.msrb.mxu3 %v12912_v62  ;;  %v12922_v37 = vld [vmem:[#allocation68_spill] sm:$0xff] }
 0x20b   :  { %2116 = vmatpush.bf16.msrb.mxu0 %v12913_v13  ;;  %2142 = vmatpush.bf16.msrb.mxu2 %v12914_v18  ;;  %v12923_v18 = vld [vmem:[#allocation87_spill] sm:$0xff] }
 0x20d   :  { %2128 = vmatpush.bf16.msrb.mxu1 %v12915_v1  ;;  %2154 = vmatpush.bf16.msrb.mxu3 %v12916_v42  ;;  %v290_v1 = vadd.f32 %v12924_v7, %v12923_v18 }
 0x20f   :  { %2117 = vmatpush.bf16.msrb.mxu0 %v12917_v26  ;;  %2143 = vmatpush.bf16.msrb.mxu2 %v12918_v32  ;;  %v1713_v62 = vpop.f32.mrf.mxu0  ;;  %v12925_v32 = vld [vmem:[#allocation93_spill] sm:$0xff] }
 0x211   :  { %2129 = vmatpush.bf16.msrb.mxu1 %v12919_v17  ;;  %2155 = vmatpush.bf16.msrb.mxu3 %v12920_v22  ;;  %v319_v17 = vadd.f32 %v12926_v15, %v12925_v32 }
 0x215   :  { %2130 = vmatpush.bf16.msrb.mxu1 %v12921_v41  ;;  %2156 = vmatpush.bf16.msrb.mxu3 %v12922_v37  ;;  %v1739_v13 = vpop.f32.mrf.mxu2  ;;  %v1726_v54 = vpop.f32.mrf.mxu1 }
 0x216   :  { %v1727_v2 = vadd.f32 %v1726_v54, %v1713_v62  ;;  %v12928_v62 = vld [vmem:[#allocation91_spill] sm:$0xff] }
 0x217   :  { %v1715_v42 = vpop.f32.mrf.mxu0 }
 0x218   :  { %v1912_v47 = vadd.f32 %v1727_v2, %v290_v1  ;;  %v12927_v42 = vld [vmem:[#allocation101_spill] sm:$0xff] }
 0x21a   :  { %v6736_v26 = vmul.f32 -1.442695, %v1912_v47  ;;  %v348_v47 = vadd.f32 %v12928_v62, %v12927_v42 }
 0x21b   :  { %v1752_v23 = vpop.f32.mrf.mxu3 }
 0x21c   :  { %7479 = vpow2.f32 %v6736_v26  ;;  %v1753_v22 = vadd.f32 %v1752_v23, %v1739_v13 }
 0x21d   :  { %v1741_v58 = vpop.f32.mrf.mxu2  ;;  %v1728_v41 = vpop.f32.mrf.mxu1 }
 0x21e   :  { %v1913_v53 = vadd.f32 %v1753_v22, %v319_v17  ;;  %v12929_v22 = vld [vmem:[#allocation102_spill] sm:$0xff] }
 0x21f   :  { %v1765_v37 = vpop.f32.mrf.mxu0 }
 0x220   :  { %v6737_v57 = vmul.f32 -1.442695, %v1913_v53 }
 0x222   :  { %v7480_v45 = vpop.eup %7479  ;;  %7481 = vpow2.f32 %v6737_v57 }
 0x223   :  { %v1926_v43 = vadd.f32 1.0, %v7480_v45  ;;  %v1754_v38 = vpop.f32.mrf.mxu3 }
 0x224   :  { %v12930_v38 = vld [vmem:[#allocation94_spill] sm:$0xff] }
 0x225   :  { %v1778_v7 = vpop.f32.mrf.mxu1  ;;  %v1791_v54 = vpop.f32.mrf.mxu2  ;;  %7483 = vrcp.f32 %v1926_v43  ;;  %v377_v41 = vadd.f32 %v12930_v38, %v12929_v22  ;;  %v12932_v38 = vld [vmem:[#allocation169_spill] sm:$0xff]  ;;  %vm1933_vm10 = vweird.f32 %v1926_v43 }
 0x226   :  { %v1779_v2 = vadd.f32 %v1778_v7, %v1765_v37 }
 0x227   :  { %v1767_v1 = vpop.f32.mrf.mxu0 }
 0x228   :  { %v7482_v15 = vpop.eup %7481  ;;  %v1914_v26 = vadd.f32 %v1779_v2, %v348_v47 }
 0x229   :  { %v9787_v13 = vadd.f32 1.0, %v7482_v15 }
 0x22a   :  { %v6738_v58 = vmul.f32 -1.442695, %v1914_v26 }
 0x22b   :  { %7485 = vrcp.f32 %v9787_v13  ;;  %v1804_v53 = vpop.f32.mrf.mxu3  ;;  %v9790_v17 = vpop.eup %7483  ;;  %vm1948_vm15 = vweird.f32 %v9787_v13 }
 0x22c   :  { %7487 = vpow2.f32 %v6738_v58  ;;  %v1805_v23 = vadd.f32 %v1804_v53, %v1791_v54  ;;  %v1929_v37 = vmul.f32 %v9790_v17, %v1926_v43  ;;  %v12931_v53 = vld [vmem:[#allocation171_spill] sm:$0xff]  ;;  %vm1934_vm9 = vweird.f32 %v9790_v17 }
 0x22d   :  { %v1780_v45 = vpop.f32.mrf.mxu1  ;;  %v1793_v57 = vpop.f32.mrf.mxu2  ;;  %vm9810_vm11 = vmor %vm1933_vm10, %vm1934_vm9 }
 0x22e   :  { %v1915_v62 = vadd.f32 %v1805_v23, %v377_v41  ;;  %v1930_v15 = vsub.f32 1.0, %v1929_v37  ;;  %v406_v41 = vadd.f32 %v12932_v38, %v12931_v53 }
 0x22f   :  { %v1817_v7 = vpop.f32.mrf.mxu0 }
 0x230   :  { %v6739_v47 = vmul.f32 -1.442695, %v1915_v62  ;;  %v1931_v45 = vmul.f32 %v9790_v17, %v1930_v15 }
 0x231   :  { %v9795_v2 = vpop.eup %7485 }
 0x232   :  { %v7488_v1 = vpop.eup %7487  ;;  %7489 = vpow2.f32 %v6739_v47  ;;  %v1944_v32 = vmul.f32 %v9795_v2, %v9787_v13  ;;  %v1937_v47 = vand.u32 2147483647, %v1926_v43  ;;  %v1932_v16 = vadd.f32 %v9790_v17, %v1931_v45 }
 0x233   :  { %v1964_v26 = vadd.f32 1.0, %v7488_v1  ;;  %v1806_v42 = vpop.f32.mrf.mxu3  ;;  %vm1949_vm13 = vweird.f32 %v9795_v2 }
 0x234   :  { %v1945_v22 = vsub.f32 1.0, %v1944_v32  ;;  %v1939_v42 = vand.u32 2147483648, %v1926_v43  ;;  %vm9814_vm12 = vcmp.eq.f32.partialorder %v1937_v47, 8.507059e+37  ;;  %v1952_v47 = vand.u32 2147483647, %v9787_v13  ;;  %vm9831_vm1 = vmor %vm1948_vm15, %vm1949_vm13 }
 0x235   :  { %7491 = vrcp.f32 %v1964_v26  ;;  %v1843_v58 = vpop.f32.mrf.mxu2  ;;  %v1830_v54 = vpop.f32.mrf.mxu1  ;;  %v1977_v53 = vand.u32 2147483648, %v1964_v26  ;;  %vm1971_vm0 = vweird.f32 %v1964_v26 }
 0x236   :  { %v1831_v23 = vadd.f32 %v1830_v54, %v1817_v7  ;;  %v1946_v15 = vmul.f32 %v9795_v2, %v1945_v22  ;;  %v12933_v54 = vld [vmem:[#allocation170_spill] sm:$0xff]  ;;  %v1936_v22 = vsel %vm9810_vm11, %v9790_v17, %v1932_v16  ;;  %vm1953_vm4 = vcmp.eq.f32.partialorder %v1952_v47, 8.507059e+37 }
 0x237   :  { %v1819_v57 = vpop.f32.mrf.mxu0  ;;  %v435_v32 = vadd.f32 %v12933_v54, %v9441_v21  ;;  %v12969_v21 = vld [vmem:[#allocation165_spill] sm:$0xff] }
 0x238   :  { %v7490_v62 = vpop.eup %7489  ;;  %v1916_v37 = vadd.f32 %v1831_v23, %v406_v41 }
 0x239   :  { %v9802_v18 = vadd.f32 1.0, %v7490_v62  ;;  %v1940_v62 = vor.u32 1.1754944e-38, %v1939_v42  ;;  %v1954_v42 = vand.u32 2147483648, %v9787_v13 }
 0x23b   :  { %v7492_v1 = vpop.eup %7491  ;;  %7493 = vrcp.f32 %v9802_v18  ;;  %v1856_v7 = vpop.f32.mrf.mxu3  ;;  %v1941_v17 = vsel %vm9814_vm12, %v1940_v62, %v1936_v22  ;;  %v1992_v45 = vand.u32 2147483648, %v9802_v18  ;;  %v1955_v22 = vor.u32 1.1754944e-38, %v1954_v42 }
 0x23c   :  { %v1967_v28 = vmul.f32 %v7492_v1, %v1964_v26  ;;  %7495 = vtanh.f32 %v1916_v37  ;;  %v1857_v38 = vadd.f32 %v1856_v7, %v1843_v58  ;;  %vm1972_vm14 = vweird.f32 %v7492_v1 }
 0x23d   :  { %v1845_v41 = vpop.f32.mrf.mxu2  ;;  %v1832_v37 = vpop.f32.mrf.mxu1  ;;  %v1947_v58 = vadd.f32 %v9795_v2, %v1946_v15  ;;  %vm1973_vm2 = vmor %vm1971_vm0, %vm1972_vm14  ;;  %vm1986_vm6 = vweird.f32 %v9802_v18 }
 0x23e   :  { %v1968_v23 = vsub.f32 1.0, %v1967_v28  ;;  %v1917_v54 = vadd.f32 %v1857_v38, %v435_v32  ;;  %v1975_v28 = vand.u32 2147483647, %v1964_v26  ;;  %v1978_v38 = vor.u32 1.1754944e-38, %v1977_v53 }
 0x23f   :  { %v1951_v26 = vsel %vm9831_vm1, %v9795_v2, %v1947_v58  ;;  %v1990_v53 = vand.u32 2147483647, %v9802_v18  ;;  %v1993_v58 = vor.u32 1.1754944e-38, %v1992_v45  ;;  %v12941_v45 = vld [vmem:[#allocation174_spill] sm:$0xff] }
 0x240   :  { %v1969_v43 = vmul.f32 %v7492_v1, %v1968_v23  ;;  %7497 = vtanh.f32 %v1917_v54  ;;  %vm1976_vm3 = vcmp.eq.f32.partialorder %v1975_v28, 8.507059e+37 }
 0x241   :  { %v7494_v7 = vpop.eup %7493  ;;  %vm1991_vm8 = vcmp.eq.f32.partialorder %v1990_v53, 8.507059e+37 }
 0x242   :  { %v7496_v41 = vpop.eup %7495  ;;  %v1982_v16 = vmul.f32 %v7494_v7, %v9802_v18  ;;  %v1970_v32 = vadd.f32 %v7492_v1, %v1969_v43  ;;  %vm1987_vm5 = vweird.f32 %v7494_v7 }
 0x243   :  { %v2038_v23 = vmul.f32 %v7496_v41, %v1941_v17  ;;  %v1858_v37 = vpop.f32.mrf.mxu3  ;;  %vm1988_vm7 = vmor %vm1986_vm6, %vm1987_vm5 }
 0x244   :  { %v1983_v57 = vsub.f32 1.0, %v1982_v16  ;;  %v1974_v13 = vsel %vm1973_vm2, %v7492_v1, %v1970_v32  ;;  %v1956_v16 = vsel %vm1953_vm4, %v1955_v22, %v1951_v26 }
 0x245   :  { %v1979_v62 = vsel %vm1976_vm3, %v1978_v38, %v1974_v13 }
 0x246   :  { %v1984_v54 = vmul.f32 %v7494_v7, %v1983_v57  ;;  %v2036_v43 = vmul.f32 %v1979_v62, %v9615_v14  ;;  %v7498_v41 = vpop.eup %7497  ;;  %v12940_v57 = vld [vmem:[#allocation172_spill] sm:$0xff] }
 0x247   :  { %v2039_v2 = vmul.f32 %v7498_v41, %v1956_v16  ;;  %v464_v13 = vadd.f32 %v12940_v57, %v9459_v31  ;;  %v12968_v31 = vld [vmem:[#allocation163_spill] sm:$0xff] }
 0x248   :  { %v9842_v1 = vadd.f32 %v2038_v23, %v2036_v43  ;;  %v1985_v28 = vadd.f32 %v7494_v7, %v1984_v54 }
 0x24a   :  { %v1989_v17 = vsel %vm1988_vm7, %v7494_v7, %v1985_v28  ;;  %v493_v7 = vadd.f32 %v12941_v45, %v9463_v11  ;;  %v12967_v11 = vld [vmem:[#allocation144_spill] sm:$0xff] }
 0x24b   :  { %v1994_v47 = vsel %vm1991_vm8, %v1993_v58, %v1989_v17 }
 0x24c   :  { %v2037_v42 = vmul.f32 %v1994_v47, %v9617_v19 }
 0x24e   :  { %v9845_v15 = vadd.f32 %v2039_v2, %v2037_v42 }
 0x24f   :  { %v1869_v32 = vpop.f32.mrf.mxu0 }
 0x255   :  { %v1882_v14 = vpop.f32.mrf.mxu1  ;;  %v1895_v38 = vpop.f32.mrf.mxu2 }
 0x256   :  { %v1883_v18 = vadd.f32 %v1882_v14, %v1869_v32 }
 0x257   :  { %v1871_v23 = vpop.f32.mrf.mxu0 }
 0x258   :  { %v1918_v26 = vadd.f32 %v1883_v18, %v464_v13 }
 0x25a   :  { %v6740_v37 = vmul.f32 -1.442695, %v1918_v26 }
 0x25b   :  { %v1908_v62 = vpop.f32.mrf.mxu3 }
 0x25c   :  { %7499 = vpow2.f32 %v6740_v37  ;;  %v1909_v22 = vadd.f32 %v1908_v62, %v1895_v38 }
 0x25d   :  { %v1884_v54 = vpop.f32.mrf.mxu1  ;;  %v1897_v19 = vpop.f32.mrf.mxu2 }
 0x25e   :  { %v1919_v43 = vadd.f32 %v1909_v22, %v493_v7 }
 0x260   :  { %v6741_v53 = vmul.f32 -1.442695, %v1919_v43 }
 0x262   :  { %v7500_v41 = vpop.eup %7499  ;;  %7501 = vpow2.f32 %v6741_v53 }
 0x263   :  { %v2004_v16 = vadd.f32 1.0, %v7500_v41  ;;  %v1910_v28 = vpop.f32.mrf.mxu3 }
 0x265   :  { %7503 = vrcp.f32 %v2004_v16  ;;  %v2017_v32 = vand.u32 2147483648, %v2004_v16  ;;  %v2015_v38 = vand.u32 2147483647, %v2004_v16  ;;  %vm2011_vm10 = vweird.f32 %v2004_v16 }
 0x267   :  { %v2018_v23 = vor.u32 1.1754944e-38, %v2017_v32  ;;  %vm2016_vm12 = vcmp.eq.f32.partialorder %v2015_v38, 8.507059e+37  ;;  %v12946_v32 = vld [vmem:[#allocation100_spill] sm:$0xff]  ;;  %v12948_v38 = vld [vmem:[#allocation113_spill] sm:$0xff] }
 0x268   :  { %v7502_v2 = vpop.eup %7501 }
 0x269   :  { %v2005_v58 = vadd.f32 1.0, %v7502_v2 }
 0x26b   :  { %v7504_v17 = vpop.eup %7503  ;;  %7505 = vrcp.f32 %v2005_v58  ;;  %v2032_v7 = vand.u32 2147483648, %v2005_v58  ;;  %v2030_v19 = vand.u32 2147483647, %v2005_v58  ;;  %vm2026_vm14 = vweird.f32 %v2005_v58 }
 0x26c   :  { %v2007_v47 = vmul.f32 %v7504_v17, %v2004_v16  ;;  %7507 = vtanh.f32 %v9842_v1  ;;  %vm2012_vm9 = vweird.f32 %v7504_v17 }
 0x26d   :  { %vm2013_vm11 = vmor %vm2011_vm10, %vm2012_vm9  ;;  %7509 = vtanh.f32 %v9845_v15  ;;  %v2033_v41 = vor.u32 1.1754944e-38, %v2032_v7  ;;  %vm2031_vm0 = vcmp.eq.f32.partialorder %v2030_v19, 8.507059e+37  ;;  %v12957_v7 = vld [vmem:[#allocation127_spill] sm:$0xff]  ;;  %v12959_v19 = vld [vmem:[#allocation116_spill] sm:$0xff] }
 0x26e   :  { %v2008_v42 = vsub.f32 1.0, %v2007_v47 }
 0x270   :  { %v2009_v14 = vmul.f32 %v7504_v17, %v2008_v42  ;;  %v12945_v42 = vld [vmem:[#allocation98_spill] sm:$0xff] }
 0x271   :  { %v7506_v57 = vpop.eup %7505 }
 0x272   :  { %v2010_v13 = vadd.f32 %v7504_v17, %v2009_v14  ;;  %v2022_v18 = vmul.f32 %v7506_v57, %v2005_v58  ;;  %v7508_v62 = vpop.eup %7507  ;;  %vm2027_vm13 = vweird.f32 %v7506_v57  ;;  %v12944_v58 = vld [vmem:[#allocation105_spill] sm:$0xff]  ;;  %v12947_v14 = vld [vmem:[#allocation111_spill] sm:$0xff] }
 0x273   :  { %vm2028_vm15 = vmor %vm2026_vm14, %vm2027_vm13  ;;  %v7510_v28 = vpop.eup %7509 }
 0x274   :  { %v2014_v26 = vsel %vm2013_vm11, %v7504_v17, %v2010_v13  ;;  %v2023_v37 = vsub.f32 1.0, %v2022_v18  ;;  %v12950_v13 = vld [vmem:[#allocation106_spill] sm:$0xff]  ;;  %v12951_v18 = vld [vmem:[#allocation115_spill] sm:$0xff] }
 0x275   :  { %v2019_v45 = vsel %vm2016_vm12, %v2018_v23, %v2014_v26  ;;  %v12952_v23 = vld [vmem:[#allocation117_spill] sm:$0xff]  ;;  %v12953_v26 = vld [vmem:[#allocation120_spill] sm:$0xff] }
 0x276   :  { %v9853_v22 = vmul.f32 %v7508_v62, %v2019_v45  ;;  %v2024_v54 = vmul.f32 %v7506_v57, %v2023_v37  ;;  %v12954_v37 = vld [vmem:[#allocation123_spill] sm:$0xff]  ;;  %v12955_v62 = vld [vmem:[#allocation112_spill] sm:$0xff]  ;;  %v12956_v45 = vld [vmem:[#allocation114_spill] sm:$0xff] }
 0x278   :  { %12942 = vst [vmem:[#allocation78_spill] sm:$0xff] %v9853_v22  ;;  %v9857_v43 = vpack.c.bf16 %v9853_v22, %v9853_v22  ;;  %v2025_v53 = vadd.f32 %v7506_v57, %v2024_v54  ;;  %v12958_v54 = vld [vmem:[#allocation129_spill] sm:$0xff]  ;;  %v12966_v22 = vld [vmem:[#allocation139_spill] sm:$0xff] }
 0x27a   :  { %v2029_v16 = vsel %vm2028_vm15, %v7506_v57, %v2025_v53  ;;  %2066 = vmatmul.bf16.vlgmr.msra.gmra.mxu0 %v9857_v43  ;;  %2092 = vmatmul.bf16.vlgmr.msra.gmra.mxu2 %v9857_v43  ;;  %v12949_v57 = vld [vmem:[#allocation104_spill] sm:$0xff]  ;;  %v12960_v53 = vld [vmem:[#allocation119_spill] sm:$0xff] }
 0x27b   :  { %v2034_v2 = vsel %vm2031_vm0, %v2033_v41, %v2029_v16  ;;  %2162 = vmatpush.bf16.msra.mxu0 %v12824_v51  ;;  %2188 = vmatpush.bf16.msra.mxu2 %v12825_v49  ;;  %v12961_v41 = vld [vmem:[#allocation122_spill] sm:$0xff]  ;;  %v12962_v16 = vld [vmem:[#allocation125_spill] sm:$0xff] }
 0x27c   :  { %v9863_v17 = vmul.f32 %v7510_v28, %v2034_v2  ;;  %v12963_v28 = vld [vmem:[#allocation131_spill] sm:$0xff] }
 0x27d   :  { %v12964_v2 = vld [vmem:[#allocation135_spill] sm:$0xff] }
 0x27e   :  { %12943 = vst [vmem:[#allocation80_spill] sm:$0xff] %v9863_v17  ;;  %v9867_v47 = vpack.c.bf16 %v9863_v17, %v9863_v17  ;;  %v12965_v17 = vld [vmem:[#allocation130_spill] sm:$0xff] }
 0x27f   :  { %2163 = vmatpush.bf16.msra.mxu0 %v12827_v59  ;;  %2189 = vmatpush.bf16.msra.mxu2 %v12828_v27 }
 0x280   :  { %2079 = vmatmul.bf16.vlgmr.msra.gmra.mxu1 %v9867_v47  ;;  %2105 = vmatmul.bf16.vlgmr.msra.gmra.mxu3 %v9867_v47 }
 0x281   :  { %2175 = vmatpush.bf16.msra.mxu1 %v12829_v61  ;;  %2201 = vmatpush.bf16.msra.mxu3 %v12830_v8 }
 0x283   :  { %2164 = vmatpush.bf16.msra.mxu0 %v12831_v52  ;;  %2190 = vmatpush.bf16.msra.mxu2 %v12832_v56 }
 0x285   :  { %2176 = vmatpush.bf16.msra.mxu1 %v12833_v36  ;;  %2202 = vmatpush.bf16.msra.mxu3 %v12834_v24 }
 0x287   :  { %2165 = vmatpush.bf16.msra.mxu0 %v12835_v3  ;;  %2191 = vmatpush.bf16.msra.mxu2 %v12836_v29 }
 0x289   :  { %2177 = vmatpush.bf16.msra.mxu1 %v12837_v33  ;;  %2203 = vmatpush.bf16.msra.mxu3 %v12838_v63 }
 0x28a   :  { %2118 = vmatmul.bf16.vlgmr.msrb.gmra.mxu0 %v9857_v43  ;;  %2144 = vmatmul.bf16.vlgmr.msrb.gmra.mxu2 %v9857_v43 }
 0x28b   :  { %2166 = vmatpush.bf16.msra.mxu0 %v12839_v34  ;;  %2192 = vmatpush.bf16.msra.mxu2 %v12840_v60 }
 0x28d   :  { %2178 = vmatpush.bf16.msra.mxu1 %v12841_v5  ;;  %2204 = vmatpush.bf16.msra.mxu3 %v12842_v46 }
 0x28f   :  { %2167 = vmatpush.bf16.msra.mxu0 %v12843_v25  ;;  %2193 = vmatpush.bf16.msra.mxu2 %v12944_v58 }
 0x290   :  { %2131 = vmatmul.bf16.vlgmr.msrb.gmra.mxu1 %v9867_v47  ;;  %2157 = vmatmul.bf16.vlgmr.msrb.gmra.mxu3 %v9867_v47 }
 0x291   :  { %2179 = vmatpush.bf16.msra.mxu1 %v12945_v42  ;;  %2205 = vmatpush.bf16.msra.mxu3 %v12946_v32 }
 0x293   :  { %2168 = vmatpush.bf16.msra.mxu0 %v12947_v14  ;;  %2194 = vmatpush.bf16.msra.mxu2 %v12948_v38 }
 0x295   :  { %2180 = vmatpush.bf16.msra.mxu1 %v12949_v57  ;;  %2206 = vmatpush.bf16.msra.mxu3 %v12950_v13 }
 0x297   :  { %2169 = vmatpush.bf16.msra.mxu0 %v12951_v18  ;;  %2195 = vmatpush.bf16.msra.mxu2 %v12952_v23 }
 0x299   :  { %2181 = vmatpush.bf16.msra.mxu1 %v12955_v62  ;;  %2207 = vmatpush.bf16.msra.mxu3 %v12956_v45 }
 0x29a   :  { %2170 = vmatmul.bf16.vlgmr.msra.gmra.mxu0 %v9857_v43  ;;  %2196 = vmatmul.bf16.vlgmr.msra.gmra.mxu2 %v9857_v43 }
 0x29b   :  { %2214 = vmatpush.bf16.msrb.mxu0 %v12953_v26  ;;  %2240 = vmatpush.bf16.msrb.mxu2 %v12954_v37 }
 0x29d   :  { %2182 = vmatpush.bf16.msra.mxu1 %v12959_v19  ;;  %2208 = vmatpush.bf16.msra.mxu3 %v12960_v53 }
 0x29f   :  { %2215 = vmatpush.bf16.msrb.mxu0 %v12957_v7  ;;  %2241 = vmatpush.bf16.msrb.mxu2 %v12958_v54 }
 0x2a0   :  { %2183 = vmatmul.bf16.vlgmr.msra.gmra.mxu1 %v9867_v47  ;;  %2209 = vmatmul.bf16.vlgmr.msra.gmra.mxu3 %v9867_v47 }
 0x2a1   :  { %2227 = vmatpush.bf16.msrb.mxu1 %v12961_v41  ;;  %2253 = vmatpush.bf16.msrb.mxu3 %v12962_v16  ;;  %v13047_v16 = vld [vmem:[#allocation176_spill] sm:$0xff] }
 0x2a3   :  { %2216 = vmatpush.bf16.msrb.mxu0 %v12963_v28  ;;  %2242 = vmatpush.bf16.msrb.mxu2 %v12964_v2 }
 0x2a5   :  { %2228 = vmatpush.bf16.msrb.mxu1 %v12862_v6  ;;  %2254 = vmatpush.bf16.msrb.mxu3 %v12965_v17 }
 0x2a7   :  { %2217 = vmatpush.bf16.msrb.mxu0 %v12966_v22  ;;  %2243 = vmatpush.bf16.msrb.mxu2 %v12865_v48 }
 0x2a9   :  { %2229 = vmatpush.bf16.msrb.mxu1 %v12866_v0  ;;  %2255 = vmatpush.bf16.msrb.mxu3 %v12867_v30 }
 0x2ab   :  { %2218 = vmatpush.bf16.msrb.mxu0 %v12967_v11  ;;  %2244 = vmatpush.bf16.msrb.mxu2 %v12869_v9 }
 0x2ad   :  { %2230 = vmatpush.bf16.msrb.mxu1 %v12870_v50  ;;  %2256 = vmatpush.bf16.msrb.mxu3 %v12871_v4  ;;  %v12970_v4 = vld [vmem:[#allocation5_spill] sm:$0xff] }
 0x2af   :  { %2219 = vmatpush.bf16.msrb.mxu0 %v12872_v44  ;;  %2245 = vmatpush.bf16.msrb.mxu2 %v9310_v12  ;;  %v12971_v44 = vld [vmem:[#allocation7_spill] sm:$0xff]  ;;  %v12972_v12 = vld [vmem:[#allocation158_spill] sm:$0xff] }
 0x2b1   :  { %2231 = vmatpush.bf16.msrb.mxu1 %v12873_v20  ;;  %2257 = vmatpush.bf16.msrb.mxu3 %v12874_v40  ;;  %v12973_v20 = vld [vmem:[#allocation162_spill] sm:$0xff] }
 0x2b3   :  { %2220 = vmatpush.bf16.msrb.mxu0 %v9340_v55  ;;  %2246 = vmatpush.bf16.msrb.mxu2 %v9351_v39  ;;  %v12974_v39 = vld [vmem:[#allocation9_spill] sm:$0xff] }
 0x2b5   :  { %2232 = vmatpush.bf16.msrb.mxu1 %v9308_v10  ;;  %2258 = vmatpush.bf16.msrb.mxu3 %v12875_v35  ;;  %v12975_v10 = vld [vmem:[#allocation11_spill] sm:$0xff]  ;;  %v12976_v35 = vld [vmem:[#allocation164_spill] sm:$0xff] }
 0x2b7   :  { %2221 = vmatpush.bf16.msrb.mxu0 %v12968_v31  ;;  %2247 = vmatpush.bf16.msrb.mxu2 %v12969_v21  ;;  %v12977_v31 = vld [vmem:[#allocation166_spill] sm:$0xff] }
 0x2b8   :  { %v12978_v21 = vld [vmem:[#allocation6_spill] sm:$0xff] }
 0x2b9   :  { %2233 = vmatpush.bf16.msrb.mxu1 %v12972_v12  ;;  %2259 = vmatpush.bf16.msrb.mxu3 %v12973_v20  ;;  %v12980_v20 = vld [vmem:[#allocation13_spill] sm:$0xff]  ;;  %v12981_v12 = vld [vmem:[#allocation15_spill] sm:$0xff] }
 0x2ba   :  { %2222 = vmatmul.bf16.vlgmr.msrb.gmra.mxu0 %v9857_v43  ;;  %2248 = vmatmul.bf16.vlgmr.msrb.gmra.mxu2 %v9857_v43  ;;  %v12982_v43 = vld [vmem:[#allocation10_spill] sm:$0xff] }
 0x2bb   :  { %2412 = vmatpush.bf16.msra.mxu0 %v12970_v4  ;;  %2438 = vmatpush.bf16.msra.mxu2 %v12971_v44  ;;  %v12979_v4 = vld [vmem:[#allocation8_spill] sm:$0xff]  ;;  %v12989_v44 = vld [vmem:[#allocation23_spill] sm:$0xff] }
 0x2bd   :  { %2234 = vmatpush.bf16.msrb.mxu1 %v12976_v35  ;;  %2260 = vmatpush.bf16.msrb.mxu3 %v12977_v31  ;;  %v12985_v35 = vld [vmem:[#allocation19_spill] sm:$0xff]  ;;  %v12986_v31 = vld [vmem:[#allocation14_spill] sm:$0xff] }
 0x2bf   :  { %2413 = vmatpush.bf16.msra.mxu0 %v12974_v39  ;;  %2439 = vmatpush.bf16.msra.mxu2 %v12975_v10  ;;  %v12983_v39 = vld [vmem:[#allocation12_spill] sm:$0xff]  ;;  %v12984_v10 = vld [vmem:[#allocation17_spill] sm:$0xff] }
 0x2c0   :  { %2235 = vmatmul.bf16.vlgmr.msrb.gmra.mxu1 %v9867_v47  ;;  %2261 = vmatmul.bf16.vlgmr.msrb.gmra.mxu3 %v9867_v47  ;;  %v12990_v47 = vld [vmem:[#allocation18_spill] sm:$0xff] }
 0x2c1   :  { %2425 = vmatpush.bf16.msra.mxu1 %v12978_v21  ;;  %2451 = vmatpush.bf16.msra.mxu3 %v12979_v4  ;;  %v12987_v21 = vld [vmem:[#allocation16_spill] sm:$0xff]  ;;  %v12988_v4 = vld [vmem:[#allocation21_spill] sm:$0xff] }
 0x2c3   :  { %2414 = vmatpush.bf16.msra.mxu0 %v12980_v20  ;;  %2440 = vmatpush.bf16.msra.mxu2 %v12981_v12  ;;  %v12991_v20 = vld [vmem:[#allocation20_spill] sm:$0xff]  ;;  %v12992_v12 = vld [vmem:[#allocation25_spill] sm:$0xff] }
 0x2c5   :  { %2426 = vmatpush.bf16.msra.mxu1 %v12982_v43  ;;  %2452 = vmatpush.bf16.msra.mxu3 %v12983_v39  ;;  %v12993_v43 = vld [vmem:[#allocation27_spill] sm:$0xff]  ;;  %v12994_v39 = vld [vmem:[#allocation22_spill] sm:$0xff] }
 0x2c7   :  { %2415 = vmatpush.bf16.msra.mxu0 %v12984_v10  ;;  %2441 = vmatpush.bf16.msra.mxu2 %v12985_v35  ;;  %v12995_v10 = vld [vmem:[#allocation24_spill] sm:$0xff]  ;;  %v12996_v35 = vld [vmem:[#allocation29_spill] sm:$0xff] }
 0x2c9   :  { %2427 = vmatpush.bf16.msra.mxu1 %v12986_v31  ;;  %2453 = vmatpush.bf16.msra.mxu3 %v12987_v21  ;;  %v12997_v31 = vld [vmem:[#allocation31_spill] sm:$0xff]  ;;  %v12998_v21 = vld [vmem:[#allocation26_spill] sm:$0xff] }
 0x2cb   :  { %2416 = vmatpush.bf16.msra.mxu0 %v12988_v4  ;;  %2442 = vmatpush.bf16.msra.mxu2 %v12989_v44  ;;  %v12999_v4 = vld [vmem:[#allocation28_spill] sm:$0xff]  ;;  %v13000_v44 = vld [vmem:[#allocation33_spill] sm:$0xff] }
 0x2cd   :  { %2428 = vmatpush.bf16.msra.mxu1 %v12990_v47  ;;  %2454 = vmatpush.bf16.msra.mxu3 %v12991_v20  ;;  %v13001_v47 = vld [vmem:[#allocation35_spill] sm:$0xff]  ;;  %v13002_v20 = vld [vmem:[#allocation37_spill] sm:$0xff] }
 0x2cf   :  { %2417 = vmatpush.bf16.msra.mxu0 %v12992_v12  ;;  %2443 = vmatpush.bf16.msra.mxu2 %v12993_v43  ;;  %v13003_v12 = vld [vmem:[#allocation39_spill] sm:$0xff]  ;;  %v13004_v43 = vld [vmem:[#allocation30_spill] sm:$0xff] }
 0x2d1   :  { %2429 = vmatpush.bf16.msra.mxu1 %v12994_v39  ;;  %2455 = vmatpush.bf16.msra.mxu3 %v12995_v10  ;;  %v13005_v39 = vld [vmem:[#allocation32_spill] sm:$0xff]  ;;  %v13006_v10 = vld [vmem:[#allocation41_spill] sm:$0xff] }
 0x2d3   :  { %2418 = vmatpush.bf16.msra.mxu0 %v12996_v35  ;;  %2444 = vmatpush.bf16.msra.mxu2 %v12997_v31  ;;  %v13007_v35 = vld [vmem:[#allocation43_spill] sm:$0xff]  ;;  %v13008_v31 = vld [vmem:[#allocation34_spill] sm:$0xff] }
 0x2d5   :  { %2430 = vmatpush.bf16.msra.mxu1 %v12998_v21  ;;  %2456 = vmatpush.bf16.msra.mxu3 %v12999_v4  ;;  %v13009_v21 = vld [vmem:[#allocation36_spill] sm:$0xff]  ;;  %v13010_v4 = vld [vmem:[#allocation38_spill] sm:$0xff] }
 0x2d7   :  { %2419 = vmatpush.bf16.msra.mxu0 %v13000_v44  ;;  %2445 = vmatpush.bf16.msra.mxu2 %v13001_v47  ;;  %v13011_v44 = vld [vmem:[#allocation40_spill] sm:$0xff]  ;;  %v13012_v47 = vld [vmem:[#allocation45_spill] sm:$0xff] }
 0x2d9   :  { %2431 = vmatpush.bf16.msra.mxu1 %v13004_v43  ;;  %2457 = vmatpush.bf16.msra.mxu3 %v13005_v39  ;;  %v13015_v43 = vld [vmem:[#allocation44_spill] sm:$0xff]  ;;  %v13016_v39 = vld [vmem:[#allocation49_spill] sm:$0xff] }
 0x2db   :  { %2464 = vmatpush.bf16.msrb.mxu0 %v13002_v20  ;;  %2490 = vmatpush.bf16.msrb.mxu2 %v13003_v12  ;;  %v13013_v20 = vld [vmem:[#allocation47_spill] sm:$0xff]  ;;  %v13014_v12 = vld [vmem:[#allocation42_spill] sm:$0xff] }
 0x2dd   :  { %2432 = vmatpush.bf16.msra.mxu1 %v13008_v31  ;;  %2458 = vmatpush.bf16.msra.mxu3 %v13009_v21  ;;  %v13019_v31 = vld [vmem:[#allocation48_spill] sm:$0xff]  ;;  %v13020_v21 = vld [vmem:[#allocation53_spill] sm:$0xff] }
 0x2df   :  { %2465 = vmatpush.bf16.msrb.mxu0 %v13006_v10  ;;  %2491 = vmatpush.bf16.msrb.mxu2 %v13007_v35  ;;  %v13017_v10 = vld [vmem:[#allocation51_spill] sm:$0xff]  ;;  %v13018_v35 = vld [vmem:[#allocation46_spill] sm:$0xff] }
 0x2e1   :  { %2477 = vmatpush.bf16.msrb.mxu1 %v13010_v4  ;;  %2503 = vmatpush.bf16.msrb.mxu3 %v13011_v44  ;;  %v13021_v4 = vld [vmem:[#allocation55_spill] sm:$0xff]  ;;  %v13022_v44 = vld [vmem:[#allocation50_spill] sm:$0xff] }
 0x2e3   :  { %2466 = vmatpush.bf16.msrb.mxu0 %v13012_v47  ;;  %2492 = vmatpush.bf16.msrb.mxu2 %v13013_v20  ;;  %v13023_v47 = vld [vmem:[#allocation52_spill] sm:$0xff]  ;;  %v13024_v20 = vld [vmem:[#allocation57_spill] sm:$0xff] }
 0x2e5   :  { %2478 = vmatpush.bf16.msrb.mxu1 %v13014_v12  ;;  %2504 = vmatpush.bf16.msrb.mxu3 %v13015_v43  ;;  %v13025_v12 = vld [vmem:[#allocation59_spill] sm:$0xff]  ;;  %v13026_v43 = vld [vmem:[#allocation54_spill] sm:$0xff] }
 0x2e7   :  { %2467 = vmatpush.bf16.msrb.mxu0 %v13016_v39  ;;  %2493 = vmatpush.bf16.msrb.mxu2 %v13017_v10  ;;  %v13027_v39 = vld [vmem:[#allocation56_spill] sm:$0xff]  ;;  %v13028_v10 = vld [vmem:[#allocation61_spill] sm:$0xff] }
 0x2e9   :  { %2479 = vmatpush.bf16.msrb.mxu1 %v13018_v35  ;;  %2505 = vmatpush.bf16.msrb.mxu3 %v13019_v31  ;;  %v13029_v35 = vld [vmem:[#allocation63_spill] sm:$0xff]  ;;  %v13030_v31 = vld [vmem:[#allocation58_spill] sm:$0xff] }
 0x2eb   :  { %2468 = vmatpush.bf16.msrb.mxu0 %v13020_v21  ;;  %2494 = vmatpush.bf16.msrb.mxu2 %v13021_v4  ;;  %v13031_v21 = vld [vmem:[#allocation60_spill] sm:$0xff]  ;;  %v13032_v4 = vld [vmem:[#allocation65_spill] sm:$0xff] }
 0x2ed   :  { %2480 = vmatpush.bf16.msrb.mxu1 %v13022_v44  ;;  %2506 = vmatpush.bf16.msrb.mxu3 %v13023_v47  ;;  %v13033_v44 = vld [vmem:[#allocation67_spill] sm:$0xff]  ;;  %v13034_v47 = vld [vmem:[#allocation62_spill] sm:$0xff] }
 0x2ef   :  { %2469 = vmatpush.bf16.msrb.mxu0 %v13024_v20  ;;  %2495 = vmatpush.bf16.msrb.mxu2 %v13025_v12  ;;  %v13035_v20 = vld [vmem:[#allocation64_spill] sm:$0xff]  ;;  %v13036_v12 = vld [vmem:[#allocation66_spill] sm:$0xff] }
 0x2f1   :  { %2481 = vmatpush.bf16.msrb.mxu1 %v13026_v43  ;;  %2507 = vmatpush.bf16.msrb.mxu3 %v13027_v39  ;;  %v13037_v43 = vld [vmem:[#allocation68_spill] sm:$0xff] }
 0x2f3   :  { %2470 = vmatpush.bf16.msrb.mxu0 %v13028_v10  ;;  %2496 = vmatpush.bf16.msrb.mxu2 %v13029_v35 }
 0x2f5   :  { %2482 = vmatpush.bf16.msrb.mxu1 %v13030_v31  ;;  %2508 = vmatpush.bf16.msrb.mxu3 %v13031_v21  ;;  %v13038_v31 = vld [vmem:[#allocation95_spill] sm:$0xff] }
 0x2f7   :  { %2471 = vmatpush.bf16.msrb.mxu0 %v13032_v4  ;;  %2497 = vmatpush.bf16.msrb.mxu2 %v13033_v44  ;;  %v2067_v39 = vpop.f32.mrf.mxu0 }
 0x2f9   :  { %2483 = vmatpush.bf16.msrb.mxu1 %v13034_v47  ;;  %2509 = vmatpush.bf16.msrb.mxu3 %v13035_v20  ;;  %v13039_v47 = vld [vmem:[#allocation97_spill] sm:$0xff] }
 0x2fd   :  { %2484 = vmatpush.bf16.msrb.mxu1 %v13036_v12  ;;  %2510 = vmatpush.bf16.msrb.mxu3 %v13037_v43  ;;  %v2080_v10 = vpop.f32.mrf.mxu1  ;;  %v2093_v55 = vpop.f32.mrf.mxu2 }
 0x2fe   :  { %v2081_v35 = vadd.f32 %v2080_v10, %v2067_v39 }
 0x2ff   :  { %v2069_v40 = vpop.f32.mrf.mxu0 }
 0x300   :  { %v2266_v50 = vadd.f32 %v2081_v35, %v13038_v31  ;;  %v13040_v31 = vld [vmem:[#allocation107_spill] sm:$0xff] }
 0x302   :  { %v6742_v21 = vmul.f32 -1.442695, %v2266_v50 }
 0x303   :  { %v2106_v9 = vpop.f32.mrf.mxu3 }
 0x304   :  { %7511 = vpow2.f32 %v6742_v21  ;;  %v2107_v4 = vadd.f32 %v2106_v9, %v2093_v55 }
 0x305   :  { %v2082_v44 = vpop.f32.mrf.mxu1  ;;  %v2095_v11 = vpop.f32.mrf.mxu2 }
 0x306   :  { %v2267_v30 = vadd.f32 %v2107_v4, %v13039_v47 }
 0x307   :  { %v2119_v20 = vpop.f32.mrf.mxu0 }
 0x308   :  { %v6743_v0 = vmul.f32 -1.442695, %v2267_v30 }
 0x30a   :  { %v7512_v12 = vpop.eup %7511  ;;  %7513 = vpow2.f32 %v6743_v0 }
 0x30b   :  { %v2280_v43 = vadd.f32 1.0, %v7512_v12  ;;  %v2108_v48 = vpop.f32.mrf.mxu3 }
 0x30c   :  { %v13041_v48 = vld [vmem:[#allocation109_spill] sm:$0xff] }
 0x30d   :  { %v2132_v22 = vpop.f32.mrf.mxu1  ;;  %v2145_v17 = vpop.f32.mrf.mxu2  ;;  %7515 = vrcp.f32 %v2280_v43  ;;  %v2291_v2 = vand.u32 2147483647, %v2280_v43  ;;  %vm2287_vm2 = vweird.f32 %v2280_v43 }
 0x30e   :  { %v2133_v10 = vadd.f32 %v2132_v22, %v2119_v20 }
 0x30f   :  { %v2121_v39 = vpop.f32.mrf.mxu0  ;;  %vm10029_vm4 = vcmp.eq.f32.partialorder %v2291_v2, 8.507059e+37 }
 0x310   :  { %v7514_v35 = vpop.eup %7513  ;;  %v2268_v50 = vadd.f32 %v2133_v10, %v13040_v31 }
 0x311   :  { %v10012_v21 = vadd.f32 1.0, %v7514_v35 }
 0x312   :  { %v6744_v55 = vmul.f32 -1.442695, %v2268_v50 }
 0x313   :  { %7517 = vrcp.f32 %v10012_v21  ;;  %v2158_v11 = vpop.f32.mrf.mxu3  ;;  %v7516_v9 = vpop.eup %7515  ;;  %vm2302_vm7 = vweird.f32 %v10012_v21  ;;  %v2306_v2 = vand.u32 2147483647, %v10012_v21 }
 0x314   :  { %7519 = vpow2.f32 %v6744_v55  ;;  %v2159_v30 = vadd.f32 %v2158_v11, %v2145_v17  ;;  %v2283_v4 = vmul.f32 %v7516_v9, %v2280_v43  ;;  %vm2288_vm1 = vweird.f32 %v7516_v9 }
 0x315   :  { %v2134_v0 = vpop.f32.mrf.mxu1  ;;  %v2147_v12 = vpop.f32.mrf.mxu2  ;;  %vm10025_vm3 = vmor %vm2287_vm2, %vm2288_vm1  ;;  %vm2307_vm12 = vcmp.eq.f32.partialorder %v2306_v2, 8.507059e+37 }
 0x316   :  { %v2269_v44 = vadd.f32 %v2159_v30, %v13041_v48  ;;  %v2284_v10 = vsub.f32 1.0, %v2283_v4 }
 0x317   :  { %v2171_v40 = vpop.f32.mrf.mxu0 }
 0x318   :  { %v6745_v20 = vmul.f32 -1.442695, %v2269_v44  ;;  %v2285_v11 = vmul.f32 %v7516_v9, %v2284_v10  ;;  %v13042_v44 = vld [vmem:[#allocation175_spill] sm:$0xff] }
 0x319   :  { %v10016_v22 = vpop.eup %7517 }
 0x31a   :  { %v7520_v47 = vpop.eup %7519  ;;  %7521 = vpow2.f32 %v6745_v20  ;;  %v2298_v31 = vmul.f32 %v10016_v22, %v10012_v21  ;;  %v2293_v20 = vand.u32 2147483648, %v2280_v43  ;;  %vm2303_vm5 = vweird.f32 %v10016_v22 }
 0x31b   :  { %v2318_v39 = vadd.f32 1.0, %v7520_v47  ;;  %v2160_v35 = vpop.f32.mrf.mxu3  ;;  %v2286_v47 = vadd.f32 %v7516_v9, %v2285_v11  ;;  %vm10046_vm9 = vmor %vm2302_vm7, %vm2303_vm5 }
 0x31c   :  { %v2299_v12 = vsub.f32 1.0, %v2298_v31 }
 0x31d   :  { %7523 = vrcp.f32 %v2318_v39  ;;  %v2197_v50 = vpop.f32.mrf.mxu2  ;;  %v2184_v17 = vpop.f32.mrf.mxu1  ;;  %v2329_v43 = vand.u32 2147483647, %v2318_v39  ;;  %vm2325_vm8 = vweird.f32 %v2318_v39 }
 0x31e   :  { %v2185_v55 = vadd.f32 %v2184_v17, %v2171_v40  ;;  %v2300_v40 = vmul.f32 %v10016_v22, %v2299_v12 }
 0x31f   :  { %v2173_v0 = vpop.f32.mrf.mxu0  ;;  %vm2330_vm11 = vcmp.eq.f32.partialorder %v2329_v43, 8.507059e+37 }
 0x320   :  { %v7522_v30 = vpop.eup %7521  ;;  %v2270_v6 = vadd.f32 %v2185_v55, %v13042_v44  ;;  %v2331_v44 = vand.u32 2147483648, %v2318_v39 }
 0x321   :  { %v10020_v48 = vadd.f32 1.0, %v7522_v30  ;;  %v2294_v30 = vor.u32 1.1754944e-38, %v2293_v20  ;;  %v2308_v20 = vand.u32 2147483648, %v10012_v21 }
 0x323   :  { %v7524_v4 = vpop.eup %7523  ;;  %7525 = vrcp.f32 %v10020_v48  ;;  %v2210_v28 = vpop.f32.mrf.mxu3  ;;  %v2346_v55 = vand.u32 2147483648, %v10020_v48  ;;  %vm2340_vm14 = vweird.f32 %v10020_v48 }
 0x324   :  { %v2321_v35 = vmul.f32 %v7524_v4, %v2318_v39  ;;  %7527 = vtanh.f32 %v2270_v6  ;;  %v2211_v10 = vadd.f32 %v2210_v28, %v2197_v50  ;;  %v2290_v6 = vsel %vm10025_vm3, %v7516_v9, %v2286_v47 }
 0x325   :  { %v2199_v17 = vpop.f32.mrf.mxu2  ;;  %v2186_v11 = vpop.f32.mrf.mxu1  ;;  %vm2326_vm6 = vweird.f32 %v7524_v4  ;;  %v2301_v50 = vadd.f32 %v10016_v22, %v2300_v40 }
 0x326   :  { %v2322_v31 = vsub.f32 1.0, %v2321_v35  ;;  %v2271_v12 = vadd.f32 %v2211_v10, %v13047_v16  ;;  %v2295_v16 = vsel %vm10029_vm4, %v2294_v30, %v2290_v6  ;;  %vm2327_vm10 = vmor %vm2325_vm8, %vm2326_vm6  ;;  %v2332_v10 = vor.u32 1.1754944e-38, %v2331_v44 }
 0x327   :  { %v2305_v39 = vsel %vm10046_vm9, %v10016_v22, %v2301_v50  ;;  %v2309_v6 = vor.u32 1.1754944e-38, %v2308_v20  ;;  %v2344_v44 = vand.u32 2147483647, %v10020_v48  ;;  %v2347_v50 = vor.u32 1.1754944e-38, %v2346_v55 }
 0x328   :  { %v2323_v28 = vmul.f32 %v7524_v4, %v2322_v31  ;;  %7529 = vtanh.f32 %v2271_v12 }
 0x329   :  { %v7526_v35 = vpop.eup %7525  ;;  %vm2345_vm0 = vcmp.eq.f32.partialorder %v2344_v44, 8.507059e+37 }
 0x32a   :  { %v7528_v17 = vpop.eup %7527  ;;  %v2336_v9 = vmul.f32 %v7526_v35, %v10020_v48  ;;  %v2324_v47 = vadd.f32 %v7524_v4, %v2323_v28  ;;  %vm2341_vm13 = vweird.f32 %v7526_v35 }
 0x32b   :  { %v2392_v31 = vmul.f32 %v7528_v17, %v2295_v16  ;;  %v2212_v11 = vpop.f32.mrf.mxu3  ;;  %vm2342_vm15 = vmor %vm2340_vm14, %vm2341_vm13 }
 0x32c   :  { %v2337_v0 = vsub.f32 1.0, %v2336_v9  ;;  %v2328_v21 = vsel %vm2327_vm10, %v7524_v4, %v2324_v47  ;;  %v2310_v9 = vsel %vm2307_vm12, %v2309_v6, %v2305_v39  ;;  %v13050_v39 = vld [vmem:[#allocation179_spill] sm:$0xff] }
 0x32d   :  { %v2333_v30 = vsel %vm2330_vm11, %v2332_v10, %v2328_v21 }
 0x32e   :  { %v2338_v12 = vmul.f32 %v7526_v35, %v2337_v0  ;;  %v2390_v28 = vmul.f32 %v2333_v30, %v9842_v1  ;;  %v7530_v17 = vpop.eup %7529 }
 0x32f   :  { %v2393_v22 = vmul.f32 %v7530_v17, %v2310_v9 }
 0x330   :  { %v10057_v4 = vadd.f32 %v2392_v31, %v2390_v28  ;;  %v2339_v43 = vadd.f32 %v7526_v35, %v2338_v12 }
 0x332   :  { %v2343_v16 = vsel %vm2342_vm15, %v7526_v35, %v2339_v43  ;;  %v13051_v35 = vld [vmem:[#allocation181_spill] sm:$0xff] }
 0x333   :  { %v2348_v2 = vsel %vm2345_vm0, %v2347_v50, %v2343_v16 }
 0x334   :  { %v2391_v20 = vmul.f32 %v2348_v2, %v9845_v15 }
 0x336   :  { %v10060_v40 = vadd.f32 %v2393_v22, %v2391_v20 }
 0x337   :  { %v2223_v47 = vpop.f32.mrf.mxu0 }
 0x33d   :  { %v2236_v1 = vpop.f32.mrf.mxu1  ;;  %v2249_v10 = vpop.f32.mrf.mxu2 }
 0x33e   :  { %v2237_v0 = vadd.f32 %v2236_v1, %v2223_v47 }
 0x33f   :  { %v2225_v21 = vpop.f32.mrf.mxu0 }
 0x340   :  { %v2272_v48 = vadd.f32 %v2237_v0, %v13050_v39 }
 0x342   :  { %v6746_v31 = vmul.f32 -1.442695, %v2272_v48 }
 0x343   :  { %v2262_v11 = vpop.f32.mrf.mxu3 }
 0x344   :  { %7531 = vpow2.f32 %v6746_v31  ;;  %v2263_v30 = vadd.f32 %v2262_v11, %v2249_v10 }
 0x345   :  { %v2238_v6 = vpop.f32.mrf.mxu1  ;;  %v2251_v55 = vpop.f32.mrf.mxu2 }
 0x346   :  { %v2273_v12 = vadd.f32 %v2263_v30, %v13051_v35 }
 0x348   :  { %v6747_v28 = vmul.f32 -1.442695, %v2273_v12 }
 0x34a   :  { %v7532_v44 = vpop.eup %7531  ;;  %7533 = vpow2.f32 %v6747_v28 }
 0x34b   :  { %v2358_v15 = vadd.f32 1.0, %v7532_v44  ;;  %v2264_v17 = vpop.f32.mrf.mxu3 }
 0x34d   :  { %7535 = vrcp.f32 %v2358_v15  ;;  %v2371_v2 = vand.u32 2147483648, %v2358_v15  ;;  %v2369_v47 = vand.u32 2147483647, %v2358_v15  ;;  %vm2365_vm2 = vweird.f32 %v2358_v15 }
 0x34f   :  { %v2372_v21 = vor.u32 1.1754944e-38, %v2371_v2  ;;  %vm2370_vm4 = vcmp.eq.f32.partialorder %v2369_v47, 8.507059e+37  ;;  %v13056_v2 = vld [vmem:[#allocation135_spill] sm:$0xff]  ;;  %v13058_v47 = vld [vmem:[#allocation130_spill] sm:$0xff] }
 0x350   :  { %v7534_v9 = vpop.eup %7533 }
 0x351   :  { %v2359_v43 = vadd.f32 1.0, %v7534_v9 }
 0x353   :  { %v7536_v22 = vpop.eup %7535  ;;  %7537 = vrcp.f32 %v2359_v43  ;;  %v2386_v30 = vand.u32 2147483648, %v2359_v43  ;;  %v2384_v35 = vand.u32 2147483647, %v2359_v43  ;;  %vm2380_vm6 = vweird.f32 %v2359_v43 }
 0x354   :  { %v2361_v50 = vmul.f32 %v7536_v22, %v2358_v15  ;;  %7539 = vtanh.f32 %v10057_v4  ;;  %vm2366_vm1 = vweird.f32 %v7536_v22 }
 0x355   :  { %vm2367_vm3 = vmor %vm2365_vm2, %vm2366_vm1  ;;  %7541 = vtanh.f32 %v10060_v40  ;;  %v2387_v44 = vor.u32 1.1754944e-38, %v2386_v30  ;;  %vm2385_vm8 = vcmp.eq.f32.partialorder %v2384_v35, 8.507059e+37  ;;  %v13067_v30 = vld [vmem:[#allocation151_spill] sm:$0xff]  ;;  %v13069_v35 = vld [vmem:[#allocation146_spill] sm:$0xff] }
 0x356   :  { %v2362_v16 = vsub.f32 1.0, %v2361_v50 }
 0x358   :  { %v2363_v20 = vmul.f32 %v7536_v22, %v2362_v16  ;;  %v13055_v16 = vld [vmem:[#allocation131_spill] sm:$0xff] }
 0x359   :  { %v7538_v1 = vpop.eup %7537 }
 0x35a   :  { %v2364_v10 = vadd.f32 %v7536_v22, %v2363_v20  ;;  %v2376_v0 = vmul.f32 %v7538_v1, %v2359_v43  ;;  %v7540_v31 = vpop.eup %7539  ;;  %vm2381_vm5 = vweird.f32 %v7538_v1  ;;  %v13054_v43 = vld [vmem:[#allocation125_spill] sm:$0xff]  ;;  %v13057_v20 = vld [vmem:[#allocation128_spill] sm:$0xff] }
 0x35b   :  { %vm2382_vm7 = vmor %vm2380_vm6, %vm2381_vm5  ;;  %v7542_v17 = vpop.eup %7541 }
 0x35c   :  { %v2368_v39 = vsel %vm2367_vm3, %v7536_v22, %v2364_v10  ;;  %v2377_v48 = vsub.f32 1.0, %v2376_v0  ;;  %v13060_v10 = vld [vmem:[#allocation141_spill] sm:$0xff]  ;;  %v13061_v0 = vld [vmem:[#allocation134_spill] sm:$0xff] }
 0x35d   :  { %v2373_v11 = vsel %vm2370_vm4, %v2372_v21, %v2368_v39  ;;  %v13062_v21 = vld [vmem:[#allocation138_spill] sm:$0xff]  ;;  %v13063_v39 = vld [vmem:[#allocation144_spill] sm:$0xff] }
 0x35e   :  { %v10066_v6 = vmul.f32 %v7540_v31, %v2373_v11  ;;  %v2378_v55 = vmul.f32 %v7538_v1, %v2377_v48  ;;  %v13064_v48 = vld [vmem:[#allocation147_spill] sm:$0xff]  ;;  %v13065_v31 = vld [vmem:[#allocation140_spill] sm:$0xff]  ;;  %v13066_v11 = vld [vmem:[#allocation142_spill] sm:$0xff] }
 0x360   :  { %13052 = vst [vmem:[#allocation71_spill] sm:$0xff] %v10066_v6  ;;  %v10070_v12 = vpack.c.bf16 %v10066_v6, %v10066_v6  ;;  %v2379_v28 = vadd.f32 %v7538_v1, %v2378_v55  ;;  %v13068_v55 = vld [vmem:[#allocation153_spill] sm:$0xff] }
 0x361   :  { %v13076_v6 = vld [vmem:[#allocation165_spill] sm:$0xff] }
 0x362   :  { %v2383_v15 = vsel %vm2382_vm7, %v7538_v1, %v2379_v28  ;;  %2420 = vmatmul.bf16.vlgmr.msra.gmra.mxu0 %v10070_v12  ;;  %2446 = vmatmul.bf16.vlgmr.msra.gmra.mxu2 %v10070_v12  ;;  %v13059_v1 = vld [vmem:[#allocation139_spill] sm:$0xff]  ;;  %v13070_v28 = vld [vmem:[#allocation149_spill] sm:$0xff] }
 0x363   :  { %v2388_v9 = vsel %vm2385_vm8, %v2387_v44, %v2383_v15  ;;  %2516 = vmatpush.bf16.msra.mxu0 %v12824_v51  ;;  %2542 = vmatpush.bf16.msra.mxu2 %v12825_v49  ;;  %v13071_v44 = vld [vmem:[#allocation155_spill] sm:$0xff] }
 0x364   :  { %v10076_v22 = vmul.f32 %v7542_v17, %v2388_v9  ;;  %v13072_v15 = vld [vmem:[#allocation159_spill] sm:$0xff]  ;;  %v13073_v17 = vld [vmem:[#allocation152_spill] sm:$0xff]  ;;  %v13074_v9 = vld [vmem:[#allocation154_spill] sm:$0xff] }
 0x366   :  { %13053 = vst [vmem:[#allocation73_spill] sm:$0xff] %v10076_v22  ;;  %v10080_v50 = vpack.c.bf16 %v10076_v22, %v10076_v22  ;;  %v13075_v22 = vld [vmem:[#allocation163_spill] sm:$0xff] }
 0x367   :  { %2517 = vmatpush.bf16.msra.mxu0 %v12827_v59  ;;  %2543 = vmatpush.bf16.msra.mxu2 %v12828_v27 }
 0x368   :  { %2433 = vmatmul.bf16.vlgmr.msra.gmra.mxu1 %v10080_v50  ;;  %2459 = vmatmul.bf16.vlgmr.msra.gmra.mxu3 %v10080_v50 }
 0x369   :  { %2529 = vmatpush.bf16.msra.mxu1 %v12829_v61  ;;  %2555 = vmatpush.bf16.msra.mxu3 %v12830_v8 }
 0x36b   :  { %2518 = vmatpush.bf16.msra.mxu0 %v12831_v52  ;;  %2544 = vmatpush.bf16.msra.mxu2 %v12832_v56 }
 0x36d   :  { %2530 = vmatpush.bf16.msra.mxu1 %v12833_v36  ;;  %2556 = vmatpush.bf16.msra.mxu3 %v12834_v24 }
 0x36f   :  { %2519 = vmatpush.bf16.msra.mxu0 %v12835_v3  ;;  %2545 = vmatpush.bf16.msra.mxu2 %v12836_v29 }
 0x371   :  { %2531 = vmatpush.bf16.msra.mxu1 %v12837_v33  ;;  %2557 = vmatpush.bf16.msra.mxu3 %v12838_v63 }
 0x372   :  { %2472 = vmatmul.bf16.vlgmr.msrb.gmra.mxu0 %v10070_v12  ;;  %2498 = vmatmul.bf16.vlgmr.msrb.gmra.mxu2 %v10070_v12 }
 0x373   :  { %2520 = vmatpush.bf16.msra.mxu0 %v12839_v34  ;;  %2546 = vmatpush.bf16.msra.mxu2 %v12840_v60 }
 0x375   :  { %2532 = vmatpush.bf16.msra.mxu1 %v12841_v5  ;;  %2558 = vmatpush.bf16.msra.mxu3 %v12842_v46 }
 0x377   :  { %2521 = vmatpush.bf16.msra.mxu0 %v12843_v25  ;;  %2547 = vmatpush.bf16.msra.mxu2 %v12944_v58 }
 0x378   :  { %2485 = vmatmul.bf16.vlgmr.msrb.gmra.mxu1 %v10080_v50  ;;  %2511 = vmatmul.bf16.vlgmr.msrb.gmra.mxu3 %v10080_v50 }
 0x379   :  { %2533 = vmatpush.bf16.msra.mxu1 %v12945_v42  ;;  %2559 = vmatpush.bf16.msra.mxu3 %v12946_v32 }
 0x37b   :  { %2522 = vmatpush.bf16.msra.mxu0 %v12947_v14  ;;  %2548 = vmatpush.bf16.msra.mxu2 %v12948_v38 }
 0x37d   :  { %2534 = vmatpush.bf16.msra.mxu1 %v12949_v57  ;;  %2560 = vmatpush.bf16.msra.mxu3 %v12950_v13 }
 0x37f   :  { %2523 = vmatpush.bf16.msra.mxu0 %v12951_v18  ;;  %2549 = vmatpush.bf16.msra.mxu2 %v12952_v23 }
 0x381   :  { %2535 = vmatpush.bf16.msra.mxu1 %v12955_v62  ;;  %2561 = vmatpush.bf16.msra.mxu3 %v12956_v45 }
 0x382   :  { %2524 = vmatmul.bf16.vlgmr.msra.gmra.mxu0 %v10070_v12  ;;  %2550 = vmatmul.bf16.vlgmr.msra.gmra.mxu2 %v10070_v12 }
 0x383   :  { %2568 = vmatpush.bf16.msrb.mxu0 %v12953_v26  ;;  %2594 = vmatpush.bf16.msrb.mxu2 %v12954_v37 }
 0x385   :  { %2536 = vmatpush.bf16.msra.mxu1 %v12959_v19  ;;  %2562 = vmatpush.bf16.msra.mxu3 %v12960_v53 }
 0x387   :  { %2569 = vmatpush.bf16.msrb.mxu0 %v12957_v7  ;;  %2595 = vmatpush.bf16.msrb.mxu2 %v12958_v54 }
 0x388   :  { %2537 = vmatmul.bf16.vlgmr.msra.gmra.mxu1 %v10080_v50  ;;  %2563 = vmatmul.bf16.vlgmr.msra.gmra.mxu3 %v10080_v50 }
 0x389   :  { %2581 = vmatpush.bf16.msrb.mxu1 %v12961_v41  ;;  %2607 = vmatpush.bf16.msrb.mxu3 %v13054_v43 }
 0x38b   :  { %2570 = vmatpush.bf16.msrb.mxu0 %v13055_v16  ;;  %2596 = vmatpush.bf16.msrb.mxu2 %v13056_v2 }
 0x38d   :  { %2582 = vmatpush.bf16.msrb.mxu1 %v13057_v20  ;;  %2608 = vmatpush.bf16.msrb.mxu3 %v13058_v47 }
 0x38f   :  { %2571 = vmatpush.bf16.msrb.mxu0 %v13059_v1  ;;  %2597 = vmatpush.bf16.msrb.mxu2 %v13060_v10 }
 0x391   :  { %2583 = vmatpush.bf16.msrb.mxu1 %v13061_v0  ;;  %2609 = vmatpush.bf16.msrb.mxu3 %v13062_v21  ;;  %v13148_v21 = vld [vmem:[#allocation110_spill] sm:$0xff] }
 0x393   :  { %2572 = vmatpush.bf16.msrb.mxu0 %v13063_v39  ;;  %2598 = vmatpush.bf16.msrb.mxu2 %v13064_v48 }
 0x395   :  { %2584 = vmatpush.bf16.msrb.mxu1 %v13065_v31  ;;  %2610 = vmatpush.bf16.msrb.mxu3 %v13066_v11  ;;  %v13077_v11 = vld [vmem:[#allocation5_spill] sm:$0xff] }
 0x397   :  { %2573 = vmatpush.bf16.msrb.mxu0 %v13067_v30  ;;  %2599 = vmatpush.bf16.msrb.mxu2 %v13068_v55  ;;  %v13078_v30 = vld [vmem:[#allocation7_spill] sm:$0xff]  ;;  %v13079_v55 = vld [vmem:[#allocation158_spill] sm:$0xff] }
 0x399   :  { %2585 = vmatpush.bf16.msrb.mxu1 %v13069_v35  ;;  %2611 = vmatpush.bf16.msrb.mxu3 %v13070_v28  ;;  %v13080_v35 = vld [vmem:[#allocation162_spill] sm:$0xff]  ;;  %v13146_v28 = vld [vmem:[#allocation108_spill] sm:$0xff] }
 0x39b   :  { %2574 = vmatpush.bf16.msrb.mxu0 %v13071_v44  ;;  %2600 = vmatpush.bf16.msrb.mxu2 %v13072_v15  ;;  %v13081_v15 = vld [vmem:[#allocation9_spill] sm:$0xff] }
 0x39d   :  { %2586 = vmatpush.bf16.msrb.mxu1 %v13073_v17  ;;  %2612 = vmatpush.bf16.msrb.mxu3 %v13074_v9  ;;  %v13082_v17 = vld [vmem:[#allocation11_spill] sm:$0xff]  ;;  %v13083_v9 = vld [vmem:[#allocation164_spill] sm:$0xff] }
 0x39f   :  { %2575 = vmatpush.bf16.msrb.mxu0 %v13075_v22  ;;  %2601 = vmatpush.bf16.msrb.mxu2 %v13076_v6  ;;  %v13084_v22 = vld [vmem:[#allocation166_spill] sm:$0xff] }
 0x3a0   :  { %v13085_v6 = vld [vmem:[#allocation6_spill] sm:$0xff] }
 0x3a1   :  { %2587 = vmatpush.bf16.msrb.mxu1 %v13079_v55  ;;  %2613 = vmatpush.bf16.msrb.mxu3 %v13080_v35  ;;  %v13087_v35 = vld [vmem:[#allocation13_spill] sm:$0xff]  ;;  %v13088_v55 = vld [vmem:[#allocation15_spill] sm:$0xff] }
 0x3a2   :  { %2576 = vmatmul.bf16.vlgmr.msrb.gmra.mxu0 %v10070_v12  ;;  %2602 = vmatmul.bf16.vlgmr.msrb.gmra.mxu2 %v10070_v12  ;;  %v13089_v12 = vld [vmem:[#allocation10_spill] sm:$0xff] }
 0x3a3   :  { %2766 = vmatpush.bf16.msra.mxu0 %v13077_v11  ;;  %2792 = vmatpush.bf16.msra.mxu2 %v13078_v30  ;;  %v13086_v11 = vld [vmem:[#allocation8_spill] sm:$0xff]  ;;  %v13096_v30 = vld [vmem:[#allocation23_spill] sm:$0xff] }
 0x3a5   :  { %2588 = vmatpush.bf16.msrb.mxu1 %v13083_v9  ;;  %2614 = vmatpush.bf16.msrb.mxu3 %v13084_v22  ;;  %v13092_v9 = vld [vmem:[#allocation19_spill] sm:$0xff]  ;;  %v13093_v22 = vld [vmem:[#allocation14_spill] sm:$0xff] }
 0x3a7   :  { %2767 = vmatpush.bf16.msra.mxu0 %v13081_v15  ;;  %2793 = vmatpush.bf16.msra.mxu2 %v13082_v17  ;;  %v13090_v15 = vld [vmem:[#allocation12_spill] sm:$0xff]  ;;  %v13091_v17 = vld [vmem:[#allocation17_spill] sm:$0xff] }
 0x3a8   :  { %2589 = vmatmul.bf16.vlgmr.msrb.gmra.mxu1 %v10080_v50  ;;  %2615 = vmatmul.bf16.vlgmr.msrb.gmra.mxu3 %v10080_v50  ;;  %v13097_v50 = vld [vmem:[#allocation18_spill] sm:$0xff] }
 0x3a9   :  { %2779 = vmatpush.bf16.msra.mxu1 %v13085_v6  ;;  %2805 = vmatpush.bf16.msra.mxu3 %v13086_v11  ;;  %v13094_v6 = vld [vmem:[#allocation16_spill] sm:$0xff]  ;;  %v13095_v11 = vld [vmem:[#allocation21_spill] sm:$0xff] }
 0x3ab   :  { %2768 = vmatpush.bf16.msra.mxu0 %v13087_v35  ;;  %2794 = vmatpush.bf16.msra.mxu2 %v13088_v55  ;;  %v13098_v35 = vld [vmem:[#allocation20_spill] sm:$0xff]  ;;  %v13099_v55 = vld [vmem:[#allocation25_spill] sm:$0xff] }
 0x3ad   :  { %2780 = vmatpush.bf16.msra.mxu1 %v13089_v12  ;;  %2806 = vmatpush.bf16.msra.mxu3 %v13090_v15  ;;  %v13100_v12 = vld [vmem:[#allocation27_spill] sm:$0xff]  ;;  %v13101_v15 = vld [vmem:[#allocation22_spill] sm:$0xff] }
 0x3af   :  { %2769 = vmatpush.bf16.msra.mxu0 %v13091_v17  ;;  %2795 = vmatpush.bf16.msra.mxu2 %v13092_v9  ;;  %v13102_v17 = vld [vmem:[#allocation24_spill] sm:$0xff]  ;;  %v13103_v9 = vld [vmem:[#allocation29_spill] sm:$0xff] }
 0x3b1   :  { %2781 = vmatpush.bf16.msra.mxu1 %v13093_v22  ;;  %2807 = vmatpush.bf16.msra.mxu3 %v13094_v6  ;;  %v13104_v22 = vld [vmem:[#allocation31_spill] sm:$0xff]  ;;  %v13105_v6 = vld [vmem:[#allocation26_spill] sm:$0xff] }
 0x3b3   :  { %2770 = vmatpush.bf16.msra.mxu0 %v13095_v11  ;;  %2796 = vmatpush.bf16.msra.mxu2 %v13096_v30  ;;  %v13106_v11 = vld [vmem:[#allocation28_spill] sm:$0xff]  ;;  %v13107_v30 = vld [vmem:[#allocation33_spill] sm:$0xff] }
 0x3b5   :  { %2782 = vmatpush.bf16.msra.mxu1 %v13097_v50  ;;  %2808 = vmatpush.bf16.msra.mxu3 %v13098_v35  ;;  %v13108_v50 = vld [vmem:[#allocation35_spill] sm:$0xff]  ;;  %v13109_v35 = vld [vmem:[#allocation37_spill] sm:$0xff] }
 0x3b7   :  { %2771 = vmatpush.bf16.msra.mxu0 %v13099_v55  ;;  %2797 = vmatpush.bf16.msra.mxu2 %v13100_v12  ;;  %v13110_v55 = vld [vmem:[#allocation39_spill] sm:$0xff]  ;;  %v13111_v12 = vld [vmem:[#allocation30_spill] sm:$0xff] }
 0x3b9   :  { %2783 = vmatpush.bf16.msra.mxu1 %v13101_v15  ;;  %2809 = vmatpush.bf16.msra.mxu3 %v13102_v17  ;;  %v13112_v15 = vld [vmem:[#allocation32_spill] sm:$0xff]  ;;  %v13113_v17 = vld [vmem:[#allocation41_spill] sm:$0xff] }
 0x3bb   :  { %2772 = vmatpush.bf16.msra.mxu0 %v13103_v9  ;;  %2798 = vmatpush.bf16.msra.mxu2 %v13104_v22  ;;  %v13114_v9 = vld [vmem:[#allocation43_spill] sm:$0xff]  ;;  %v13115_v22 = vld [vmem:[#allocation34_spill] sm:$0xff] }
 0x3bd   :  { %2784 = vmatpush.bf16.msra.mxu1 %v13105_v6  ;;  %2810 = vmatpush.bf16.msra.mxu3 %v13106_v11  ;;  %v13116_v6 = vld [vmem:[#allocation36_spill] sm:$0xff]  ;;  %v13117_v11 = vld [vmem:[#allocation38_spill] sm:$0xff] }
 0x3bf   :  { %2773 = vmatpush.bf16.msra.mxu0 %v13107_v30  ;;  %2799 = vmatpush.bf16.msra.mxu2 %v13108_v50  ;;  %v13118_v30 = vld [vmem:[#allocation40_spill] sm:$0xff]  ;;  %v13119_v50 = vld [vmem:[#allocation45_spill] sm:$0xff] }
 0x3c1   :  { %2785 = vmatpush.bf16.msra.mxu1 %v13111_v12  ;;  %2811 = vmatpush.bf16.msra.mxu3 %v13112_v15  ;;  %v13122_v12 = vld [vmem:[#allocation44_spill] sm:$0xff]  ;;  %v13123_v15 = vld [vmem:[#allocation49_spill] sm:$0xff] }
 0x3c3   :  { %2818 = vmatpush.bf16.msrb.mxu0 %v13109_v35  ;;  %2844 = vmatpush.bf16.msrb.mxu2 %v13110_v55  ;;  %v13120_v35 = vld [vmem:[#allocation47_spill] sm:$0xff]  ;;  %v13121_v55 = vld [vmem:[#allocation42_spill] sm:$0xff] }
 0x3c5   :  { %2786 = vmatpush.bf16.msra.mxu1 %v13115_v22  ;;  %2812 = vmatpush.bf16.msra.mxu3 %v13116_v6  ;;  %v13126_v22 = vld [vmem:[#allocation48_spill] sm:$0xff]  ;;  %v13127_v6 = vld [vmem:[#allocation53_spill] sm:$0xff] }
 0x3c7   :  { %2819 = vmatpush.bf16.msrb.mxu0 %v13113_v17  ;;  %2845 = vmatpush.bf16.msrb.mxu2 %v13114_v9  ;;  %v13124_v17 = vld [vmem:[#allocation51_spill] sm:$0xff]  ;;  %v13125_v9 = vld [vmem:[#allocation46_spill] sm:$0xff] }
 0x3c9   :  { %2831 = vmatpush.bf16.msrb.mxu1 %v13117_v11  ;;  %2857 = vmatpush.bf16.msrb.mxu3 %v13118_v30  ;;  %v13128_v11 = vld [vmem:[#allocation55_spill] sm:$0xff]  ;;  %v13129_v30 = vld [vmem:[#allocation50_spill] sm:$0xff] }
 0x3cb   :  { %2820 = vmatpush.bf16.msrb.mxu0 %v13119_v50  ;;  %2846 = vmatpush.bf16.msrb.mxu2 %v13120_v35  ;;  %v13130_v50 = vld [vmem:[#allocation52_spill] sm:$0xff]  ;;  %v13131_v35 = vld [vmem:[#allocation57_spill] sm:$0xff] }
 0x3cd   :  { %2832 = vmatpush.bf16.msrb.mxu1 %v13121_v55  ;;  %2858 = vmatpush.bf16.msrb.mxu3 %v13122_v12  ;;  %v13132_v55 = vld [vmem:[#allocation59_spill] sm:$0xff]  ;;  %v13133_v12 = vld [vmem:[#allocation54_spill] sm:$0xff] }
 0x3cf   :  { %2821 = vmatpush.bf16.msrb.mxu0 %v13123_v15  ;;  %2847 = vmatpush.bf16.msrb.mxu2 %v13124_v17  ;;  %v13134_v15 = vld [vmem:[#allocation56_spill] sm:$0xff]  ;;  %v13135_v17 = vld [vmem:[#allocation61_spill] sm:$0xff] }
 0x3d1   :  { %2833 = vmatpush.bf16.msrb.mxu1 %v13125_v9  ;;  %2859 = vmatpush.bf16.msrb.mxu3 %v13126_v22  ;;  %v13136_v9 = vld [vmem:[#allocation63_spill] sm:$0xff]  ;;  %v13137_v22 = vld [vmem:[#allocation58_spill] sm:$0xff] }
 0x3d3   :  { %2822 = vmatpush.bf16.msrb.mxu0 %v13127_v6  ;;  %2848 = vmatpush.bf16.msrb.mxu2 %v13128_v11  ;;  %v13138_v6 = vld [vmem:[#allocation60_spill] sm:$0xff]  ;;  %v13139_v11 = vld [vmem:[#allocation65_spill] sm:$0xff] }
 0x3d5   :  { %2834 = vmatpush.bf16.msrb.mxu1 %v13129_v30  ;;  %2860 = vmatpush.bf16.msrb.mxu3 %v13130_v50  ;;  %v13140_v30 = vld [vmem:[#allocation67_spill] sm:$0xff]  ;;  %v13141_v50 = vld [vmem:[#allocation62_spill] sm:$0xff] }
 0x3d7   :  { %2823 = vmatpush.bf16.msrb.mxu0 %v13131_v35  ;;  %2849 = vmatpush.bf16.msrb.mxu2 %v13132_v55  ;;  %v13142_v35 = vld [vmem:[#allocation64_spill] sm:$0xff]  ;;  %v13143_v55 = vld [vmem:[#allocation66_spill] sm:$0xff] }
 0x3d9   :  { %2835 = vmatpush.bf16.msrb.mxu1 %v13133_v12  ;;  %2861 = vmatpush.bf16.msrb.mxu3 %v13134_v15  ;;  %v13144_v12 = vld [vmem:[#allocation68_spill] sm:$0xff] }
 0x3db   :  { %2824 = vmatpush.bf16.msrb.mxu0 %v13135_v17  ;;  %2850 = vmatpush.bf16.msrb.mxu2 %v13136_v9  ;;  %v13145_v9 = vld [vmem:[#allocation87_spill] sm:$0xff] }
 0x3dd   :  { %2836 = vmatpush.bf16.msrb.mxu1 %v13137_v22  ;;  %2862 = vmatpush.bf16.msrb.mxu3 %v13138_v6  ;;  %v295_v22 = vadd.f32 %v13146_v28, %v13145_v9 }
 0x3df   :  { %2825 = vmatpush.bf16.msrb.mxu0 %v13139_v11  ;;  %2851 = vmatpush.bf16.msrb.mxu2 %v13140_v30  ;;  %v2421_v15 = vpop.f32.mrf.mxu0  ;;  %v13147_v30 = vld [vmem:[#allocation93_spill] sm:$0xff] }
 0x3e1   :  { %2837 = vmatpush.bf16.msrb.mxu1 %v13141_v50  ;;  %2863 = vmatpush.bf16.msrb.mxu3 %v13142_v35  ;;  %v324_v50 = vadd.f32 %v13148_v21, %v13147_v30 }
 0x3e5   :  { %2838 = vmatpush.bf16.msrb.mxu1 %v13143_v55  ;;  %2864 = vmatpush.bf16.msrb.mxu3 %v13144_v12  ;;  %v2434_v17 = vpop.f32.mrf.mxu1  ;;  %v2447_v44 = vpop.f32.mrf.mxu2 }
 0x3e6   :  { %v2435_v31 = vadd.f32 %v2434_v17, %v2421_v15 }
 0x3e7   :  { %v2423_v6 = vpop.f32.mrf.mxu0 }
 0x3e8   :  { %v2620_v48 = vadd.f32 %v2435_v31, %v295_v22  ;;  %v13149_v6 = vld [vmem:[#allocation101_spill] sm:$0xff]  ;;  %v13150_v22 = vld [vmem:[#allocation118_spill] sm:$0xff] }
 0x3ea   :  { %v6748_v11 = vmul.f32 -1.442695, %v2620_v48  ;;  %v353_v48 = vadd.f32 %v13150_v22, %v13149_v6 }
 0x3eb   :  { %v2460_v39 = vpop.f32.mrf.mxu3 }
 0x3ec   :  { %7543 = vpow2.f32 %v6748_v11  ;;  %v2461_v35 = vadd.f32 %v2460_v39, %v2447_v44 }
 0x3ed   :  { %v2436_v0 = vpop.f32.mrf.mxu1  ;;  %v2449_v55 = vpop.f32.mrf.mxu2 }
 0x3ee   :  { %v2621_v10 = vadd.f32 %v2461_v35, %v324_v50 }
 0x3ef   :  { %v2473_v12 = vpop.f32.mrf.mxu0 }
 0x3f0   :  { %v6749_v1 = vmul.f32 -1.442695, %v2621_v10 }
 0x3f2   :  { %v7544_v47 = vpop.eup %7543  ;;  %7545 = vpow2.f32 %v6749_v1 }
 0x3f3   :  { %v2634_v20 = vadd.f32 1.0, %v7544_v47  ;;  %v2462_v2 = vpop.f32.mrf.mxu3  ;;  %v13151_v47 = vld [vmem:[#allocation102_spill] sm:$0xff] }
 0x3f4   :  { %v13152_v2 = vld [vmem:[#allocation121_spill] sm:$0xff] }
 0x3f5   :  { %v2486_v28 = vpop.f32.mrf.mxu1  ;;  %v2499_v15 = vpop.f32.mrf.mxu2  ;;  %7547 = vrcp.f32 %v2634_v20  ;;  %v382_v1 = vadd.f32 %v13152_v2, %v13151_v47  ;;  %v13154_v2 = vld [vmem:[#allocation180_spill] sm:$0xff]  ;;  %vm2641_vm10 = vweird.f32 %v2634_v20 }
 0x3f6   :  { %v2487_v31 = vadd.f32 %v2486_v28, %v2473_v12 }
 0x3f7   :  { %v2475_v17 = vpop.f32.mrf.mxu0 }
 0x3f8   :  { %v7546_v21 = vpop.eup %7545  ;;  %v2622_v11 = vadd.f32 %v2487_v31, %v353_v48 }
 0x3f9   :  { %v10228_v39 = vadd.f32 1.0, %v7546_v21 }
 0x3fa   :  { %v6750_v0 = vmul.f32 -1.442695, %v2622_v11 }
 0x3fb   :  { %7549 = vrcp.f32 %v10228_v39  ;;  %v2512_v10 = vpop.f32.mrf.mxu3  ;;  %v10231_v55 = vpop.eup %7547  ;;  %vm2656_vm15 = vweird.f32 %v10228_v39 }
 0x3fc   :  { %7551 = vpow2.f32 %v6750_v0  ;;  %v2513_v35 = vadd.f32 %v2512_v10, %v2499_v15  ;;  %v2637_v12 = vmul.f32 %v10231_v55, %v2634_v20  ;;  %v13153_v10 = vld [vmem:[#allocation171_spill] sm:$0xff]  ;;  %vm2642_vm9 = vweird.f32 %v10231_v55 }
 0x3fd   :  { %v2488_v44 = vpop.f32.mrf.mxu1  ;;  %v2501_v50 = vpop.f32.mrf.mxu2  ;;  %vm10251_vm11 = vmor %vm2641_vm10, %vm2642_vm9 }
 0x3fe   :  { %v2623_v22 = vadd.f32 %v2513_v35, %v382_v1  ;;  %v2638_v21 = vsub.f32 1.0, %v2637_v12  ;;  %v411_v1 = vadd.f32 %v13154_v2, %v13153_v10  ;;  %v13156_v2 = vld [vmem:[#allocation182_spill] sm:$0xff] }
 0x3ff   :  { %v2525_v28 = vpop.f32.mrf.mxu0 }
 0x400   :  { %v6751_v48 = vmul.f32 -1.442695, %v2623_v22  ;;  %v2639_v44 = vmul.f32 %v10231_v55, %v2638_v21 }
 0x401   :  { %v10236_v31 = vpop.eup %7549 }
 0x402   :  { %v7552_v17 = vpop.eup %7551  ;;  %7553 = vpow2.f32 %v6751_v48  ;;  %v2652_v30 = vmul.f32 %v10236_v31, %v10228_v39  ;;  %v2645_v48 = vand.u32 2147483647, %v2634_v20  ;;  %v2640_v16 = vadd.f32 %v10231_v55, %v2639_v44 }
 0x403   :  { %v2672_v11 = vadd.f32 1.0, %v7552_v17  ;;  %v2514_v6 = vpop.f32.mrf.mxu3  ;;  %vm2657_vm13 = vweird.f32 %v10236_v31 }
 0x404   :  { %v2653_v47 = vsub.f32 1.0, %v2652_v30  ;;  %v2647_v6 = vand.u32 2147483648, %v2634_v20  ;;  %vm10255_vm12 = vcmp.eq.f32.partialorder %v2645_v48, 8.507059e+37  ;;  %v2660_v48 = vand.u32 2147483647, %v10228_v39  ;;  %vm10272_vm1 = vmor %vm2656_vm15, %vm2657_vm13 }
 0x405   :  { %7555 = vrcp.f32 %v2672_v11  ;;  %v2551_v0 = vpop.f32.mrf.mxu2  ;;  %v2538_v15 = vpop.f32.mrf.mxu1  ;;  %v2685_v41 = vand.u32 2147483648, %v2672_v11  ;;  %vm2679_vm0 = vweird.f32 %v2672_v11 }
 0x406   :  { %v2539_v35 = vadd.f32 %v2538_v15, %v2525_v28  ;;  %v2654_v21 = vmul.f32 %v10236_v31, %v2653_v47  ;;  %v13155_v15 = vld [vmem:[#allocation173_spill] sm:$0xff]  ;;  %v2648_v10 = vor.u32 1.1754944e-38, %v2647_v6  ;;  %v2644_v47 = vsel %vm10251_vm11, %v10231_v55, %v2640_v16 }
 0x407   :  { %v2527_v50 = vpop.f32.mrf.mxu0  ;;  %v440_v30 = vadd.f32 %v13156_v2, %v13155_v15  ;;  %v2662_v6 = vand.u32 2147483648, %v10228_v39  ;;  %vm2661_vm4 = vcmp.eq.f32.partialorder %v2660_v48, 8.507059e+37  ;;  %v13192_v15 = vld [vmem:[#allocation165_spill] sm:$0xff] }
 0x408   :  { %v7554_v22 = vpop.eup %7553  ;;  %v2624_v12 = vadd.f32 %v2539_v35, %v411_v1  ;;  %v2649_v55 = vsel %vm10255_vm12, %v2648_v10, %v2644_v47 }
 0x409   :  { %v10243_v9 = vadd.f32 1.0, %v7554_v22  ;;  %v2663_v47 = vor.u32 1.1754944e-38, %v2662_v6 }
 0x40b   :  { %v7556_v17 = vpop.eup %7555  ;;  %7557 = vrcp.f32 %v10243_v9  ;;  %v2564_v28 = vpop.f32.mrf.mxu3  ;;  %v2700_v10 = vand.u32 2147483648, %v10243_v9  ;;  %vm2694_vm6 = vweird.f32 %v10243_v9 }
 0x40c   :  { %v2675_v43 = vmul.f32 %v7556_v17, %v2672_v11  ;;  %7559 = vtanh.f32 %v2624_v12  ;;  %v2565_v50 = vadd.f32 %v2564_v28, %v2551_v0  ;;  %vm2680_vm14 = vweird.f32 %v7556_v17 }
 0x40d   :  { %v2553_v1 = vpop.f32.mrf.mxu2  ;;  %v2540_v12 = vpop.f32.mrf.mxu1  ;;  %v2655_v0 = vadd.f32 %v10236_v31, %v2654_v21  ;;  %vm2681_vm2 = vmor %vm2679_vm0, %vm2680_vm14 }
 0x40e   :  { %v2676_v35 = vsub.f32 1.0, %v2675_v43  ;;  %v2625_v2 = vadd.f32 %v2565_v50, %v440_v30  ;;  %v2683_v43 = vand.u32 2147483647, %v2672_v11  ;;  %v2686_v50 = vor.u32 1.1754944e-38, %v2685_v41 }
 0x40f   :  { %v2659_v11 = vsel %vm10272_vm1, %v10236_v31, %v2655_v0  ;;  %v2698_v41 = vand.u32 2147483647, %v10243_v9  ;;  %v2701_v0 = vor.u32 1.1754944e-38, %v2700_v10  ;;  %v13166_v10 = vld [vmem:[#allocation184_spill] sm:$0xff] }
 0x410   :  { %v2677_v20 = vmul.f32 %v7556_v17, %v2676_v35  ;;  %7561 = vtanh.f32 %v2625_v2  ;;  %vm2684_vm3 = vcmp.eq.f32.partialorder %v2683_v43, 8.507059e+37 }
 0x411   :  { %v7558_v28 = vpop.eup %7557  ;;  %vm2699_vm8 = vcmp.eq.f32.partialorder %v2698_v41, 8.507059e+37 }
 0x412   :  { %v7560_v1 = vpop.eup %7559  ;;  %v2690_v16 = vmul.f32 %v7558_v28, %v10243_v9  ;;  %v2678_v30 = vadd.f32 %v7556_v17, %v2677_v20  ;;  %vm2695_vm5 = vweird.f32 %v7558_v28 }
 0x413   :  { %v2746_v35 = vmul.f32 %v7560_v1, %v2649_v55  ;;  %v2566_v12 = vpop.f32.mrf.mxu3  ;;  %vm2696_vm7 = vmor %vm2694_vm6, %vm2695_vm5 }
 0x414   :  { %v2691_v22 = vsub.f32 1.0, %v2690_v16  ;;  %v2682_v39 = vsel %vm2681_vm2, %v7556_v17, %v2678_v30  ;;  %v2664_v16 = vsel %vm2661_vm4, %v2663_v47, %v2659_v11 }
 0x415   :  { %v2687_v44 = vsel %vm2684_vm3, %v2686_v50, %v2682_v39  ;;  %v13164_v39 = vld [vmem:[#allocation183_spill] sm:$0xff] }
 0x416   :  { %v2692_v2 = vmul.f32 %v7558_v28, %v2691_v22  ;;  %v2744_v20 = vmul.f32 %v2687_v44, %v10057_v4  ;;  %v7562_v1 = vpop.eup %7561  ;;  %v13163_v22 = vld [vmem:[#allocation177_spill] sm:$0xff] }
 0x417   :  { %v2747_v31 = vmul.f32 %v7562_v1, %v2664_v16  ;;  %v469_v11 = vadd.f32 %v13164_v39, %v13163_v22  ;;  %v13191_v22 = vld [vmem:[#allocation163_spill] sm:$0xff] }
 0x418   :  { %v10283_v17 = vadd.f32 %v2746_v35, %v2744_v20  ;;  %v2693_v43 = vadd.f32 %v7558_v28, %v2692_v2  ;;  %v13165_v2 = vld [vmem:[#allocation178_spill] sm:$0xff] }
 0x41a   :  { %v2697_v55 = vsel %vm2696_vm7, %v7558_v28, %v2693_v43  ;;  %v498_v28 = vadd.f32 %v13166_v10, %v13165_v2  ;;  %v13190_v2 = vld [vmem:[#allocation154_spill] sm:$0xff] }
 0x41b   :  { %v2702_v48 = vsel %vm2699_vm8, %v2701_v0, %v2697_v55 }
 0x41c   :  { %v2745_v6 = vmul.f32 %v2702_v48, %v10060_v40 }
 0x41e   :  { %v10286_v21 = vadd.f32 %v2747_v31, %v2745_v6 }
 0x41f   :  { %v2577_v30 = vpop.f32.mrf.mxu0 }
 0x425   :  { %v2590_v4 = vpop.f32.mrf.mxu1  ;;  %v2603_v50 = vpop.f32.mrf.mxu2 }
 0x426   :  { %v2591_v9 = vadd.f32 %v2590_v4, %v2577_v30 }
 0x427   :  { %v2579_v35 = vpop.f32.mrf.mxu0 }
 0x428   :  { %v2626_v12 = vadd.f32 %v2591_v9, %v469_v11 }
 0x42a   :  { %v6752_v44 = vmul.f32 -1.442695, %v2626_v12 }
 0x42b   :  { %v2616_v47 = vpop.f32.mrf.mxu3 }
 0x42c   :  { %7563 = vpow2.f32 %v6752_v44  ;;  %v2617_v20 = vadd.f32 %v2616_v47, %v2603_v50 }
 0x42d   :  { %v2592_v41 = vpop.f32.mrf.mxu1  ;;  %v2605_v40 = vpop.f32.mrf.mxu2 }
 0x42e   :  { %v2627_v1 = vadd.f32 %v2617_v20, %v498_v28 }
 0x430   :  { %v6753_v16 = vmul.f32 -1.442695, %v2627_v1 }
 0x432   :  { %v7564_v43 = vpop.eup %7563  ;;  %7565 = vpow2.f32 %v6753_v16 }
 0x433   :  { %v2712_v31 = vadd.f32 1.0, %v7564_v43  ;;  %v2618_v0 = vpop.f32.mrf.mxu3 }
 0x435   :  { %7567 = vrcp.f32 %v2712_v31  ;;  %v2725_v39 = vand.u32 2147483648, %v2712_v31  ;;  %v2723_v50 = vand.u32 2147483647, %v2712_v31  ;;  %vm2719_vm10 = vweird.f32 %v2712_v31 }
 0x437   :  { %v2726_v44 = vor.u32 1.1754944e-38, %v2725_v39  ;;  %vm2724_vm12 = vcmp.eq.f32.partialorder %v2723_v50, 8.507059e+37  ;;  %v13171_v50 = vld [vmem:[#allocation131_spill] sm:$0xff] }
 0x438   :  { %v7566_v55 = vpop.eup %7565 }
 0x439   :  { %v2713_v48 = vadd.f32 1.0, %v7566_v55 }
 0x43b   :  { %v7568_v6 = vpop.eup %7567  ;;  %7569 = vrcp.f32 %v2713_v48  ;;  %v2740_v41 = vand.u32 2147483648, %v2713_v48  ;;  %v2738_v16 = vand.u32 2147483647, %v2713_v48  ;;  %vm2734_vm14 = vweird.f32 %v2713_v48 }
 0x43c   :  { %v2715_v30 = vmul.f32 %v7568_v6, %v2712_v31  ;;  %7571 = vtanh.f32 %v10283_v17  ;;  %vm2720_vm9 = vweird.f32 %v7568_v6 }
 0x43d   :  { %vm2721_vm11 = vmor %vm2719_vm10, %vm2720_vm9  ;;  %7573 = vtanh.f32 %v10286_v21  ;;  %v2741_v0 = vor.u32 1.1754944e-38, %v2740_v41  ;;  %vm2739_vm0 = vcmp.eq.f32.partialorder %v2738_v16, 8.507059e+37  ;;  %v13180_v41 = vld [vmem:[#allocation147_spill] sm:$0xff]  ;;  %v13182_v16 = vld [vmem:[#allocation142_spill] sm:$0xff] }
 0x43e   :  { %v2716_v4 = vsub.f32 1.0, %v2715_v30 }
 0x440   :  { %v2717_v11 = vmul.f32 %v7568_v6, %v2716_v4 }
 0x441   :  { %v7570_v9 = vpop.eup %7569 }
 0x442   :  { %v2718_v35 = vadd.f32 %v7568_v6, %v2717_v11  ;;  %v2730_v12 = vmul.f32 %v7570_v9, %v2713_v48  ;;  %v7572_v28 = vpop.eup %7571  ;;  %vm2735_vm13 = vweird.f32 %v7570_v9  ;;  %v13169_v48 = vld [vmem:[#allocation122_spill] sm:$0xff]  ;;  %v13170_v11 = vld [vmem:[#allocation125_spill] sm:$0xff] }
 0x443   :  { %vm2736_vm15 = vmor %vm2734_vm14, %vm2735_vm13 }
 0x444   :  { %v2722_v47 = vsel %vm2721_vm11, %v7568_v6, %v2718_v35  ;;  %v2731_v10 = vsub.f32 1.0, %v2730_v12  ;;  %v7574_v6 = vpop.eup %7573  ;;  %v13173_v35 = vld [vmem:[#allocation128_spill] sm:$0xff]  ;;  %v13174_v12 = vld [vmem:[#allocation130_spill] sm:$0xff] }
 0x445   :  { %v2727_v20 = vsel %vm2724_vm12, %v2726_v44, %v2722_v47  ;;  %v13175_v44 = vld [vmem:[#allocation139_spill] sm:$0xff]  ;;  %v13176_v47 = vld [vmem:[#allocation141_spill] sm:$0xff] }
 0x446   :  { %v10294_v40 = vmul.f32 %v7572_v28, %v2727_v20  ;;  %v2732_v1 = vmul.f32 %v7570_v9, %v2731_v10  ;;  %v13177_v10 = vld [vmem:[#allocation134_spill] sm:$0xff]  ;;  %v13179_v20 = vld [vmem:[#allocation144_spill] sm:$0xff] }
 0x447   :  { %v13178_v28 = vld [vmem:[#allocation138_spill] sm:$0xff] }
 0x448   :  { %13167 = vst [vmem:[#allocation75_spill] sm:$0xff] %v10294_v40  ;;  %v10298_v43 = vpack.c.bf16 %v10294_v40, %v10294_v40  ;;  %v2733_v31 = vadd.f32 %v7570_v9, %v2732_v1  ;;  %v13181_v1 = vld [vmem:[#allocation140_spill] sm:$0xff] }
 0x449   :  { %v13189_v40 = vld [vmem:[#allocation152_spill] sm:$0xff] }
 0x44a   :  { %v2737_v55 = vsel %vm2736_vm15, %v7570_v9, %v2733_v31  ;;  %2774 = vmatmul.bf16.vlgmr.msra.gmra.mxu0 %v10298_v43  ;;  %2800 = vmatmul.bf16.vlgmr.msra.gmra.mxu2 %v10298_v43  ;;  %v13172_v9 = vld [vmem:[#allocation135_spill] sm:$0xff] }
 0x44b   :  { %v2742_v30 = vsel %vm2739_vm0, %v2741_v0, %v2737_v55  ;;  %2870 = vmatpush.bf16.msra.mxu0 %v12824_v51  ;;  %2896 = vmatpush.bf16.msra.mxu2 %v12825_v49  ;;  %v13183_v31 = vld [vmem:[#allocation151_spill] sm:$0xff]  ;;  %v13184_v0 = vld [vmem:[#allocation153_spill] sm:$0xff]  ;;  %v13185_v55 = vld [vmem:[#allocation146_spill] sm:$0xff] }
 0x44c   :  { %v10304_v4 = vmul.f32 %v7574_v6, %v2742_v30  ;;  %v13186_v6 = vld [vmem:[#allocation149_spill] sm:$0xff]  ;;  %v13187_v30 = vld [vmem:[#allocation155_spill] sm:$0xff] }
 0x44e   :  { %13168 = vst [vmem:[#allocation77_spill] sm:$0xff] %v10304_v4  ;;  %v10308_v39 = vpack.c.bf16 %v10304_v4, %v10304_v4  ;;  %v13188_v4 = vld [vmem:[#allocation159_spill] sm:$0xff] }
 0x44f   :  { %2871 = vmatpush.bf16.msra.mxu0 %v12827_v59  ;;  %2897 = vmatpush.bf16.msra.mxu2 %v12828_v27 }
 0x450   :  { %2787 = vmatmul.bf16.vlgmr.msra.gmra.mxu1 %v10308_v39  ;;  %2813 = vmatmul.bf16.vlgmr.msra.gmra.mxu3 %v10308_v39 }
 0x451   :  { %2883 = vmatpush.bf16.msra.mxu1 %v12829_v61  ;;  %2909 = vmatpush.bf16.msra.mxu3 %v12830_v8 }
 0x453   :  { %2872 = vmatpush.bf16.msra.mxu0 %v12831_v52  ;;  %2898 = vmatpush.bf16.msra.mxu2 %v12832_v56 }
 0x455   :  { %2884 = vmatpush.bf16.msra.mxu1 %v12833_v36  ;;  %2910 = vmatpush.bf16.msra.mxu3 %v12834_v24 }
 0x457   :  { %2873 = vmatpush.bf16.msra.mxu0 %v12835_v3  ;;  %2899 = vmatpush.bf16.msra.mxu2 %v12836_v29 }
 0x459   :  { %2885 = vmatpush.bf16.msra.mxu1 %v12837_v33  ;;  %2911 = vmatpush.bf16.msra.mxu3 %v12838_v63 }
 0x45a   :  { %2826 = vmatmul.bf16.vlgmr.msrb.gmra.mxu0 %v10298_v43  ;;  %2852 = vmatmul.bf16.vlgmr.msrb.gmra.mxu2 %v10298_v43 }
 0x45b   :  { %2874 = vmatpush.bf16.msra.mxu0 %v12839_v34  ;;  %2900 = vmatpush.bf16.msra.mxu2 %v12840_v60 }
 0x45d   :  { %2886 = vmatpush.bf16.msra.mxu1 %v12841_v5  ;;  %2912 = vmatpush.bf16.msra.mxu3 %v12842_v46 }
 0x45f   :  { %2875 = vmatpush.bf16.msra.mxu0 %v12843_v25  ;;  %2901 = vmatpush.bf16.msra.mxu2 %v12944_v58 }
 0x460   :  { %2839 = vmatmul.bf16.vlgmr.msrb.gmra.mxu1 %v10308_v39  ;;  %2865 = vmatmul.bf16.vlgmr.msrb.gmra.mxu3 %v10308_v39 }
 0x461   :  { %2887 = vmatpush.bf16.msra.mxu1 %v12945_v42  ;;  %2913 = vmatpush.bf16.msra.mxu3 %v12946_v32 }
 0x463   :  { %2876 = vmatpush.bf16.msra.mxu0 %v12947_v14  ;;  %2902 = vmatpush.bf16.msra.mxu2 %v12948_v38 }
 0x465   :  { %2888 = vmatpush.bf16.msra.mxu1 %v12949_v57  ;;  %2914 = vmatpush.bf16.msra.mxu3 %v12950_v13 }
 0x467   :  { %2877 = vmatpush.bf16.msra.mxu0 %v12951_v18  ;;  %2903 = vmatpush.bf16.msra.mxu2 %v12952_v23 }
 0x469   :  { %2889 = vmatpush.bf16.msra.mxu1 %v12955_v62  ;;  %2915 = vmatpush.bf16.msra.mxu3 %v12956_v45 }
 0x46a   :  { %2878 = vmatmul.bf16.vlgmr.msra.gmra.mxu0 %v10298_v43  ;;  %2904 = vmatmul.bf16.vlgmr.msra.gmra.mxu2 %v10298_v43 }
 0x46b   :  { %2922 = vmatpush.bf16.msrb.mxu0 %v12953_v26  ;;  %2948 = vmatpush.bf16.msrb.mxu2 %v12954_v37 }
 0x46d   :  { %2890 = vmatpush.bf16.msra.mxu1 %v12959_v19  ;;  %2916 = vmatpush.bf16.msra.mxu3 %v12960_v53 }
 0x46f   :  { %2923 = vmatpush.bf16.msrb.mxu0 %v12957_v7  ;;  %2949 = vmatpush.bf16.msrb.mxu2 %v12958_v54 }
 0x470   :  { %2891 = vmatmul.bf16.vlgmr.msra.gmra.mxu1 %v10308_v39  ;;  %2917 = vmatmul.bf16.vlgmr.msra.gmra.mxu3 %v10308_v39 }
 0x471   :  { %2935 = vmatpush.bf16.msrb.mxu1 %v13169_v48  ;;  %2961 = vmatpush.bf16.msrb.mxu3 %v13170_v11  ;;  %v13270_v11 = vld [vmem:[#allocation186_spill] sm:$0xff] }
 0x473   :  { %2924 = vmatpush.bf16.msrb.mxu0 %v13171_v50  ;;  %2950 = vmatpush.bf16.msrb.mxu2 %v13172_v9 }
 0x475   :  { %2936 = vmatpush.bf16.msrb.mxu1 %v13173_v35  ;;  %2962 = vmatpush.bf16.msrb.mxu3 %v13174_v12 }
 0x477   :  { %2925 = vmatpush.bf16.msrb.mxu0 %v13175_v44  ;;  %2951 = vmatpush.bf16.msrb.mxu2 %v13176_v47 }
 0x479   :  { %2937 = vmatpush.bf16.msrb.mxu1 %v13177_v10  ;;  %2963 = vmatpush.bf16.msrb.mxu3 %v13178_v28 }
 0x47b   :  { %2926 = vmatpush.bf16.msrb.mxu0 %v13179_v20  ;;  %2952 = vmatpush.bf16.msrb.mxu2 %v13180_v41 }
 0x47d   :  { %2938 = vmatpush.bf16.msrb.mxu1 %v13181_v1  ;;  %2964 = vmatpush.bf16.msrb.mxu3 %v13182_v16  ;;  %v13193_v16 = vld [vmem:[#allocation5_spill] sm:$0xff] }
 0x47f   :  { %2927 = vmatpush.bf16.msrb.mxu0 %v13183_v31  ;;  %2953 = vmatpush.bf16.msrb.mxu2 %v13184_v0  ;;  %v13194_v31 = vld [vmem:[#allocation7_spill] sm:$0xff]  ;;  %v13195_v0 = vld [vmem:[#allocation158_spill] sm:$0xff] }
 0x481   :  { %2939 = vmatpush.bf16.msrb.mxu1 %v13185_v55  ;;  %2965 = vmatpush.bf16.msrb.mxu3 %v13186_v6  ;;  %v13196_v55 = vld [vmem:[#allocation162_spill] sm:$0xff] }
 0x483   :  { %2928 = vmatpush.bf16.msrb.mxu0 %v13187_v30  ;;  %2954 = vmatpush.bf16.msrb.mxu2 %v13188_v4  ;;  %v13197_v4 = vld [vmem:[#allocation9_spill] sm:$0xff] }
 0x485   :  { %2940 = vmatpush.bf16.msrb.mxu1 %v13189_v40  ;;  %2966 = vmatpush.bf16.msrb.mxu3 %v13190_v2  ;;  %v13198_v40 = vld [vmem:[#allocation11_spill] sm:$0xff]  ;;  %v13199_v2 = vld [vmem:[#allocation164_spill] sm:$0xff] }
 0x487   :  { %2929 = vmatpush.bf16.msrb.mxu0 %v13191_v22  ;;  %2955 = vmatpush.bf16.msrb.mxu2 %v13192_v15  ;;  %v13200_v22 = vld [vmem:[#allocation166_spill] sm:$0xff] }
 0x488   :  { %v13201_v15 = vld [vmem:[#allocation6_spill] sm:$0xff] }
 0x489   :  { %2941 = vmatpush.bf16.msrb.mxu1 %v13195_v0  ;;  %2967 = vmatpush.bf16.msrb.mxu3 %v13196_v55  ;;  %v13203_v55 = vld [vmem:[#allocation13_spill] sm:$0xff]  ;;  %v13204_v0 = vld [vmem:[#allocation15_spill] sm:$0xff] }
 0x48a   :  { %2930 = vmatmul.bf16.vlgmr.msrb.gmra.mxu0 %v10298_v43  ;;  %2956 = vmatmul.bf16.vlgmr.msrb.gmra.mxu2 %v10298_v43  ;;  %v13205_v43 = vld [vmem:[#allocation10_spill] sm:$0xff] }
 0x48b   :  { %3120 = vmatpush.bf16.msra.mxu0 %v13193_v16  ;;  %3146 = vmatpush.bf16.msra.mxu2 %v13194_v31  ;;  %v13202_v16 = vld [vmem:[#allocation8_spill] sm:$0xff]  ;;  %v13212_v31 = vld [vmem:[#allocation23_spill] sm:$0xff] }
 0x48d   :  { %2942 = vmatpush.bf16.msrb.mxu1 %v13199_v2  ;;  %2968 = vmatpush.bf16.msrb.mxu3 %v13200_v22  ;;  %v13208_v2 = vld [vmem:[#allocation19_spill] sm:$0xff]  ;;  %v13209_v22 = vld [vmem:[#allocation14_spill] sm:$0xff] }
 0x48f   :  { %3121 = vmatpush.bf16.msra.mxu0 %v13197_v4  ;;  %3147 = vmatpush.bf16.msra.mxu2 %v13198_v40  ;;  %v13206_v4 = vld [vmem:[#allocation12_spill] sm:$0xff]  ;;  %v13207_v40 = vld [vmem:[#allocation17_spill] sm:$0xff] }
 0x490   :  { %2943 = vmatmul.bf16.vlgmr.msrb.gmra.mxu1 %v10308_v39  ;;  %2969 = vmatmul.bf16.vlgmr.msrb.gmra.mxu3 %v10308_v39  ;;  %v13213_v39 = vld [vmem:[#allocation18_spill] sm:$0xff] }
 0x491   :  { %3133 = vmatpush.bf16.msra.mxu1 %v13201_v15  ;;  %3159 = vmatpush.bf16.msra.mxu3 %v13202_v16  ;;  %v13210_v15 = vld [vmem:[#allocation16_spill] sm:$0xff]  ;;  %v13211_v16 = vld [vmem:[#allocation21_spill] sm:$0xff] }
 0x493   :  { %3122 = vmatpush.bf16.msra.mxu0 %v13203_v55  ;;  %3148 = vmatpush.bf16.msra.mxu2 %v13204_v0  ;;  %v13214_v55 = vld [vmem:[#allocation20_spill] sm:$0xff]  ;;  %v13215_v0 = vld [vmem:[#allocation25_spill] sm:$0xff] }
 0x495   :  { %3134 = vmatpush.bf16.msra.mxu1 %v13205_v43  ;;  %3160 = vmatpush.bf16.msra.mxu3 %v13206_v4  ;;  %v13216_v43 = vld [vmem:[#allocation27_spill] sm:$0xff]  ;;  %v13217_v4 = vld [vmem:[#allocation22_spill] sm:$0xff] }
 0x497   :  { %3123 = vmatpush.bf16.msra.mxu0 %v13207_v40  ;;  %3149 = vmatpush.bf16.msra.mxu2 %v13208_v2  ;;  %v13218_v40 = vld [vmem:[#allocation24_spill] sm:$0xff]  ;;  %v13219_v2 = vld [vmem:[#allocation29_spill] sm:$0xff] }
 0x499   :  { %3135 = vmatpush.bf16.msra.mxu1 %v13209_v22  ;;  %3161 = vmatpush.bf16.msra.mxu3 %v13210_v15  ;;  %v13220_v22 = vld [vmem:[#allocation31_spill] sm:$0xff]  ;;  %v13221_v15 = vld [vmem:[#allocation26_spill] sm:$0xff] }
 0x49b   :  { %3124 = vmatpush.bf16.msra.mxu0 %v13211_v16  ;;  %3150 = vmatpush.bf16.msra.mxu2 %v13212_v31  ;;  %v13222_v16 = vld [vmem:[#allocation28_spill] sm:$0xff]  ;;  %v13223_v31 = vld [vmem:[#allocation33_spill] sm:$0xff] }
 0x49d   :  { %3136 = vmatpush.bf16.msra.mxu1 %v13213_v39  ;;  %3162 = vmatpush.bf16.msra.mxu3 %v13214_v55  ;;  %v13224_v39 = vld [vmem:[#allocation35_spill] sm:$0xff]  ;;  %v13225_v55 = vld [vmem:[#allocation37_spill] sm:$0xff] }
 0x49f   :  { %3125 = vmatpush.bf16.msra.mxu0 %v13215_v0  ;;  %3151 = vmatpush.bf16.msra.mxu2 %v13216_v43  ;;  %v13226_v0 = vld [vmem:[#allocation39_spill] sm:$0xff]  ;;  %v13227_v43 = vld [vmem:[#allocation30_spill] sm:$0xff] }
 0x4a1   :  { %3137 = vmatpush.bf16.msra.mxu1 %v13217_v4  ;;  %3163 = vmatpush.bf16.msra.mxu3 %v13218_v40  ;;  %v13228_v4 = vld [vmem:[#allocation32_spill] sm:$0xff]  ;;  %v13229_v40 = vld [vmem:[#allocation41_spill] sm:$0xff] }
 0x4a3   :  { %3126 = vmatpush.bf16.msra.mxu0 %v13219_v2  ;;  %3152 = vmatpush.bf16.msra.mxu2 %v13220_v22  ;;  %v13230_v2 = vld [vmem:[#allocation43_spill] sm:$0xff]  ;;  %v13231_v22 = vld [vmem:[#allocation34_spill] sm:$0xff] }
 0x4a5   :  { %3138 = vmatpush.bf16.msra.mxu1 %v13221_v15  ;;  %3164 = vmatpush.bf16.msra.mxu3 %v13222_v16  ;;  %v13232_v15 = vld [vmem:[#allocation36_spill] sm:$0xff]  ;;  %v13233_v16 = vld [vmem:[#allocation38_spill] sm:$0xff] }
 0x4a7   :  { %3127 = vmatpush.bf16.msra.mxu0 %v13223_v31  ;;  %3153 = vmatpush.bf16.msra.mxu2 %v13224_v39  ;;  %v13234_v31 = vld [vmem:[#allocation40_spill] sm:$0xff]  ;;  %v13235_v39 = vld [vmem:[#allocation45_spill] sm:$0xff] }
 0x4a9   :  { %3139 = vmatpush.bf16.msra.mxu1 %v13227_v43  ;;  %3165 = vmatpush.bf16.msra.mxu3 %v13228_v4  ;;  %v13238_v43 = vld [vmem:[#allocation44_spill] sm:$0xff]  ;;  %v13239_v4 = vld [vmem:[#allocation49_spill] sm:$0xff] }
 0x4ab   :  { %3172 = vmatpush.bf16.msrb.mxu0 %v13225_v55  ;;  %3198 = vmatpush.bf16.msrb.mxu2 %v13226_v0  ;;  %v13236_v55 = vld [vmem:[#allocation47_spill] sm:$0xff]  ;;  %v13237_v0 = vld [vmem:[#allocation42_spill] sm:$0xff] }
 0x4ad   :  { %3140 = vmatpush.bf16.msra.mxu1 %v13231_v22  ;;  %3166 = vmatpush.bf16.msra.mxu3 %v13232_v15  ;;  %v13242_v22 = vld [vmem:[#allocation48_spill] sm:$0xff]  ;;  %v13243_v15 = vld [vmem:[#allocation53_spill] sm:$0xff] }
 0x4af   :  { %3173 = vmatpush.bf16.msrb.mxu0 %v13229_v40  ;;  %3199 = vmatpush.bf16.msrb.mxu2 %v13230_v2  ;;  %v13240_v40 = vld [vmem:[#allocation51_spill] sm:$0xff]  ;;  %v13241_v2 = vld [vmem:[#allocation46_spill] sm:$0xff] }
 0x4b1   :  { %3185 = vmatpush.bf16.msrb.mxu1 %v13233_v16  ;;  %3211 = vmatpush.bf16.msrb.mxu3 %v13234_v31  ;;  %v13244_v16 = vld [vmem:[#allocation55_spill] sm:$0xff]  ;;  %v13245_v31 = vld [vmem:[#allocation50_spill] sm:$0xff] }
 0x4b3   :  { %3174 = vmatpush.bf16.msrb.mxu0 %v13235_v39  ;;  %3200 = vmatpush.bf16.msrb.mxu2 %v13236_v55  ;;  %v13246_v39 = vld [vmem:[#allocation52_spill] sm:$0xff]  ;;  %v13247_v55 = vld [vmem:[#allocation57_spill] sm:$0xff] }
 0x4b5   :  { %3186 = vmatpush.bf16.msrb.mxu1 %v13237_v0  ;;  %3212 = vmatpush.bf16.msrb.mxu3 %v13238_v43  ;;  %v13248_v0 = vld [vmem:[#allocation59_spill] sm:$0xff]  ;;  %v13249_v43 = vld [vmem:[#allocation54_spill] sm:$0xff] }
 0x4b7   :  { %3175 = vmatpush.bf16.msrb.mxu0 %v13239_v4  ;;  %3201 = vmatpush.bf16.msrb.mxu2 %v13240_v40  ;;  %v13250_v4 = vld [vmem:[#allocation56_spill] sm:$0xff]  ;;  %v13251_v40 = vld [vmem:[#allocation61_spill] sm:$0xff] }
 0x4b9   :  { %3187 = vmatpush.bf16.msrb.mxu1 %v13241_v2  ;;  %3213 = vmatpush.bf16.msrb.mxu3 %v13242_v22  ;;  %v13252_v2 = vld [vmem:[#allocation63_spill] sm:$0xff]  ;;  %v13253_v22 = vld [vmem:[#allocation58_spill] sm:$0xff] }
 0x4bb   :  { %3176 = vmatpush.bf16.msrb.mxu0 %v13243_v15  ;;  %3202 = vmatpush.bf16.msrb.mxu2 %v13244_v16  ;;  %v13254_v15 = vld [vmem:[#allocation60_spill] sm:$0xff]  ;;  %v13255_v16 = vld [vmem:[#allocation65_spill] sm:$0xff] }
 0x4bd   :  { %3188 = vmatpush.bf16.msrb.mxu1 %v13245_v31  ;;  %3214 = vmatpush.bf16.msrb.mxu3 %v13246_v39  ;;  %v13256_v31 = vld [vmem:[#allocation67_spill] sm:$0xff]  ;;  %v13257_v39 = vld [vmem:[#allocation62_spill] sm:$0xff] }
 0x4bf   :  { %3177 = vmatpush.bf16.msrb.mxu0 %v13247_v55  ;;  %3203 = vmatpush.bf16.msrb.mxu2 %v13248_v0  ;;  %v13258_v55 = vld [vmem:[#allocation64_spill] sm:$0xff]  ;;  %v13259_v0 = vld [vmem:[#allocation66_spill] sm:$0xff] }
 0x4c1   :  { %3189 = vmatpush.bf16.msrb.mxu1 %v13249_v43  ;;  %3215 = vmatpush.bf16.msrb.mxu3 %v13250_v4  ;;  %v13260_v43 = vld [vmem:[#allocation68_spill] sm:$0xff] }
 0x4c3   :  { %3178 = vmatpush.bf16.msrb.mxu0 %v13251_v40  ;;  %3204 = vmatpush.bf16.msrb.mxu2 %v13252_v2 }
 0x4c5   :  { %3190 = vmatpush.bf16.msrb.mxu1 %v13253_v22  ;;  %3216 = vmatpush.bf16.msrb.mxu3 %v13254_v15  ;;  %v13261_v22 = vld [vmem:[#allocation124_spill] sm:$0xff] }
 0x4c7   :  { %3179 = vmatpush.bf16.msrb.mxu0 %v13255_v16  ;;  %3205 = vmatpush.bf16.msrb.mxu2 %v13256_v31  ;;  %v2775_v4 = vpop.f32.mrf.mxu0 }
 0x4c9   :  { %3191 = vmatpush.bf16.msrb.mxu1 %v13257_v39  ;;  %3217 = vmatpush.bf16.msrb.mxu3 %v13258_v55  ;;  %v13262_v39 = vld [vmem:[#allocation126_spill] sm:$0xff] }
 0x4cd   :  { %3192 = vmatpush.bf16.msrb.mxu1 %v13259_v0  ;;  %3218 = vmatpush.bf16.msrb.mxu3 %v13260_v43  ;;  %v2788_v40 = vpop.f32.mrf.mxu1  ;;  %v2801_v30 = vpop.f32.mrf.mxu2 }
 0x4ce   :  { %v2789_v2 = vadd.f32 %v2788_v40, %v2775_v4 }
 0x4cf   :  { %v2777_v6 = vpop.f32.mrf.mxu0 }
 0x4d0   :  { %v2974_v1 = vadd.f32 %v2789_v2, %v13261_v22  ;;  %v13263_v2 = vld [vmem:[#allocation132_spill] sm:$0xff] }
 0x4d2   :  { %v6754_v15 = vmul.f32 -1.442695, %v2974_v1 }
 0x4d3   :  { %v2814_v41 = vpop.f32.mrf.mxu3 }
 0x4d4   :  { %7575 = vpow2.f32 %v6754_v15  ;;  %v2815_v16 = vadd.f32 %v2814_v41, %v2801_v30 }
 0x4d5   :  { %v2790_v31 = vpop.f32.mrf.mxu1  ;;  %v2803_v20 = vpop.f32.mrf.mxu2 }
 0x4d6   :  { %v2975_v28 = vadd.f32 %v2815_v16, %v13262_v39 }
 0x4d7   :  { %v2827_v55 = vpop.f32.mrf.mxu0 }
 0x4d8   :  { %v6755_v10 = vmul.f32 -1.442695, %v2975_v28 }
 0x4da   :  { %v7576_v0 = vpop.eup %7575  ;;  %7577 = vpow2.f32 %v6755_v10 }
 0x4db   :  { %v2988_v43 = vadd.f32 1.0, %v7576_v0  ;;  %v2816_v47 = vpop.f32.mrf.mxu3 }
 0x4dc   :  { %v13264_v47 = vld [vmem:[#allocation136_spill] sm:$0xff] }
 0x4dd   :  { %v2840_v44 = vpop.f32.mrf.mxu1  ;;  %v2853_v12 = vpop.f32.mrf.mxu2  ;;  %7579 = vrcp.f32 %v2988_v43  ;;  %v2999_v9 = vand.u32 2147483647, %v2988_v43  ;;  %vm2995_vm2 = vweird.f32 %v2988_v43 }
 0x4de   :  { %v2841_v40 = vadd.f32 %v2840_v44, %v2827_v55 }
 0x4df   :  { %v2829_v4 = vpop.f32.mrf.mxu0  ;;  %vm10470_vm4 = vcmp.eq.f32.partialorder %v2999_v9, 8.507059e+37 }
 0x4e0   :  { %v7578_v22 = vpop.eup %7577  ;;  %v2976_v1 = vadd.f32 %v2841_v40, %v13263_v2 }
 0x4e1   :  { %v10453_v15 = vadd.f32 1.0, %v7578_v22 }
 0x4e2   :  { %v6756_v41 = vmul.f32 -1.442695, %v2976_v1 }
 0x4e3   :  { %7581 = vrcp.f32 %v10453_v15  ;;  %v2866_v20 = vpop.f32.mrf.mxu3  ;;  %v7580_v16 = vpop.eup %7579  ;;  %vm3010_vm7 = vweird.f32 %v10453_v15  ;;  %v3014_v9 = vand.u32 2147483647, %v10453_v15 }
 0x4e4   :  { %7583 = vpow2.f32 %v6756_v41  ;;  %v2867_v28 = vadd.f32 %v2866_v20, %v2853_v12  ;;  %v2991_v6 = vmul.f32 %v7580_v16, %v2988_v43  ;;  %vm2996_vm1 = vweird.f32 %v7580_v16 }
 0x4e5   :  { %v2842_v10 = vpop.f32.mrf.mxu1  ;;  %v2855_v31 = vpop.f32.mrf.mxu2  ;;  %vm10466_vm3 = vmor %vm2995_vm2, %vm2996_vm1  ;;  %vm3015_vm12 = vcmp.eq.f32.partialorder %v3014_v9, 8.507059e+37 }
 0x4e6   :  { %v2977_v0 = vadd.f32 %v2867_v28, %v13264_v47  ;;  %v2992_v40 = vsub.f32 1.0, %v2991_v6 }
 0x4e7   :  { %v2879_v30 = vpop.f32.mrf.mxu0 }
 0x4e8   :  { %v6757_v44 = vmul.f32 -1.442695, %v2977_v0  ;;  %v2993_v20 = vmul.f32 %v7580_v16, %v2992_v40  ;;  %v13265_v0 = vld [vmem:[#allocation185_spill] sm:$0xff] }
 0x4e9   :  { %v10457_v55 = vpop.eup %7581 }
 0x4ea   :  { %v7584_v39 = vpop.eup %7583  ;;  %7585 = vpow2.f32 %v6757_v44  ;;  %v3006_v2 = vmul.f32 %v10457_v55, %v10453_v15  ;;  %v3001_v44 = vand.u32 2147483648, %v2988_v43  ;;  %vm3011_vm5 = vweird.f32 %v10457_v55 }
 0x4eb   :  { %v3026_v4 = vadd.f32 1.0, %v7584_v39  ;;  %v2868_v22 = vpop.f32.mrf.mxu3  ;;  %v2994_v39 = vadd.f32 %v7580_v16, %v2993_v20  ;;  %vm10487_vm9 = vmor %vm3010_vm7, %vm3011_vm5 }
 0x4ec   :  { %v3007_v31 = vsub.f32 1.0, %v3006_v2 }
 0x4ed   :  { %7587 = vrcp.f32 %v3026_v4  ;;  %v2905_v1 = vpop.f32.mrf.mxu2  ;;  %v2892_v12 = vpop.f32.mrf.mxu1  ;;  %v3037_v43 = vand.u32 2147483647, %v3026_v4  ;;  %vm3033_vm8 = vweird.f32 %v3026_v4 }
 0x4ee   :  { %v2893_v41 = vadd.f32 %v2892_v12, %v2879_v30  ;;  %v3008_v30 = vmul.f32 %v10457_v55, %v3007_v31 }
 0x4ef   :  { %v2881_v10 = vpop.f32.mrf.mxu0  ;;  %vm3038_vm11 = vcmp.eq.f32.partialorder %v3037_v43, 8.507059e+37 }
 0x4f0   :  { %v7586_v28 = vpop.eup %7585  ;;  %v2978_v35 = vadd.f32 %v2893_v41, %v13265_v0  ;;  %v3039_v0 = vand.u32 2147483648, %v3026_v4 }
 0x4f1   :  { %v10461_v47 = vadd.f32 1.0, %v7586_v28  ;;  %v3002_v28 = vor.u32 1.1754944e-38, %v3001_v44  ;;  %v3016_v44 = vand.u32 2147483648, %v10453_v15 }
 0x4f3   :  { %v7588_v6 = vpop.eup %7587  ;;  %7589 = vrcp.f32 %v10461_v47  ;;  %v2918_v50 = vpop.f32.mrf.mxu3  ;;  %v3054_v41 = vand.u32 2147483648, %v10461_v47  ;;  %vm3048_vm14 = vweird.f32 %v10461_v47 }
 0x4f4   :  { %v3029_v22 = vmul.f32 %v7588_v6, %v3026_v4  ;;  %7591 = vtanh.f32 %v2978_v35  ;;  %v2919_v40 = vadd.f32 %v2918_v50, %v2905_v1  ;;  %v2998_v35 = vsel %vm10466_vm3, %v7580_v16, %v2994_v39 }
 0x4f5   :  { %v2907_v12 = vpop.f32.mrf.mxu2  ;;  %v2894_v20 = vpop.f32.mrf.mxu1  ;;  %vm3034_vm6 = vweird.f32 %v7588_v6  ;;  %v3009_v1 = vadd.f32 %v10457_v55, %v3008_v30 }
 0x4f6   :  { %v3030_v2 = vsub.f32 1.0, %v3029_v22  ;;  %v2979_v31 = vadd.f32 %v2919_v40, %v13270_v11  ;;  %v3003_v11 = vsel %vm10470_vm4, %v3002_v28, %v2998_v35  ;;  %vm3035_vm10 = vmor %vm3033_vm8, %vm3034_vm6  ;;  %v3040_v40 = vor.u32 1.1754944e-38, %v3039_v0 }
 0x4f7   :  { %v3013_v4 = vsel %vm10487_vm9, %v10457_v55, %v3009_v1  ;;  %v3017_v35 = vor.u32 1.1754944e-38, %v3016_v44  ;;  %v3052_v0 = vand.u32 2147483647, %v10461_v47  ;;  %v3055_v1 = vor.u32 1.1754944e-38, %v3054_v41 }
 0x4f8   :  { %v3031_v50 = vmul.f32 %v7588_v6, %v3030_v2  ;;  %7593 = vtanh.f32 %v2979_v31 }
 0x4f9   :  { %v7590_v22 = vpop.eup %7589  ;;  %vm3053_vm0 = vcmp.eq.f32.partialorder %v3052_v0, 8.507059e+37 }
 0x4fa   :  { %v7592_v12 = vpop.eup %7591  ;;  %v3044_v16 = vmul.f32 %v7590_v22, %v10461_v47  ;;  %v3032_v39 = vadd.f32 %v7588_v6, %v3031_v50  ;;  %vm3049_vm13 = vweird.f32 %v7590_v22 }
 0x4fb   :  { %v3100_v2 = vmul.f32 %v7592_v12, %v3003_v11  ;;  %v2920_v20 = vpop.f32.mrf.mxu3  ;;  %vm3050_vm15 = vmor %vm3048_vm14, %vm3049_vm13 }
 0x4fc   :  { %v3045_v10 = vsub.f32 1.0, %v3044_v16  ;;  %v3036_v15 = vsel %vm3035_vm10, %v7588_v6, %v3032_v39  ;;  %v3018_v16 = vsel %vm3015_vm12, %v3017_v35, %v3013_v4  ;;  %v13273_v4 = vld [vmem:[#allocation187_spill] sm:$0xff] }
 0x4fd   :  { %v3041_v28 = vsel %vm3038_vm11, %v3040_v40, %v3036_v15 }
 0x4fe   :  { %v3046_v31 = vmul.f32 %v7590_v22, %v3045_v10  ;;  %v3098_v50 = vmul.f32 %v3041_v28, %v10283_v17  ;;  %v7594_v12 = vpop.eup %7593 }
 0x4ff   :  { %v3101_v55 = vmul.f32 %v7594_v12, %v3018_v16 }
 0x500   :  { %v10498_v6 = vadd.f32 %v3100_v2, %v3098_v50  ;;  %v3047_v43 = vadd.f32 %v7590_v22, %v3046_v31 }
 0x502   :  { %v3051_v11 = vsel %vm3050_vm15, %v7590_v22, %v3047_v43  ;;  %v13274_v22 = vld [vmem:[#allocation189_spill] sm:$0xff] }
 0x503   :  { %v3056_v9 = vsel %vm3053_vm0, %v3055_v1, %v3051_v11 }
 0x504   :  { %v3099_v44 = vmul.f32 %v3056_v9, %v10286_v21 }
 0x506   :  { %v10501_v30 = vadd.f32 %v3101_v55, %v3099_v44 }
 0x507   :  { %v2931_v39 = vpop.f32.mrf.mxu0 }
 0x50d   :  { %v2944_v17 = vpop.f32.mrf.mxu1  ;;  %v2957_v40 = vpop.f32.mrf.mxu2 }
 0x50e   :  { %v2945_v10 = vadd.f32 %v2944_v17, %v2931_v39 }
 0x50f   :  { %v2933_v15 = vpop.f32.mrf.mxu0 }
 0x510   :  { %v2980_v47 = vadd.f32 %v2945_v10, %v13273_v4 }
 0x512   :  { %v6758_v2 = vmul.f32 -1.442695, %v2980_v47 }
 0x513   :  { %v2970_v20 = vpop.f32.mrf.mxu3 }
 0x514   :  { %7595 = vpow2.f32 %v6758_v2  ;;  %v2971_v28 = vadd.f32 %v2970_v20, %v2957_v40 }
 0x515   :  { %v2946_v35 = vpop.f32.mrf.mxu1  ;;  %v2959_v41 = vpop.f32.mrf.mxu2 }
 0x516   :  { %v2981_v31 = vadd.f32 %v2971_v28, %v13274_v22 }
 0x518   :  { %v6759_v50 = vmul.f32 -1.442695, %v2981_v31 }
 0x51a   :  { %v7596_v0 = vpop.eup %7595  ;;  %7597 = vpow2.f32 %v6759_v50 }
 0x51b   :  { %v3066_v21 = vadd.f32 1.0, %v7596_v0  ;;  %v2972_v12 = vpop.f32.mrf.mxu3 }
 0x51d   :  { %7599 = vrcp.f32 %v3066_v21  ;;  %v3079_v9 = vand.u32 2147483648, %v3066_v21  ;;  %v3077_v39 = vand.u32 2147483647, %v3066_v21  ;;  %vm3073_vm2 = vweird.f32 %v3066_v21 }
 0x51f   :  { %v3080_v15 = vor.u32 1.1754944e-38, %v3079_v9  ;;  %vm3078_vm4 = vcmp.eq.f32.partialorder %v3077_v39, 8.507059e+37  ;;  %v13279_v9 = vld [vmem:[#allocation135_spill] sm:$0xff]  ;;  %v13281_v39 = vld [vmem:[#allocation130_spill] sm:$0xff] }
 0x520   :  { %v7598_v16 = vpop.eup %7597 }
 0x521   :  { %v3067_v43 = vadd.f32 1.0, %v7598_v16 }
 0x523   :  { %v7600_v55 = vpop.eup %7599  ;;  %7601 = vrcp.f32 %v3067_v43  ;;  %v3094_v28 = vand.u32 2147483648, %v3067_v43  ;;  %v3092_v22 = vand.u32 2147483647, %v3067_v43  ;;  %vm3088_vm6 = vweird.f32 %v3067_v43 }
 0x524   :  { %v3069_v1 = vmul.f32 %v7600_v55, %v3066_v21  ;;  %7603 = vtanh.f32 %v10498_v6  ;;  %vm3074_vm1 = vweird.f32 %v7600_v55 }
 0x525   :  { %vm3075_vm3 = vmor %vm3073_vm2, %vm3074_vm1  ;;  %7605 = vtanh.f32 %v10501_v30  ;;  %v3095_v0 = vor.u32 1.1754944e-38, %v3094_v28  ;;  %vm3093_vm8 = vcmp.eq.f32.partialorder %v3092_v22, 8.507059e+37  ;;  %v13290_v28 = vld [vmem:[#allocation151_spill] sm:$0xff]  ;;  %v13292_v22 = vld [vmem:[#allocation146_spill] sm:$0xff] }
 0x526   :  { %v3070_v11 = vsub.f32 1.0, %v3069_v1 }
 0x528   :  { %v3071_v44 = vmul.f32 %v7600_v55, %v3070_v11  ;;  %v13278_v11 = vld [vmem:[#allocation131_spill] sm:$0xff] }
 0x529   :  { %v7602_v17 = vpop.eup %7601 }
 0x52a   :  { %v3072_v40 = vadd.f32 %v7600_v55, %v3071_v44  ;;  %v3084_v10 = vmul.f32 %v7602_v17, %v3067_v43  ;;  %v7604_v2 = vpop.eup %7603  ;;  %vm3089_vm5 = vweird.f32 %v7602_v17  ;;  %v13277_v43 = vld [vmem:[#allocation125_spill] sm:$0xff]  ;;  %v13280_v44 = vld [vmem:[#allocation128_spill] sm:$0xff] }
 0x52b   :  { %vm3090_vm7 = vmor %vm3088_vm6, %vm3089_vm5  ;;  %v7606_v12 = vpop.eup %7605 }
 0x52c   :  { %v3076_v4 = vsel %vm3075_vm3, %v7600_v55, %v3072_v40  ;;  %v3085_v47 = vsub.f32 1.0, %v3084_v10  ;;  %v13283_v40 = vld [vmem:[#allocation141_spill] sm:$0xff]  ;;  %v13284_v10 = vld [vmem:[#allocation134_spill] sm:$0xff] }
 0x52d   :  { %v3081_v20 = vsel %vm3078_vm4, %v3080_v15, %v3076_v4  ;;  %v13285_v15 = vld [vmem:[#allocation138_spill] sm:$0xff]  ;;  %v13286_v4 = vld [vmem:[#allocation144_spill] sm:$0xff] }
 0x52e   :  { %v10507_v35 = vmul.f32 %v7604_v2, %v3081_v20  ;;  %v3086_v41 = vmul.f32 %v7602_v17, %v3085_v47  ;;  %v13287_v47 = vld [vmem:[#allocation147_spill] sm:$0xff]  ;;  %v13288_v2 = vld [vmem:[#allocation140_spill] sm:$0xff]  ;;  %v13289_v20 = vld [vmem:[#allocation142_spill] sm:$0xff] }
 0x530   :  { %13275 = vst [vmem:[#allocation72_spill] sm:$0xff] %v10507_v35  ;;  %v10511_v31 = vpack.c.bf16 %v10507_v35, %v10507_v35  ;;  %v3087_v50 = vadd.f32 %v7602_v17, %v3086_v41  ;;  %v13291_v41 = vld [vmem:[#allocation153_spill] sm:$0xff] }
 0x531   :  { %v13299_v35 = vld [vmem:[#allocation165_spill] sm:$0xff] }
 0x532   :  { %v3091_v21 = vsel %vm3090_vm7, %v7602_v17, %v3087_v50  ;;  %3128 = vmatmul.bf16.vlgmr.msra.gmra.mxu0 %v10511_v31  ;;  %3154 = vmatmul.bf16.vlgmr.msra.gmra.mxu2 %v10511_v31  ;;  %v13282_v17 = vld [vmem:[#allocation139_spill] sm:$0xff]  ;;  %v13293_v50 = vld [vmem:[#allocation149_spill] sm:$0xff] }
 0x533   :  { %v3096_v16 = vsel %vm3093_vm8, %v3095_v0, %v3091_v21  ;;  %3224 = vmatpush.bf16.msra.mxu0 %v12824_v51  ;;  %3250 = vmatpush.bf16.msra.mxu2 %v12825_v49  ;;  %v13294_v0 = vld [vmem:[#allocation155_spill] sm:$0xff] }
 0x534   :  { %v10517_v55 = vmul.f32 %v7606_v12, %v3096_v16  ;;  %v13295_v21 = vld [vmem:[#allocation159_spill] sm:$0xff]  ;;  %v13296_v12 = vld [vmem:[#allocation152_spill] sm:$0xff]  ;;  %v13297_v16 = vld [vmem:[#allocation154_spill] sm:$0xff] }
 0x536   :  { %13276 = vst [vmem:[#allocation74_spill] sm:$0xff] %v10517_v55  ;;  %v10521_v1 = vpack.c.bf16 %v10517_v55, %v10517_v55  ;;  %v13298_v55 = vld [vmem:[#allocation163_spill] sm:$0xff] }
 0x537   :  { %3225 = vmatpush.bf16.msra.mxu0 %v12827_v59  ;;  %3251 = vmatpush.bf16.msra.mxu2 %v12828_v27 }
 0x538   :  { %3141 = vmatmul.bf16.vlgmr.msra.gmra.mxu1 %v10521_v1  ;;  %3167 = vmatmul.bf16.vlgmr.msra.gmra.mxu3 %v10521_v1 }
 0x539   :  { %3237 = vmatpush.bf16.msra.mxu1 %v12829_v61  ;;  %3263 = vmatpush.bf16.msra.mxu3 %v12830_v8 }
 0x53b   :  { %3226 = vmatpush.bf16.msra.mxu0 %v12831_v52  ;;  %3252 = vmatpush.bf16.msra.mxu2 %v12832_v56 }
 0x53d   :  { %3238 = vmatpush.bf16.msra.mxu1 %v12833_v36  ;;  %3264 = vmatpush.bf16.msra.mxu3 %v12834_v24 }
 0x53f   :  { %3227 = vmatpush.bf16.msra.mxu0 %v12835_v3  ;;  %3253 = vmatpush.bf16.msra.mxu2 %v12836_v29 }
 0x541   :  { %3239 = vmatpush.bf16.msra.mxu1 %v12837_v33  ;;  %3265 = vmatpush.bf16.msra.mxu3 %v12838_v63 }
 0x542   :  { %3180 = vmatmul.bf16.vlgmr.msrb.gmra.mxu0 %v10511_v31  ;;  %3206 = vmatmul.bf16.vlgmr.msrb.gmra.mxu2 %v10511_v31 }
 0x543   :  { %3228 = vmatpush.bf16.msra.mxu0 %v12839_v34  ;;  %3254 = vmatpush.bf16.msra.mxu2 %v12840_v60 }
 0x545   :  { %3240 = vmatpush.bf16.msra.mxu1 %v12841_v5  ;;  %3266 = vmatpush.bf16.msra.mxu3 %v12842_v46 }
 0x547   :  { %3229 = vmatpush.bf16.msra.mxu0 %v12843_v25  ;;  %3255 = vmatpush.bf16.msra.mxu2 %v12944_v58 }
 0x548   :  { %3193 = vmatmul.bf16.vlgmr.msrb.gmra.mxu1 %v10521_v1  ;;  %3219 = vmatmul.bf16.vlgmr.msrb.gmra.mxu3 %v10521_v1 }
 0x549   :  { %3241 = vmatpush.bf16.msra.mxu1 %v12945_v42  ;;  %3267 = vmatpush.bf16.msra.mxu3 %v12946_v32 }
 0x54b   :  { %3230 = vmatpush.bf16.msra.mxu0 %v12947_v14  ;;  %3256 = vmatpush.bf16.msra.mxu2 %v12948_v38 }
 0x54d   :  { %3242 = vmatpush.bf16.msra.mxu1 %v12949_v57  ;;  %3268 = vmatpush.bf16.msra.mxu3 %v12950_v13 }
 0x54f   :  { %3231 = vmatpush.bf16.msra.mxu0 %v12951_v18  ;;  %3257 = vmatpush.bf16.msra.mxu2 %v12952_v23 }
 0x551   :  { %3243 = vmatpush.bf16.msra.mxu1 %v12955_v62  ;;  %3269 = vmatpush.bf16.msra.mxu3 %v12956_v45 }
 0x552   :  { %3232 = vmatmul.bf16.vlgmr.msra.gmra.mxu0 %v10511_v31  ;;  %3258 = vmatmul.bf16.vlgmr.msra.gmra.mxu2 %v10511_v31 }
 0x553   :  { %3276 = vmatpush.bf16.msrb.mxu0 %v12953_v26  ;;  %3302 = vmatpush.bf16.msrb.mxu2 %v12954_v37 }
 0x555   :  { %3244 = vmatpush.bf16.msra.mxu1 %v12959_v19  ;;  %3270 = vmatpush.bf16.msra.mxu3 %v12960_v53 }
 0x557   :  { %3277 = vmatpush.bf16.msrb.mxu0 %v12957_v7  ;;  %3303 = vmatpush.bf16.msrb.mxu2 %v12958_v54 }
 0x558   :  { %3245 = vmatmul.bf16.vlgmr.msra.gmra.mxu1 %v10521_v1  ;;  %3271 = vmatmul.bf16.vlgmr.msra.gmra.mxu3 %v10521_v1 }
 0x559   :  { %3289 = vmatpush.bf16.msrb.mxu1 %v13169_v48  ;;  %3315 = vmatpush.bf16.msrb.mxu3 %v13277_v43 }
 0x55b   :  { %3278 = vmatpush.bf16.msrb.mxu0 %v13278_v11  ;;  %3304 = vmatpush.bf16.msrb.mxu2 %v13279_v9 }
 0x55d   :  { %3290 = vmatpush.bf16.msrb.mxu1 %v13280_v44  ;;  %3316 = vmatpush.bf16.msrb.mxu3 %v13281_v39 }
 0x55f   :  { %3279 = vmatpush.bf16.msrb.mxu0 %v13282_v17  ;;  %3305 = vmatpush.bf16.msrb.mxu2 %v13283_v40 }
 0x561   :  { %3291 = vmatpush.bf16.msrb.mxu1 %v13284_v10  ;;  %3317 = vmatpush.bf16.msrb.mxu3 %v13285_v15  ;;  %v13371_v15 = vld [vmem:[#allocation137_spill] sm:$0xff] }
 0x563   :  { %3280 = vmatpush.bf16.msrb.mxu0 %v13286_v4  ;;  %3306 = vmatpush.bf16.msrb.mxu2 %v13287_v47 }
 0x565   :  { %3292 = vmatpush.bf16.msrb.mxu1 %v13288_v2  ;;  %3318 = vmatpush.bf16.msrb.mxu3 %v13289_v20  ;;  %v13300_v20 = vld [vmem:[#allocation5_spill] sm:$0xff] }
 0x567   :  { %3281 = vmatpush.bf16.msrb.mxu0 %v13290_v28  ;;  %3307 = vmatpush.bf16.msrb.mxu2 %v13291_v41  ;;  %v13301_v28 = vld [vmem:[#allocation7_spill] sm:$0xff]  ;;  %v13302_v41 = vld [vmem:[#allocation158_spill] sm:$0xff] }
 0x569   :  { %3293 = vmatpush.bf16.msrb.mxu1 %v13292_v22  ;;  %3319 = vmatpush.bf16.msrb.mxu3 %v13293_v50  ;;  %v13303_v22 = vld [vmem:[#allocation162_spill] sm:$0xff]  ;;  %v13369_v50 = vld [vmem:[#allocation133_spill] sm:$0xff] }
 0x56b   :  { %3282 = vmatpush.bf16.msrb.mxu0 %v13294_v0  ;;  %3308 = vmatpush.bf16.msrb.mxu2 %v13295_v21  ;;  %v13304_v21 = vld [vmem:[#allocation9_spill] sm:$0xff] }
 0x56d   :  { %3294 = vmatpush.bf16.msrb.mxu1 %v13296_v12  ;;  %3320 = vmatpush.bf16.msrb.mxu3 %v13297_v16  ;;  %v13305_v12 = vld [vmem:[#allocation11_spill] sm:$0xff]  ;;  %v13306_v16 = vld [vmem:[#allocation164_spill] sm:$0xff] }
 0x56f   :  { %3283 = vmatpush.bf16.msrb.mxu0 %v13298_v55  ;;  %3309 = vmatpush.bf16.msrb.mxu2 %v13299_v35  ;;  %v13307_v55 = vld [vmem:[#allocation166_spill] sm:$0xff] }
 0x570   :  { %v13308_v35 = vld [vmem:[#allocation6_spill] sm:$0xff] }
 0x571   :  { %3295 = vmatpush.bf16.msrb.mxu1 %v13302_v41  ;;  %3321 = vmatpush.bf16.msrb.mxu3 %v13303_v22  ;;  %v13310_v22 = vld [vmem:[#allocation13_spill] sm:$0xff]  ;;  %v13311_v41 = vld [vmem:[#allocation15_spill] sm:$0xff] }
 0x572   :  { %3284 = vmatmul.bf16.vlgmr.msrb.gmra.mxu0 %v10511_v31  ;;  %3310 = vmatmul.bf16.vlgmr.msrb.gmra.mxu2 %v10511_v31  ;;  %v13312_v31 = vld [vmem:[#allocation10_spill] sm:$0xff] }
 0x573   :  { %3474 = vmatpush.bf16.msra.mxu0 %v13300_v20  ;;  %3500 = vmatpush.bf16.msra.mxu2 %v13301_v28  ;;  %v13309_v20 = vld [vmem:[#allocation8_spill] sm:$0xff]  ;;  %v13319_v28 = vld [vmem:[#allocation23_spill] sm:$0xff] }
 0x575   :  { %3296 = vmatpush.bf16.msrb.mxu1 %v13306_v16  ;;  %3322 = vmatpush.bf16.msrb.mxu3 %v13307_v55  ;;  %v13315_v16 = vld [vmem:[#allocation19_spill] sm:$0xff]  ;;  %v13316_v55 = vld [vmem:[#allocation14_spill] sm:$0xff] }
 0x577   :  { %3475 = vmatpush.bf16.msra.mxu0 %v13304_v21  ;;  %3501 = vmatpush.bf16.msra.mxu2 %v13305_v12  ;;  %v13313_v21 = vld [vmem:[#allocation12_spill] sm:$0xff]  ;;  %v13314_v12 = vld [vmem:[#allocation17_spill] sm:$0xff] }
 0x578   :  { %3297 = vmatmul.bf16.vlgmr.msrb.gmra.mxu1 %v10521_v1  ;;  %3323 = vmatmul.bf16.vlgmr.msrb.gmra.mxu3 %v10521_v1  ;;  %v13320_v1 = vld [vmem:[#allocation18_spill] sm:$0xff] }
 0x579   :  { %3487 = vmatpush.bf16.msra.mxu1 %v13308_v35  ;;  %3513 = vmatpush.bf16.msra.mxu3 %v13309_v20  ;;  %v13317_v35 = vld [vmem:[#allocation16_spill] sm:$0xff]  ;;  %v13318_v20 = vld [vmem:[#allocation21_spill] sm:$0xff] }
 0x57b   :  { %3476 = vmatpush.bf16.msra.mxu0 %v13310_v22  ;;  %3502 = vmatpush.bf16.msra.mxu2 %v13311_v41  ;;  %v13321_v22 = vld [vmem:[#allocation20_spill] sm:$0xff]  ;;  %v13322_v41 = vld [vmem:[#allocation25_spill] sm:$0xff] }
 0x57d   :  { %3488 = vmatpush.bf16.msra.mxu1 %v13312_v31  ;;  %3514 = vmatpush.bf16.msra.mxu3 %v13313_v21  ;;  %v13323_v31 = vld [vmem:[#allocation27_spill] sm:$0xff]  ;;  %v13324_v21 = vld [vmem:[#allocation22_spill] sm:$0xff] }
 0x57f   :  { %3477 = vmatpush.bf16.msra.mxu0 %v13314_v12  ;;  %3503 = vmatpush.bf16.msra.mxu2 %v13315_v16  ;;  %v13325_v12 = vld [vmem:[#allocation24_spill] sm:$0xff]  ;;  %v13326_v16 = vld [vmem:[#allocation29_spill] sm:$0xff] }
 0x581   :  { %3489 = vmatpush.bf16.msra.mxu1 %v13316_v55  ;;  %3515 = vmatpush.bf16.msra.mxu3 %v13317_v35  ;;  %v13327_v55 = vld [vmem:[#allocation31_spill] sm:$0xff]  ;;  %v13328_v35 = vld [vmem:[#allocation26_spill] sm:$0xff] }
 0x583   :  { %3478 = vmatpush.bf16.msra.mxu0 %v13318_v20  ;;  %3504 = vmatpush.bf16.msra.mxu2 %v13319_v28  ;;  %v13329_v20 = vld [vmem:[#allocation28_spill] sm:$0xff]  ;;  %v13330_v28 = vld [vmem:[#allocation33_spill] sm:$0xff] }
 0x585   :  { %3490 = vmatpush.bf16.msra.mxu1 %v13320_v1  ;;  %3516 = vmatpush.bf16.msra.mxu3 %v13321_v22  ;;  %v13331_v1 = vld [vmem:[#allocation35_spill] sm:$0xff]  ;;  %v13332_v22 = vld [vmem:[#allocation37_spill] sm:$0xff] }
 0x587   :  { %3479 = vmatpush.bf16.msra.mxu0 %v13322_v41  ;;  %3505 = vmatpush.bf16.msra.mxu2 %v13323_v31  ;;  %v13333_v41 = vld [vmem:[#allocation39_spill] sm:$0xff]  ;;  %v13334_v31 = vld [vmem:[#allocation30_spill] sm:$0xff] }
 0x589   :  { %3491 = vmatpush.bf16.msra.mxu1 %v13324_v21  ;;  %3517 = vmatpush.bf16.msra.mxu3 %v13325_v12  ;;  %v13335_v21 = vld [vmem:[#allocation32_spill] sm:$0xff]  ;;  %v13336_v12 = vld [vmem:[#allocation41_spill] sm:$0xff] }
 0x58b   :  { %3480 = vmatpush.bf16.msra.mxu0 %v13326_v16  ;;  %3506 = vmatpush.bf16.msra.mxu2 %v13327_v55  ;;  %v13337_v16 = vld [vmem:[#allocation43_spill] sm:$0xff]  ;;  %v13338_v55 = vld [vmem:[#allocation34_spill] sm:$0xff] }
 0x58d   :  { %3492 = vmatpush.bf16.msra.mxu1 %v13328_v35  ;;  %3518 = vmatpush.bf16.msra.mxu3 %v13329_v20  ;;  %v13339_v35 = vld [vmem:[#allocation36_spill] sm:$0xff]  ;;  %v13340_v20 = vld [vmem:[#allocation38_spill] sm:$0xff] }
 0x58f   :  { %3481 = vmatpush.bf16.msra.mxu0 %v13330_v28  ;;  %3507 = vmatpush.bf16.msra.mxu2 %v13331_v1  ;;  %v13341_v28 = vld [vmem:[#allocation40_spill] sm:$0xff]  ;;  %v13342_v1 = vld [vmem:[#allocation45_spill] sm:$0xff] }
 0x591   :  { %3493 = vmatpush.bf16.msra.mxu1 %v13334_v31  ;;  %3519 = vmatpush.bf16.msra.mxu3 %v13335_v21  ;;  %v13345_v31 = vld [vmem:[#allocation44_spill] sm:$0xff]  ;;  %v13346_v21 = vld [vmem:[#allocation49_spill] sm:$0xff] }
 0x593   :  { %3526 = vmatpush.bf16.msrb.mxu0 %v13332_v22  ;;  %3552 = vmatpush.bf16.msrb.mxu2 %v13333_v41  ;;  %v13343_v22 = vld [vmem:[#allocation47_spill] sm:$0xff]  ;;  %v13344_v41 = vld [vmem:[#allocation42_spill] sm:$0xff] }
 0x595   :  { %3494 = vmatpush.bf16.msra.mxu1 %v13338_v55  ;;  %3520 = vmatpush.bf16.msra.mxu3 %v13339_v35  ;;  %v13349_v55 = vld [vmem:[#allocation48_spill] sm:$0xff]  ;;  %v13350_v35 = vld [vmem:[#allocation53_spill] sm:$0xff] }
 0x597   :  { %3527 = vmatpush.bf16.msrb.mxu0 %v13336_v12  ;;  %3553 = vmatpush.bf16.msrb.mxu2 %v13337_v16  ;;  %v13347_v12 = vld [vmem:[#allocation51_spill] sm:$0xff]  ;;  %v13348_v16 = vld [vmem:[#allocation46_spill] sm:$0xff] }
 0x599   :  { %3539 = vmatpush.bf16.msrb.mxu1 %v13340_v20  ;;  %3565 = vmatpush.bf16.msrb.mxu3 %v13341_v28  ;;  %v13351_v20 = vld [vmem:[#allocation55_spill] sm:$0xff]  ;;  %v13352_v28 = vld [vmem:[#allocation50_spill] sm:$0xff] }
 0x59b   :  { %3528 = vmatpush.bf16.msrb.mxu0 %v13342_v1  ;;  %3554 = vmatpush.bf16.msrb.mxu2 %v13343_v22  ;;  %v13353_v1 = vld [vmem:[#allocation52_spill] sm:$0xff]  ;;  %v13354_v22 = vld [vmem:[#allocation57_spill] sm:$0xff] }
 0x59d   :  { %3540 = vmatpush.bf16.msrb.mxu1 %v13344_v41  ;;  %3566 = vmatpush.bf16.msrb.mxu3 %v13345_v31  ;;  %v13355_v41 = vld [vmem:[#allocation59_spill] sm:$0xff]  ;;  %v13356_v31 = vld [vmem:[#allocation54_spill] sm:$0xff] }
 0x59f   :  { %3529 = vmatpush.bf16.msrb.mxu0 %v13346_v21  ;;  %3555 = vmatpush.bf16.msrb.mxu2 %v13347_v12  ;;  %v13357_v21 = vld [vmem:[#allocation56_spill] sm:$0xff]  ;;  %v13358_v12 = vld [vmem:[#allocation61_spill] sm:$0xff] }
 0x5a1   :  { %3541 = vmatpush.bf16.msrb.mxu1 %v13348_v16  ;;  %3567 = vmatpush.bf16.msrb.mxu3 %v13349_v55  ;;  %v13359_v16 = vld [vmem:[#allocation63_spill] sm:$0xff]  ;;  %v13360_v55 = vld [vmem:[#allocation58_spill] sm:$0xff] }
 0x5a3   :  { %3530 = vmatpush.bf16.msrb.mxu0 %v13350_v35  ;;  %3556 = vmatpush.bf16.msrb.mxu2 %v13351_v20  ;;  %v13361_v35 = vld [vmem:[#allocation60_spill] sm:$0xff]  ;;  %v13362_v20 = vld [vmem:[#allocation65_spill] sm:$0xff] }
 0x5a5   :  { %3542 = vmatpush.bf16.msrb.mxu1 %v13352_v28  ;;  %3568 = vmatpush.bf16.msrb.mxu3 %v13353_v1  ;;  %v13363_v28 = vld [vmem:[#allocation67_spill] sm:$0xff]  ;;  %v13364_v1 = vld [vmem:[#allocation62_spill] sm:$0xff] }
 0x5a7   :  { %3531 = vmatpush.bf16.msrb.mxu0 %v13354_v22  ;;  %3557 = vmatpush.bf16.msrb.mxu2 %v13355_v41  ;;  %v13365_v22 = vld [vmem:[#allocation64_spill] sm:$0xff]  ;;  %v13366_v41 = vld [vmem:[#allocation66_spill] sm:$0xff] }
 0x5a9   :  { %3543 = vmatpush.bf16.msrb.mxu1 %v13356_v31  ;;  %3569 = vmatpush.bf16.msrb.mxu3 %v13357_v21  ;;  %v13367_v31 = vld [vmem:[#allocation68_spill] sm:$0xff] }
 0x5ab   :  { %3532 = vmatpush.bf16.msrb.mxu0 %v13358_v12  ;;  %3558 = vmatpush.bf16.msrb.mxu2 %v13359_v16  ;;  %v13368_v16 = vld [vmem:[#allocation87_spill] sm:$0xff] }
 0x5ad   :  { %3544 = vmatpush.bf16.msrb.mxu1 %v13360_v55  ;;  %3570 = vmatpush.bf16.msrb.mxu3 %v13361_v35  ;;  %v300_v55 = vadd.f32 %v13369_v50, %v13368_v16 }
 0x5af   :  { %3533 = vmatpush.bf16.msrb.mxu0 %v13362_v20  ;;  %3559 = vmatpush.bf16.msrb.mxu2 %v13363_v28  ;;  %v3129_v21 = vpop.f32.mrf.mxu0  ;;  %v13370_v28 = vld [vmem:[#allocation93_spill] sm:$0xff] }
 0x5b1   :  { %3545 = vmatpush.bf16.msrb.mxu1 %v13364_v1  ;;  %3571 = vmatpush.bf16.msrb.mxu3 %v13365_v22  ;;  %v329_v1 = vadd.f32 %v13371_v15, %v13370_v28 }
 0x5b5   :  { %3546 = vmatpush.bf16.msrb.mxu1 %v13366_v41  ;;  %3572 = vmatpush.bf16.msrb.mxu3 %v13367_v31  ;;  %v3142_v12 = vpop.f32.mrf.mxu1  ;;  %v3155_v0 = vpop.f32.mrf.mxu2 }
 0x5b6   :  { %v3143_v2 = vadd.f32 %v3142_v12, %v3129_v21 }
 0x5b7   :  { %v3131_v35 = vpop.f32.mrf.mxu0 }
 0x5b8   :  { %v3328_v47 = vadd.f32 %v3143_v2, %v300_v55  ;;  %v13372_v35 = vld [vmem:[#allocation101_spill] sm:$0xff]  ;;  %v13373_v55 = vld [vmem:[#allocation143_spill] sm:$0xff] }
 0x5ba   :  { %v6760_v20 = vmul.f32 -1.442695, %v3328_v47  ;;  %v358_v47 = vadd.f32 %v13373_v55, %v13372_v35 }
 0x5bb   :  { %v3168_v4 = vpop.f32.mrf.mxu3 }
 0x5bc   :  { %7607 = vpow2.f32 %v6760_v20  ;;  %v3169_v22 = vadd.f32 %v3168_v4, %v3155_v0 }
 0x5bd   :  { %v3144_v10 = vpop.f32.mrf.mxu1  ;;  %v3157_v41 = vpop.f32.mrf.mxu2 }
 0x5be   :  { %v3329_v40 = vadd.f32 %v3169_v22, %v329_v1 }
 0x5bf   :  { %v3181_v31 = vpop.f32.mrf.mxu0 }
 0x5c0   :  { %v6761_v17 = vmul.f32 -1.442695, %v3329_v40 }
 0x5c2   :  { %v7608_v39 = vpop.eup %7607  ;;  %7609 = vpow2.f32 %v6761_v17 }
 0x5c3   :  { %v3342_v44 = vadd.f32 1.0, %v7608_v39  ;;  %v3170_v9 = vpop.f32.mrf.mxu3  ;;  %v13374_v39 = vld [vmem:[#allocation102_spill] sm:$0xff] }
 0x5c4   :  { %v13375_v9 = vld [vmem:[#allocation145_spill] sm:$0xff] }
 0x5c5   :  { %v3194_v50 = vpop.f32.mrf.mxu1  ;;  %v3207_v21 = vpop.f32.mrf.mxu2  ;;  %7611 = vrcp.f32 %v3342_v44  ;;  %v387_v17 = vadd.f32 %v13375_v9, %v13374_v39  ;;  %v13377_v9 = vld [vmem:[#allocation188_spill] sm:$0xff]  ;;  %vm3349_vm10 = vweird.f32 %v3342_v44 }
 0x5c6   :  { %v3195_v2 = vadd.f32 %v3194_v50, %v3181_v31 }
 0x5c7   :  { %v3183_v12 = vpop.f32.mrf.mxu0 }
 0x5c8   :  { %v7610_v15 = vpop.eup %7609  ;;  %v3330_v20 = vadd.f32 %v3195_v2, %v358_v47 }
 0x5c9   :  { %v10669_v4 = vadd.f32 1.0, %v7610_v15 }
 0x5ca   :  { %v6762_v10 = vmul.f32 -1.442695, %v3330_v20 }
 0x5cb   :  { %7613 = vrcp.f32 %v10669_v4  ;;  %v3220_v40 = vpop.f32.mrf.mxu3  ;;  %v10672_v41 = vpop.eup %7611  ;;  %vm3364_vm15 = vweird.f32 %v10669_v4 }
 0x5cc   :  { %7615 = vpow2.f32 %v6762_v10  ;;  %v3221_v22 = vadd.f32 %v3220_v40, %v3207_v21  ;;  %v3345_v31 = vmul.f32 %v10672_v41, %v3342_v44  ;;  %v13376_v40 = vld [vmem:[#allocation171_spill] sm:$0xff]  ;;  %vm3350_vm9 = vweird.f32 %v10672_v41 }
 0x5cd   :  { %v3196_v0 = vpop.f32.mrf.mxu1  ;;  %v3209_v1 = vpop.f32.mrf.mxu2  ;;  %vm10692_vm11 = vmor %vm3349_vm10, %vm3350_vm9 }
 0x5ce   :  { %v3331_v55 = vadd.f32 %v3221_v22, %v387_v17  ;;  %v3346_v15 = vsub.f32 1.0, %v3345_v31  ;;  %v416_v17 = vadd.f32 %v13377_v9, %v13376_v40  ;;  %v13379_v9 = vld [vmem:[#allocation190_spill] sm:$0xff] }
 0x5cf   :  { %v3233_v50 = vpop.f32.mrf.mxu0 }
 0x5d0   :  { %v6763_v47 = vmul.f32 -1.442695, %v3331_v55  ;;  %v3347_v0 = vmul.f32 %v10672_v41, %v3346_v15 }
 0x5d1   :  { %v10677_v2 = vpop.eup %7613 }
 0x5d2   :  { %v7616_v12 = vpop.eup %7615  ;;  %7617 = vpow2.f32 %v6763_v47  ;;  %v3360_v28 = vmul.f32 %v10677_v2, %v10669_v4  ;;  %v3353_v47 = vand.u32 2147483647, %v3342_v44  ;;  %v3348_v11 = vadd.f32 %v10672_v41, %v3347_v0 }
 0x5d3   :  { %v3380_v20 = vadd.f32 1.0, %v7616_v12  ;;  %v3222_v35 = vpop.f32.mrf.mxu3  ;;  %vm3365_vm13 = vweird.f32 %v10677_v2 }
 0x5d4   :  { %v3361_v39 = vsub.f32 1.0, %v3360_v28  ;;  %v3355_v35 = vand.u32 2147483648, %v3342_v44  ;;  %vm10696_vm12 = vcmp.eq.f32.partialorder %v3353_v47, 8.507059e+37  ;;  %v3368_v47 = vand.u32 2147483647, %v10669_v4  ;;  %vm10713_vm1 = vmor %vm3364_vm15, %vm3365_vm13 }
 0x5d5   :  { %7619 = vrcp.f32 %v3380_v20  ;;  %v3259_v10 = vpop.f32.mrf.mxu2  ;;  %v3246_v21 = vpop.f32.mrf.mxu1  ;;  %v3393_v48 = vand.u32 2147483648, %v3380_v20  ;;  %vm3387_vm0 = vweird.f32 %v3380_v20 }
 0x5d6   :  { %v3247_v22 = vadd.f32 %v3246_v21, %v3233_v50  ;;  %v3362_v15 = vmul.f32 %v10677_v2, %v3361_v39  ;;  %v13378_v21 = vld [vmem:[#allocation173_spill] sm:$0xff]  ;;  %v3356_v40 = vor.u32 1.1754944e-38, %v3355_v35  ;;  %v3352_v39 = vsel %vm10692_vm11, %v10672_v41, %v3348_v11 }
 0x5d7   :  { %v3235_v1 = vpop.f32.mrf.mxu0  ;;  %v445_v28 = vadd.f32 %v13379_v9, %v13378_v21  ;;  %v3370_v35 = vand.u32 2147483648, %v10669_v4  ;;  %vm3369_vm4 = vcmp.eq.f32.partialorder %v3368_v47, 8.507059e+37  ;;  %v13413_v21 = vld [vmem:[#allocation154_spill] sm:$0xff] }
 0x5d8   :  { %v7618_v55 = vpop.eup %7617  ;;  %v3332_v31 = vadd.f32 %v3247_v22, %v416_v17  ;;  %v3357_v41 = vsel %vm10696_vm12, %v3356_v40, %v3352_v39 }
 0x5d9   :  { %v10684_v16 = vadd.f32 1.0, %v7618_v55  ;;  %v3371_v39 = vor.u32 1.1754944e-38, %v3370_v35 }
 0x5db   :  { %v7620_v12 = vpop.eup %7619  ;;  %7621 = vrcp.f32 %v10684_v16  ;;  %v3272_v50 = vpop.f32.mrf.mxu3  ;;  %v3408_v40 = vand.u32 2147483648, %v10684_v16  ;;  %vm3402_vm6 = vweird.f32 %v10684_v16 }
 0x5dc   :  { %v3383_v43 = vmul.f32 %v7620_v12, %v3380_v20  ;;  %7623 = vtanh.f32 %v3332_v31  ;;  %v3273_v1 = vadd.f32 %v3272_v50, %v3259_v10  ;;  %vm3388_vm14 = vweird.f32 %v7620_v12 }
 0x5dd   :  { %v3261_v17 = vpop.f32.mrf.mxu2  ;;  %v3248_v31 = vpop.f32.mrf.mxu1  ;;  %v3363_v10 = vadd.f32 %v10677_v2, %v3362_v15  ;;  %vm3389_vm2 = vmor %vm3387_vm0, %vm3388_vm14 }
 0x5de   :  { %v3384_v22 = vsub.f32 1.0, %v3383_v43  ;;  %v3333_v9 = vadd.f32 %v3273_v1, %v445_v28  ;;  %v3391_v43 = vand.u32 2147483647, %v3380_v20  ;;  %v3394_v1 = vor.u32 1.1754944e-38, %v3393_v48 }
 0x5df   :  { %v3367_v20 = vsel %vm10713_vm1, %v10677_v2, %v3363_v10  ;;  %v3406_v48 = vand.u32 2147483647, %v10684_v16  ;;  %v3409_v10 = vor.u32 1.1754944e-38, %v3408_v40  ;;  %v13389_v40 = vld [vmem:[#allocation192_spill] sm:$0xff] }
 0x5e0   :  { %v3385_v44 = vmul.f32 %v7620_v12, %v3384_v22  ;;  %7625 = vtanh.f32 %v3333_v9  ;;  %vm3392_vm3 = vcmp.eq.f32.partialorder %v3391_v43, 8.507059e+37 }
 0x5e1   :  { %v7622_v50 = vpop.eup %7621  ;;  %vm3407_vm8 = vcmp.eq.f32.partialorder %v3406_v48, 8.507059e+37 }
 0x5e2   :  { %v7624_v17 = vpop.eup %7623  ;;  %v3398_v11 = vmul.f32 %v7622_v50, %v10684_v16  ;;  %v3386_v28 = vadd.f32 %v7620_v12, %v3385_v44  ;;  %vm3403_vm5 = vweird.f32 %v7622_v50 }
 0x5e3   :  { %v3454_v22 = vmul.f32 %v7624_v17, %v3357_v41  ;;  %v3274_v31 = vpop.f32.mrf.mxu3  ;;  %vm3404_vm7 = vmor %vm3402_vm6, %vm3403_vm5 }
 0x5e4   :  { %v3399_v55 = vsub.f32 1.0, %v3398_v11  ;;  %v3390_v4 = vsel %vm3389_vm2, %v7620_v12, %v3386_v28  ;;  %v3372_v11 = vsel %vm3369_vm4, %v3371_v39, %v3367_v20 }
 0x5e5   :  { %v3395_v0 = vsel %vm3392_vm3, %v3394_v1, %v3390_v4  ;;  %v13387_v4 = vld [vmem:[#allocation191_spill] sm:$0xff] }
 0x5e6   :  { %v3400_v9 = vmul.f32 %v7622_v50, %v3399_v55  ;;  %v3452_v44 = vmul.f32 %v3395_v0, %v10498_v6  ;;  %v7626_v17 = vpop.eup %7625  ;;  %v13386_v55 = vld [vmem:[#allocation177_spill] sm:$0xff] }
 0x5e7   :  { %v3455_v2 = vmul.f32 %v7626_v17, %v3372_v11  ;;  %v474_v20 = vadd.f32 %v13387_v4, %v13386_v55  ;;  %v13412_v55 = vld [vmem:[#allocation152_spill] sm:$0xff] }
 0x5e8   :  { %v10724_v12 = vadd.f32 %v3454_v22, %v3452_v44  ;;  %v3401_v43 = vadd.f32 %v7622_v50, %v3400_v9  ;;  %v13388_v9 = vld [vmem:[#allocation178_spill] sm:$0xff] }
 0x5ea   :  { %v3405_v41 = vsel %vm3404_vm7, %v7622_v50, %v3401_v43  ;;  %v503_v50 = vadd.f32 %v13389_v40, %v13388_v9  ;;  %v13411_v9 = vld [vmem:[#allocation159_spill] sm:$0xff] }
 0x5eb   :  { %v3410_v47 = vsel %vm3407_vm8, %v3409_v10, %v3405_v41 }
 0x5ec   :  { %v3453_v35 = vmul.f32 %v3410_v47, %v10501_v30 }
 0x5ee   :  { %v10727_v15 = vadd.f32 %v3455_v2, %v3453_v35 }
 0x5ef   :  { %v3285_v28 = vpop.f32.mrf.mxu0 }
 0x5f5   :  { %v3298_v6 = vpop.f32.mrf.mxu1  ;;  %v3311_v1 = vpop.f32.mrf.mxu2 }
 0x5f6   :  { %v3299_v16 = vadd.f32 %v3298_v6, %v3285_v28 }
 0x5f7   :  { %v3287_v22 = vpop.f32.mrf.mxu0 }
 0x5f8   :  { %v3334_v31 = vadd.f32 %v3299_v16, %v474_v20 }
 0x5fa   :  { %v6764_v0 = vmul.f32 -1.442695, %v3334_v31 }
 0x5fb   :  { %v3324_v39 = vpop.f32.mrf.mxu3 }
 0x5fc   :  { %7627 = vpow2.f32 %v6764_v0  ;;  %v3325_v44 = vadd.f32 %v3324_v39, %v3311_v1 }
 0x5fd   :  { %v3300_v48 = vpop.f32.mrf.mxu1  ;;  %v3313_v30 = vpop.f32.mrf.mxu2 }
 0x5fe   :  { %v3335_v17 = vadd.f32 %v3325_v44, %v503_v50 }
 0x600   :  { %v6765_v11 = vmul.f32 -1.442695, %v3335_v17 }
 0x602   :  { %v7628_v43 = vpop.eup %7627  ;;  %7629 = vpow2.f32 %v6765_v11 }
 0x603   :  { %v3420_v2 = vadd.f32 1.0, %v7628_v43  ;;  %v3326_v10 = vpop.f32.mrf.mxu3 }
 0x605   :  { %7631 = vrcp.f32 %v3420_v2  ;;  %v3433_v4 = vand.u32 2147483648, %v3420_v2  ;;  %v3431_v1 = vand.u32 2147483647, %v3420_v2  ;;  %vm3427_vm10 = vweird.f32 %v3420_v2 }
 0x607   :  { %v3434_v0 = vor.u32 1.1754944e-38, %v3433_v4  ;;  %vm3432_vm12 = vcmp.eq.f32.partialorder %v3431_v1, 8.507059e+37  ;;  %v13394_v1 = vld [vmem:[#allocation131_spill] sm:$0xff] }
 0x608   :  { %v7630_v41 = vpop.eup %7629 }
 0x609   :  { %v3421_v47 = vadd.f32 1.0, %v7630_v41 }
 0x60b   :  { %v7632_v35 = vpop.eup %7631  ;;  %7633 = vrcp.f32 %v3421_v47  ;;  %v3448_v48 = vand.u32 2147483648, %v3421_v47  ;;  %v3446_v11 = vand.u32 2147483647, %v3421_v47  ;;  %vm3442_vm14 = vweird.f32 %v3421_v47 }
 0x60c   :  { %v3423_v28 = vmul.f32 %v7632_v35, %v3420_v2  ;;  %7635 = vtanh.f32 %v10724_v12  ;;  %vm3428_vm9 = vweird.f32 %v7632_v35 }
 0x60d   :  { %vm3429_vm11 = vmor %vm3427_vm10, %vm3428_vm9  ;;  %7637 = vtanh.f32 %v10727_v15  ;;  %v3449_v10 = vor.u32 1.1754944e-38, %v3448_v48  ;;  %vm3447_vm0 = vcmp.eq.f32.partialorder %v3446_v11, 8.507059e+37  ;;  %v13403_v48 = vld [vmem:[#allocation147_spill] sm:$0xff]  ;;  %v13405_v11 = vld [vmem:[#allocation142_spill] sm:$0xff] }
 0x60e   :  { %v3424_v6 = vsub.f32 1.0, %v3423_v28 }
 0x610   :  { %v3425_v20 = vmul.f32 %v7632_v35, %v3424_v6 }
 0x611   :  { %v7634_v16 = vpop.eup %7633 }
 0x612   :  { %v3426_v22 = vadd.f32 %v7632_v35, %v3425_v20  ;;  %v3438_v31 = vmul.f32 %v7634_v16, %v3421_v47  ;;  %v7636_v50 = vpop.eup %7635  ;;  %vm3443_vm13 = vweird.f32 %v7634_v16  ;;  %v13392_v47 = vld [vmem:[#allocation122_spill] sm:$0xff]  ;;  %v13393_v20 = vld [vmem:[#allocation125_spill] sm:$0xff] }
 0x613   :  { %vm3444_vm15 = vmor %vm3442_vm14, %vm3443_vm13 }
 0x614   :  { %v3430_v39 = vsel %vm3429_vm11, %v7632_v35, %v3426_v22  ;;  %v3439_v40 = vsub.f32 1.0, %v3438_v31  ;;  %v7638_v35 = vpop.eup %7637  ;;  %v13396_v22 = vld [vmem:[#allocation128_spill] sm:$0xff]  ;;  %v13397_v31 = vld [vmem:[#allocation130_spill] sm:$0xff] }
 0x615   :  { %v3435_v44 = vsel %vm3432_vm12, %v3434_v0, %v3430_v39  ;;  %v13398_v0 = vld [vmem:[#allocation139_spill] sm:$0xff]  ;;  %v13399_v39 = vld [vmem:[#allocation141_spill] sm:$0xff] }
 0x616   :  { %v10735_v30 = vmul.f32 %v7636_v50, %v3435_v44  ;;  %v3440_v17 = vmul.f32 %v7634_v16, %v3439_v40  ;;  %v13400_v40 = vld [vmem:[#allocation134_spill] sm:$0xff]  ;;  %v13402_v44 = vld [vmem:[#allocation144_spill] sm:$0xff] }
 0x617   :  { %v13401_v50 = vld [vmem:[#allocation138_spill] sm:$0xff] }
 0x618   :  { %13390 = vst [vmem:[#allocation83_spill] sm:$0xff] %v10735_v30  ;;  %v10739_v43 = vpack.c.bf16 %v10735_v30, %v10735_v30  ;;  %v3441_v2 = vadd.f32 %v7634_v16, %v3440_v17  ;;  %v13404_v17 = vld [vmem:[#allocation140_spill] sm:$0xff]  ;;  %v13415_v30 = vld [vmem:[#allocation165_spill] sm:$0xff] }
 0x61a   :  { %v3445_v41 = vsel %vm3444_vm15, %v7634_v16, %v3441_v2  ;;  %3482 = vmatmul.bf16.vlgmr.msra.gmra.mxu0 %v10739_v43  ;;  %3508 = vmatmul.bf16.vlgmr.msra.gmra.mxu2 %v10739_v43  ;;  %v13395_v16 = vld [vmem:[#allocation135_spill] sm:$0xff] }
 0x61b   :  { %v3450_v28 = vsel %vm3447_vm0, %v3449_v10, %v3445_v41  ;;  %3578 = vmatpush.bf16.msra.mxu0 %v12824_v51  ;;  %3604 = vmatpush.bf16.msra.mxu2 %v12825_v49  ;;  %v13406_v2 = vld [vmem:[#allocation151_spill] sm:$0xff]  ;;  %v13407_v10 = vld [vmem:[#allocation153_spill] sm:$0xff]  ;;  %v13408_v41 = vld [vmem:[#allocation146_spill] sm:$0xff] }
 0x61c   :  { %v10745_v6 = vmul.f32 %v7638_v35, %v3450_v28  ;;  %v13409_v35 = vld [vmem:[#allocation149_spill] sm:$0xff]  ;;  %v13410_v28 = vld [vmem:[#allocation155_spill] sm:$0xff] }
 0x61e   :  { %13391 = vst [vmem:[#allocation85_spill] sm:$0xff] %v10745_v6  ;;  %v10749_v4 = vpack.c.bf16 %v10745_v6, %v10745_v6  ;;  %v13414_v6 = vld [vmem:[#allocation163_spill] sm:$0xff] }
 0x61f   :  { %3579 = vmatpush.bf16.msra.mxu0 %v12827_v59  ;;  %3605 = vmatpush.bf16.msra.mxu2 %v12828_v27 }
 0x620   :  { %3495 = vmatmul.bf16.vlgmr.msra.gmra.mxu1 %v10749_v4  ;;  %3521 = vmatmul.bf16.vlgmr.msra.gmra.mxu3 %v10749_v4 }
 0x621   :  { %3591 = vmatpush.bf16.msra.mxu1 %v12829_v61  ;;  %3617 = vmatpush.bf16.msra.mxu3 %v12830_v8 }
 0x623   :  { %3580 = vmatpush.bf16.msra.mxu0 %v12831_v52  ;;  %3606 = vmatpush.bf16.msra.mxu2 %v12832_v56 }
 0x625   :  { %3592 = vmatpush.bf16.msra.mxu1 %v12833_v36  ;;  %3618 = vmatpush.bf16.msra.mxu3 %v12834_v24 }
 0x627   :  { %3581 = vmatpush.bf16.msra.mxu0 %v12835_v3  ;;  %3607 = vmatpush.bf16.msra.mxu2 %v12836_v29 }
 0x629   :  { %3593 = vmatpush.bf16.msra.mxu1 %v12837_v33  ;;  %3619 = vmatpush.bf16.msra.mxu3 %v12838_v63 }
 0x62a   :  { %3534 = vmatmul.bf16.vlgmr.msrb.gmra.mxu0 %v10739_v43  ;;  %3560 = vmatmul.bf16.vlgmr.msrb.gmra.mxu2 %v10739_v43 }
 0x62b   :  { %3582 = vmatpush.bf16.msra.mxu0 %v12839_v34  ;;  %3608 = vmatpush.bf16.msra.mxu2 %v12840_v60 }
 0x62d   :  { %3594 = vmatpush.bf16.msra.mxu1 %v12841_v5  ;;  %3620 = vmatpush.bf16.msra.mxu3 %v12842_v46 }
 0x62f   :  { %3583 = vmatpush.bf16.msra.mxu0 %v12843_v25  ;;  %3609 = vmatpush.bf16.msra.mxu2 %v12944_v58 }
 0x630   :  { %3547 = vmatmul.bf16.vlgmr.msrb.gmra.mxu1 %v10749_v4  ;;  %3573 = vmatmul.bf16.vlgmr.msrb.gmra.mxu3 %v10749_v4 }
 0x631   :  { %3595 = vmatpush.bf16.msra.mxu1 %v12945_v42  ;;  %3621 = vmatpush.bf16.msra.mxu3 %v12946_v32 }
 0x633   :  { %3584 = vmatpush.bf16.msra.mxu0 %v12947_v14  ;;  %3610 = vmatpush.bf16.msra.mxu2 %v12948_v38 }
 0x635   :  { %3596 = vmatpush.bf16.msra.mxu1 %v12949_v57  ;;  %3622 = vmatpush.bf16.msra.mxu3 %v12950_v13 }
 0x637   :  { %3585 = vmatpush.bf16.msra.mxu0 %v12951_v18  ;;  %3611 = vmatpush.bf16.msra.mxu2 %v12952_v23 }
 0x639   :  { %3597 = vmatpush.bf16.msra.mxu1 %v12955_v62  ;;  %3623 = vmatpush.bf16.msra.mxu3 %v12956_v45 }
 0x63a   :  { %3586 = vmatmul.bf16.vlgmr.msra.gmra.mxu0 %v10739_v43  ;;  %3612 = vmatmul.bf16.vlgmr.msra.gmra.mxu2 %v10739_v43 }
 0x63b   :  { %3630 = vmatpush.bf16.msrb.mxu0 %v12953_v26  ;;  %3656 = vmatpush.bf16.msrb.mxu2 %v12954_v37 }
 0x63d   :  { %3598 = vmatpush.bf16.msra.mxu1 %v12959_v19  ;;  %3624 = vmatpush.bf16.msra.mxu3 %v12960_v53 }
 0x63f   :  { %3631 = vmatpush.bf16.msrb.mxu0 %v12957_v7  ;;  %3657 = vmatpush.bf16.msrb.mxu2 %v12958_v54 }
 0x640   :  { %3599 = vmatmul.bf16.vlgmr.msra.gmra.mxu1 %v10749_v4  ;;  %3625 = vmatmul.bf16.vlgmr.msra.gmra.mxu3 %v10749_v4 }
 0x641   :  { %3643 = vmatpush.bf16.msrb.mxu1 %v13392_v47  ;;  %3669 = vmatpush.bf16.msrb.mxu3 %v13393_v20  ;;  %v13493_v20 = vld [vmem:[#allocation194_spill] sm:$0xff] }
 0x643   :  { %3632 = vmatpush.bf16.msrb.mxu0 %v13394_v1  ;;  %3658 = vmatpush.bf16.msrb.mxu2 %v13395_v16 }
 0x645   :  { %3644 = vmatpush.bf16.msrb.mxu1 %v13396_v22  ;;  %3670 = vmatpush.bf16.msrb.mxu3 %v13397_v31 }
 0x647   :  { %3633 = vmatpush.bf16.msrb.mxu0 %v13398_v0  ;;  %3659 = vmatpush.bf16.msrb.mxu2 %v13399_v39 }
 0x649   :  { %3645 = vmatpush.bf16.msrb.mxu1 %v13400_v40  ;;  %3671 = vmatpush.bf16.msrb.mxu3 %v13401_v50 }
 0x64b   :  { %3634 = vmatpush.bf16.msrb.mxu0 %v13402_v44  ;;  %3660 = vmatpush.bf16.msrb.mxu2 %v13403_v48 }
 0x64d   :  { %3646 = vmatpush.bf16.msrb.mxu1 %v13404_v17  ;;  %3672 = vmatpush.bf16.msrb.mxu3 %v13405_v11  ;;  %v13416_v11 = vld [vmem:[#allocation5_spill] sm:$0xff] }
 0x64f   :  { %3635 = vmatpush.bf16.msrb.mxu0 %v13406_v2  ;;  %3661 = vmatpush.bf16.msrb.mxu2 %v13407_v10  ;;  %v13417_v2 = vld [vmem:[#allocation7_spill] sm:$0xff]  ;;  %v13418_v10 = vld [vmem:[#allocation158_spill] sm:$0xff] }
 0x651   :  { %3647 = vmatpush.bf16.msrb.mxu1 %v13408_v41  ;;  %3673 = vmatpush.bf16.msrb.mxu3 %v13409_v35  ;;  %v13419_v41 = vld [vmem:[#allocation162_spill] sm:$0xff] }
 0x653   :  { %3636 = vmatpush.bf16.msrb.mxu0 %v13410_v28  ;;  %3662 = vmatpush.bf16.msrb.mxu2 %v13411_v9  ;;  %v13420_v9 = vld [vmem:[#allocation9_spill] sm:$0xff] }
 0x655   :  { %3648 = vmatpush.bf16.msrb.mxu1 %v13412_v55  ;;  %3674 = vmatpush.bf16.msrb.mxu3 %v13413_v21  ;;  %v13421_v55 = vld [vmem:[#allocation11_spill] sm:$0xff]  ;;  %v13422_v21 = vld [vmem:[#allocation164_spill] sm:$0xff] }
 0x657   :  { %3637 = vmatpush.bf16.msrb.mxu0 %v13414_v6  ;;  %3663 = vmatpush.bf16.msrb.mxu2 %v13415_v30  ;;  %v13423_v6 = vld [vmem:[#allocation166_spill] sm:$0xff] }
 0x658   :  { %v13424_v30 = vld [vmem:[#allocation6_spill] sm:$0xff] }
 0x659   :  { %3649 = vmatpush.bf16.msrb.mxu1 %v13418_v10  ;;  %3675 = vmatpush.bf16.msrb.mxu3 %v13419_v41  ;;  %v13427_v41 = vld [vmem:[#allocation15_spill] sm:$0xff] }
 0x65a   :  { %3638 = vmatmul.bf16.vlgmr.msrb.gmra.mxu0 %v10739_v43  ;;  %3664 = vmatmul.bf16.vlgmr.msrb.gmra.mxu2 %v10739_v43  ;;  %v13428_v43 = vld [vmem:[#allocation10_spill] sm:$0xff]  ;;  %v13435_v10 = vld [vmem:[#allocation23_spill] sm:$0xff] }
 0x65b   :  { %3828 = vmatpush.bf16.msra.mxu0 %v13416_v11  ;;  %3854 = vmatpush.bf16.msra.mxu2 %v13417_v2  ;;  %v13425_v11 = vld [vmem:[#allocation8_spill] sm:$0xff]  ;;  %v13426_v2 = vld [vmem:[#allocation13_spill] sm:$0xff] }
 0x65d   :  { %3650 = vmatpush.bf16.msrb.mxu1 %v13422_v21  ;;  %3676 = vmatpush.bf16.msrb.mxu3 %v13423_v6  ;;  %v13431_v21 = vld [vmem:[#allocation19_spill] sm:$0xff]  ;;  %v13432_v6 = vld [vmem:[#allocation14_spill] sm:$0xff] }
 0x65f   :  { %3829 = vmatpush.bf16.msra.mxu0 %v13420_v9  ;;  %3855 = vmatpush.bf16.msra.mxu2 %v13421_v55  ;;  %v13429_v9 = vld [vmem:[#allocation12_spill] sm:$0xff]  ;;  %v13430_v55 = vld [vmem:[#allocation17_spill] sm:$0xff] }
 0x660   :  { %3651 = vmatmul.bf16.vlgmr.msrb.gmra.mxu1 %v10749_v4  ;;  %3677 = vmatmul.bf16.vlgmr.msrb.gmra.mxu3 %v10749_v4  ;;  %v13436_v4 = vld [vmem:[#allocation18_spill] sm:$0xff] }
 0x661   :  { %3841 = vmatpush.bf16.msra.mxu1 %v13424_v30  ;;  %3867 = vmatpush.bf16.msra.mxu3 %v13425_v11  ;;  %v13433_v30 = vld [vmem:[#allocation16_spill] sm:$0xff]  ;;  %v13434_v11 = vld [vmem:[#allocation21_spill] sm:$0xff] }
 0x663   :  { %3830 = vmatpush.bf16.msra.mxu0 %v13426_v2  ;;  %3856 = vmatpush.bf16.msra.mxu2 %v13427_v41  ;;  %v13437_v2 = vld [vmem:[#allocation20_spill] sm:$0xff]  ;;  %v13438_v41 = vld [vmem:[#allocation25_spill] sm:$0xff] }
 0x665   :  { %3842 = vmatpush.bf16.msra.mxu1 %v13428_v43  ;;  %3868 = vmatpush.bf16.msra.mxu3 %v13429_v9  ;;  %v13439_v43 = vld [vmem:[#allocation27_spill] sm:$0xff]  ;;  %v13440_v9 = vld [vmem:[#allocation22_spill] sm:$0xff] }
 0x667   :  { %3831 = vmatpush.bf16.msra.mxu0 %v13430_v55  ;;  %3857 = vmatpush.bf16.msra.mxu2 %v13431_v21  ;;  %v13441_v55 = vld [vmem:[#allocation24_spill] sm:$0xff]  ;;  %v13442_v21 = vld [vmem:[#allocation29_spill] sm:$0xff] }
 0x669   :  { %3843 = vmatpush.bf16.msra.mxu1 %v13432_v6  ;;  %3869 = vmatpush.bf16.msra.mxu3 %v13433_v30  ;;  %v13443_v6 = vld [vmem:[#allocation31_spill] sm:$0xff]  ;;  %v13444_v30 = vld [vmem:[#allocation26_spill] sm:$0xff] }
 0x66b   :  { %3832 = vmatpush.bf16.msra.mxu0 %v13434_v11  ;;  %3858 = vmatpush.bf16.msra.mxu2 %v13435_v10  ;;  %v13445_v11 = vld [vmem:[#allocation28_spill] sm:$0xff]  ;;  %v13446_v10 = vld [vmem:[#allocation33_spill] sm:$0xff] }
 0x66d   :  { %3844 = vmatpush.bf16.msra.mxu1 %v13436_v4  ;;  %3870 = vmatpush.bf16.msra.mxu3 %v13437_v2  ;;  %v13447_v4 = vld [vmem:[#allocation35_spill] sm:$0xff]  ;;  %v13448_v2 = vld [vmem:[#allocation37_spill] sm:$0xff] }
 0x66f   :  { %3833 = vmatpush.bf16.msra.mxu0 %v13438_v41  ;;  %3859 = vmatpush.bf16.msra.mxu2 %v13439_v43  ;;  %v13449_v41 = vld [vmem:[#allocation39_spill] sm:$0xff]  ;;  %v13450_v43 = vld [vmem:[#allocation30_spill] sm:$0xff] }
 0x671   :  { %3845 = vmatpush.bf16.msra.mxu1 %v13440_v9  ;;  %3871 = vmatpush.bf16.msra.mxu3 %v13441_v55  ;;  %v13451_v9 = vld [vmem:[#allocation32_spill] sm:$0xff]  ;;  %v13452_v55 = vld [vmem:[#allocation41_spill] sm:$0xff] }
 0x673   :  { %3834 = vmatpush.bf16.msra.mxu0 %v13442_v21  ;;  %3860 = vmatpush.bf16.msra.mxu2 %v13443_v6  ;;  %v13453_v21 = vld [vmem:[#allocation43_spill] sm:$0xff]  ;;  %v13454_v6 = vld [vmem:[#allocation34_spill] sm:$0xff] }
 0x675   :  { %3846 = vmatpush.bf16.msra.mxu1 %v13444_v30  ;;  %3872 = vmatpush.bf16.msra.mxu3 %v13445_v11  ;;  %v13455_v30 = vld [vmem:[#allocation36_spill] sm:$0xff]  ;;  %v13456_v11 = vld [vmem:[#allocation38_spill] sm:$0xff] }
 0x677   :  { %3835 = vmatpush.bf16.msra.mxu0 %v13446_v10  ;;  %3861 = vmatpush.bf16.msra.mxu2 %v13447_v4  ;;  %v13457_v10 = vld [vmem:[#allocation40_spill] sm:$0xff]  ;;  %v13458_v4 = vld [vmem:[#allocation45_spill] sm:$0xff] }
 0x679   :  { %3847 = vmatpush.bf16.msra.mxu1 %v13450_v43  ;;  %3873 = vmatpush.bf16.msra.mxu3 %v13451_v9  ;;  %v13461_v43 = vld [vmem:[#allocation44_spill] sm:$0xff]  ;;  %v13462_v9 = vld [vmem:[#allocation49_spill] sm:$0xff] }
 0x67b   :  { %3880 = vmatpush.bf16.msrb.mxu0 %v13448_v2  ;;  %3906 = vmatpush.bf16.msrb.mxu2 %v13449_v41  ;;  %v13459_v2 = vld [vmem:[#allocation47_spill] sm:$0xff]  ;;  %v13460_v41 = vld [vmem:[#allocation42_spill] sm:$0xff] }
 0x67d   :  { %3848 = vmatpush.bf16.msra.mxu1 %v13454_v6  ;;  %3874 = vmatpush.bf16.msra.mxu3 %v13455_v30  ;;  %v13465_v6 = vld [vmem:[#allocation48_spill] sm:$0xff]  ;;  %v13466_v30 = vld [vmem:[#allocation53_spill] sm:$0xff] }
 0x67f   :  { %3881 = vmatpush.bf16.msrb.mxu0 %v13452_v55  ;;  %3907 = vmatpush.bf16.msrb.mxu2 %v13453_v21  ;;  %v13463_v55 = vld [vmem:[#allocation51_spill] sm:$0xff]  ;;  %v13464_v21 = vld [vmem:[#allocation46_spill] sm:$0xff] }
 0x681   :  { %3893 = vmatpush.bf16.msrb.mxu1 %v13456_v11  ;;  %3919 = vmatpush.bf16.msrb.mxu3 %v13457_v10  ;;  %v13467_v11 = vld [vmem:[#allocation55_spill] sm:$0xff]  ;;  %v13468_v10 = vld [vmem:[#allocation50_spill] sm:$0xff] }
 0x683   :  { %3882 = vmatpush.bf16.msrb.mxu0 %v13458_v4  ;;  %3908 = vmatpush.bf16.msrb.mxu2 %v13459_v2  ;;  %v13469_v4 = vld [vmem:[#allocation52_spill] sm:$0xff]  ;;  %v13470_v2 = vld [vmem:[#allocation57_spill] sm:$0xff] }
 0x685   :  { %3894 = vmatpush.bf16.msrb.mxu1 %v13460_v41  ;;  %3920 = vmatpush.bf16.msrb.mxu3 %v13461_v43  ;;  %v13471_v41 = vld [vmem:[#allocation59_spill] sm:$0xff]  ;;  %v13472_v43 = vld [vmem:[#allocation54_spill] sm:$0xff] }
 0x687   :  { %3883 = vmatpush.bf16.msrb.mxu0 %v13462_v9  ;;  %3909 = vmatpush.bf16.msrb.mxu2 %v13463_v55  ;;  %v13473_v9 = vld [vmem:[#allocation56_spill] sm:$0xff]  ;;  %v13474_v55 = vld [vmem:[#allocation61_spill] sm:$0xff] }
 0x689   :  { %3895 = vmatpush.bf16.msrb.mxu1 %v13464_v21  ;;  %3921 = vmatpush.bf16.msrb.mxu3 %v13465_v6  ;;  %v13475_v21 = vld [vmem:[#allocation63_spill] sm:$0xff]  ;;  %v13476_v6 = vld [vmem:[#allocation58_spill] sm:$0xff] }
 0x68b   :  { %3884 = vmatpush.bf16.msrb.mxu0 %v13466_v30  ;;  %3910 = vmatpush.bf16.msrb.mxu2 %v13467_v11  ;;  %v13477_v30 = vld [vmem:[#allocation60_spill] sm:$0xff]  ;;  %v13478_v11 = vld [vmem:[#allocation65_spill] sm:$0xff] }
 0x68d   :  { %3896 = vmatpush.bf16.msrb.mxu1 %v13468_v10  ;;  %3922 = vmatpush.bf16.msrb.mxu3 %v13469_v4  ;;  %v13479_v10 = vld [vmem:[#allocation67_spill] sm:$0xff]  ;;  %v13480_v4 = vld [vmem:[#allocation62_spill] sm:$0xff] }
 0x68f   :  { %3885 = vmatpush.bf16.msrb.mxu0 %v13470_v2  ;;  %3911 = vmatpush.bf16.msrb.mxu2 %v13471_v41  ;;  %v13481_v2 = vld [vmem:[#allocation64_spill] sm:$0xff]  ;;  %v13482_v41 = vld [vmem:[#allocation66_spill] sm:$0xff] }
 0x691   :  { %3897 = vmatpush.bf16.msrb.mxu1 %v13472_v43  ;;  %3923 = vmatpush.bf16.msrb.mxu3 %v13473_v9  ;;  %v13483_v43 = vld [vmem:[#allocation68_spill] sm:$0xff] }
 0x693   :  { %3886 = vmatpush.bf16.msrb.mxu0 %v13474_v55  ;;  %3912 = vmatpush.bf16.msrb.mxu2 %v13475_v21 }
 0x695   :  { %3898 = vmatpush.bf16.msrb.mxu1 %v13476_v6  ;;  %3924 = vmatpush.bf16.msrb.mxu3 %v13477_v30  ;;  %v13484_v6 = vld [vmem:[#allocation148_spill] sm:$0xff] }
 0x697   :  { %3887 = vmatpush.bf16.msrb.mxu0 %v13478_v11  ;;  %3913 = vmatpush.bf16.msrb.mxu2 %v13479_v10  ;;  %v3483_v9 = vpop.f32.mrf.mxu0 }
 0x699   :  { %3899 = vmatpush.bf16.msrb.mxu1 %v13480_v4  ;;  %3925 = vmatpush.bf16.msrb.mxu3 %v13481_v2  ;;  %v13485_v4 = vld [vmem:[#allocation150_spill] sm:$0xff] }
 0x69d   :  { %3900 = vmatpush.bf16.msrb.mxu1 %v13482_v41  ;;  %3926 = vmatpush.bf16.msrb.mxu3 %v13483_v43  ;;  %v3496_v55 = vpop.f32.mrf.mxu1  ;;  %v3509_v28 = vpop.f32.mrf.mxu2 }
 0x69e   :  { %v3497_v21 = vadd.f32 %v3496_v55, %v3483_v9 }
 0x69f   :  { %v3485_v35 = vpop.f32.mrf.mxu0 }
 0x6a0   :  { %v3682_v17 = vadd.f32 %v3497_v21, %v13484_v6 }
 0x6a2   :  { %v6766_v30 = vmul.f32 -1.442695, %v3682_v17  ;;  %v13486_v17 = vld [vmem:[#allocation156_spill] sm:$0xff] }
 0x6a3   :  { %v3522_v48 = vpop.f32.mrf.mxu3 }
 0x6a4   :  { %7639 = vpow2.f32 %v6766_v30  ;;  %v3523_v11 = vadd.f32 %v3522_v48, %v3509_v28 }
 0x6a5   :  { %v3498_v10 = vpop.f32.mrf.mxu1  ;;  %v3511_v44 = vpop.f32.mrf.mxu2 }
 0x6a6   :  { %v3683_v50 = vadd.f32 %v3523_v11, %v13485_v4 }
 0x6a7   :  { %v3535_v2 = vpop.f32.mrf.mxu0 }
 0x6a8   :  { %v6767_v40 = vmul.f32 -1.442695, %v3683_v50 }
 0x6aa   :  { %v7640_v41 = vpop.eup %7639  ;;  %7641 = vpow2.f32 %v6767_v40 }
 0x6ab   :  { %v3696_v43 = vadd.f32 1.0, %v7640_v41  ;;  %v3524_v39 = vpop.f32.mrf.mxu3 }
 0x6ac   :  { %v13487_v39 = vld [vmem:[#allocation160_spill] sm:$0xff] }
 0x6ad   :  { %v3548_v0 = vpop.f32.mrf.mxu1  ;;  %v3561_v31 = vpop.f32.mrf.mxu2  ;;  %7643 = vrcp.f32 %v3696_v43  ;;  %v3707_v16 = vand.u32 2147483647, %v3696_v43  ;;  %vm3703_vm2 = vweird.f32 %v3696_v43 }
 0x6ae   :  { %v3549_v35 = vadd.f32 %v3548_v0, %v3535_v2 }
 0x6af   :  { %v3537_v9 = vpop.f32.mrf.mxu0  ;;  %vm10911_vm4 = vcmp.eq.f32.partialorder %v3707_v16, 8.507059e+37 }
 0x6b0   :  { %v7642_v55 = vpop.eup %7641  ;;  %v3684_v21 = vadd.f32 %v3549_v35, %v13486_v17 }
 0x6b1   :  { %v10894_v6 = vadd.f32 1.0, %v7642_v55 }
 0x6b2   :  { %v6768_v48 = vmul.f32 -1.442695, %v3684_v21 }
 0x6b3   :  { %7645 = vrcp.f32 %v10894_v6  ;;  %v3574_v44 = vpop.f32.mrf.mxu3  ;;  %v7644_v28 = vpop.eup %7643  ;;  %vm3718_vm7 = vweird.f32 %v10894_v6  ;;  %v3722_v16 = vand.u32 2147483647, %v10894_v6 }
 0x6b4   :  { %7647 = vpow2.f32 %v6768_v48  ;;  %v3575_v50 = vadd.f32 %v3574_v44, %v3561_v31  ;;  %v3699_v10 = vmul.f32 %v7644_v28, %v3696_v43  ;;  %vm3704_vm1 = vweird.f32 %v7644_v28 }
 0x6b5   :  { %v3550_v40 = vpop.f32.mrf.mxu1  ;;  %v3563_v30 = vpop.f32.mrf.mxu2  ;;  %vm10907_vm3 = vmor %vm3703_vm2, %vm3704_vm1  ;;  %vm3723_vm12 = vcmp.eq.f32.partialorder %v3722_v16, 8.507059e+37 }
 0x6b6   :  { %v3685_v11 = vadd.f32 %v3575_v50, %v13487_v39  ;;  %v3700_v35 = vsub.f32 1.0, %v3699_v10 }
 0x6b7   :  { %v3587_v4 = vpop.f32.mrf.mxu0 }
 0x6b8   :  { %v6769_v0 = vmul.f32 -1.442695, %v3685_v11  ;;  %v3701_v44 = vmul.f32 %v7644_v28, %v3700_v35  ;;  %v13488_v11 = vld [vmem:[#allocation193_spill] sm:$0xff] }
 0x6b9   :  { %v10898_v2 = vpop.eup %7645 }
 0x6ba   :  { %v7648_v41 = vpop.eup %7647  ;;  %7649 = vpow2.f32 %v6769_v0  ;;  %v3714_v17 = vmul.f32 %v10898_v2, %v10894_v6  ;;  %v3709_v0 = vand.u32 2147483648, %v3696_v43  ;;  %vm3719_vm5 = vweird.f32 %v10898_v2 }
 0x6bb   :  { %v3734_v9 = vadd.f32 1.0, %v7648_v41  ;;  %v3576_v55 = vpop.f32.mrf.mxu3  ;;  %v3702_v41 = vadd.f32 %v7644_v28, %v3701_v44  ;;  %vm10928_vm9 = vmor %vm3718_vm7, %vm3719_vm5 }
 0x6bc   :  { %v3715_v30 = vsub.f32 1.0, %v3714_v17 }
 0x6bd   :  { %7651 = vrcp.f32 %v3734_v9  ;;  %v3613_v21 = vpop.f32.mrf.mxu2  ;;  %v3600_v31 = vpop.f32.mrf.mxu1  ;;  %v3745_v43 = vand.u32 2147483647, %v3734_v9  ;;  %vm3741_vm8 = vweird.f32 %v3734_v9 }
 0x6be   :  { %v3601_v48 = vadd.f32 %v3600_v31, %v3587_v4  ;;  %v3716_v4 = vmul.f32 %v10898_v2, %v3715_v30 }
 0x6bf   :  { %v3589_v40 = vpop.f32.mrf.mxu0  ;;  %vm3746_vm11 = vcmp.eq.f32.partialorder %v3745_v43, 8.507059e+37 }
 0x6c0   :  { %v7650_v50 = vpop.eup %7649  ;;  %v3686_v22 = vadd.f32 %v3601_v48, %v13488_v11  ;;  %v3747_v11 = vand.u32 2147483648, %v3734_v9 }
 0x6c1   :  { %v10902_v39 = vadd.f32 1.0, %v7650_v50  ;;  %v3710_v50 = vor.u32 1.1754944e-38, %v3709_v0  ;;  %v3724_v0 = vand.u32 2147483648, %v10894_v6 }
 0x6c3   :  { %v7652_v10 = vpop.eup %7651  ;;  %7653 = vrcp.f32 %v10902_v39  ;;  %v3626_v1 = vpop.f32.mrf.mxu3  ;;  %v3762_v48 = vand.u32 2147483648, %v10902_v39  ;;  %vm3756_vm14 = vweird.f32 %v10902_v39 }
 0x6c4   :  { %v3737_v55 = vmul.f32 %v7652_v10, %v3734_v9  ;;  %7655 = vtanh.f32 %v3686_v22  ;;  %v3627_v35 = vadd.f32 %v3626_v1, %v3613_v21  ;;  %v3706_v22 = vsel %vm10907_vm3, %v7644_v28, %v3702_v41 }
 0x6c5   :  { %v3615_v31 = vpop.f32.mrf.mxu2  ;;  %v3602_v44 = vpop.f32.mrf.mxu1  ;;  %vm3742_vm6 = vweird.f32 %v7652_v10  ;;  %v3717_v21 = vadd.f32 %v10898_v2, %v3716_v4 }
 0x6c6   :  { %v3738_v17 = vsub.f32 1.0, %v3737_v55  ;;  %v3687_v30 = vadd.f32 %v3627_v35, %v13493_v20  ;;  %v3711_v20 = vsel %vm10911_vm4, %v3710_v50, %v3706_v22  ;;  %vm3743_vm10 = vmor %vm3741_vm8, %vm3742_vm6  ;;  %v3748_v35 = vor.u32 1.1754944e-38, %v3747_v11 }
 0x6c7   :  { %v3721_v9 = vsel %vm10928_vm9, %v10898_v2, %v3717_v21  ;;  %v3725_v22 = vor.u32 1.1754944e-38, %v3724_v0  ;;  %v3760_v11 = vand.u32 2147483647, %v10902_v39  ;;  %v3763_v21 = vor.u32 1.1754944e-38, %v3762_v48 }
 0x6c8   :  { %v3739_v1 = vmul.f32 %v7652_v10, %v3738_v17  ;;  %7657 = vtanh.f32 %v3687_v30 }
 0x6c9   :  { %v7654_v55 = vpop.eup %7653  ;;  %vm3761_vm0 = vcmp.eq.f32.partialorder %v3760_v11, 8.507059e+37 }
 0x6ca   :  { %v7656_v31 = vpop.eup %7655  ;;  %v3752_v28 = vmul.f32 %v7654_v55, %v10902_v39  ;;  %v3740_v41 = vadd.f32 %v7652_v10, %v3739_v1  ;;  %vm3757_vm13 = vweird.f32 %v7654_v55 }
 0x6cb   :  { %v3808_v17 = vmul.f32 %v7656_v31, %v3711_v20  ;;  %v3628_v44 = vpop.f32.mrf.mxu3  ;;  %vm3758_vm15 = vmor %vm3756_vm14, %vm3757_vm13 }
 0x6cc   :  { %v3753_v40 = vsub.f32 1.0, %v3752_v28  ;;  %v3744_v6 = vsel %vm3743_vm10, %v7652_v10, %v3740_v41  ;;  %v3726_v28 = vsel %vm3723_vm12, %v3725_v22, %v3721_v9  ;;  %v13496_v9 = vld [vmem:[#allocation195_spill] sm:$0xff] }
 0x6cd   :  { %v3749_v50 = vsel %vm3746_vm11, %v3748_v35, %v3744_v6 }
 0x6ce   :  { %v3754_v30 = vmul.f32 %v7654_v55, %v3753_v40  ;;  %v3806_v1 = vmul.f32 %v3749_v50, %v10724_v12  ;;  %v7658_v31 = vpop.eup %7657 }
 0x6cf   :  { %v3809_v2 = vmul.f32 %v7658_v31, %v3726_v28 }
 0x6d0   :  { %v10939_v10 = vadd.f32 %v3808_v17, %v3806_v1  ;;  %v3755_v43 = vadd.f32 %v7654_v55, %v3754_v30 }
 0x6d2   :  { %v3759_v20 = vsel %vm3758_vm15, %v7654_v55, %v3755_v43  ;;  %v13497_v55 = vld [vmem:[#allocation197_spill] sm:$0xff] }
 0x6d3   :  { %v3764_v16 = vsel %vm3761_vm0, %v3763_v21, %v3759_v20 }
 0x6d4   :  { %v3807_v0 = vmul.f32 %v3764_v16, %v10727_v15 }
 0x6d6   :  { %v10942_v4 = vadd.f32 %v3809_v2, %v3807_v0 }
 0x6d7   :  { %v3639_v41 = vpop.f32.mrf.mxu0 }
 0x6dd   :  { %v3652_v12 = vpop.f32.mrf.mxu1  ;;  %v3665_v35 = vpop.f32.mrf.mxu2 }
 0x6de   :  { %v3653_v40 = vadd.f32 %v3652_v12, %v3639_v41 }
 0x6df   :  { %v3641_v6 = vpop.f32.mrf.mxu0 }
 0x6e0   :  { %v3688_v39 = vadd.f32 %v3653_v40, %v13496_v9 }
 0x6e2   :  { %v6770_v17 = vmul.f32 -1.442695, %v3688_v39 }
 0x6e3   :  { %v3678_v44 = vpop.f32.mrf.mxu3 }
 0x6e4   :  { %7659 = vpow2.f32 %v6770_v17  ;;  %v3679_v50 = vadd.f32 %v3678_v44, %v3665_v35 }
 0x6e5   :  { %v3654_v22 = vpop.f32.mrf.mxu1  ;;  %v3667_v48 = vpop.f32.mrf.mxu2 }
 0x6e6   :  { %v3689_v30 = vadd.f32 %v3679_v50, %v13497_v55 }
 0x6e8   :  { %v6771_v1 = vmul.f32 -1.442695, %v3689_v30 }
 0x6ea   :  { %v7660_v11 = vpop.eup %7659  ;;  %7661 = vpow2.f32 %v6771_v1 }
 0x6eb   :  { %v3774_v15 = vadd.f32 1.0, %v7660_v11  ;;  %v3680_v31 = vpop.f32.mrf.mxu3 }
 0x6ed   :  { %7663 = vrcp.f32 %v3774_v15  ;;  %v3787_v16 = vand.u32 2147483648, %v3774_v15  ;;  %v3785_v41 = vand.u32 2147483647, %v3774_v15  ;;  %vm3781_vm2 = vweird.f32 %v3774_v15 }
 0x6ef   :  { %v3788_v6 = vor.u32 1.1754944e-38, %v3787_v16  ;;  %vm3786_vm4 = vcmp.eq.f32.partialorder %v3785_v41, 8.507059e+37  ;;  %v13521_v16 = vld [vmem:[#allocation158_spill] sm:$0xff]  ;;  %v6860_v41 = vld [vmem:[%s12286_s4 + $0xa0] sm:$0xf] }
 0x6f0   :  { %v7662_v28 = vpop.eup %7661 }
 0x6f1   :  { %v3775_v43 = vadd.f32 1.0, %v7662_v28 }
 0x6f3   :  { %v7664_v2 = vpop.eup %7663  ;;  %7665 = vrcp.f32 %v3775_v43  ;;  %v3802_v50 = vand.u32 2147483648, %v3775_v43  ;;  %v3800_v55 = vand.u32 2147483647, %v3775_v43  ;;  %vm3796_vm6 = vweird.f32 %v3775_v43 }
 0x6f4   :  { %v3777_v21 = vmul.f32 %v7664_v2, %v3774_v15  ;;  %7667 = vtanh.f32 %v10939_v10  ;;  %vm3782_vm1 = vweird.f32 %v7664_v2 }
 0x6f5   :  { %vm3783_vm3 = vmor %vm3781_vm2, %vm3782_vm1  ;;  %7669 = vtanh.f32 %v10942_v4  ;;  %v3803_v11 = vor.u32 1.1754944e-38, %v3802_v50  ;;  %vm3801_vm8 = vcmp.eq.f32.partialorder %v3800_v55, 8.507059e+37  ;;  %v7006_v50 = vld [vmem:[%s12286_s4 + $0x1d0] sm:$0xf0]  ;;  %v13524_v55 = vld [vmem:[#allocation166_spill] sm:$0xff] }
 0x6f6   :  { %v3778_v20 = vsub.f32 1.0, %v3777_v21 }
 0x6f8   :  { %v3779_v0 = vmul.f32 %v7664_v2, %v3778_v20 }
 0x6f9   :  { %v7666_v12 = vpop.eup %7665 }
 0x6fa   :  { %v3780_v35 = vadd.f32 %v7664_v2, %v3779_v0  ;;  %v3792_v40 = vmul.f32 %v7666_v12, %v3775_v43  ;;  %v7668_v17 = vpop.eup %7667  ;;  %vm3797_vm5 = vweird.f32 %v7666_v12  ;;  %v13522_v0 = vld [vmem:[#allocation162_spill] sm:$0xff] }
 0x6fb   :  { %vm3798_vm7 = vmor %vm3796_vm6, %vm3797_vm5  ;;  %v7670_v31 = vpop.eup %7669 }
 0x6fc   :  { %v3784_v9 = vsel %vm3783_vm3, %v7664_v2, %v3780_v35  ;;  %v3793_v39 = vsub.f32 1.0, %v3792_v40 }
 0x6fd   :  { %v3789_v44 = vsel %vm3786_vm4, %v3788_v6, %v3784_v9  ;;  %v7370_v6 = vld [vmem:[%s12286_s4 + $0xa4] sm:$0xf]  ;;  %v6862_v9 = vld [vmem:[%s12286_s4 + $0xb0] sm:$0xf0] }
 0x6fe   :  { %v10948_v22 = vmul.f32 %v7668_v17, %v3789_v44  ;;  %v3794_v48 = vmul.f32 %v7666_v12, %v3793_v39  ;;  %v7004_v39 = vld [vmem:[%s12286_s4 + $0x1c0] sm:$0xf]  ;;  %v7408_v17 = vld [vmem:[%s12286_s4 + $0x1cc] sm:$0xf0]  ;;  %v7406_v44 = vld [vmem:[%s12286_s4 + $0x1c4] sm:$0xf] }
 0x700   :  { %v10952_v30 = vpack.c.bf16 %v10948_v22, %v10948_v22  ;;  %v3795_v1 = vadd.f32 %v7666_v12, %v3794_v48  ;;  %v13523_v48 = vld [vmem:[#allocation164_spill] sm:$0xff] }
 0x702   :  { %v3799_v15 = vsel %vm3798_vm7, %v7666_v12, %v3795_v1  ;;  %3836 = vmatmul.bf16.vlgmr.msra.gmra.mxu0 %v10952_v30  ;;  %3862 = vmatmul.bf16.vlgmr.msra.gmra.mxu2 %v10952_v30  ;;  %v7372_v12 = vld [vmem:[%s12286_s4 + $0xac] sm:$0xf0]  ;;  %v6865_v1 = vor.u32 %v7370_v6, %v6862_v9 }
 0x703   :  { %v3804_v28 = vsel %vm3801_vm8, %v3803_v11, %v3799_v15  ;;  %3932 = vmatpush.bf16.msra.mxu0 %v12824_v51  ;;  %3958 = vmatpush.bf16.msra.mxu2 %v12825_v49  ;;  %v13498_v51 = vld [vmem:[#allocation125_spill] sm:$0xff]  ;;  %v13499_v49 = vld [vmem:[#allocation131_spill] sm:$0xff] }
 0x704   :  { %v10958_v2 = vmul.f32 %v7670_v31, %v3804_v28  ;;  %v6844_v11 = vld [vmem:[%s12286_s4 + $0x80] sm:$0xf]  ;;  %v7368_v15 = vld [vmem:[%s12286_s4 + $0x8c] sm:$0xf0]  ;;  %v7005_v31 = vor.u32 %v7408_v17, %v7004_v39  ;;  %v7009_v28 = vor.u32 %v7406_v44, %v7006_v50  ;;  %v7350_v39 = vld [vmem:[%s12286_s4 + $0x4] sm:$0xf] }
 0x705   :  { %v6782_v17 = vld [vmem:[%s12286_s4 + $0x10] sm:$0xf0]  ;;  %v6924_v44 = vld [vmem:[%s12286_s4 + $0x120] sm:$0xf]  ;;  %v7388_v50 = vld [vmem:[%s12286_s4 + $0x12c] sm:$0xf0] }
 0x706   :  { %v10962_v21 = vpack.c.bf16 %v10958_v2, %v10958_v2 }
 0x707   :  { %3933 = vmatpush.bf16.msra.mxu0 %v12827_v59  ;;  %3959 = vmatpush.bf16.msra.mxu2 %v12828_v27  ;;  %v13500_v59 = vld [vmem:[#allocation135_spill] sm:$0xff]  ;;  %v13501_v27 = vld [vmem:[#allocation128_spill] sm:$0xff] }
 0x708   :  { %3849 = vmatmul.bf16.vlgmr.msra.gmra.mxu1 %v10962_v21  ;;  %3875 = vmatmul.bf16.vlgmr.msra.gmra.mxu3 %v10962_v21 }
 0x709   :  { %3945 = vmatpush.bf16.msra.mxu1 %v12829_v61  ;;  %3971 = vmatpush.bf16.msra.mxu3 %v12830_v8  ;;  %v13502_v61 = vld [vmem:[#allocation130_spill] sm:$0xff]  ;;  %v13503_v8 = vld [vmem:[#allocation139_spill] sm:$0xff] }
 0x70b   :  { %3934 = vmatpush.bf16.msra.mxu0 %v12831_v52  ;;  %3960 = vmatpush.bf16.msra.mxu2 %v12832_v56  ;;  %v13504_v52 = vld [vmem:[#allocation141_spill] sm:$0xff]  ;;  %v13505_v56 = vld [vmem:[#allocation134_spill] sm:$0xff] }
 0x70d   :  { %3946 = vmatpush.bf16.msra.mxu1 %v12833_v36  ;;  %3972 = vmatpush.bf16.msra.mxu3 %v12834_v24  ;;  %v13506_v36 = vld [vmem:[#allocation138_spill] sm:$0xff]  ;;  %v13507_v24 = vld [vmem:[#allocation144_spill] sm:$0xff] }
 0x70f   :  { %3935 = vmatpush.bf16.msra.mxu0 %v12835_v3  ;;  %3961 = vmatpush.bf16.msra.mxu2 %v12836_v29  ;;  %v13508_v3 = vld [vmem:[#allocation147_spill] sm:$0xff]  ;;  %v13509_v29 = vld [vmem:[#allocation140_spill] sm:$0xff] }
 0x711   :  { %3947 = vmatpush.bf16.msra.mxu1 %v12837_v33  ;;  %3973 = vmatpush.bf16.msra.mxu3 %v12838_v63  ;;  %v13510_v33 = vld [vmem:[#allocation142_spill] sm:$0xff]  ;;  %v13511_v63 = vld [vmem:[#allocation151_spill] sm:$0xff] }
 0x712   :  { %3888 = vmatmul.bf16.vlgmr.msrb.gmra.mxu0 %v10952_v30  ;;  %3914 = vmatmul.bf16.vlgmr.msrb.gmra.mxu2 %v10952_v30 }
 0x713   :  { %3936 = vmatpush.bf16.msra.mxu0 %v12839_v34  ;;  %3962 = vmatpush.bf16.msra.mxu2 %v12840_v60  ;;  %v13512_v34 = vld [vmem:[#allocation153_spill] sm:$0xff] }
 0x714   :  { %v6892_v60 = vld [vmem:[%s12286_s4 + $0xe0] sm:$0xf] }
 0x715   :  { %3948 = vmatpush.bf16.msra.mxu1 %v12841_v5  ;;  %3974 = vmatpush.bf16.msra.mxu3 %v12842_v46  ;;  %v13513_v5 = vld [vmem:[#allocation146_spill] sm:$0xff]  ;;  %v13514_v46 = vld [vmem:[#allocation149_spill] sm:$0xff] }
 0x717   :  { %3937 = vmatpush.bf16.msra.mxu0 %v12843_v25  ;;  %3963 = vmatpush.bf16.msra.mxu2 %v12944_v58  ;;  %v7380_v25 = vld [vmem:[%s12286_s4 + $0xec] sm:$0xf0]  ;;  %v7378_v58 = vld [vmem:[%s12286_s4 + $0xe4] sm:$0xf] }
 0x718   :  { %3901 = vmatmul.bf16.vlgmr.msrb.gmra.mxu1 %v10962_v21  ;;  %3927 = vmatmul.bf16.vlgmr.msrb.gmra.mxu3 %v10962_v21 }
 0x719   :  { %3949 = vmatpush.bf16.msra.mxu1 %v12945_v42  ;;  %3975 = vmatpush.bf16.msra.mxu3 %v12946_v32  ;;  %v6894_v42 = vld [vmem:[%s12286_s4 + $0xf0] sm:$0xf0] }
 0x71a   :  { %v13515_v32 = vld [vmem:[#allocation155_spill] sm:$0xff] }
 0x71b   :  { %3938 = vmatpush.bf16.msra.mxu0 %v12947_v14  ;;  %3964 = vmatpush.bf16.msra.mxu2 %v12948_v38  ;;  %v13516_v14 = vld [vmem:[#allocation159_spill] sm:$0xff]  ;;  %v6893_v38 = vor.u32 %v7380_v25, %v6892_v60  ;;  %v7398_v60 = vld [vmem:[%s12286_s4 + $0x184] sm:$0xf] }
 0x71d   :  { %3950 = vmatpush.bf16.msra.mxu1 %v12949_v57  ;;  %3976 = vmatpush.bf16.msra.mxu3 %v12950_v13  ;;  %v6897_v57 = vor.u32 %v7378_v58, %v6894_v42  ;;  %v6876_v13 = vld [vmem:[%s12286_s4 + $0xc0] sm:$0xf]  ;;  %v7360_v42 = vld [vmem:[%s12286_s4 + $0x4c] sm:$0xf0] }
 0x71e   :  { %v6812_v58 = vld [vmem:[%s12286_s4 + $0x40] sm:$0xf] }
 0x71f   :  { %3939 = vmatpush.bf16.msra.mxu0 %v12951_v18  ;;  %3965 = vmatpush.bf16.msra.mxu2 %v12952_v23  ;;  %v13517_v18 = vld [vmem:[#allocation152_spill] sm:$0xff]  ;;  %v13518_v23 = vld [vmem:[#allocation154_spill] sm:$0xff] }
 0x721   :  { %3951 = vmatpush.bf16.msra.mxu1 %v12955_v62  ;;  %3977 = vmatpush.bf16.msra.mxu3 %v12956_v45  ;;  %v6878_v62 = vld [vmem:[%s12286_s4 + $0xd0] sm:$0xf0]  ;;  %v7020_v45 = vld [vmem:[%s12286_s4 + $0x1e0] sm:$0xf] }
 0x722   :  { %3940 = vmatmul.bf16.vlgmr.msra.gmra.mxu0 %v10952_v30  ;;  %3966 = vmatmul.bf16.vlgmr.msra.gmra.mxu2 %v10952_v30 }
 0x723   :  { %3984 = vmatpush.bf16.msrb.mxu0 %v12953_v26  ;;  %4010 = vmatpush.bf16.msrb.mxu2 %v12954_v37  ;;  %v7376_v26 = vld [vmem:[%s12286_s4 + $0xcc] sm:$0xf0]  ;;  %v7374_v37 = vld [vmem:[%s12286_s4 + $0xc4] sm:$0xf] }
 0x724   :  { %v6877_v43 = vor.u32 %v7376_v26, %v6876_v13  ;;  %v6881_v20 = vor.u32 %v7374_v37, %v6878_v62  ;;  %v6956_v13 = vld [vmem:[%s12286_s4 + $0x160] sm:$0xf]  ;;  %v6958_v26 = vld [vmem:[%s12286_s4 + $0x170] sm:$0xf0]  ;;  %v6813_v37 = vor.u32 %v7360_v42, %v6812_v58  ;;  %v13535_v58 = vld [vmem:[#allocation74_spill] sm:$0xff] }
 0x725   :  { %3952 = vmatpush.bf16.msra.mxu1 %v12959_v19  ;;  %3978 = vmatpush.bf16.msra.mxu3 %v12960_v53  ;;  %v7412_v19 = vld [vmem:[%s12286_s4 + $0x1ec] sm:$0xf0]  ;;  %v7410_v53 = vld [vmem:[%s12286_s4 + $0x1e4] sm:$0xf] }
 0x726   :  { %v7021_v35 = vor.u32 %v7412_v19, %v7020_v45  ;;  %v6796_v45 = vld [vmem:[%s12286_s4 + $0x20] sm:$0xf] }
 0x727   :  { %3985 = vmatpush.bf16.msrb.mxu0 %v12957_v7  ;;  %4011 = vmatpush.bf16.msrb.mxu2 %v12958_v54  ;;  %v13519_v7 = vld [vmem:[#allocation163_spill] sm:$0xff]  ;;  %v13520_v54 = vld [vmem:[#allocation165_spill] sm:$0xff] }
 0x728   :  { %3953 = vmatmul.bf16.vlgmr.msra.gmra.mxu1 %v10962_v21  ;;  %3979 = vmatmul.bf16.vlgmr.msra.gmra.mxu3 %v10962_v21  ;;  %v13536_v42 = vld [vmem:[#allocation85_spill] sm:$0xff] }
 0x729   :  { %3997 = vmatpush.bf16.msrb.mxu1 %v13392_v47  ;;  %4023 = vmatpush.bf16.msrb.mxu3 %v13498_v51  ;;  %v7022_v47 = vld [vmem:[%s12286_s4 + $0x1f0] sm:$0xf0]  ;;  %v7366_v51 = vld [vmem:[%s12286_s4 + $0x84] sm:$0xf] }
 0x72a   :  { %v7025_v40 = vor.u32 %v7410_v53, %v7022_v47  ;;  %v7354_v53 = vld [vmem:[%s12286_s4 + $0x24] sm:$0xf]  ;;  %v6798_v47 = vld [vmem:[%s12286_s4 + $0x30] sm:$0xf0] }
 0x72b   :  { %3986 = vmatpush.bf16.msrb.mxu0 %v13499_v49  ;;  %4012 = vmatpush.bf16.msrb.mxu2 %v13500_v59  ;;  %v6846_v49 = vld [vmem:[%s12286_s4 + $0x90] sm:$0xf0]  ;;  %v6988_v59 = vld [vmem:[%s12286_s4 + $0x1a0] sm:$0xf] }
 0x72d   :  { %3998 = vmatpush.bf16.msrb.mxu1 %v13501_v27  ;;  %4024 = vmatpush.bf16.msrb.mxu3 %v13502_v61  ;;  %v7404_v27 = vld [vmem:[%s12286_s4 + $0x1ac] sm:$0xf0]  ;;  %v7402_v61 = vld [vmem:[%s12286_s4 + $0x1a4] sm:$0xf] }
 0x72f   :  { %3987 = vmatpush.bf16.msrb.mxu0 %v13503_v8  ;;  %4013 = vmatpush.bf16.msrb.mxu2 %v13504_v52  ;;  %v6990_v8 = vld [vmem:[%s12286_s4 + $0x1b0] sm:$0xf0]  ;;  %v6845_v52 = vor.u32 %v7368_v15, %v6844_v11  ;;  %v6925_v11 = vor.u32 %v7388_v50, %v6924_v44 }
 0x731   :  { %3999 = vmatpush.bf16.msrb.mxu1 %v13505_v56  ;;  %4025 = vmatpush.bf16.msrb.mxu3 %v13506_v36  ;;  %v6849_v56 = vor.u32 %v7366_v51, %v6846_v49  ;;  %v6828_v36 = vld [vmem:[%s12286_s4 + $0x60] sm:$0xf]  ;;  %v7382_v51 = vld [vmem:[%s12286_s4 + $0x104] sm:$0xf]  ;;  %v6910_v49 = vld [vmem:[%s12286_s4 + $0x110] sm:$0xf0] }
 0x733   :  { %3988 = vmatpush.bf16.msrb.mxu0 %v13507_v24  ;;  %4014 = vmatpush.bf16.msrb.mxu2 %v13508_v3  ;;  %v7364_v24 = vld [vmem:[%s12286_s4 + $0x6c] sm:$0xf0]  ;;  %v6989_v3 = vor.u32 %v7404_v27, %v6988_v59  ;;  %v13525_v59 = vld [vmem:[#allocation69_spill] sm:$0xff]  ;;  %v13526_v27 = vld [vmem:[#allocation78_spill] sm:$0xff] }
 0x735   :  { %4000 = vmatpush.bf16.msrb.mxu1 %v13509_v29  ;;  %4026 = vmatpush.bf16.msrb.mxu3 %v13510_v33  ;;  %v6993_v29 = vor.u32 %v7402_v61, %v6990_v8  ;;  %v6830_v33 = vld [vmem:[%s12286_s4 + $0x70] sm:$0xf0]  ;;  %v11234_v61 = vpack.c.bf16 %v13526_v27, %v13525_v59 }
 0x737   :  { %3989 = vmatpush.bf16.msrb.mxu0 %v13511_v63  ;;  %4015 = vmatpush.bf16.msrb.mxu2 %v13512_v34  ;;  %v6972_v63 = vld [vmem:[%s12286_s4 + $0x180] sm:$0xf]  ;;  %v7400_v34 = vld [vmem:[%s12286_s4 + $0x18c] sm:$0xf0] }
 0x739   :  { %4001 = vmatpush.bf16.msrb.mxu1 %v13513_v5  ;;  %4027 = vmatpush.bf16.msrb.mxu3 %v13514_v46  ;;  %v6974_v5 = vld [vmem:[%s12286_s4 + $0x190] sm:$0xf0]  ;;  %v6829_v46 = vor.u32 %v7364_v24, %v6828_v36  ;;  %v13528_v36 = vld [vmem:[#allocation80_spill] sm:$0xff] }
 0x73b   :  { %3990 = vmatpush.bf16.msrb.mxu0 %v13515_v32  ;;  %4016 = vmatpush.bf16.msrb.mxu2 %v13516_v14  ;;  %v6973_v32 = vor.u32 %v7400_v34, %v6972_v63  ;;  %v6977_v14 = vor.u32 %v7398_v60, %v6974_v5  ;;  %v13532_v63 = vld [vmem:[#allocation77_spill] sm:$0xff]  ;;  %v13533_v60 = vld [vmem:[#allocation72_spill] sm:$0xff]  ;;  %v13534_v5 = vld [vmem:[#allocation83_spill] sm:$0xff] }
 0x73d   :  { %4002 = vmatpush.bf16.msrb.mxu1 %v13517_v18  ;;  %4028 = vmatpush.bf16.msrb.mxu3 %v13518_v23  ;;  %v7396_v18 = vld [vmem:[%s12286_s4 + $0x16c] sm:$0xf0]  ;;  %v7394_v23 = vld [vmem:[%s12286_s4 + $0x164] sm:$0xf] }
 0x73e   :  { %v6961_v19 = vor.u32 %v7394_v23, %v6958_v26 }
 0x73f   :  { %3991 = vmatpush.bf16.msrb.mxu0 %v13519_v7  ;;  %4017 = vmatpush.bf16.msrb.mxu2 %v13520_v54  ;;  %v7356_v7 = vld [vmem:[%s12286_s4 + $0x2c] sm:$0xf0]  ;;  %v6957_v54 = vor.u32 %v7396_v18, %v6956_v13  ;;  %v13538_v13 = vld [vmem:[#allocation157_spill] sm:$0xff] }
 0x741   :  { %4003 = vmatpush.bf16.msrb.mxu1 %v13521_v16  ;;  %4029 = vmatpush.bf16.msrb.mxu3 %v13522_v0  ;;  %v7390_v16 = vld [vmem:[%s12286_s4 + $0x144] sm:$0xf]  ;;  %v6942_v0 = vld [vmem:[%s12286_s4 + $0x150] sm:$0xf0] }
 0x742   :  { %3992 = vmatmul.bf16.vlgmr.msrb.gmra.mxu0 %v10952_v30  ;;  %4018 = vmatmul.bf16.vlgmr.msrb.gmra.mxu2 %v10952_v30  ;;  %v6861_v30 = vor.u32 %v7372_v12, %v6860_v41  ;;  %v6797_v41 = vor.u32 %v7356_v7, %v6796_v45  ;;  %v6801_v12 = vor.u32 %v7354_v53, %v6798_v47  ;;  %v13539_v7 = vld [vmem:[#allocation93_spill] sm:$0xff] }
 0x743   :  { %4590 = vmatpush.bf16.msra.mxu0 %v6893_v38  ;;  %4648 = vmatpush.bf16.msra.mxu2 %v6897_v57  ;;  %v7358_v38 = vld [vmem:[%s12286_s4 + $0x44] sm:$0xf]  ;;  %v6814_v57 = vld [vmem:[%s12286_s4 + $0x50] sm:$0xf0]  ;;  %v6945_v9 = vor.u32 %v7390_v16, %v6942_v0 }
 0x744   :  { %v6817_v62 = vor.u32 %v7358_v38, %v6814_v57  ;;  %v13537_v57 = vld [vmem:[#allocation87_spill] sm:$0xff] }
 0x745   :  { %4004 = vmatpush.bf16.msrb.mxu1 %v13523_v48  ;;  %4030 = vmatpush.bf16.msrb.mxu3 %v13524_v55  ;;  %v7386_v48 = vld [vmem:[%s12286_s4 + $0x124] sm:$0xf]  ;;  %v6926_v55 = vld [vmem:[%s12286_s4 + $0x130] sm:$0xf0]  ;;  %v305_v18 = vadd.f32 %v13538_v13, %v13537_v57 }
 0x746   :  { %v6929_v15 = vor.u32 %v7386_v48, %v6926_v55 }
 0x747   :  { %4591 = vmatpush.bf16.msra.mxu0 %v6877_v43  ;;  %4649 = vmatpush.bf16.msra.mxu2 %v6881_v20  ;;  %v6940_v43 = vld [vmem:[%s12286_s4 + $0x140] sm:$0xf]  ;;  %v7392_v20 = vld [vmem:[%s12286_s4 + $0x14c] sm:$0xf0] }
 0x748   :  { %4005 = vmatmul.bf16.vlgmr.msrb.gmra.mxu1 %v10962_v21  ;;  %4031 = vmatmul.bf16.vlgmr.msrb.gmra.mxu3 %v10962_v21  ;;  %v7362_v21 = vld [vmem:[%s12286_s4 + $0x64] sm:$0xf]  ;;  %v6941_v6 = vor.u32 %v7392_v20, %v6940_v43 }
 0x749   :  { %4619 = vmatpush.bf16.msra.mxu1 %v7021_v35  ;;  %4677 = vmatpush.bf16.msra.mxu3 %v7025_v40  ;;  %v6833_v25 = vor.u32 %v7362_v21, %v6830_v33  ;;  %v6780_v35 = vld [vmem:[%s12286_s4] sm:$0xf]  ;;  %v7352_v40 = vld [vmem:[%s12286_s4 + $0xc] sm:$0xf0] }
 0x74a   :  { %v13531_v33 = vld [vmem:[#allocation73_spill] sm:$0xff] }
 0x74b   :  { %4592 = vmatpush.bf16.msra.mxu0 %v6861_v30  ;;  %4650 = vmatpush.bf16.msra.mxu2 %v6865_v1  ;;  %v6781_v30 = vor.u32 %v7352_v40, %v6780_v35  ;;  %v6785_v1 = vor.u32 %v7350_v39, %v6782_v17  ;;  %v11252_v34 = vpack.c.bf16 %v13532_v63, %v13531_v33  ;;  %v13542_v39 = vld [vmem:[#allocation167_spill] sm:$0xff] }
 0x74d   :  { %4620 = vmatpush.bf16.msra.mxu1 %v7005_v31  ;;  %4678 = vmatpush.bf16.msra.mxu3 %v7009_v28  ;;  %v6908_v31 = vld [vmem:[%s12286_s4 + $0x100] sm:$0xf]  ;;  %v7384_v28 = vld [vmem:[%s12286_s4 + $0x10c] sm:$0xf0] }
 0x74e   :  { %v6909_v8 = vor.u32 %v7384_v28, %v6908_v31  ;;  %v13543_v31 = vld [vmem:[#allocation102_spill] sm:$0xff]  ;;  %v13544_v28 = vld [vmem:[#allocation168_spill] sm:$0xff] }
 0x74f   :  { %4593 = vmatpush.bf16.msra.mxu0 %v6845_v52  ;;  %4651 = vmatpush.bf16.msra.mxu2 %v6849_v56  ;;  %v6913_v52 = vor.u32 %v7382_v51, %v6910_v49  ;;  %v13527_v56 = vld [vmem:[#allocation70_spill] sm:$0xff]  ;;  %v392_v51 = vadd.f32 %v13544_v28, %v13543_v31 }
 0x750   :  { %v11240_v24 = vpack.c.bf16 %v13528_v36, %v13527_v56 }
 0x751   :  { %4621 = vmatpush.bf16.msra.mxu1 %v6989_v3  ;;  %4679 = vmatpush.bf16.msra.mxu3 %v6993_v29  ;;  %v13529_v3 = vld [vmem:[#allocation71_spill] sm:$0xff] }
 0x752   :  { %v13530_v29 = vld [vmem:[#allocation75_spill] sm:$0xff] }
 0x753   :  { %4594 = vmatpush.bf16.msra.mxu0 %v6829_v46  ;;  %4652 = vmatpush.bf16.msra.mxu2 %v6833_v25  ;;  %v11246_v21 = vpack.c.bf16 %v13530_v29, %v13529_v3  ;;  %v11258_v46 = vpack.c.bf16 %v13534_v5, %v13533_v60  ;;  %v6900_v3 = vld [vmem:[%s12286_s4 + $0xe8] sm:$0xf]  ;;  %v7381_v29 = vld [vmem:[%s12286_s4 + $0xf4] sm:$0xf0] }
 0x754   :  { %v6901_v63 = vor.u32 %v7381_v29, %v6900_v3  ;;  %v7028_v60 = vld [vmem:[%s12286_s4 + $0x1e8] sm:$0xf]  ;;  %v7413_v5 = vld [vmem:[%s12286_s4 + $0x1f4] sm:$0xf0] }
 0x755   :  { %4622 = vmatpush.bf16.msra.mxu1 %v6973_v32  ;;  %4680 = vmatpush.bf16.msra.mxu3 %v6977_v14  ;;  %v11264_v32 = vpack.c.bf16 %v13536_v42, %v13535_v58 }
 0x757   :  { %4595 = vmatpush.bf16.msra.mxu0 %v6813_v37  ;;  %4653 = vmatpush.bf16.msra.mxu2 %v6817_v62 }
 0x759   :  { %4623 = vmatpush.bf16.msra.mxu1 %v6957_v54  ;;  %4681 = vmatpush.bf16.msra.mxu3 %v6961_v19  ;;  %v13540_v54 = vld [vmem:[#allocation161_spill] sm:$0xff] }
 0x75a   :  { %v334_v19 = vadd.f32 %v13540_v54, %v13539_v7 }
 0x75b   :  { %4596 = vmatpush.bf16.msra.mxu0 %v6797_v41  ;;  %4654 = vmatpush.bf16.msra.mxu2 %v6801_v12 }
 0x75d   :  { %4624 = vmatpush.bf16.msra.mxu1 %v6941_v6  ;;  %4682 = vmatpush.bf16.msra.mxu3 %v6945_v9  ;;  %v13541_v9 = vld [vmem:[#allocation101_spill] sm:$0xff] }
 0x75e   :  { %v363_v17 = vadd.f32 %v13542_v39, %v13541_v9  ;;  %v13548_v9 = vld [vmem:[#allocation198_spill] sm:$0xff] }
 0x75f   :  { %4597 = vmatpush.bf16.msra.mxu0 %v6781_v30  ;;  %4655 = vmatpush.bf16.msra.mxu2 %v6785_v1 }
 0x761   :  { %4625 = vmatpush.bf16.msra.mxu1 %v6925_v11  ;;  %4683 = vmatpush.bf16.msra.mxu3 %v6929_v15 }
 0x762   :  { %4598 = vmatmul.bf16.vlgmr.msra.gmra.mxu0 %v11234_v61  ;;  %4656 = vmatmul.bf16.vlgmr.msra.gmra.mxu2 %v11234_v61 }
 0x763   :  { %4706 = vmatpush.bf16.msrb.mxu0 %v6901_v63 }
 0x765   :  { %4626 = vmatpush.bf16.msra.mxu1 %v6909_v8  ;;  %4684 = vmatpush.bf16.msra.mxu3 %v6913_v52 }
 0x768   :  { %4627 = vmatmul.bf16.vlgmr.msra.gmra.mxu1 %v11240_v24  ;;  %4685 = vmatmul.bf16.vlgmr.msra.gmra.mxu3 %v11240_v24 }
 0x772   :  { %4603 = vmatmul.bf16.gmra.mxu0 %v11246_v21  ;;  %4661 = vmatmul.bf16.gmra.mxu2 %v11246_v21 }
 0x778   :  { %4632 = vmatmul.bf16.gmra.mxu1 %v11252_v34  ;;  %4690 = vmatmul.bf16.gmra.mxu3 %v11252_v34 }
 0x77f   :  { %v3837_v25 = vpop.f32.mrf.mxu0 }
 0x782   :  { %4608 = vmatmul.bf16.gmra.mxu0 %v11258_v46  ;;  %4666 = vmatmul.bf16.gmra.mxu2 %v11258_v46 }
 0x785   :  { %v3850_v14 = vpop.f32.mrf.mxu1  ;;  %v3863_v38 = vpop.f32.mrf.mxu2 }
 0x786   :  { %v3851_v23 = vadd.f32 %v3850_v14, %v3837_v25 }
 0x787   :  { %v3839_v26 = vpop.f32.mrf.mxu0 }
 0x788   :  { %4637 = vmatmul.bf16.gmra.mxu1 %v11264_v32  ;;  %4695 = vmatmul.bf16.gmra.mxu3 %v11264_v32  ;;  %v4036_v37 = vadd.f32 %v3851_v23, %v305_v18  ;;  %v13545_v23 = vld [vmem:[#allocation171_spill] sm:$0xff]  ;;  %v13546_v26 = vld [vmem:[#allocation196_spill] sm:$0xff] }
 0x78a   :  { %v6772_v62 = vmul.f32 -1.442695, %v4036_v37  ;;  %v421_v37 = vadd.f32 %v13546_v26, %v13545_v23  ;;  %v7379_v23 = vld [vmem:[%s12286_s4 + $0xec] sm:$0xf] }
 0x78b   :  { %v3876_v45 = vpop.f32.mrf.mxu3 }
 0x78c   :  { %7671 = vpow2.f32 %v6772_v62  ;;  %v3877_v53 = vadd.f32 %v3876_v45, %v3863_v38  ;;  %v7029_v38 = vor.u32 %v7413_v5, %v7028_v60 }
 0x78d   :  { %v3852_v47 = vpop.f32.mrf.mxu1  ;;  %v3865_v43 = vpop.f32.mrf.mxu2 }
 0x78e   :  { %v4037_v20 = vadd.f32 %v3877_v53, %v334_v19  ;;  %4735 = vmatpush.bf16.msrb.mxu1 %v7029_v38 }
 0x78f   :  { %v3889_v16 = vpop.f32.mrf.mxu0 }
 0x790   :  { %v6773_v0 = vmul.f32 -1.442695, %v4037_v20 }
 0x792   :  { %v7672_v41 = vpop.eup %7671  ;;  %7673 = vpow2.f32 %v6773_v0 }
 0x793   :  { %v11272_v12 = vadd.f32 1.0, %v7672_v41  ;;  %v3878_v35 = vpop.f32.mrf.mxu3 }
 0x795   :  { %v3902_v40 = vpop.f32.mrf.mxu1  ;;  %v3915_v6 = vpop.f32.mrf.mxu2  ;;  %7675 = vrcp.f32 %v11272_v12  ;;  %v4061_v43 = vand.u32 2147483647, %v11272_v12  ;;  %v4063_v20 = vand.u32 2147483648, %v11272_v12  ;;  %vm4057_vm10 = vweird.f32 %v11272_v12 }
 0x796   :  { %v3903_v44 = vadd.f32 %v3902_v40, %v3889_v16 }
 0x797   :  { %v3891_v50 = vpop.f32.mrf.mxu0  ;;  %vm11320_vm12 = vcmp.eq.f32.partialorder %v4061_v43, 8.507059e+37  ;;  %v7377_v43 = vld [vmem:[%s12286_s4 + $0xd4] sm:$0xf0] }
 0x798   :  { %v7674_v48 = vpop.eup %7673  ;;  %v4038_v55 = vadd.f32 %v3903_v44, %v363_v17 }
 0x799   :  { %v11277_v30 = vadd.f32 1.0, %v7674_v48 }
 0x79a   :  { %v6774_v1 = vmul.f32 -1.442695, %v4038_v55  ;;  %v7373_v55 = vld [vmem:[%s12286_s4 + $0xb4] sm:$0xf0] }
 0x79b   :  { %7677 = vrcp.f32 %v11277_v30  ;;  %v3928_v11 = vpop.f32.mrf.mxu3  ;;  %v11280_v15 = vpop.eup %7675  ;;  %vm4072_vm15 = vweird.f32 %v11277_v30 }
 0x79c   :  { %7679 = vpow2.f32 %v6774_v1  ;;  %v3929_v49 = vadd.f32 %v3928_v11, %v3915_v6  ;;  %v4053_v52 = vmul.f32 %v11280_v15, %v11272_v12  ;;  %vm4058_vm9 = vweird.f32 %v11280_v15  ;;  %v13547_v6 = vld [vmem:[#allocation173_spill] sm:$0xff] }
 0x79d   :  { %v3904_v59 = vpop.f32.mrf.mxu1  ;;  %v3917_v27 = vpop.f32.mrf.mxu2  ;;  %v450_v39 = vadd.f32 %v13548_v9, %v13547_v6  ;;  %vm11316_vm11 = vmor %vm4057_vm10, %vm4058_vm9  ;;  %v4064_v1 = vor.u32 1.1754944e-38, %v4063_v20 }
 0x79e   :  { %v4039_v8 = vadd.f32 %v3929_v49, %v392_v51  ;;  %v4054_v58 = vsub.f32 1.0, %v4053_v52  ;;  %v4078_v52 = vand.u32 2147483648, %v11277_v30 }
 0x79f   :  { %v3941_v56 = vpop.f32.mrf.mxu0 }
 0x7a0   :  { %v6775_v36 = vmul.f32 -1.442695, %v4039_v8  ;;  %v4055_v45 = vmul.f32 %v11280_v15, %v4054_v58  ;;  %v4076_v8 = vand.u32 2147483647, %v11277_v30  ;;  %v4079_v38 = vor.u32 1.1754944e-38, %v4078_v52  ;;  %v13555_v52 = vld [vmem:[#allocation177_spill] sm:$0xff] }
 0x7a1   :  { %v11292_v33 = vpop.eup %7677 }
 0x7a2   :  { %v7680_v25 = vpop.eup %7679  ;;  %7681 = vpow2.f32 %v6775_v36  ;;  %v4068_v57 = vmul.f32 %v11292_v33, %v11277_v30  ;;  %v4056_v0 = vadd.f32 %v11280_v15, %v4055_v45  ;;  %vm4073_vm13 = vweird.f32 %v11292_v33 }
 0x7a3   :  { %v4088_v42 = vadd.f32 1.0, %v7680_v25  ;;  %v3930_v14 = vpop.f32.mrf.mxu3  ;;  %vm11337_vm1 = vmor %vm4072_vm15, %vm4073_vm13  ;;  %vm4077_vm5 = vcmp.eq.f32.partialorder %v4076_v8, 8.507059e+37  ;;  %v7403_v8 = vld [vmem:[%s12286_s4 + $0x1ac] sm:$0xf] }
 0x7a4   :  { %v4069_v19 = vsub.f32 1.0, %v4068_v57  ;;  %v4060_v28 = vsel %vm11316_vm11, %v11280_v15, %v4056_v0  ;;  %v7030_v0 = vld [vmem:[%s12286_s4 + $0x1f8] sm:$0xf0] }
 0x7a5   :  { %7683 = vrcp.f32 %v4088_v42  ;;  %v3967_v13 = vpop.f32.mrf.mxu2  ;;  %v3954_v18 = vpop.f32.mrf.mxu1  ;;  %v4101_v31 = vand.u32 2147483648, %v4088_v42  ;;  %v4099_v49 = vand.u32 2147483647, %v4088_v42  ;;  %vm4095_vm0 = vweird.f32 %v4088_v42 }
 0x7a6   :  { %v3955_v62 = vadd.f32 %v3954_v18, %v3941_v56  ;;  %v4070_v40 = vmul.f32 %v11292_v33, %v4069_v19  ;;  %v4065_v36 = vsel %vm11320_vm12, %v4064_v1, %v4060_v28  ;;  %v7371_v1 = vld [vmem:[%s12286_s4 + $0xac] sm:$0xf] }
 0x7a7   :  { %v3943_v7 = vpop.f32.mrf.mxu0  ;;  %v4102_v63 = vor.u32 1.1754944e-38, %v4101_v31  ;;  %vm4100_vm3 = vcmp.eq.f32.partialorder %v4099_v49, 8.507059e+37  ;;  %v6870_v31 = vld [vmem:[%s12286_s4 + $0xb8] sm:$0xf0]  ;;  %v7407_v28 = vld [vmem:[%s12286_s4 + $0x1cc] sm:$0xf] }
 0x7a8   :  { %v7682_v54 = vpop.eup %7681  ;;  %v4040_v47 = vadd.f32 %v3955_v62, %v421_v37  ;;  %v4071_v59 = vadd.f32 %v11292_v33, %v4070_v40 }
 0x7a9   :  { %v11305_v53 = vadd.f32 1.0, %v7682_v54 }
 0x7aa   :  { %v4075_v25 = vsel %vm11337_vm1, %v11292_v33, %v4071_v59  ;;  %v6902_v33 = vld [vmem:[%s12286_s4 + $0xf8] sm:$0xf0]  ;;  %v6996_v59 = vld [vmem:[%s12286_s4 + $0x1a8] sm:$0xf] }
 0x7ab   :  { %v7684_v16 = vpop.eup %7683  ;;  %7685 = vrcp.f32 %v11305_v53  ;;  %v3980_v35 = vpop.f32.mrf.mxu3  ;;  %v4114_v57 = vand.u32 2147483647, %v11305_v53  ;;  %v4080_v37 = vsel %vm4077_vm5, %v4079_v38, %v4075_v25  ;;  %v6905_v62 = vor.u32 %v7379_v23, %v6902_v33  ;;  %v7399_v38 = vld [vmem:[%s12286_s4 + $0x18c] sm:$0xf]  ;;  %v6836_v23 = vld [vmem:[%s12286_s4 + $0x68] sm:$0xf] }
 0x7ac   :  { %v4091_v41 = vmul.f32 %v7684_v16, %v4088_v42  ;;  %7687 = vtanh.f32 %v4040_v47  ;;  %v3981_v17 = vadd.f32 %v3980_v35, %v3967_v13  ;;  %vm4096_vm14 = vweird.f32 %v7684_v16  ;;  %v6884_v47 = vld [vmem:[%s12286_s4 + $0xc8] sm:$0xf]  ;;  %v7365_v33 = vld [vmem:[%s12286_s4 + $0x74] sm:$0xf0] }
 0x7ad   :  { %v3969_v44 = vpop.f32.mrf.mxu2  ;;  %v3956_v11 = vpop.f32.mrf.mxu1  ;;  %vm4097_vm2 = vmor %vm4095_vm0, %vm4096_vm14  ;;  %v4116_v42 = vand.u32 2147483648, %v11305_v53  ;;  %vm4110_vm6 = vweird.f32 %v11305_v53  ;;  %vm4115_vm8 = vcmp.eq.f32.partialorder %v4114_v57, 8.507059e+37  ;;  %4764 = vmatpush.bf16.msrb.mxu2 %v6905_v62  ;;  %v7012_v35 = vld [vmem:[%s12286_s4 + $0x1c8] sm:$0xf] }
 0x7ae   :  { %v4092_v50 = vsub.f32 1.0, %v4091_v41  ;;  %v4041_v51 = vadd.f32 %v3981_v17, %v450_v39  ;;  %v6885_v41 = vor.u32 %v7377_v43, %v6884_v47  ;;  %v7409_v39 = vld [vmem:[%s12286_s4 + $0x1d4] sm:$0xf0]  ;;  %v6886_v17 = vld [vmem:[%s12286_s4 + $0xd8] sm:$0xf0] }
 0x7af   :  { %v7013_v44 = vor.u32 %v7409_v39, %v7012_v35  ;;  %v6964_v62 = vld [vmem:[%s12286_s4 + $0x168] sm:$0xf]  ;;  %v6966_v35 = vld [vmem:[%s12286_s4 + $0x178] sm:$0xf0] }
 0x7b0   :  { %v4093_v12 = vmul.f32 %v7684_v16, %v4092_v50  ;;  %7689 = vtanh.f32 %v4041_v51  ;;  %4707 = vmatpush.bf16.msrb.mxu0 %v6885_v41  ;;  %v7014_v51 = vld [vmem:[%s12286_s4 + $0x1d8] sm:$0xf0]  ;;  %v7395_v41 = vld [vmem:[%s12286_s4 + $0x16c] sm:$0xf] }
 0x7b1   :  { %v7686_v27 = vpop.eup %7685  ;;  %4736 = vmatpush.bf16.msrb.mxu1 %v7013_v44  ;;  %v7017_v49 = vor.u32 %v7407_v28, %v7014_v51  ;;  %v7359_v28 = vld [vmem:[%s12286_s4 + $0x4c] sm:$0xf]  ;;  %v6822_v51 = vld [vmem:[%s12286_s4 + $0x58] sm:$0xf0] }
 0x7b2   :  { %v7688_v56 = vpop.eup %7687  ;;  %v4106_v15 = vmul.f32 %v7686_v27, %v11305_v53  ;;  %v4094_v3 = vadd.f32 %v7684_v16, %v4093_v12  ;;  %vm4111_vm4 = vweird.f32 %v7686_v27  ;;  %v7375_v53 = vld [vmem:[%s12286_s4 + $0xcc] sm:$0xf]  ;;  %v6873_v12 = vor.u32 %v7371_v1, %v6870_v31 }
 0x7b3   :  { %v4162_v60 = vmul.f32 %v7688_v56, %v4065_v36  ;;  %v3982_v58 = vpop.f32.mrf.mxu3  ;;  %vm4112_vm7 = vmor %vm4110_vm6, %vm4111_vm4  ;;  %v6889_v50 = vor.u32 %v7375_v53, %v6886_v17  ;;  %v13556_v56 = vld [vmem:[#allocation199_spill] sm:$0xff]  ;;  %v6820_v53 = vld [vmem:[%s12286_s4 + $0x48] sm:$0xf] }
 0x7b4   :  { %v4107_v5 = vsub.f32 1.0, %v4106_v15  ;;  %v4098_v30 = vsel %vm4097_vm2, %v7684_v16, %v4094_v3  ;;  %v7411_v16 = vld [vmem:[%s12286_s4 + $0x1ec] sm:$0xf]  ;;  %v479_v15 = vadd.f32 %v13556_v56, %v13555_v52  ;;  %v6825_v56 = vor.u32 %v7359_v28, %v6822_v51 }
 0x7b5   :  { %v4103_v14 = vsel %vm4100_vm3, %v4102_v63, %v4098_v30  ;;  %v7033_v9 = vor.u32 %v7411_v16, %v7030_v0  ;;  %4765 = vmatpush.bf16.msrb.mxu2 %v6889_v50  ;;  %v6998_v63 = vld [vmem:[%s12286_s4 + $0x1b8] sm:$0xf0]  ;;  %v6948_v50 = vld [vmem:[%s12286_s4 + $0x148] sm:$0xf] }
 0x7b6   :  { %v4108_v13 = vmul.f32 %v7686_v27, %v4107_v5  ;;  %v4160_v18 = vmul.f32 %v4103_v14, %v10939_v10  ;;  %v7690_v26 = vpop.eup %7689  ;;  %v4117_v10 = vor.u32 1.1754944e-38, %v4116_v42  ;;  %v7369_v5 = vld [vmem:[%s12286_s4 + $0x94] sm:$0xf0]  ;;  %v7001_v25 = vor.u32 %v7403_v8, %v6998_v63  ;;  %v6980_v42 = vld [vmem:[%s12286_s4 + $0x188] sm:$0xf] }
 0x7b7   :  { %v4163_v54 = vmul.f32 %v7690_v26, %v4080_v37  ;;  %4793 = vmatpush.bf16.msrb.mxu3 %v7033_v9  ;;  %v7401_v14 = vld [vmem:[%s12286_s4 + $0x194] sm:$0xf0]  ;;  %v6837_v37 = vor.u32 %v7365_v33, %v6836_v23  ;;  %v6950_v8 = vld [vmem:[%s12286_s4 + $0x158] sm:$0xf0] }
 0x7b8   :  { %v11354_v45 = vadd.f32 %v4162_v60, %v4160_v18  ;;  %v4109_v7 = vadd.f32 %v7686_v27, %v4108_v13  ;;  %v6852_v60 = vld [vmem:[%s12286_s4 + $0x88] sm:$0xf]  ;;  %v6981_v13 = vor.u32 %v7401_v14, %v6980_v42  ;;  %v6982_v18 = vld [vmem:[%s12286_s4 + $0x198] sm:$0xf0]  ;;  %v7353_v23 = vld [vmem:[%s12286_s4 + $0x14] sm:$0xf0] }
 0x7b9   :  { %v6853_v58 = vor.u32 %v7369_v5, %v6852_v60  ;;  %4766 = vmatpush.bf16.msrb.mxu2 %v6873_v12  ;;  %v6985_v47 = vor.u32 %v7399_v38, %v6982_v18  ;;  %v13558_v9 = vld [vmem:[#allocation200_spill] sm:$0xff] }
 0x7ba   :  { %v4113_v19 = vsel %vm4112_vm7, %v7686_v27, %v4109_v7  ;;  %v7405_v27 = vld [vmem:[%s12286_s4 + $0x1b4] sm:$0xf0]  ;;  %v6934_v18 = vld [vmem:[%s12286_s4 + $0x138] sm:$0xf0] }
 0x7bb   :  { %v4118_v20 = vsel %vm4115_vm8, %v4117_v10, %v4113_v19  ;;  %v6997_v29 = vor.u32 %v7405_v27, %v6996_v59  ;;  %4794 = vmatpush.bf16.msrb.mxu3 %v7017_v49  ;;  %v7397_v7 = vld [vmem:[%s12286_s4 + $0x174] sm:$0xf0]  ;;  %v6854_v10 = vld [vmem:[%s12286_s4 + $0x98] sm:$0xf0]  ;;  %v6969_v49 = vor.u32 %v7395_v41, %v6966_v35  ;;  %v7391_v27 = vld [vmem:[%s12286_s4 + $0x14c] sm:$0xf] }
 0x7bc   :  { %v4161_v40 = vmul.f32 %v4118_v20, %v10942_v4  ;;  %v6868_v4 = vld [vmem:[%s12286_s4 + $0xa8] sm:$0xf]  ;;  %v7361_v20 = vld [vmem:[%s12286_s4 + $0x54] sm:$0xf0]  ;;  %v6965_v0 = vor.u32 %v7397_v7, %v6964_v62  ;;  %v6953_v63 = vor.u32 %v7391_v27, %v6950_v8  ;;  %v6790_v62 = vld [vmem:[%s12286_s4 + $0x18] sm:$0xf0] }
 0x7bd   :  { %v6869_v11 = vor.u32 %v7373_v55, %v6868_v4  ;;  %4737 = vmatpush.bf16.msrb.mxu1 %v6997_v29  ;;  %v6821_v44 = vor.u32 %v7361_v20, %v6820_v53  ;;  %v7393_v4 = vld [vmem:[%s12286_s4 + $0x154] sm:$0xf0]  ;;  %v6838_v55 = vld [vmem:[%s12286_s4 + $0x78] sm:$0xf0] }
 0x7be   :  { %v11381_v48 = vadd.f32 %v4163_v54, %v4161_v40  ;;  %v7367_v54 = vld [vmem:[%s12286_s4 + $0x8c] sm:$0xf]  ;;  %v6949_v59 = vor.u32 %v7393_v4, %v6948_v50  ;;  %v7389_v5 = vld [vmem:[%s12286_s4 + $0x134] sm:$0xf0]  ;;  %v6918_v41 = vld [vmem:[%s12286_s4 + $0x118] sm:$0xf0] }
 0x7bf   :  { %v3993_v6 = vpop.f32.mrf.mxu0  ;;  %4708 = vmatpush.bf16.msrb.mxu0 %v6869_v11  ;;  %4795 = vmatpush.bf16.msrb.mxu3 %v7001_v25  ;;  %v6857_v43 = vor.u32 %v7367_v54, %v6854_v10  ;;  %v7363_v40 = vld [vmem:[%s12286_s4 + $0x6c] sm:$0xf]  ;;  %v6806_v25 = vld [vmem:[%s12286_s4 + $0x38] sm:$0xf0] }
 0x7c0   :  { %v6841_v31 = vor.u32 %v7363_v40, %v6838_v55  ;;  %v7148_v55 = vld [vmem:[%s12288_s6 + $0xe0] sm:$0xf] }
 0x7c1   :  { %4738 = vmatpush.bf16.msrb.mxu1 %v6981_v13  ;;  %4767 = vmatpush.bf16.msrb.mxu2 %v6857_v43  ;;  %v7387_v13 = vld [vmem:[%s12286_s4 + $0x12c] sm:$0xf]  ;;  %v11539_v43 = vld [vmem:[%s12287_s5] sm:$0xf] }
 0x7c2   :  { %v6937_v33 = vor.u32 %v7387_v13, %v6934_v18  ;;  %v11550_v35 = vperm.slane %v11539_v43, 0 }
 0x7c3   :  { %4709 = vmatpush.bf16.msrb.mxu0 %v6853_v58  ;;  %4796 = vmatpush.bf16.msrb.mxu3 %v6985_v47  ;;  %v7385_v47 = vld [vmem:[%s12286_s4 + $0x114] sm:$0xf0] }
 0x7c5   :  { %v4006_v36 = vpop.f32.mrf.mxu1  ;;  %v4019_v3 = vpop.f32.mrf.mxu2  ;;  %4739 = vmatpush.bf16.msrb.mxu1 %v6965_v0  ;;  %4768 = vmatpush.bf16.msrb.mxu2 %v6841_v31 }
 0x7c6   :  { %v4007_v30 = vadd.f32 %v4006_v36, %v3993_v6  ;;  %v13557_v6 = vld [vmem:[#allocation178_spill] sm:$0xff]  ;;  %v7357_v36 = vld [vmem:[%s12286_s4 + $0x34] sm:$0xf0] }
 0x7c7   :  { %v3995_v57 = vpop.f32.mrf.mxu0  ;;  %v508_v39 = vadd.f32 %v13558_v9, %v13557_v6  ;;  %4710 = vmatpush.bf16.msrb.mxu0 %v6837_v37  ;;  %4797 = vmatpush.bf16.msrb.mxu3 %v6969_v49  ;;  %v7351_v37 = vld [vmem:[%s12286_s4 + $0xc] sm:$0xf] }
 0x7c8   :  { %v4042_v26 = vadd.f32 %v4007_v30, %v479_v15  ;;  %v6804_v15 = vld [vmem:[%s12286_s4 + $0x28] sm:$0xf]  ;;  %v7355_v30 = vld [vmem:[%s12286_s4 + $0x2c] sm:$0xf]  ;;  %v6793_v54 = vor.u32 %v7351_v37, %v6790_v62 }
 0x7c9   :  { %v6805_v60 = vor.u32 %v7357_v36, %v6804_v15  ;;  %4740 = vmatpush.bf16.msrb.mxu1 %v6949_v59  ;;  %4769 = vmatpush.bf16.msrb.mxu2 %v6825_v56  ;;  %v6809_v38 = vor.u32 %v7355_v30, %v6806_v25  ;;  %v6788_v57 = vld [vmem:[%s12286_s4 + $0x8] sm:$0xf]  ;;  %v11575_v59 = vperm.slane %v11539_v43, 1  ;;  %v7443_v25 = vld [vmem:[%s12288_s6 + $0xec] sm:$0xf] }
 0x7ca   :  { %v6776_v19 = vmul.f32 -1.442695, %v4042_v26  ;;  %v6789_v26 = vor.u32 %v7353_v23, %v6788_v57 }
 0x7cb   :  { %v4032_v16 = vpop.f32.mrf.mxu3  ;;  %4711 = vmatpush.bf16.msrb.mxu0 %v6821_v44  ;;  %4798 = vmatpush.bf16.msrb.mxu3 %v6953_v63 }
 0x7cc   :  { %7691 = vpow2.f32 %v6776_v19  ;;  %v4033_v17 = vadd.f32 %v4032_v16, %v4019_v3  ;;  %v6932_v3 = vld [vmem:[%s12286_s4 + $0x128] sm:$0xf]  ;;  %v7383_v16 = vld [vmem:[%s12286_s4 + $0x10c] sm:$0xf] }
 0x7cd   :  { %v4008_v1 = vpop.f32.mrf.mxu1  ;;  %v4021_v11 = vpop.f32.mrf.mxu2  ;;  %v6933_v14 = vor.u32 %v7389_v5, %v6932_v3  ;;  %4770 = vmatpush.bf16.msrb.mxu2 %v6809_v38  ;;  %v6916_v19 = vld [vmem:[%s12286_s4 + $0x108] sm:$0xf]  ;;  %v6921_v6 = vor.u32 %v7383_v16, %v6918_v41  ;;  %v7439_v16 = vld [vmem:[%s12288_s6 + $0xcc] sm:$0xf] }
 0x7ce   :  { %v4043_v12 = vadd.f32 %v4033_v17, %v508_v39  ;;  %v6917_v53 = vor.u32 %v7385_v47, %v6916_v19  ;;  %v7444_v1 = vld [vmem:[%s12288_s6 + $0xec] sm:$0xf0]  ;;  %v7156_v41 = vld [vmem:[%s12288_s6 + $0xe8] sm:$0xf] }
 0x7cf   :  { %4712 = vmatpush.bf16.msrb.mxu0 %v6805_v60  ;;  %4741 = vmatpush.bf16.msrb.mxu1 %v6933_v14  ;;  %v11567_v51 = vor.u32 %v7444_v1, %v7148_v55  ;;  %v7434_v55 = vld [vmem:[%s12288_s6 + $0xa4] sm:$0xf] }
 0x7d0   :  { %v6777_v52 = vmul.f32 -1.442695, %v4043_v12  ;;  %4799 = vmatpush.bf16.msrb.mxu3 %v6937_v33  ;;  %v7150_v12 = vld [vmem:[%s12288_s6 + $0xf0] sm:$0xf0]  ;;  %v7132_v33 = vld [vmem:[%s12288_s6 + $0xc0] sm:$0xf] }
 0x7d1   :  { %4771 = vmatpush.bf16.msrb.mxu2 %v6793_v54  ;;  %v7134_v54 = vld [vmem:[%s12288_s6 + $0xd0] sm:$0xf0] }
 0x7d2   :  { %v7692_v29 = vpop.eup %7691  ;;  %7693 = vpow2.f32 %v6777_v52 }
 0x7d3   :  { %v11507_v58 = vadd.f32 1.0, %v7692_v29  ;;  %v4034_v42 = vpop.f32.mrf.mxu3  ;;  %4713 = vmatpush.bf16.msrb.mxu0 %v6789_v26  ;;  %4742 = vmatpush.bf16.msrb.mxu1 %v6917_v53  ;;  %v7440_v26 = vld [vmem:[%s12288_s6 + $0xcc] sm:$0xf0] }
 0x7d4   :  { %4800 = vmatpush.bf16.msrb.mxu3 %v6921_v6 }
 0x7d5   :  { %7695 = vrcp.f32 %v11507_v58  ;;  %v4141_v39 = vand.u32 2147483648, %v11507_v58  ;;  %v4139_v44 = vand.u32 2147483647, %v11507_v58  ;;  %vm4135_vm10 = vweird.f32 %v11507_v58 }
 0x7d7   :  { %v4142_v8 = vor.u32 1.1754944e-38, %v4141_v39  ;;  %vm4140_vm12 = vcmp.eq.f32.partialorder %v4139_v44, 8.507059e+37  ;;  %5050 = vmatpush.bf16.msra.mxu0 %v11567_v51 }
 0x7d8   :  { %v7694_v7 = vpop.eup %7693 }
 0x7d9   :  { %v11528_v10 = vadd.f32 1.0, %v7694_v7  ;;  %v11622_v7 = vor.u32 %v7440_v26, %v7132_v33  ;;  %v7431_v33 = vld [vmem:[%s12288_s6 + $0x8c] sm:$0xf]  ;;  %v7110_v26 = vld [vmem:[%s12288_s6 + $0x98] sm:$0xf0] }
 0x7db   :  { %v7696_v20 = vpop.eup %7695  ;;  %7697 = vrcp.f32 %v11528_v10  ;;  %v4156_v36 = vand.u32 2147483648, %v11528_v10  ;;  %v4154_v30 = vand.u32 2147483647, %v11528_v10  ;;  %vm4150_vm14 = vweird.f32 %v11528_v10  ;;  %5051 = vmatpush.bf16.msra.mxu0 %v11622_v7 }
 0x7dc   :  { %v4131_v0 = vmul.f32 %v7696_v20, %v11507_v58  ;;  %7699 = vtanh.f32 %v11354_v45  ;;  %vm4136_vm9 = vweird.f32 %v7696_v20  ;;  %v7442_v45 = vld [vmem:[%s12288_s6 + $0xe4] sm:$0xf]  ;;  %v7158_v58 = vld [vmem:[%s12288_s6 + $0xf8] sm:$0xf0] }
 0x7dd   :  { %vm4137_vm11 = vmor %vm4135_vm10, %vm4136_vm9  ;;  %v11578_v52 = vor.u32 %v7442_v45, %v7150_v12  ;;  %7701 = vtanh.f32 %v11381_v48  ;;  %v11595_v42 = vor.u32 %v7443_v25, %v7158_v58  ;;  %v4157_v18 = vor.u32 1.1754944e-38, %v4156_v36  ;;  %v7441_v36 = vld [vmem:[%s12288_s6 + $0xd4] sm:$0xf0] }
 0x7de   :  { %v4132_v9 = vsub.f32 1.0, %v4131_v0  ;;  %vm4155_vm0 = vcmp.eq.f32.partialorder %v4154_v30, 8.507059e+37  ;;  %v7142_v0 = vld [vmem:[%s12288_s6 + $0xd8] sm:$0xf0]  ;;  %v7102_v30 = vld [vmem:[%s12288_s6 + $0x90] sm:$0xf0] }
 0x7df   :  { %v4599_v40 = vpop.f32.mrf.mxu0  ;;  %5063 = vmatpush.bf16.msra.mxu1 %v11578_v52  ;;  %5089 = vmatpush.bf16.msra.mxu3 %v11595_v42  ;;  %v11642_v6 = vor.u32 %v7439_v16, %v7142_v0  ;;  %v7084_v16 = vld [vmem:[%s12288_s6 + $0x60] sm:$0xf]  ;;  %v7428_v0 = vld [vmem:[%s12288_s6 + $0x6c] sm:$0xf0] }
 0x7e0   :  { %v4133_v17 = vmul.f32 %v7696_v20, %v4132_v9  ;;  %v4600_v4 = vadd.f32 %v4599_v40, %v11550_v35  ;;  %v7445_v9 = vld [vmem:[%s12288_s6 + $0xf4] sm:$0xf0] }
 0x7e1   :  { %v7698_v50 = vpop.eup %7697 }
 0x7e2   :  { %v4146_v11 = vmul.f32 %v7698_v50, %v11528_v10  ;;  %v4134_v28 = vadd.f32 %v7696_v20, %v4133_v17  ;;  %v7700_v3 = vpop.eup %7699  ;;  %vm4151_vm13 = vweird.f32 %v7698_v50  ;;  %v11650_v17 = vor.u32 %v7445_v9, %v7156_v41  ;;  %v7426_v41 = vld [vmem:[%s12288_s6 + $0x64] sm:$0xf] }
 0x7e3   :  { %vm11600_vm15 = vmor %vm4150_vm14, %vm4151_vm13  ;;  %v7702_v10 = vpop.eup %7701  ;;  %5090 = vmatpush.bf16.msra.mxu3 %v11642_v6  ;;  %v11758_v9 = vor.u32 %v7428_v0, %v7084_v16  ;;  %v7423_v16 = vld [vmem:[%s12288_s6 + $0x4c] sm:$0xf]  ;;  %v7078_v0 = vld [vmem:[%s12288_s6 + $0x58] sm:$0xf0] }
 0x7e4   :  { %v4147_v56 = vsub.f32 1.0, %v4146_v11  ;;  %v4138_v15 = vsel %vm4137_vm11, %v7696_v20, %v4134_v28  ;;  %5076 = vmatpush.bf16.msra.mxu2 %v11650_v17  ;;  %v7118_v11 = vld [vmem:[%s12288_s6 + $0xb0] sm:$0xf0]  ;;  %v7126_v28 = vld [vmem:[%s12288_s6 + $0xb8] sm:$0xf0] }
 0x7e5   :  { %v4628_v31 = vpop.f32.mrf.mxu1  ;;  %v4657_v27 = vpop.f32.mrf.mxu2  ;;  %v4143_v63 = vsel %vm4140_vm12, %v4142_v8, %v4138_v15  ;;  %v11681_v8 = vor.u32 %v7434_v55, %v7118_v11  ;;  %v7140_v15 = vld [vmem:[%s12288_s6 + $0xc8] sm:$0xf] }
 0x7e6   :  { %v11572_v49 = vadd.f32 %v4628_v31, %v4600_v4  ;;  %v4168_v60 = vmul.f32 %v7700_v3, %v4143_v63  ;;  %v4148_v5 = vmul.f32 %v7698_v50, %v4147_v56  ;;  %v4658_v48 = vadd.f32 %v4657_v27, %v11575_v59  ;;  %v7116_v4 = vld [vmem:[%s12288_s6 + $0xa0] sm:$0xf]  ;;  %v7435_v31 = vld [vmem:[%s12288_s6 + $0xac] sm:$0xf]  ;;  %v7108_v11 = vld [vmem:[%s12288_s6 + $0x88] sm:$0xf] }
 0x7e7   :  { %v11583_v29 = vpop.f32.mrf.mxu0  ;;  %v11683_v56 = vor.u32 %v7435_v31, %v7126_v28  ;;  %v7100_v3 = vld [vmem:[%s12288_s6 + $0x80] sm:$0xf]  ;;  %v11695_v63 = vor.u32 %v7441_v36, %v7140_v15  ;;  %v7433_v31 = vld [vmem:[%s12288_s6 + $0x94] sm:$0xf0]  ;;  %v7424_v36 = vld [vmem:[%s12288_s6 + $0x4c] sm:$0xf0] }
 0x7e8   :  { %v11598_v38 = vpack.c.bf16 %v4168_v60, %v10948_v22  ;;  %v4149_v57 = vadd.f32 %v7698_v50, %v4148_v5  ;;  %v7438_v22 = vld [vmem:[%s12288_s6 + $0xc4] sm:$0xf]  ;;  %v7432_v60 = vld [vmem:[%s12288_s6 + $0x8c] sm:$0xf0]  ;;  %v7068_v28 = vld [vmem:[%s12288_s6 + $0x40] sm:$0xf]  ;;  %v11785_v15 = vor.u32 %v7433_v31, %v7108_v11 }
 0x7e9   :  { %v11629_v53 = vor.u32 %v7438_v22, %v7134_v54  ;;  %v7430_v5 = vld [vmem:[%s12288_s6 + $0x84] sm:$0xf]  ;;  %5091 = vmatpush.bf16.msra.mxu3 %v11683_v56  ;;  %v11710_v58 = vor.u32 %v7432_v60, %v7100_v3  ;;  %5077 = vmatpush.bf16.msra.mxu2 %v11695_v63  ;;  %v7124_v22 = vld [vmem:[%s12288_s6 + $0xa8] sm:$0xf]  ;;  %v11735_v54 = vor.u32 %v7431_v33, %v7110_v26  ;;  %v7070_v60 = vld [vmem:[%s12288_s6 + $0x50] sm:$0xf0] }
 0x7ea   :  { %4613 = vmatmul.bf16.gmra.mxu0 %v11598_v38  ;;  %4671 = vmatmul.bf16.gmra.mxu2 %v11598_v38  ;;  %v4153_v62 = vsel %vm11600_vm15, %v7698_v50, %v4149_v57  ;;  %v7422_v3 = vld [vmem:[%s12288_s6 + $0x44] sm:$0xf]  ;;  %v7060_v31 = vld [vmem:[%s12288_s6 + $0x28] sm:$0xf] }
 0x7eb   :  { %v4686_v14 = vpop.f32.mrf.mxu3  ;;  %v4158_v47 = vsel %vm4155_vm0, %v4157_v18, %v4153_v62  ;;  %5064 = vmatpush.bf16.msra.mxu1 %v11629_v53 }
 0x7ec   :  { %v11604_v23 = vadd.f32 %v4686_v14, %v4658_v48  ;;  %v4169_v20 = vmul.f32 %v7702_v10, %v4158_v47  ;;  %v11712_v48 = vor.u32 %v7430_v5, %v7102_v30  ;;  %v11798_v30 = vor.u32 %v7424_v36, %v7068_v28  ;;  %v7421_v28 = vld [vmem:[%s12288_s6 + $0x34] sm:$0xf0] }
 0x7ed   :  { %v11617_v37 = vpop.f32.mrf.mxu1  ;;  %v11627_v19 = vpop.f32.mrf.mxu2  ;;  %5092 = vmatpush.bf16.msra.mxu3 %v11735_v54 }
 0x7ee   :  { %v11648_v39 = vpack.c.bf16 %v4169_v20, %v10958_v2  ;;  %v7436_v2 = vld [vmem:[%s12288_s6 + $0xac] sm:$0xf0] }
 0x7ef   :  { %v4604_v40 = vpop.f32.mrf.mxu0  ;;  %v11668_v45 = vor.u32 %v7436_v2, %v7116_v4  ;;  %5065 = vmatpush.bf16.msra.mxu1 %v11681_v8  ;;  %v7094_v4 = vld [vmem:[%s12288_s6 + $0x78] sm:$0xf0] }
 0x7f0   :  { %4642 = vmatmul.bf16.gmra.mxu1 %v11648_v39  ;;  %4700 = vmatmul.bf16.gmra.mxu3 %v11648_v39  ;;  %v4605_v50 = vadd.f32 %v4604_v40, %v11550_v35 }
 0x7f1   :  { %5052 = vmatpush.bf16.msra.mxu0 %v11668_v45 }
 0x7f3   :  { %v11654_v44 = vpop.f32.mrf.mxu3  ;;  %5066 = vmatpush.bf16.msra.mxu1 %v11712_v48 }
 0x7f5   :  { %v4633_v1 = vpop.f32.mrf.mxu1  ;;  %v4662_v27 = vpop.f32.mrf.mxu2  ;;  %5053 = vmatpush.bf16.msra.mxu0 %v11710_v58 }
 0x7f6   :  { %v11679_v12 = vadd.f32 %v4633_v1, %v4605_v50  ;;  %v4663_v14 = vadd.f32 %v4662_v27, %v11575_v59  ;;  %v7427_v50 = vld [vmem:[%s12288_s6 + $0x6c] sm:$0xf] }
 0x7f7   :  { %v11706_v25 = vpop.f32.mrf.mxu0  ;;  %v11771_v1 = vor.u32 %v7427_v50, %v7094_v4  ;;  %v7052_v50 = vld [vmem:[%s12288_s6 + $0x20] sm:$0xf]  ;;  %v7420_v4 = vld [vmem:[%s12288_s6 + $0x2c] sm:$0xf0] }
 0x7f8   :  { %13561 = vst [vmem:[#allocation76_spill] sm:$0xff] %v11679_v12  ;;  %v11848_v11 = vor.u32 %v7420_v4, %v7052_v50 }
 0x7f9   :  { %13562 = vst [vmem:[#allocation79_spill] sm:$0xff] %v11706_v25  ;;  %5054 = vmatpush.bf16.msra.mxu0 %v11758_v9  ;;  %5093 = vmatpush.bf16.msra.mxu3 %v11771_v1 }
 0x7fa   :  { %4714 = vmatmul.bf16.vlgmr.msrb.gmra.mxu0 %v11234_v61  ;;  %4772 = vmatmul.bf16.vlgmr.msrb.gmra.mxu2 %v11234_v61  ;;  %v7437_v61 = vld [vmem:[%s12288_s6 + $0xb4] sm:$0xf0] }
 0x7fb   :  { %v4691_v57 = vpop.f32.mrf.mxu3  ;;  %v11740_v10 = vor.u32 %v7437_v61, %v7124_v22  ;;  %v7092_v22 = vld [vmem:[%s12288_s6 + $0x68] sm:$0xf]  ;;  %v7429_v61 = vld [vmem:[%s12288_s6 + $0x74] sm:$0xf0] }
 0x7fc   :  { %v11717_v13 = vadd.f32 %v4691_v57, %v4663_v14  ;;  %v11800_v14 = vor.u32 %v7422_v3, %v7070_v60  ;;  %v11861_v3 = vor.u32 %v7421_v28, %v7060_v31  ;;  %v7419_v60 = vld [vmem:[%s12288_s6 + $0x2c] sm:$0xf] }
 0x7fd   :  { %v11720_v18 = vpop.f32.mrf.mxu1  ;;  %v11733_v62 = vpop.f32.mrf.mxu2  ;;  %5078 = vmatpush.bf16.msra.mxu2 %v11740_v10  ;;  %5055 = vmatpush.bf16.msra.mxu0 %v11798_v30 }
 0x7fe   :  { %13563 = vst [vmem:[#allocation88_spill] sm:$0xff] %v11717_v13 }
 0x7ff   :  { %13564 = vst [vmem:[#allocation90_spill] sm:$0xff] %v11720_v18  ;;  %v4609_v47 = vpop.f32.mrf.mxu0 }
 0x800   :  { %13565 = vst [vmem:[#allocation84_spill] sm:$0xff] %v11733_v62  ;;  %4743 = vmatmul.bf16.vlgmr.msrb.gmra.mxu1 %v11240_v24  ;;  %4801 = vmatmul.bf16.vlgmr.msrb.gmra.mxu3 %v11240_v24  ;;  %v4610_v40 = vadd.f32 %v4609_v47, %v11550_v35  ;;  %v7086_v24 = vld [vmem:[%s12288_s6 + $0x70] sm:$0xf0]  ;;  %v11816_v47 = vor.u32 %v7429_v61, %v7092_v22  ;;  %v7416_v22 = vld [vmem:[%s12288_s6 + $0xc] sm:$0xf0] }
 0x801   :  { %v11769_v55 = vor.u32 %v7426_v41, %v7086_v24  ;;  %5079 = vmatpush.bf16.msra.mxu2 %v11785_v15  ;;  %v7076_v41 = vld [vmem:[%s12288_s6 + $0x48] sm:$0xf]  ;;  %5056 = vmatpush.bf16.msra.mxu0 %v11848_v11 }
 0x802   :  { %v7044_v61 = vld [vmem:[%s12288_s6 + $0x8] sm:$0xf] }
 0x803   :  { %v11744_v20 = vpop.f32.mrf.mxu3  ;;  %5067 = vmatpush.bf16.msra.mxu1 %v11769_v55 }
 0x804   :  { %13566 = vst [vmem:[#allocation86_spill] sm:$0xff] %v11744_v20 }
 0x805   :  { %v4638_v2 = vpop.f32.mrf.mxu1  ;;  %v4667_v5 = vpop.f32.mrf.mxu2  ;;  %5080 = vmatpush.bf16.msra.mxu2 %v11816_v47 }
 0x806   :  { %v11782_v27 = vadd.f32 %v4638_v2, %v4610_v40  ;;  %v4668_v57 = vadd.f32 %v4667_v5, %v11575_v59  ;;  %v11827_v40 = vor.u32 %v7423_v16, %v7078_v0  ;;  %v7418_v2 = vld [vmem:[%s12288_s6 + $0x24] sm:$0xf]  ;;  %v7062_v5 = vld [vmem:[%s12288_s6 + $0x38] sm:$0xf0]  ;;  %v7417_v16 = vld [vmem:[%s12288_s6 + $0x14] sm:$0xf0] }
 0x807   :  { %5068 = vmatpush.bf16.msra.mxu1 %v11800_v14  ;;  %v11895_v50 = vor.u32 %v7417_v16, %v7044_v61 }
 0x808   :  { %13567 = vst [vmem:[#allocation96_spill] sm:$0xff] %v11782_v27  ;;  %5094 = vmatpush.bf16.msra.mxu3 %v11827_v40 }
 0x80a   :  { %4719 = vmatmul.bf16.gmra.mxu0 %v11246_v21  ;;  %4777 = vmatmul.bf16.gmra.mxu2 %v11246_v21  ;;  %v7425_v21 = vld [vmem:[%s12288_s6 + $0x54] sm:$0xf0] }
 0x80b   :  { %v4696_v33 = vpop.f32.mrf.mxu3  ;;  %v11834_v24 = vor.u32 %v7425_v21, %v7076_v41  ;;  %v7414_v41 = vld [vmem:[%s12288_s6 + $0x4] sm:$0xf]  ;;  %v7038_v21 = vld [vmem:[%s12288_s6 + $0x10] sm:$0xf0] }
 0x80c   :  { %v11806_v26 = vadd.f32 %v4696_v33, %v4668_v57  ;;  %v7036_v57 = vld [vmem:[%s12288_s6] sm:$0xf]  ;;  %v11873_v33 = vor.u32 %v7419_v60, %v7062_v5  ;;  %v11897_v4 = vor.u32 %v7414_v41, %v7038_v21 }
 0x80d   :  { %5081 = vmatpush.bf16.msra.mxu2 %v11834_v24  ;;  %v11885_v0 = vor.u32 %v7416_v22, %v7036_v57 }
 0x80e   :  { %13568 = vst [vmem:[#allocation99_spill] sm:$0xff] %v11806_v26  ;;  %5095 = vmatpush.bf16.msra.mxu3 %v11873_v33 }
 0x80f   :  { %5057 = vmatpush.bf16.msra.mxu0 %v11885_v0 }
 0x810   :  { %4748 = vmatmul.bf16.gmra.mxu1 %v11252_v34  ;;  %4806 = vmatmul.bf16.gmra.mxu3 %v11252_v34  ;;  %v7054_v34 = vld [vmem:[%s12288_s6 + $0x30] sm:$0xf0] }
 0x811   :  { %v11859_v36 = vor.u32 %v7418_v2, %v7054_v34  ;;  %5082 = vmatpush.bf16.msra.mxu2 %v11861_v3  ;;  %v7415_v2 = vld [vmem:[%s12288_s6 + $0xc] sm:$0xf]  ;;  %v7046_v34 = vld [vmem:[%s12288_s6 + $0x18] sm:$0xf0] }
 0x812   :  { %v11912_v31 = vor.u32 %v7415_v2, %v7046_v34 }
 0x813   :  { %5069 = vmatpush.bf16.msra.mxu1 %v11859_v36  ;;  %5174 = vmatpush.bf16.msrb.mxu0 %v11567_v51  ;;  %v11993_v60 = vpop.f32.mrf.mxu3 }
 0x814   :  { %5096 = vmatpush.bf16.msra.mxu3 %v11912_v31  ;;  %13573 = vst [vmem:[#allocation81_spill] sm:$0xff] %v11993_v60  ;;  %v4264_v60 = vperm.slane %v11539_v43, 2 }
 0x815   :  { %5083 = vmatpush.bf16.msra.mxu2 %v11895_v50 }
 0x817   :  { %5070 = vmatpush.bf16.msra.mxu1 %v11897_v4  ;;  %5175 = vmatpush.bf16.msrb.mxu0 %v11622_v7 }
 0x818   :  { %5213 = vmatpush.bf16.msrb.mxu3 %v11595_v42 }
 0x819   :  { %5200 = vmatpush.bf16.msrb.mxu2 %v11650_v17 }
 0x81a   :  { %4724 = vmatmul.bf16.gmra.mxu0 %v11258_v46  ;;  %4782 = vmatmul.bf16.gmra.mxu2 %v11258_v46  ;;  %v13569_v46 = vmov 0  }
 0x81b   :  { %5187 = vmatpush.bf16.msrb.mxu1 %v11578_v52  ;;  %5176 = vmatpush.bf16.msrb.mxu0 %v11668_v45 }
 0x81c   :  { %5214 = vmatpush.bf16.msrb.mxu3 %v11642_v6 }
 0x81d   :  { %5201 = vmatpush.bf16.msrb.mxu2 %v11695_v63 }
 0x81f   :  { %5188 = vmatpush.bf16.msrb.mxu1 %v11629_v53  ;;  %5177 = vmatpush.bf16.msrb.mxu0 %v11710_v58 }
 0x820   :  { %4753 = vmatmul.bf16.gmra.mxu1 %v11264_v32  ;;  %4811 = vmatmul.bf16.gmra.mxu3 %v11264_v32  ;;  %v11987_v32 = vpop.f32.mrf.mxu0 }
 0x821   :  { %5202 = vmatpush.bf16.msrb.mxu2 %v11740_v10  ;;  %5215 = vmatpush.bf16.msrb.mxu3 %v11683_v56  ;;  %13570 = vst [vmem:[#allocation89_spill] sm:$0xff] %v11987_v32 }
 0x823   :  { %5189 = vmatpush.bf16.msrb.mxu1 %v11681_v8  ;;  %5178 = vmatpush.bf16.msrb.mxu0 %v11758_v9 }
 0x825   :  { %5203 = vmatpush.bf16.msrb.mxu2 %v11785_v15  ;;  %5216 = vmatpush.bf16.msrb.mxu3 %v11735_v54 }
 0x827   :  { %5190 = vmatpush.bf16.msrb.mxu1 %v11712_v48  ;;  %5179 = vmatpush.bf16.msrb.mxu0 %v11798_v30 }
 0x829   :  { %5204 = vmatpush.bf16.msrb.mxu2 %v11816_v47  ;;  %5217 = vmatpush.bf16.msrb.mxu3 %v11771_v1 }
 0x82a   :  { %4729 = vmatmul.bf16.gmra.mxu0 %v11598_v38  ;;  %4787 = vmatmul.bf16.gmra.mxu2 %v11598_v38  ;;  %v11989_v38 = vpop.f32.mrf.mxu1 }
 0x82b   :  { %5191 = vmatpush.bf16.msrb.mxu1 %v11769_v55  ;;  %5180 = vmatpush.bf16.msrb.mxu0 %v11848_v11  ;;  %13571 = vst [vmem:[#allocation92_spill] sm:$0xff] %v11989_v38 }
 0x82d   :  { %5205 = vmatpush.bf16.msrb.mxu2 %v11834_v24  ;;  %5218 = vmatpush.bf16.msrb.mxu3 %v11827_v40 }
 0x82f   :  { %5192 = vmatpush.bf16.msrb.mxu1 %v11800_v14  ;;  %5181 = vmatpush.bf16.msrb.mxu0 %v11885_v0 }
 0x830   :  { %4758 = vmatmul.bf16.gmra.mxu1 %v11648_v39  ;;  %4816 = vmatmul.bf16.gmra.mxu3 %v11648_v39  ;;  %v11991_v39 = vpop.f32.mrf.mxu2 }
 0x831   :  { %5206 = vmatpush.bf16.msrb.mxu2 %v11861_v3  ;;  %5219 = vmatpush.bf16.msrb.mxu3 %v11873_v33  ;;  %13572 = vst [vmem:[#allocation103_spill] sm:$0xff] %v11991_v39 }
 0x833   :  { %5193 = vmatpush.bf16.msrb.mxu1 %v11859_v36 }
 0x835   :  { %5207 = vmatpush.bf16.msrb.mxu2 %v11895_v50  ;;  %5220 = vmatpush.bf16.msrb.mxu3 %v11912_v31 }
 0x837   :  { %5194 = vmatpush.bf16.msrb.mxu1 %v11897_v4 }
 0x83a   :  { %5058 = vmatmul.bf16.vlgmr.msra.gmra.mxu0 %v13569_v46  ;;  %5084 = vmatmul.bf16.vlgmr.msra.gmra.mxu2 %v13569_v46 }
 0x83b   :  { %5298 = vmatpush.bf16.msra.mxu0 %v11567_v51  ;;  %5324 = vmatpush.bf16.msra.mxu2 %v11650_v17 }
 0x83f   :  { %5299 = vmatpush.bf16.msra.mxu0 %v11622_v7  ;;  %5325 = vmatpush.bf16.msra.mxu2 %v11695_v63 }
 0x840   :  { %5071 = vmatmul.bf16.vlgmr.msra.gmra.mxu1 %v13569_v46  ;;  %5097 = vmatmul.bf16.vlgmr.msra.gmra.mxu3 %v13569_v46 }
 0x841   :  { %5311 = vmatpush.bf16.msra.mxu1 %v11578_v52  ;;  %5337 = vmatpush.bf16.msra.mxu3 %v11595_v42 }
 0x843   :  { %5300 = vmatpush.bf16.msra.mxu0 %v11668_v45  ;;  %5326 = vmatpush.bf16.msra.mxu2 %v11740_v10 }
 0x845   :  { %5312 = vmatpush.bf16.msra.mxu1 %v11629_v53  ;;  %5338 = vmatpush.bf16.msra.mxu3 %v11642_v6 }
 0x847   :  { %5301 = vmatpush.bf16.msra.mxu0 %v11710_v58  ;;  %5327 = vmatpush.bf16.msra.mxu2 %v11785_v15 }
 0x849   :  { %5313 = vmatpush.bf16.msra.mxu1 %v11681_v8  ;;  %5339 = vmatpush.bf16.msra.mxu3 %v11683_v56 }
 0x84b   :  { %5302 = vmatpush.bf16.msra.mxu0 %v11758_v9  ;;  %5328 = vmatpush.bf16.msra.mxu2 %v11816_v47 }
 0x84d   :  { %5314 = vmatpush.bf16.msra.mxu1 %v11712_v48  ;;  %5340 = vmatpush.bf16.msra.mxu3 %v11735_v54 }
 0x84f   :  { %5303 = vmatpush.bf16.msra.mxu0 %v11798_v30  ;;  %5329 = vmatpush.bf16.msra.mxu2 %v11834_v24 }
 0x851   :  { %5315 = vmatpush.bf16.msra.mxu1 %v11769_v55  ;;  %5341 = vmatpush.bf16.msra.mxu3 %v11771_v1 }
 0x853   :  { %5304 = vmatpush.bf16.msra.mxu0 %v11848_v11  ;;  %5330 = vmatpush.bf16.msra.mxu2 %v11861_v3 }
 0x855   :  { %5316 = vmatpush.bf16.msra.mxu1 %v11800_v14  ;;  %5342 = vmatpush.bf16.msra.mxu3 %v11827_v40 }
 0x857   :  { %5305 = vmatpush.bf16.msra.mxu0 %v11885_v0  ;;  %5331 = vmatpush.bf16.msra.mxu2 %v11895_v50 }
 0x859   :  { %5317 = vmatpush.bf16.msra.mxu1 %v11859_v36  ;;  %5343 = vmatpush.bf16.msra.mxu3 %v11873_v33 }
 0x85d   :  { %5318 = vmatpush.bf16.msra.mxu1 %v11897_v4  ;;  %5344 = vmatpush.bf16.msra.mxu3 %v11912_v31 }
 0x867   :  { %v4614_v28 = vpop.f32.mrf.mxu0 }
 0x868   :  { %v4615_v5 = vadd.f32 %v4614_v28, %v11550_v35 }
 0x86d   :  { %v4643_v57 = vpop.f32.mrf.mxu1  ;;  %v4672_v22 = vpop.f32.mrf.mxu2 }
 0x86e   :  { %v11996_v61 = vadd.f32 %v4643_v57, %v4615_v5  ;;  %v4673_v41 = vadd.f32 %v4672_v22, %v11575_v59 }
 0x86f   :  { %v11998_v16 = vpop.f32.mrf.mxu0 }
 0x870   :  { %13574 = vst [vmem:[#allocation82_spill] sm:$0xff] %v11996_v61 }
 0x871   :  { %13575 = vst [vmem:[#allocation91_spill] sm:$0xff] %v11998_v16  ;;  %v4265_v16 = vperm.slane %v11539_v43, 3 }
 0x873   :  { %v4701_v21 = vpop.f32.mrf.mxu3 }
 0x874   :  { %v12001_v2 = vadd.f32 %v4701_v21, %v4673_v41 }
 0x875   :  { %v12003_v34 = vpop.f32.mrf.mxu1  ;;  %v12005_v46 = vpop.f32.mrf.mxu2 }
 0x876   :  { %13576 = vst [vmem:[#allocation94_spill] sm:$0xff] %v12001_v2 }
 0x877   :  { %13577 = vst [vmem:[#allocation169_spill] sm:$0xff] %v12003_v34  ;;  %v4715_v38 = vpop.f32.mrf.mxu0 }
 0x878   :  { %13578 = vst [vmem:[#allocation170_spill] sm:$0xff] %v12005_v46  ;;  %v4716_v28 = vadd.f32 %v4715_v38, %v4264_v60 }
 0x87b   :  { %v12008_v39 = vpop.f32.mrf.mxu3 }
 0x87c   :  { %13579 = vst [vmem:[#allocation172_spill] sm:$0xff] %v12008_v39 }
 0x87d   :  { %v4744_v32 = vpop.f32.mrf.mxu1  ;;  %v4773_v5 = vpop.f32.mrf.mxu2 }
 0x87e   :  { %v12010_v57 = vadd.f32 %v4744_v32, %v4716_v28  ;;  %v4774_v41 = vadd.f32 %v4773_v5, %v4265_v16 }
 0x87f   :  { %v4717_v22 = vpop.f32.mrf.mxu0 }
 0x880   :  { %v4718_v61 = vadd.f32 %v4717_v22, %v4264_v60 }
 0x883   :  { %v4802_v21 = vpop.f32.mrf.mxu3 }
 0x884   :  { %v12013_v2 = vadd.f32 %v4802_v21, %v4774_v41 }
 0x885   :  { %v4746_v34 = vpop.f32.mrf.mxu1  ;;  %v4775_v46 = vpop.f32.mrf.mxu2 }
 0x886   :  { %v12015_v26 = vadd.f32 %v4746_v34, %v4718_v61  ;;  %v4776_v27 = vadd.f32 %v4775_v46, %v4265_v16 }
 0x887   :  { %v4720_v20 = vpop.f32.mrf.mxu0 }
 0x888   :  { %13580 = vst [vmem:[#allocation174_spill] sm:$0xff] %v12015_v26  ;;  %v4721_v39 = vadd.f32 %v4720_v20, %v4264_v60 }
 0x88b   :  { %v4804_v38 = vpop.f32.mrf.mxu3 }
 0x88c   :  { %v12017_v18 = vadd.f32 %v4804_v38, %v4776_v27 }
 0x88d   :  { %v4749_v32 = vpop.f32.mrf.mxu1  ;;  %v4778_v28 = vpop.f32.mrf.mxu2 }
 0x88e   :  { %v12019_v62 = vadd.f32 %v4749_v32, %v4721_v39  ;;  %v4779_v43 = vadd.f32 %v4778_v28, %v4265_v16 }
 0x88f   :  { %v4722_v22 = vpop.f32.mrf.mxu0 }
 0x890   :  { %13581 = vst [vmem:[#allocation105_spill] sm:$0xff] %v12019_v62  ;;  %v4723_v5 = vadd.f32 %v4722_v22, %v4264_v60 }
 0x893   :  { %v4807_v25 = vpop.f32.mrf.mxu3 }
 0x894   :  { %v12021_v41 = vadd.f32 %v4807_v25, %v4779_v43 }
 0x895   :  { %v4751_v21 = vpop.f32.mrf.mxu1  ;;  %v4780_v13 = vpop.f32.mrf.mxu2 }
 0x896   :  { %13582 = vst [vmem:[#allocation98_spill] sm:$0xff] %v12021_v41  ;;  %v12023_v61 = vadd.f32 %v4751_v21, %v4723_v5  ;;  %v4781_v34 = vadd.f32 %v4780_v13, %v4265_v16 }
 0x897   :  { %v4725_v46 = vpop.f32.mrf.mxu0 }
 0x898   :  { %13583 = vst [vmem:[#allocation100_spill] sm:$0xff] %v12023_v61  ;;  %v4726_v20 = vadd.f32 %v4725_v46, %v4264_v60 }
 0x89b   :  { %v4809_v12 = vpop.f32.mrf.mxu3 }
 0x89c   :  { %v12025_v27 = vadd.f32 %v4809_v12, %v4781_v34 }
 0x89d   :  { %v4754_v38 = vpop.f32.mrf.mxu1  ;;  %v4783_v26 = vpop.f32.mrf.mxu2 }
 0x89e   :  { %13584 = vst [vmem:[#allocation111_spill] sm:$0xff] %v12025_v27  ;;  %v12027_v39 = vadd.f32 %v4754_v38, %v4726_v20  ;;  %v4784_v32 = vadd.f32 %v4783_v26, %v4265_v16 }
 0x89f   :  { %v4727_v28 = vpop.f32.mrf.mxu0 }
 0x8a0   :  { %13585 = vst [vmem:[#allocation113_spill] sm:$0xff] %v12027_v39  ;;  %v4728_v22 = vadd.f32 %v4727_v28, %v4264_v60 }
 0x8a3   :  { %v4812_v62 = vpop.f32.mrf.mxu3 }
 0x8a4   :  { %v12029_v25 = vadd.f32 %v4812_v62, %v4784_v32 }
 0x8a5   :  { %v4756_v43 = vpop.f32.mrf.mxu1  ;;  %v4785_v41 = vpop.f32.mrf.mxu2 }
 0x8a6   :  { %13586 = vst [vmem:[#allocation104_spill] sm:$0xff] %v12029_v25  ;;  %v12031_v5 = vadd.f32 %v4756_v43, %v4728_v22  ;;  %v4786_v13 = vadd.f32 %v4785_v41, %v4265_v16 }
 0x8a7   :  { %v4730_v21 = vpop.f32.mrf.mxu0 }
 0x8a8   :  { %13587 = vst [vmem:[#allocation106_spill] sm:$0xff] %v12031_v5  ;;  %v4731_v46 = vadd.f32 %v4730_v21, %v4264_v60 }
 0x8ab   :  { %v4814_v61 = vpop.f32.mrf.mxu3 }
 0x8ac   :  { %v12033_v12 = vadd.f32 %v4814_v61, %v4786_v13 }
 0x8ad   :  { %v4759_v34 = vpop.f32.mrf.mxu1  ;;  %v4788_v27 = vpop.f32.mrf.mxu2 }
 0x8ae   :  { %v12035_v20 = vadd.f32 %v4759_v34, %v4731_v46  ;;  %v4789_v26 = vadd.f32 %v4788_v27, %v4265_v16 }
 0x8af   :  { %v4732_v38 = vpop.f32.mrf.mxu0 }
 0x8b0   :  { %13588 = vst [vmem:[#allocation115_spill] sm:$0xff] %v12035_v20  ;;  %v4733_v28 = vadd.f32 %v4732_v38, %v4264_v60 }
 0x8b3   :  { %v4817_v39 = vpop.f32.mrf.mxu3 }
 0x8b4   :  { %v12037_v62 = vadd.f32 %v4817_v39, %v4789_v26 }
 0x8b5   :  { %v4761_v32 = vpop.f32.mrf.mxu1  ;;  %v4790_v25 = vpop.f32.mrf.mxu2 }
 0x8b6   :  { %v12039_v22 = vadd.f32 %v4761_v32, %v4733_v28  ;;  %v4791_v41 = vadd.f32 %v4790_v25, %v4265_v16 }
 0x8b7   :  { %v5059_v43 = vpop.f32.mrf.mxu0 }
 0x8b8   :  { %13589 = vst [vmem:[#allocation117_spill] sm:$0xff] %v12039_v22  ;;  %v5102_v21 = vadd.f32 %v5059_v43, %v11572_v49 }
 0x8ba   :  { %v7162_v61 = vmul.f32 -1.442695, %v5102_v21 }
 0x8bb   :  { %v4819_v13 = vpop.f32.mrf.mxu3 }
 0x8bc   :  { %7703 = vpow2.f32 %v7162_v61  ;;  %v12042_v5 = vadd.f32 %v4819_v13, %v4791_v41 }
 0x8bd   :  { %v5072_v46 = vpop.f32.mrf.mxu1  ;;  %v5085_v27 = vpop.f32.mrf.mxu2 }
 0x8be   :  { %13590 = vst [vmem:[#allocation120_spill] sm:$0xff] %v12042_v5  ;;  %v5103_v60 = vadd.f32 %v5072_v46, %v11604_v23  ;;  %v5104_v61 = vadd.f32 %v5085_v27, %v12010_v57 }
 0x8bf   :  { %v5061_v34 = vpop.f32.mrf.mxu0 }
 0x8c0   :  { %v7163_v39 = vmul.f32 -1.442695, %v5103_v60 }
 0x8c2   :  { %v7704_v26 = vpop.eup %7703  ;;  %7705 = vpow2.f32 %v7163_v39 }
 0x8c3   :  { %v5109_v38 = vadd.f32 1.0, %v7704_v26  ;;  %v5098_v28 = vpop.f32.mrf.mxu3 }
 0x8c4   :  { %v5105_v16 = vadd.f32 %v5098_v28, %v12013_v2 }
 0x8c5   :  { %7707 = vrcp.f32 %v5109_v38  ;;  %v5074_v25 = vpop.f32.mrf.mxu1  ;;  %v5087_v49 = vpop.f32.mrf.mxu2  ;;  %v5121_v34 = vand.u32 2147483648, %v5109_v38  ;;  %v5119_v2 = vand.u32 2147483647, %v5109_v38  ;;  %vm5115_vm2 = vweird.f32 %v5109_v38 }
 0x8c6   :  { %v7164_v32 = vmul.f32 -1.442695, %v5105_v16 }
 0x8c7   :  { %v5122_v49 = vor.u32 1.1754944e-38, %v5121_v34  ;;  %vm5120_vm4 = vcmp.eq.f32.partialorder %v5119_v2, 8.507059e+37 }
 0x8c8   :  { %v7706_v43 = vpop.eup %7705  ;;  %7709 = vpow2.f32 %v7164_v32 }
 0x8c9   :  { %v5128_v41 = vadd.f32 1.0, %v7706_v43 }
 0x8cb   :  { %v7708_v21 = vpop.eup %7707  ;;  %7711 = vrcp.f32 %v5128_v41  ;;  %v5100_v23 = vpop.f32.mrf.mxu3  ;;  %v5140_v27 = vand.u32 2147483648, %v5128_v41  ;;  %vm5134_vm6 = vweird.f32 %v5128_v41 }
 0x8cc   :  { %v5111_v13 = vmul.f32 %v7708_v21, %v5109_v38  ;;  %7713 = vtanh.f32 %v5104_v61  ;;  %vm5116_vm1 = vweird.f32 %v7708_v21  ;;  %v5138_v61 = vand.u32 2147483647, %v5128_v41 }
 0x8cd   :  { %vm5117_vm3 = vmor %vm5115_vm2, %vm5116_vm1  ;;  %v5141_v20 = vor.u32 1.1754944e-38, %v5140_v27 }
 0x8ce   :  { %v7710_v46 = vpop.eup %7709  ;;  %v5112_v60 = vsub.f32 1.0, %v5111_v13  ;;  %vm5139_vm8 = vcmp.eq.f32.partialorder %v5138_v61, 8.507059e+37 }
 0x8cf   :  { %v5148_v39 = vadd.f32 1.0, %v7710_v46 }
 0x8d0   :  { %v5113_v26 = vmul.f32 %v7708_v21, %v5112_v60 }
 0x8d1   :  { %v7712_v28 = vpop.eup %7711  ;;  %7715 = vrcp.f32 %v5148_v39  ;;  %vm5154_vm10 = vweird.f32 %v5148_v39 }
 0x8d2   :  { %v5130_v16 = vmul.f32 %v7712_v28, %v5128_v41  ;;  %v5114_v25 = vadd.f32 %v7708_v21, %v5113_v26  ;;  %v7714_v57 = vpop.eup %7713  ;;  %vm5135_vm5 = vweird.f32 %v7712_v28 }
 0x8d3   :  { %vm5136_vm7 = vmor %vm5134_vm6, %vm5135_vm5 }
 0x8d4   :  { %v5131_v32 = vsub.f32 1.0, %v5130_v16  ;;  %v5118_v43 = vsel %vm5117_vm3, %v7708_v21, %v5114_v25 }
 0x8d5   :  { %v5123_v23 = vsel %vm5120_vm4, %v5122_v49, %v5118_v43  ;;  %v5160_v49 = vand.u32 2147483648, %v5148_v39 }
 0x8d6   :  { %v5132_v13 = vmul.f32 %v7712_v28, %v5131_v32  ;;  %v5165_v46 = vmul.f32 %v7714_v57, %v5123_v23  ;;  %v5158_v32 = vand.u32 2147483647, %v5148_v39 }
 0x8d7   :  { %v7716_v60 = vpop.eup %7715  ;;  %v5161_v43 = vor.u32 1.1754944e-38, %v5160_v49 }
 0x8d8   :  { %v5133_v22 = vadd.f32 %v7712_v28, %v5132_v13  ;;  %v5150_v5 = vmul.f32 %v7716_v60, %v5148_v39  ;;  %vm5155_vm9 = vweird.f32 %v7716_v60  ;;  %vm5159_vm12 = vcmp.eq.f32.partialorder %v5158_v32, 8.507059e+37 }
 0x8d9   :  { %vm5156_vm11 = vmor %vm5154_vm10, %vm5155_vm9  ;;  %v4660_v39 = vadd.f32 %v11627_v19, %v11575_v59 }
 0x8da   :  { %v5137_v26 = vsel %vm5136_vm7, %v7712_v28, %v5133_v22  ;;  %v5151_v38 = vsub.f32 1.0, %v5150_v5 }
 0x8db   :  { %v5142_v34 = vsel %vm5139_vm8, %v5141_v20, %v5137_v26  ;;  %v4602_v20 = vadd.f32 %v11583_v29, %v11550_v35  ;;  %v4689_v23 = vadd.f32 %v11654_v44, %v4660_v39 }
 0x8dc   :  { %v5164_v16 = vmul.f32 0.0, %v5142_v34  ;;  %v5152_v21 = vmul.f32 %v7716_v60, %v5151_v38 }
 0x8dd   :  { %v4631_v27 = vadd.f32 %v11617_v37, %v4602_v20 }
 0x8de   :  { %v12047_v2 = vadd.f32 %v5165_v46, %v5164_v16  ;;  %v5153_v25 = vadd.f32 %v7716_v60, %v5152_v21 }
 0x8e0   :  { %7717 = vtanh.f32 %v12047_v2  ;;  %v5157_v41 = vsel %vm5156_vm11, %v7716_v60, %v5153_v25 }
 0x8e1   :  { %v5162_v22 = vsel %vm5159_vm12, %v5161_v43, %v5157_v41 }
 0x8e6   :  { %v7718_v57 = vpop.eup %7717 }
 0x8e7   :  { %v5168_v28 = vmul.f32 %v7718_v57, %v5162_v22 }
 0x8e9   :  { %v5173_v5 = vpack.c.bf16 %v5168_v28, %v5168_v28 }
 0x8eb   :  { %5182 = vmatmul.bf16.vlgmr.msrb.gmra.mxu0 %v5173_v5  ;;  %5195 = vmatmul.bf16.vlgmr.msrb.gmra.mxu1 %v5173_v5 }
 0x8ec   :  { %5208 = vmatmul.bf16.vlgmr.msrb.gmra.mxu2 %v5173_v5  ;;  %5221 = vmatmul.bf16.vlgmr.msrb.gmra.mxu3 %v5173_v5  ;;  %v13591_v5 = vld [vmem:[#allocation174_spill] sm:$0xff] }
 0x8ed   :  { %5422 = vmatpush.bf16.msrb.mxu0 %v11567_v51  ;;  %5435 = vmatpush.bf16.msrb.mxu1 %v11578_v52 }
 0x8ee   :  { %5448 = vmatpush.bf16.msrb.mxu2 %v11650_v17  ;;  %5461 = vmatpush.bf16.msrb.mxu3 %v11595_v42 }
 0x8f1   :  { %5423 = vmatpush.bf16.msrb.mxu0 %v11622_v7  ;;  %5436 = vmatpush.bf16.msrb.mxu1 %v11629_v53 }
 0x8f2   :  { %5449 = vmatpush.bf16.msrb.mxu2 %v11695_v63  ;;  %5462 = vmatpush.bf16.msrb.mxu3 %v11642_v6 }
 0x8f5   :  { %5424 = vmatpush.bf16.msrb.mxu0 %v11668_v45  ;;  %5437 = vmatpush.bf16.msrb.mxu1 %v11681_v8 }
 0x8f6   :  { %5450 = vmatpush.bf16.msrb.mxu2 %v11740_v10  ;;  %5463 = vmatpush.bf16.msrb.mxu3 %v11683_v56 }
 0x8f9   :  { %5425 = vmatpush.bf16.msrb.mxu0 %v11710_v58  ;;  %5438 = vmatpush.bf16.msrb.mxu1 %v11712_v48 }
 0x8fa   :  { %5451 = vmatpush.bf16.msrb.mxu2 %v11785_v15  ;;  %5464 = vmatpush.bf16.msrb.mxu3 %v11735_v54 }
 0x8fd   :  { %5426 = vmatpush.bf16.msrb.mxu0 %v11758_v9  ;;  %5439 = vmatpush.bf16.msrb.mxu1 %v11769_v55 }
 0x8fe   :  { %5452 = vmatpush.bf16.msrb.mxu2 %v11816_v47  ;;  %5465 = vmatpush.bf16.msrb.mxu3 %v11771_v1 }
 0x901   :  { %5427 = vmatpush.bf16.msrb.mxu0 %v11798_v30  ;;  %5440 = vmatpush.bf16.msrb.mxu1 %v11800_v14 }
 0x902   :  { %5453 = vmatpush.bf16.msrb.mxu2 %v11834_v24  ;;  %5466 = vmatpush.bf16.msrb.mxu3 %v11827_v40 }
 0x905   :  { %5428 = vmatpush.bf16.msrb.mxu0 %v11848_v11  ;;  %5441 = vmatpush.bf16.msrb.mxu1 %v11859_v36 }
 0x906   :  { %5454 = vmatpush.bf16.msrb.mxu2 %v11861_v3  ;;  %5467 = vmatpush.bf16.msrb.mxu3 %v11873_v33 }
 0x909   :  { %5429 = vmatpush.bf16.msrb.mxu0 %v11885_v0  ;;  %5442 = vmatpush.bf16.msrb.mxu1 %v11897_v4 }
 0x90a   :  { %5455 = vmatpush.bf16.msrb.mxu2 %v11895_v50  ;;  %5468 = vmatpush.bf16.msrb.mxu3 %v11912_v31 }
 0x968   :  { %v5183_v13 = vpop.f32.mrf.mxu0  ;;  %v5196_v61 = vpop.f32.mrf.mxu1 }
 0x969   :  { %v5226_v46 = vadd.f32 %v5183_v13, %v4631_v27  ;;  %v5227_v60 = vadd.f32 %v5196_v61, %v4689_v23 }
 0x96b   :  { %v7165_v26 = vmul.f32 -1.442695, %v5226_v46  ;;  %v7166_v38 = vmul.f32 -1.442695, %v5227_v60 }
 0x96d   :  { %7719 = vpow2.f32 %v7165_v26 }
 0x96e   :  { %7721 = vpow2.f32 %v7166_v38 }
 0x96f   :  { %v5209_v34 = vpop.f32.mrf.mxu2  ;;  %v5222_v16 = vpop.f32.mrf.mxu3 }
 0x970   :  { %v5229_v21 = vadd.f32 %v5222_v16, %v12017_v18  ;;  %v5185_v29 = vpop.f32.mrf.mxu0  ;;  %v5198_v25 = vpop.f32.mrf.mxu1  ;;  %v5228_v20 = vadd.f32 %v5209_v34, %v13591_v5 }
 0x972   :  { %v7167_v49 = vmul.f32 -1.442695, %v5229_v21 }
 0x973   :  { %v7720_v19 = vpop.eup %7719 }
 0x974   :  { %v7722_v32 = vpop.eup %7721  ;;  %v5233_v37 = vadd.f32 1.0, %v7720_v19  ;;  %7723 = vpow2.f32 %v7167_v49 }
 0x975   :  { %v5252_v44 = vadd.f32 1.0, %v7722_v32 }
 0x976   :  { %7725 = vrcp.f32 %v5233_v37  ;;  %v5245_v61 = vand.u32 2147483648, %v5233_v37  ;;  %v5243_v26 = vand.u32 2147483647, %v5233_v37  ;;  %vm5239_vm15 = vweird.f32 %v5233_v37 }
 0x977   :  { %7727 = vrcp.f32 %v5252_v44  ;;  %v5211_v41 = vpop.f32.mrf.mxu2  ;;  %v5224_v43 = vpop.f32.mrf.mxu3  ;;  %v5264_v46 = vand.u32 2147483648, %v5252_v44  ;;  %v5262_v16 = vand.u32 2147483647, %v5252_v44  ;;  %vm5258_vm0 = vweird.f32 %v5252_v44 }
 0x978   :  { %v5246_v34 = vor.u32 1.1754944e-38, %v5245_v61  ;;  %vm5244_vm3 = vcmp.eq.f32.partialorder %v5243_v26, 8.507059e+37 }
 0x979   :  { %v5265_v19 = vor.u32 1.1754944e-38, %v5264_v46  ;;  %vm5263_vm4 = vcmp.eq.f32.partialorder %v5262_v16, 8.507059e+37  ;;  %v13592_v16 = vld [vmem:[#allocation76_spill] sm:$0xff] }
 0x97a   :  { %v7724_v57 = vpop.eup %7723 }
 0x97b   :  { %v5272_v22 = vadd.f32 1.0, %v7724_v57 }
 0x97c   :  { %v7726_v28 = vpop.eup %7725 }
 0x97d   :  { %v7728_v39 = vpop.eup %7727  ;;  %v5235_v27 = vmul.f32 %v7726_v28, %v5233_v37  ;;  %7729 = vrcp.f32 %v5272_v22  ;;  %vm5240_vm13 = vweird.f32 %v7726_v28  ;;  %vm5278_vm6 = vweird.f32 %v5272_v22 }
 0x97e   :  { %v5254_v18 = vmul.f32 %v7728_v39, %v5252_v44  ;;  %7731 = vtanh.f32 %v5228_v20  ;;  %vm5259_vm14 = vweird.f32 %v7728_v39  ;;  %vm5241_vm1 = vmor %vm5239_vm15, %vm5240_vm13 }
 0x97f   :  { %v5236_v23 = vsub.f32 1.0, %v5235_v27  ;;  %vm5260_vm2 = vmor %vm5258_vm0, %vm5259_vm14 }
 0x980   :  { %v5255_v13 = vsub.f32 1.0, %v5254_v18 }
 0x981   :  { %v5237_v60 = vmul.f32 %v7726_v28, %v5236_v23 }
 0x982   :  { %v5256_v38 = vmul.f32 %v7728_v39, %v5255_v13  ;;  %v5284_v13 = vand.u32 2147483648, %v5272_v22 }
 0x983   :  { %v7730_v21 = vpop.eup %7729  ;;  %v5238_v29 = vadd.f32 %v7726_v28, %v5237_v60 }
 0x984   :  { %v5257_v25 = vadd.f32 %v7728_v39, %v5256_v38  ;;  %v5274_v49 = vmul.f32 %v7730_v21, %v5272_v22  ;;  %v7732_v41 = vpop.eup %7731  ;;  %vm5279_vm5 = vweird.f32 %v7730_v21  ;;  %v5285_v46 = vor.u32 1.1754944e-38, %v5284_v13 }
 0x985   :  { %v5242_v32 = vsel %vm5241_vm1, %v7726_v28, %v5238_v29  ;;  %v5282_v28 = vand.u32 2147483647, %v5272_v22  ;;  %vm5280_vm7 = vmor %vm5278_vm6, %vm5279_vm5  ;;  %v13593_v29 = vld [vmem:[#allocation88_spill] sm:$0xff] }
 0x986   :  { %v5247_v43 = vsel %vm5244_vm3, %v5246_v34, %v5242_v32  ;;  %v5261_v57 = vsel %vm5260_vm2, %v7728_v39, %v5257_v25  ;;  %v5275_v5 = vsub.f32 1.0, %v5274_v49 }
 0x987   :  { %v5266_v20 = vsel %vm5263_vm4, %v5265_v19, %v5261_v57  ;;  %v5289_v27 = vmul.f32 %v7732_v41, %v5247_v43  ;;  %vm5283_vm8 = vcmp.eq.f32.partialorder %v5282_v28, 8.507059e+37  ;;  %v13594_v41 = vld [vmem:[#allocation98_spill] sm:$0xff] }
 0x988   :  { %v5288_v18 = vmul.f32 %v5266_v20, %v12047_v2  ;;  %v5276_v23 = vmul.f32 %v7730_v21, %v5275_v5 }
 0x98a   :  { %v12091_v37 = vadd.f32 %v5289_v27, %v5288_v18  ;;  %v5277_v44 = vadd.f32 %v7730_v21, %v5276_v23 }
 0x98c   :  { %7733 = vtanh.f32 %v12091_v37  ;;  %v5281_v61 = vsel %vm5280_vm7, %v7730_v21, %v5277_v44 }
 0x98d   :  { %v5286_v60 = vsel %vm5283_vm8, %v5285_v46, %v5281_v61 }
 0x992   :  { %v7734_v39 = vpop.eup %7733 }
 0x993   :  { %v5292_v26 = vmul.f32 %v7734_v39, %v5286_v60  ;;  %v13595_v60 = vld [vmem:[#allocation105_spill] sm:$0xff] }
 0x995   :  { %v5297_v38 = vpack.c.bf16 %v5292_v26, %v5292_v26 }
 0x997   :  { %5306 = vmatmul.bf16.vlgmr.msra.gmra.mxu0 %v5297_v38  ;;  %5319 = vmatmul.bf16.vlgmr.msra.gmra.mxu1 %v5297_v38 }
 0x998   :  { %5332 = vmatmul.bf16.vlgmr.msra.gmra.mxu2 %v5297_v38  ;;  %5345 = vmatmul.bf16.vlgmr.msra.gmra.mxu3 %v5297_v38 }
 0x999   :  { %5546 = vmatpush.bf16.msra.mxu0 %v11567_v51  ;;  %5559 = vmatpush.bf16.msra.mxu1 %v11578_v52 }
 0x99a   :  { %5572 = vmatpush.bf16.msra.mxu2 %v11650_v17  ;;  %5585 = vmatpush.bf16.msra.mxu3 %v11595_v42 }
 0x99d   :  { %5547 = vmatpush.bf16.msra.mxu0 %v11622_v7  ;;  %5560 = vmatpush.bf16.msra.mxu1 %v11629_v53 }
 0x99e   :  { %5573 = vmatpush.bf16.msra.mxu2 %v11695_v63  ;;  %5586 = vmatpush.bf16.msra.mxu3 %v11642_v6 }
 0x9a1   :  { %5548 = vmatpush.bf16.msra.mxu0 %v11668_v45  ;;  %5561 = vmatpush.bf16.msra.mxu1 %v11681_v8 }
 0x9a2   :  { %5574 = vmatpush.bf16.msra.mxu2 %v11740_v10  ;;  %5587 = vmatpush.bf16.msra.mxu3 %v11683_v56 }
 0x9a5   :  { %5549 = vmatpush.bf16.msra.mxu0 %v11710_v58  ;;  %5562 = vmatpush.bf16.msra.mxu1 %v11712_v48 }
 0x9a6   :  { %5575 = vmatpush.bf16.msra.mxu2 %v11785_v15  ;;  %5588 = vmatpush.bf16.msra.mxu3 %v11735_v54 }
 0x9a9   :  { %5550 = vmatpush.bf16.msra.mxu0 %v11758_v9  ;;  %5563 = vmatpush.bf16.msra.mxu1 %v11769_v55 }
 0x9aa   :  { %5576 = vmatpush.bf16.msra.mxu2 %v11816_v47  ;;  %5589 = vmatpush.bf16.msra.mxu3 %v11771_v1 }
 0x9ad   :  { %5551 = vmatpush.bf16.msra.mxu0 %v11798_v30  ;;  %5564 = vmatpush.bf16.msra.mxu1 %v11800_v14 }
 0x9ae   :  { %5577 = vmatpush.bf16.msra.mxu2 %v11834_v24  ;;  %5590 = vmatpush.bf16.msra.mxu3 %v11827_v40 }
 0x9b1   :  { %5552 = vmatpush.bf16.msra.mxu0 %v11848_v11  ;;  %5565 = vmatpush.bf16.msra.mxu1 %v11859_v36 }
 0x9b2   :  { %5578 = vmatpush.bf16.msra.mxu2 %v11861_v3  ;;  %5591 = vmatpush.bf16.msra.mxu3 %v11873_v33 }
 0x9b5   :  { %5553 = vmatpush.bf16.msra.mxu0 %v11885_v0  ;;  %5566 = vmatpush.bf16.msra.mxu1 %v11897_v4 }
 0x9b6   :  { %5579 = vmatpush.bf16.msra.mxu2 %v11895_v50  ;;  %5592 = vmatpush.bf16.msra.mxu3 %v11912_v31 }
 0xa14   :  { %v5307_v2 = vpop.f32.mrf.mxu0  ;;  %v5320_v22 = vpop.f32.mrf.mxu1 }
 0xa15   :  { %v5350_v21 = vadd.f32 %v5307_v2, %v13592_v16  ;;  %v5351_v34 = vadd.f32 %v5320_v22, %v13593_v29 }
 0xa17   :  { %v7168_v25 = vmul.f32 -1.442695, %v5350_v21  ;;  %v7169_v49 = vmul.f32 -1.442695, %v5351_v34 }
 0xa19   :  { %7735 = vpow2.f32 %v7168_v25 }
 0xa1a   :  { %7737 = vpow2.f32 %v7169_v49 }
 0xa1b   :  { %v5333_v19 = vpop.f32.mrf.mxu2  ;;  %v5346_v32 = vpop.f32.mrf.mxu3 }
 0xa1c   :  { %v5353_v43 = vadd.f32 %v5346_v32, %v13594_v41  ;;  %v5309_v57 = vpop.f32.mrf.mxu0  ;;  %v5322_v5 = vpop.f32.mrf.mxu1  ;;  %v5352_v26 = vadd.f32 %v5333_v19, %v13595_v60 }
 0xa1e   :  { %v7170_v20 = vmul.f32 -1.442695, %v5353_v43 }
 0xa1f   :  { %v7736_v27 = vpop.eup %7735 }
 0xa20   :  { %v7738_v18 = vpop.eup %7737  ;;  %v5357_v23 = vadd.f32 1.0, %v7736_v27  ;;  %7739 = vpow2.f32 %v7170_v20 }
 0xa21   :  { %v5376_v44 = vadd.f32 1.0, %v7738_v18 }
 0xa22   :  { %7741 = vrcp.f32 %v5357_v23  ;;  %v5369_v29 = vand.u32 2147483648, %v5357_v23  ;;  %v5367_v49 = vand.u32 2147483647, %v5357_v23  ;;  %vm5363_vm11 = vweird.f32 %v5357_v23 }
 0xa23   :  { %7743 = vrcp.f32 %v5376_v44  ;;  %v5335_v13 = vpop.f32.mrf.mxu2  ;;  %v5348_v28 = vpop.f32.mrf.mxu3  ;;  %v5388_v34 = vand.u32 2147483648, %v5376_v44  ;;  %v5386_v41 = vand.u32 2147483647, %v5376_v44  ;;  %vm5382_vm12 = vweird.f32 %v5376_v44 }
 0xa24   :  { %v5370_v19 = vor.u32 1.1754944e-38, %v5369_v29  ;;  %vm5368_vm15 = vcmp.eq.f32.partialorder %v5367_v49, 8.507059e+37 }
 0xa25   :  { %v5389_v27 = vor.u32 1.1754944e-38, %v5388_v34  ;;  %vm5387_vm0 = vcmp.eq.f32.partialorder %v5386_v41, 8.507059e+37  ;;  %v13597_v41 = vld [vmem:[#allocation84_spill] sm:$0xff] }
 0xa26   :  { %v7740_v61 = vpop.eup %7739 }
 0xa27   :  { %v5396_v46 = vadd.f32 1.0, %v7740_v61 }
 0xa28   :  { %v7742_v39 = vpop.eup %7741 }
 0xa29   :  { %v7744_v38 = vpop.eup %7743  ;;  %v5359_v2 = vmul.f32 %v7742_v39, %v5357_v23  ;;  %7745 = vrcp.f32 %v5396_v46  ;;  %vm5364_vm9 = vweird.f32 %v7742_v39  ;;  %vm5402_vm2 = vweird.f32 %v5396_v46 }
 0xa2a   :  { %v5378_v22 = vmul.f32 %v7744_v38, %v5376_v44  ;;  %7747 = vtanh.f32 %v5352_v26  ;;  %vm5383_vm10 = vweird.f32 %v7744_v38  ;;  %vm5365_vm13 = vmor %vm5363_vm11, %vm5364_vm9 }
 0xa2b   :  { %v5360_v16 = vsub.f32 1.0, %v5359_v2  ;;  %vm5384_vm14 = vmor %vm5382_vm12, %vm5383_vm10 }
 0xa2c   :  { %v5379_v21 = vsub.f32 1.0, %v5378_v22 }
 0xa2d   :  { %v5361_v25 = vmul.f32 %v7742_v39, %v5360_v16 }
 0xa2e   :  { %v5380_v32 = vmul.f32 %v7744_v38, %v5379_v21  ;;  %v5408_v21 = vand.u32 2147483648, %v5396_v46 }
 0xa2f   :  { %v7746_v43 = vpop.eup %7745  ;;  %v5362_v57 = vadd.f32 %v7742_v39, %v5361_v25 }
 0xa30   :  { %v5381_v5 = vadd.f32 %v7744_v38, %v5380_v32  ;;  %v5398_v20 = vmul.f32 %v7746_v43, %v5396_v46  ;;  %v7748_v13 = vpop.eup %7747  ;;  %vm5403_vm1 = vweird.f32 %v7746_v43  ;;  %v5409_v34 = vor.u32 1.1754944e-38, %v5408_v21 }
 0xa31   :  { %v5366_v18 = vsel %vm5365_vm13, %v7742_v39, %v5362_v57  ;;  %v5406_v39 = vand.u32 2147483647, %v5396_v46  ;;  %vm5404_vm3 = vmor %vm5402_vm2, %vm5403_vm1  ;;  %v13598_v57 = vld [vmem:[#allocation90_spill] sm:$0xff] }
 0xa32   :  { %v5371_v28 = vsel %vm5368_vm15, %v5370_v19, %v5366_v18  ;;  %v5385_v61 = vsel %vm5384_vm14, %v7744_v38, %v5381_v5  ;;  %v5399_v60 = vsub.f32 1.0, %v5398_v20  ;;  %v13599_v5 = vld [vmem:[#allocation86_spill] sm:$0xff] }
 0xa33   :  { %v5390_v26 = vsel %vm5387_vm0, %v5389_v27, %v5385_v61  ;;  %v5413_v2 = vmul.f32 %v7748_v13, %v5371_v28  ;;  %vm5407_vm4 = vcmp.eq.f32.partialorder %v5406_v39, 8.507059e+37 }
 0xa34   :  { %v5412_v22 = vmul.f32 %v5390_v26, %v12091_v37  ;;  %v5400_v16 = vmul.f32 %v7746_v43, %v5399_v60  ;;  %v13596_v37 = vld [vmem:[#allocation79_spill] sm:$0xff] }
 0xa35   :  { %v4607_v46 = vadd.f32 %v13596_v37, %v11550_v35 }
 0xa36   :  { %v12131_v23 = vadd.f32 %v5413_v2, %v5412_v22  ;;  %v5401_v44 = vadd.f32 %v7746_v43, %v5400_v16  ;;  %v13600_v22 = vld [vmem:[#allocation111_spill] sm:$0xff] }
 0xa37   :  { %v4636_v19 = vadd.f32 %v13598_v57, %v4607_v46 }
 0xa38   :  { %7749 = vtanh.f32 %v12131_v23  ;;  %v5405_v29 = vsel %vm5404_vm3, %v7746_v43, %v5401_v44  ;;  %v4665_v43 = vadd.f32 %v13597_v41, %v11575_v59 }
 0xa39   :  { %v5410_v25 = vsel %vm5407_vm4, %v5409_v34, %v5405_v29 }
 0xa3a   :  { %v4694_v20 = vadd.f32 %v13599_v5, %v4665_v43  ;;  %v13601_v43 = vld [vmem:[#allocation100_spill] sm:$0xff] }
 0xa3e   :  { %v7750_v38 = vpop.eup %7749 }
 0xa3f   :  { %v5416_v49 = vmul.f32 %v7750_v38, %v5410_v25 }
 0xa41   :  { %v5421_v32 = vpack.c.bf16 %v5416_v49, %v5416_v49 }
 0xa43   :  { %5430 = vmatmul.bf16.vlgmr.msrb.gmra.mxu0 %v5421_v32  ;;  %5443 = vmatmul.bf16.vlgmr.msrb.gmra.mxu1 %v5421_v32 }
 0xa44   :  { %5456 = vmatmul.bf16.vlgmr.msrb.gmra.mxu2 %v5421_v32  ;;  %5469 = vmatmul.bf16.vlgmr.msrb.gmra.mxu3 %v5421_v32 }
 0xa45   :  { %5670 = vmatpush.bf16.msrb.mxu0 %v11567_v51  ;;  %5683 = vmatpush.bf16.msrb.mxu1 %v11578_v52 }
 0xa46   :  { %5696 = vmatpush.bf16.msrb.mxu2 %v11650_v17  ;;  %5709 = vmatpush.bf16.msrb.mxu3 %v11595_v42 }
 0xa49   :  { %5671 = vmatpush.bf16.msrb.mxu0 %v11622_v7  ;;  %5684 = vmatpush.bf16.msrb.mxu1 %v11629_v53 }
 0xa4a   :  { %5697 = vmatpush.bf16.msrb.mxu2 %v11695_v63  ;;  %5710 = vmatpush.bf16.msrb.mxu3 %v11642_v6 }
 0xa4d   :  { %5672 = vmatpush.bf16.msrb.mxu0 %v11668_v45  ;;  %5685 = vmatpush.bf16.msrb.mxu1 %v11681_v8 }
 0xa4e   :  { %5698 = vmatpush.bf16.msrb.mxu2 %v11740_v10  ;;  %5711 = vmatpush.bf16.msrb.mxu3 %v11683_v56 }
 0xa51   :  { %5673 = vmatpush.bf16.msrb.mxu0 %v11710_v58  ;;  %5686 = vmatpush.bf16.msrb.mxu1 %v11712_v48 }
 0xa52   :  { %5699 = vmatpush.bf16.msrb.mxu2 %v11785_v15  ;;  %5712 = vmatpush.bf16.msrb.mxu3 %v11735_v54 }
 0xa55   :  { %5674 = vmatpush.bf16.msrb.mxu0 %v11758_v9  ;;  %5687 = vmatpush.bf16.msrb.mxu1 %v11769_v55 }
 0xa56   :  { %5700 = vmatpush.bf16.msrb.mxu2 %v11816_v47  ;;  %5713 = vmatpush.bf16.msrb.mxu3 %v11771_v1 }
 0xa59   :  { %5675 = vmatpush.bf16.msrb.mxu0 %v11798_v30  ;;  %5688 = vmatpush.bf16.msrb.mxu1 %v11800_v14 }
 0xa5a   :  { %5701 = vmatpush.bf16.msrb.mxu2 %v11834_v24  ;;  %5714 = vmatpush.bf16.msrb.mxu3 %v11827_v40 }
 0xa5d   :  { %5676 = vmatpush.bf16.msrb.mxu0 %v11848_v11  ;;  %5689 = vmatpush.bf16.msrb.mxu1 %v11859_v36 }
 0xa5e   :  { %5702 = vmatpush.bf16.msrb.mxu2 %v11861_v3  ;;  %5715 = vmatpush.bf16.msrb.mxu3 %v11873_v33 }
 0xa61   :  { %5677 = vmatpush.bf16.msrb.mxu0 %v11885_v0  ;;  %5690 = vmatpush.bf16.msrb.mxu1 %v11897_v4 }
 0xa62   :  { %5703 = vmatpush.bf16.msrb.mxu2 %v11895_v50  ;;  %5716 = vmatpush.bf16.msrb.mxu3 %v11912_v31 }
 0xac0   :  { %v5431_v27 = vpop.f32.mrf.mxu0  ;;  %v5444_v18 = vpop.f32.mrf.mxu1 }
 0xac1   :  { %v5474_v13 = vadd.f32 %v5431_v27, %v4636_v19  ;;  %v5475_v28 = vadd.f32 %v5444_v18, %v4694_v20 }
 0xac3   :  { %v7171_v61 = vmul.f32 -1.442695, %v5474_v13  ;;  %v7172_v60 = vmul.f32 -1.442695, %v5475_v28 }
 0xac5   :  { %7751 = vpow2.f32 %v7171_v61 }
 0xac6   :  { %7753 = vpow2.f32 %v7172_v60 }
 0xac7   :  { %v5457_v26 = vpop.f32.mrf.mxu2  ;;  %v5470_v2 = vpop.f32.mrf.mxu3 }
 0xac8   :  { %v5477_v16 = vadd.f32 %v5470_v2, %v13600_v22  ;;  %v5433_v44 = vpop.f32.mrf.mxu0  ;;  %v5446_v21 = vpop.f32.mrf.mxu1  ;;  %v5476_v57 = vadd.f32 %v5457_v26, %v13601_v43 }
 0xaca   :  { %v7173_v39 = vmul.f32 -1.442695, %v5477_v16 }
 0xacb   :  { %v7752_v29 = vpop.eup %7751 }
 0xacc   :  { %v7754_v34 = vpop.eup %7753  ;;  %v5481_v38 = vadd.f32 1.0, %v7752_v29  ;;  %7755 = vpow2.f32 %v7173_v39 }
 0xacd   :  { %v5500_v25 = vadd.f32 1.0, %v7754_v34 }
 0xace   :  { %7757 = vrcp.f32 %v5481_v38  ;;  %v5493_v13 = vand.u32 2147483648, %v5481_v38  ;;  %v5491_v60 = vand.u32 2147483647, %v5481_v38  ;;  %vm5487_vm7 = vweird.f32 %v5481_v38 }
 0xacf   :  { %7759 = vrcp.f32 %v5500_v25  ;;  %v5459_v49 = vpop.f32.mrf.mxu2  ;;  %v5472_v32 = vpop.f32.mrf.mxu3  ;;  %v5512_v28 = vand.u32 2147483648, %v5500_v25  ;;  %v5510_v22 = vand.u32 2147483647, %v5500_v25  ;;  %vm5506_vm8 = vweird.f32 %v5500_v25 }
 0xad0   :  { %v5494_v26 = vor.u32 1.1754944e-38, %v5493_v13  ;;  %vm5492_vm11 = vcmp.eq.f32.partialorder %v5491_v60, 8.507059e+37 }
 0xad1   :  { %v5513_v29 = vor.u32 1.1754944e-38, %v5512_v28  ;;  %vm5511_vm12 = vcmp.eq.f32.partialorder %v5510_v22, 8.507059e+37  ;;  %v13602_v22 = vld [vmem:[#allocation96_spill] sm:$0xff] }
 0xad2   :  { %v7756_v37 = vpop.eup %7755 }
 0xad3   :  { %v5520_v46 = vadd.f32 1.0, %v7756_v37 }
 0xad4   :  { %v7758_v41 = vpop.eup %7757 }
 0xad5   :  { %v7760_v19 = vpop.eup %7759  ;;  %v5483_v5 = vmul.f32 %v7758_v41, %v5481_v38  ;;  %7761 = vrcp.f32 %v5520_v46  ;;  %vm5488_vm5 = vweird.f32 %v7758_v41  ;;  %vm5526_vm14 = vweird.f32 %v5520_v46 }
 0xad6   :  { %v5502_v20 = vmul.f32 %v7760_v19, %v5500_v25  ;;  %7763 = vtanh.f32 %v5476_v57  ;;  %vm5507_vm6 = vweird.f32 %v7760_v19  ;;  %vm5489_vm9 = vmor %vm5487_vm7, %vm5488_vm5 }
 0xad7   :  { %v5484_v27 = vsub.f32 1.0, %v5483_v5  ;;  %vm5508_vm10 = vmor %vm5506_vm8, %vm5507_vm6 }
 0xad8   :  { %v5503_v18 = vsub.f32 1.0, %v5502_v20 }
 0xad9   :  { %v5485_v61 = vmul.f32 %v7758_v41, %v5484_v27 }
 0xada   :  { %v5504_v2 = vmul.f32 %v7760_v19, %v5503_v18  ;;  %v5532_v18 = vand.u32 2147483648, %v5520_v46 }
 0xadb   :  { %v7762_v16 = vpop.eup %7761  ;;  %v5486_v44 = vadd.f32 %v7758_v41, %v5485_v61 }
 0xadc   :  { %v5505_v21 = vadd.f32 %v7760_v19, %v5504_v2  ;;  %v5522_v39 = vmul.f32 %v7762_v16, %v5520_v46  ;;  %v7764_v49 = vpop.eup %7763  ;;  %vm5527_vm13 = vweird.f32 %v7762_v16  ;;  %v5533_v28 = vor.u32 1.1754944e-38, %v5532_v18 }
 0xadd   :  { %v5490_v34 = vsel %vm5489_vm9, %v7758_v41, %v5486_v44  ;;  %v5530_v41 = vand.u32 2147483647, %v5520_v46  ;;  %vm5528_vm15 = vmor %vm5526_vm14, %vm5527_vm13  ;;  %v13603_v44 = vld [vmem:[#allocation99_spill] sm:$0xff] }
 0xade   :  { %v5495_v32 = vsel %vm5492_vm11, %v5494_v26, %v5490_v34  ;;  %v5509_v37 = vsel %vm5508_vm10, %v7760_v19, %v5505_v21  ;;  %v5523_v43 = vsub.f32 1.0, %v5522_v39 }
 0xadf   :  { %v5514_v57 = vsel %vm5511_vm12, %v5513_v29, %v5509_v37  ;;  %v5537_v5 = vmul.f32 %v7764_v49, %v5495_v32  ;;  %vm5531_vm0 = vcmp.eq.f32.partialorder %v5530_v41, 8.507059e+37  ;;  %v13604_v49 = vld [vmem:[#allocation104_spill] sm:$0xff] }
 0xae0   :  { %v5536_v20 = vmul.f32 %v5514_v57, %v12131_v23  ;;  %v5524_v27 = vmul.f32 %v7762_v16, %v5523_v43 }
 0xae2   :  { %v12175_v38 = vadd.f32 %v5537_v5, %v5536_v20  ;;  %v5525_v25 = vadd.f32 %v7762_v16, %v5524_v27 }
 0xae4   :  { %7765 = vtanh.f32 %v12175_v38  ;;  %v5529_v13 = vsel %vm5528_vm15, %v7762_v16, %v5525_v25 }
 0xae5   :  { %v5534_v61 = vsel %vm5531_vm0, %v5533_v28, %v5529_v13 }
 0xaea   :  { %v7766_v19 = vpop.eup %7765 }
 0xaeb   :  { %v5540_v60 = vmul.f32 %v7766_v19, %v5534_v61  ;;  %v13605_v61 = vld [vmem:[#allocation113_spill] sm:$0xff] }
 0xaed   :  { %v5545_v2 = vpack.c.bf16 %v5540_v60, %v5540_v60 }
 0xaef   :  { %5554 = vmatmul.bf16.vlgmr.msra.gmra.mxu0 %v5545_v2  ;;  %5567 = vmatmul.bf16.vlgmr.msra.gmra.mxu1 %v5545_v2 }
 0xaf0   :  { %5580 = vmatmul.bf16.vlgmr.msra.gmra.mxu2 %v5545_v2  ;;  %5593 = vmatmul.bf16.vlgmr.msra.gmra.mxu3 %v5545_v2 }
 0xaf1   :  { %5794 = vmatpush.bf16.msra.mxu0 %v11567_v51  ;;  %5807 = vmatpush.bf16.msra.mxu1 %v11578_v52 }
 0xaf2   :  { %5820 = vmatpush.bf16.msra.mxu2 %v11650_v17  ;;  %5833 = vmatpush.bf16.msra.mxu3 %v11595_v42 }
 0xaf5   :  { %5795 = vmatpush.bf16.msra.mxu0 %v11622_v7  ;;  %5808 = vmatpush.bf16.msra.mxu1 %v11629_v53 }
 0xaf6   :  { %5821 = vmatpush.bf16.msra.mxu2 %v11695_v63  ;;  %5834 = vmatpush.bf16.msra.mxu3 %v11642_v6 }
 0xaf9   :  { %5796 = vmatpush.bf16.msra.mxu0 %v11668_v45  ;;  %5809 = vmatpush.bf16.msra.mxu1 %v11681_v8 }
 0xafa   :  { %5822 = vmatpush.bf16.msra.mxu2 %v11740_v10  ;;  %5835 = vmatpush.bf16.msra.mxu3 %v11683_v56 }
 0xafd   :  { %5797 = vmatpush.bf16.msra.mxu0 %v11710_v58  ;;  %5810 = vmatpush.bf16.msra.mxu1 %v11712_v48 }
 0xafe   :  { %5823 = vmatpush.bf16.msra.mxu2 %v11785_v15  ;;  %5836 = vmatpush.bf16.msra.mxu3 %v11735_v54 }
 0xb01   :  { %5798 = vmatpush.bf16.msra.mxu0 %v11758_v9  ;;  %5811 = vmatpush.bf16.msra.mxu1 %v11769_v55 }
 0xb02   :  { %5824 = vmatpush.bf16.msra.mxu2 %v11816_v47  ;;  %5837 = vmatpush.bf16.msra.mxu3 %v11771_v1 }
 0xb05   :  { %5799 = vmatpush.bf16.msra.mxu0 %v11798_v30  ;;  %5812 = vmatpush.bf16.msra.mxu1 %v11800_v14 }
 0xb06   :  { %5825 = vmatpush.bf16.msra.mxu2 %v11834_v24  ;;  %5838 = vmatpush.bf16.msra.mxu3 %v11827_v40 }
 0xb09   :  { %5800 = vmatpush.bf16.msra.mxu0 %v11848_v11  ;;  %5813 = vmatpush.bf16.msra.mxu1 %v11859_v36 }
 0xb0a   :  { %5826 = vmatpush.bf16.msra.mxu2 %v11861_v3  ;;  %5839 = vmatpush.bf16.msra.mxu3 %v11873_v33 }
 0xb0d   :  { %5801 = vmatpush.bf16.msra.mxu0 %v11885_v0  ;;  %5814 = vmatpush.bf16.msra.mxu1 %v11897_v4 }
 0xb0e   :  { %5827 = vmatpush.bf16.msra.mxu2 %v11895_v50  ;;  %5840 = vmatpush.bf16.msra.mxu3 %v11912_v31 }
 0xb6c   :  { %v5555_v23 = vpop.f32.mrf.mxu0  ;;  %v5568_v46 = vpop.f32.mrf.mxu1 }
 0xb6d   :  { %v5598_v16 = vadd.f32 %v5555_v23, %v13602_v22  ;;  %v5599_v26 = vadd.f32 %v5568_v46, %v13603_v44 }
 0xb6f   :  { %v7174_v21 = vmul.f32 -1.442695, %v5598_v16  ;;  %v7175_v39 = vmul.f32 -1.442695, %v5599_v26 }
 0xb71   :  { %7767 = vpow2.f32 %v7174_v21 }
 0xb72   :  { %7769 = vpow2.f32 %v7175_v39 }
 0xb73   :  { %v5581_v29 = vpop.f32.mrf.mxu2  ;;  %v5594_v34 = vpop.f32.mrf.mxu3 }
 0xb74   :  { %v5601_v32 = vadd.f32 %v5594_v34, %v13604_v49  ;;  %v5557_v37 = vpop.f32.mrf.mxu0  ;;  %v5570_v43 = vpop.f32.mrf.mxu1  ;;  %v5600_v60 = vadd.f32 %v5581_v29, %v13605_v61 }
 0xb76   :  { %v7176_v57 = vmul.f32 -1.442695, %v5601_v32 }
 0xb77   :  { %v7768_v5 = vpop.eup %7767 }
 0xb78   :  { %v7770_v20 = vpop.eup %7769  ;;  %v5605_v27 = vadd.f32 1.0, %v7768_v5  ;;  %7771 = vpow2.f32 %v7176_v57 }
 0xb79   :  { %v5624_v25 = vadd.f32 1.0, %v7770_v20 }
 0xb7a   :  { %7773 = vrcp.f32 %v5605_v27  ;;  %v5617_v44 = vand.u32 2147483648, %v5605_v27  ;;  %v5615_v39 = vand.u32 2147483647, %v5605_v27  ;;  %vm5611_vm3 = vweird.f32 %v5605_v27 }
 0xb7b   :  { %7775 = vrcp.f32 %v5624_v25  ;;  %v5583_v18 = vpop.f32.mrf.mxu2  ;;  %v5596_v41 = vpop.f32.mrf.mxu3  ;;  %v5636_v26 = vand.u32 2147483648, %v5624_v25  ;;  %v5634_v49 = vand.u32 2147483647, %v5624_v25  ;;  %vm5630_vm4 = vweird.f32 %v5624_v25 }
 0xb7c   :  { %v5618_v29 = vor.u32 1.1754944e-38, %v5617_v44  ;;  %vm5616_vm7 = vcmp.eq.f32.partialorder %v5615_v39, 8.507059e+37 }
 0xb7d   :  { %v5637_v5 = vor.u32 1.1754944e-38, %v5636_v26  ;;  %vm5635_vm8 = vcmp.eq.f32.partialorder %v5634_v49, 8.507059e+37 }
 0xb7e   :  { %v7772_v13 = vpop.eup %7771 }
 0xb7f   :  { %v5644_v28 = vadd.f32 1.0, %v7772_v13 }
 0xb80   :  { %v7774_v19 = vpop.eup %7773 }
 0xb81   :  { %v7776_v2 = vpop.eup %7775  ;;  %v5607_v23 = vmul.f32 %v7774_v19, %v5605_v27  ;;  %7777 = vrcp.f32 %v5644_v28  ;;  %vm5612_vm1 = vweird.f32 %v7774_v19  ;;  %vm5650_vm10 = vweird.f32 %v5644_v28 }
 0xb82   :  { %v5626_v46 = vmul.f32 %v7776_v2, %v5624_v25  ;;  %7779 = vtanh.f32 %v5600_v60  ;;  %vm5631_vm2 = vweird.f32 %v7776_v2  ;;  %vm5613_vm5 = vmor %vm5611_vm3, %vm5612_vm1 }
 0xb83   :  { %v5608_v22 = vsub.f32 1.0, %v5607_v23  ;;  %vm5632_vm6 = vmor %vm5630_vm4, %vm5631_vm2 }
 0xb84   :  { %v5627_v16 = vsub.f32 1.0, %v5626_v46 }
 0xb85   :  { %v5609_v21 = vmul.f32 %v7774_v19, %v5608_v22 }
 0xb86   :  { %v5628_v34 = vmul.f32 %v7776_v2, %v5627_v16  ;;  %v5656_v16 = vand.u32 2147483648, %v5644_v28 }
 0xb87   :  { %v7778_v32 = vpop.eup %7777  ;;  %v5610_v37 = vadd.f32 %v7774_v19, %v5609_v21 }
 0xb88   :  { %v5629_v43 = vadd.f32 %v7776_v2, %v5628_v34  ;;  %v5646_v57 = vmul.f32 %v7778_v32, %v5644_v28  ;;  %v7780_v18 = vpop.eup %7779  ;;  %vm5651_vm9 = vweird.f32 %v7778_v32  ;;  %v5657_v26 = vor.u32 1.1754944e-38, %v5656_v16 }
 0xb89   :  { %v5614_v20 = vsel %vm5613_vm5, %v7774_v19, %v5610_v37  ;;  %v5654_v19 = vand.u32 2147483647, %v5644_v28  ;;  %vm5652_vm11 = vmor %vm5650_vm10, %vm5651_vm9 }
 0xb8a   :  { %v5619_v41 = vsel %vm5616_vm7, %v5618_v29, %v5614_v20  ;;  %v5633_v13 = vsel %vm5632_vm6, %v7776_v2, %v5629_v43  ;;  %v5647_v61 = vsub.f32 1.0, %v5646_v57 }
 0xb8b   :  { %v5638_v60 = vsel %vm5635_vm8, %v5637_v5, %v5633_v13  ;;  %v5661_v23 = vmul.f32 %v7780_v18, %v5619_v41  ;;  %vm5655_vm12 = vcmp.eq.f32.partialorder %v5654_v19, 8.507059e+37 }
 0xb8c   :  { %v5660_v46 = vmul.f32 %v5638_v60, %v12175_v38  ;;  %v5648_v22 = vmul.f32 %v7778_v32, %v5647_v61 }
 0xb8e   :  { %v12215_v27 = vadd.f32 %v5661_v23, %v5660_v46  ;;  %v5649_v25 = vadd.f32 %v7778_v32, %v5648_v22 }
 0xb90   :  { %7781 = vtanh.f32 %v12215_v27  ;;  %v5653_v44 = vsel %vm5652_vm11, %v7778_v32, %v5649_v25 }
 0xb91   :  { %v5658_v21 = vsel %vm5655_vm12, %v5657_v26, %v5653_v44 }
 0xb96   :  { %v7782_v2 = vpop.eup %7781 }
 0xb97   :  { %v5664_v39 = vmul.f32 %v7782_v2, %v5658_v21 }
 0xb99   :  { %v5669_v34 = vpack.c.bf16 %v5664_v39, %v5664_v39 }
 0xb9b   :  { %5678 = vmatmul.bf16.vlgmr.msrb.gmra.mxu0 %v5669_v34  ;;  %5691 = vmatmul.bf16.vlgmr.msrb.gmra.mxu1 %v5669_v34 }
 0xb9c   :  { %5704 = vmatmul.bf16.vlgmr.msrb.gmra.mxu2 %v5669_v34  ;;  %5717 = vmatmul.bf16.vlgmr.msrb.gmra.mxu3 %v5669_v34 }
 0xb9d   :  { %5918 = vmatpush.bf16.msrb.mxu0 %v11567_v51  ;;  %5931 = vmatpush.bf16.msrb.mxu1 %v11578_v52  ;;  %v13606_v51 = vld [vmem:[#allocation89_spill] sm:$0xff] }
 0xb9e   :  { %5944 = vmatpush.bf16.msrb.mxu2 %v11650_v17  ;;  %5957 = vmatpush.bf16.msrb.mxu3 %v11595_v42  ;;  %v4612_v52 = vadd.f32 %v13606_v51, %v11550_v35  ;;  %v13607_v42 = vld [vmem:[#allocation103_spill] sm:$0xff]  ;;  %v13609_v17 = vld [vmem:[#allocation81_spill] sm:$0xff] }
 0xba1   :  { %5919 = vmatpush.bf16.msrb.mxu0 %v11622_v7  ;;  %5932 = vmatpush.bf16.msrb.mxu1 %v11629_v53  ;;  %v4670_v7 = vadd.f32 %v13607_v42, %v11575_v59  ;;  %v13608_v53 = vld [vmem:[#allocation92_spill] sm:$0xff] }
 0xba2   :  { %5945 = vmatpush.bf16.msrb.mxu2 %v11695_v63  ;;  %5958 = vmatpush.bf16.msrb.mxu3 %v11642_v6  ;;  %v4641_v6 = vadd.f32 %v13608_v53, %v4612_v52 }
 0xba5   :  { %5920 = vmatpush.bf16.msrb.mxu0 %v11668_v45  ;;  %5933 = vmatpush.bf16.msrb.mxu1 %v11681_v8  ;;  %v4699_v45 = vadd.f32 %v13609_v17, %v4670_v7 }
 0xba6   :  { %5946 = vmatpush.bf16.msrb.mxu2 %v11740_v10  ;;  %5959 = vmatpush.bf16.msrb.mxu3 %v11683_v56 }
 0xba9   :  { %5921 = vmatpush.bf16.msrb.mxu0 %v11710_v58  ;;  %5934 = vmatpush.bf16.msrb.mxu1 %v11712_v48 }
 0xbaa   :  { %5947 = vmatpush.bf16.msrb.mxu2 %v11785_v15  ;;  %5960 = vmatpush.bf16.msrb.mxu3 %v11735_v54 }
 0xbad   :  { %5922 = vmatpush.bf16.msrb.mxu0 %v11758_v9  ;;  %5935 = vmatpush.bf16.msrb.mxu1 %v11769_v55 }
 0xbae   :  { %5948 = vmatpush.bf16.msrb.mxu2 %v11816_v47  ;;  %5961 = vmatpush.bf16.msrb.mxu3 %v11771_v1 }
 0xbb1   :  { %5923 = vmatpush.bf16.msrb.mxu0 %v11798_v30  ;;  %5936 = vmatpush.bf16.msrb.mxu1 %v11800_v14 }
 0xbb2   :  { %5949 = vmatpush.bf16.msrb.mxu2 %v11834_v24  ;;  %5962 = vmatpush.bf16.msrb.mxu3 %v11827_v40 }
 0xbb5   :  { %5924 = vmatpush.bf16.msrb.mxu0 %v11848_v11  ;;  %5937 = vmatpush.bf16.msrb.mxu1 %v11859_v36 }
 0xbb6   :  { %5950 = vmatpush.bf16.msrb.mxu2 %v11861_v3  ;;  %5963 = vmatpush.bf16.msrb.mxu3 %v11873_v33 }
 0xbb9   :  { %5925 = vmatpush.bf16.msrb.mxu0 %v11885_v0  ;;  %5938 = vmatpush.bf16.msrb.mxu1 %v11897_v4 }
 0xbba   :  { %5951 = vmatpush.bf16.msrb.mxu2 %v11895_v50  ;;  %5964 = vmatpush.bf16.msrb.mxu3 %v11912_v31  ;;  %v13610_v50 = vld [vmem:[#allocation106_spill] sm:$0xff] }
 0xc18   :  { %v5679_v8 = vpop.f32.mrf.mxu0  ;;  %v5692_v56 = vpop.f32.mrf.mxu1 }
 0xc19   :  { %v5722_v63 = vadd.f32 %v5679_v8, %v4641_v6  ;;  %v5723_v58 = vadd.f32 %v5692_v56, %v4699_v45  ;;  %v13611_v8 = vld [vmem:[#allocation82_spill] sm:$0xff] }
 0xc1b   :  { %v7177_v48 = vmul.f32 -1.442695, %v5722_v63  ;;  %v7178_v54 = vmul.f32 -1.442695, %v5723_v58  ;;  %v13612_v63 = vld [vmem:[#allocation94_spill] sm:$0xff] }
 0xc1d   :  { %7783 = vpow2.f32 %v7177_v48 }
 0xc1e   :  { %7785 = vpow2.f32 %v7178_v54 }
 0xc1f   :  { %v5705_v10 = vpop.f32.mrf.mxu2  ;;  %v5718_v9 = vpop.f32.mrf.mxu3 }
 0xc20   :  { %v5725_v55 = vadd.f32 %v5718_v9, %v12033_v12  ;;  %v5681_v1 = vpop.f32.mrf.mxu0  ;;  %v5694_v15 = vpop.f32.mrf.mxu1  ;;  %v5724_v4 = vadd.f32 %v5705_v10, %v13610_v50  ;;  %v13613_v50 = vld [vmem:[#allocation115_spill] sm:$0xff] }
 0xc22   :  { %v7179_v30 = vmul.f32 -1.442695, %v5725_v55 }
 0xc23   :  { %v7784_v14 = vpop.eup %7783 }
 0xc24   :  { %v7786_v47 = vpop.eup %7785  ;;  %v5729_v40 = vadd.f32 1.0, %v7784_v14  ;;  %7787 = vpow2.f32 %v7179_v30 }
 0xc25   :  { %v5748_v24 = vadd.f32 1.0, %v7786_v47 }
 0xc26   :  { %7789 = vrcp.f32 %v5729_v40  ;;  %v5741_v32 = vand.u32 2147483648, %v5729_v40  ;;  %v5739_v43 = vand.u32 2147483647, %v5729_v40  ;;  %vm5735_vm15 = vweird.f32 %v5729_v40 }
 0xc27   :  { %7791 = vrcp.f32 %v5748_v24  ;;  %v5707_v11 = vpop.f32.mrf.mxu2  ;;  %v5720_v36 = vpop.f32.mrf.mxu3  ;;  %v5760_v37 = vand.u32 2147483648, %v5748_v24  ;;  %v5758_v5 = vand.u32 2147483647, %v5748_v24  ;;  %vm5754_vm0 = vweird.f32 %v5748_v24 }
 0xc28   :  { %v5742_v41 = vor.u32 1.1754944e-38, %v5741_v32  ;;  %vm5740_vm3 = vcmp.eq.f32.partialorder %v5739_v43, 8.507059e+37 }
 0xc29   :  { %v5761_v60 = vor.u32 1.1754944e-38, %v5760_v37  ;;  %vm5759_vm4 = vcmp.eq.f32.partialorder %v5758_v5, 8.507059e+37 }
 0xc2a   :  { %v7788_v3 = vpop.eup %7787 }
 0xc2b   :  { %v5768_v33 = vadd.f32 1.0, %v7788_v3 }
 0xc2c   :  { %v7790_v0 = vpop.eup %7789 }
 0xc2d   :  { %v7792_v31 = vpop.eup %7791  ;;  %v5731_v38 = vmul.f32 %v7790_v0, %v5729_v40  ;;  %7793 = vrcp.f32 %v5768_v33  ;;  %vm5736_vm13 = vweird.f32 %v7790_v0  ;;  %v5780_v34 = vand.u32 2147483648, %v5768_v33 }
 0xc2e   :  { %v5750_v12 = vmul.f32 %v7792_v31, %v5748_v24  ;;  %7795 = vtanh.f32 %v5724_v4  ;;  %vm5755_vm14 = vweird.f32 %v7792_v31  ;;  %vm5737_vm1 = vmor %vm5735_vm15, %vm5736_vm13  ;;  %vm5774_vm6 = vweird.f32 %v5768_v33 }
 0xc2f   :  { %v5732_v28 = vsub.f32 1.0, %v5731_v38  ;;  %vm5756_vm2 = vmor %vm5754_vm0, %vm5755_vm14  ;;  %v5778_v51 = vand.u32 2147483647, %v5768_v33  ;;  %v5781_v42 = vor.u32 1.1754944e-38, %v5780_v34 }
 0xc30   :  { %v5751_v49 = vsub.f32 1.0, %v5750_v12 }
 0xc31   :  { %v5733_v29 = vmul.f32 %v7790_v0, %v5732_v28  ;;  %vm5779_vm8 = vcmp.eq.f32.partialorder %v5778_v51, 8.507059e+37 }
 0xc32   :  { %v5752_v57 = vmul.f32 %v7792_v31, %v5751_v49 }
 0xc33   :  { %v7794_v20 = vpop.eup %7793  ;;  %v5734_v18 = vadd.f32 %v7790_v0, %v5733_v29 }
 0xc34   :  { %v5753_v13 = vadd.f32 %v7792_v31, %v5752_v57  ;;  %v5770_v61 = vmul.f32 %v7794_v20, %v5768_v33  ;;  %v7796_v46 = vpop.eup %7795  ;;  %vm5775_vm5 = vweird.f32 %v7794_v20 }
 0xc35   :  { %v5738_v23 = vsel %vm5737_vm1, %v7790_v0, %v5734_v18  ;;  %vm5776_vm7 = vmor %vm5774_vm6, %vm5775_vm5 }
 0xc36   :  { %v5743_v22 = vsel %vm5740_vm3, %v5742_v41, %v5738_v23  ;;  %v5757_v25 = vsel %vm5756_vm2, %v7792_v31, %v5753_v13  ;;  %v5771_v16 = vsub.f32 1.0, %v5770_v61 }
 0xc37   :  { %v5762_v19 = vsel %vm5759_vm4, %v5761_v60, %v5757_v25  ;;  %v5785_v44 = vmul.f32 %v7796_v46, %v5743_v22 }
 0xc38   :  { %v5784_v26 = vmul.f32 %v5762_v19, %v12215_v27  ;;  %v5772_v2 = vmul.f32 %v7794_v20, %v5771_v16 }
 0xc3a   :  { %v12259_v21 = vadd.f32 %v5785_v44, %v5784_v26  ;;  %v5773_v39 = vadd.f32 %v7794_v20, %v5772_v2 }
 0xc3c   :  { %7797 = vtanh.f32 %v12259_v21  ;;  %v5777_v52 = vsel %vm5776_vm7, %v7794_v20, %v5773_v39 }
 0xc3d   :  { %v5782_v53 = vsel %vm5779_vm8, %v5781_v42, %v5777_v52 }
 0xc42   :  { %v7798_v7 = vpop.eup %7797 }
 0xc43   :  { %v5788_v6 = vmul.f32 %v7798_v7, %v5782_v53 }
 0xc45   :  { %v5793_v17 = vpack.c.bf16 %v5788_v6, %v5788_v6 }
 0xc47   :  { %5802 = vmatmul.bf16.vlgmr.msra.gmra.mxu0 %v5793_v17  ;;  %5815 = vmatmul.bf16.vlgmr.msra.gmra.mxu1 %v5793_v17 }
 0xc48   :  { %5828 = vmatmul.bf16.vlgmr.msra.gmra.mxu2 %v5793_v17  ;;  %5841 = vmatmul.bf16.vlgmr.msra.gmra.mxu3 %v5793_v17 }
 0xcc4   :  { %v5803_v27 = vpop.f32.mrf.mxu0  ;;  %v5816_v45 = vpop.f32.mrf.mxu1 }
 0xcc5   :  { %v5846_v56 = vadd.f32 %v5803_v27, %v13611_v8  ;;  %v5847_v58 = vadd.f32 %v5816_v45, %v13612_v63  ;;  %v13615_v45 = vld [vmem:[#allocation170_spill] sm:$0xff] }
 0xcc6   :  { %v4675_v8 = vadd.f32 %v13615_v45, %v11575_v59 }
 0xcc7   :  { %v7180_v48 = vmul.f32 -1.442695, %v5846_v56  ;;  %v7181_v54 = vmul.f32 -1.442695, %v5847_v58  ;;  %v13616_v56 = vld [vmem:[#allocation169_spill] sm:$0xff]  ;;  %v13617_v58 = vld [vmem:[#allocation172_spill] sm:$0xff] }
 0xcc9   :  { %7799 = vpow2.f32 %v7180_v48  ;;  %v4704_v48 = vadd.f32 %v13617_v58, %v4675_v8 }
 0xcca   :  { %7801 = vpow2.f32 %v7181_v54 }
 0xccb   :  { %v5829_v10 = vpop.f32.mrf.mxu2  ;;  %v5842_v9 = vpop.f32.mrf.mxu3 }
 0xccc   :  { %v5849_v55 = vadd.f32 %v5842_v9, %v12037_v62  ;;  %v5805_v1 = vpop.f32.mrf.mxu0  ;;  %v5818_v15 = vpop.f32.mrf.mxu1  ;;  %v5848_v4 = vadd.f32 %v5829_v10, %v13613_v50 }
 0xcce   :  { %v7182_v30 = vmul.f32 -1.442695, %v5849_v55 }
 0xccf   :  { %v7800_v14 = vpop.eup %7799 }
 0xcd0   :  { %v7802_v47 = vpop.eup %7801  ;;  %v5853_v40 = vadd.f32 1.0, %v7800_v14  ;;  %7803 = vpow2.f32 %v7182_v30 }
 0xcd1   :  { %v5872_v24 = vadd.f32 1.0, %v7802_v47  ;;  %v13618_v47 = vld [vmem:[#allocation120_spill] sm:$0xff] }
 0xcd2   :  { %7805 = vrcp.f32 %v5853_v40  ;;  %v5865_v49 = vand.u32 2147483648, %v5853_v40  ;;  %v5863_v29 = vand.u32 2147483647, %v5853_v40  ;;  %vm5859_vm11 = vweird.f32 %v5853_v40 }
 0xcd3   :  { %7807 = vrcp.f32 %v5872_v24  ;;  %v5831_v11 = vpop.f32.mrf.mxu2  ;;  %v5844_v36 = vpop.f32.mrf.mxu3  ;;  %v5884_v32 = vand.u32 2147483648, %v5872_v24  ;;  %v5882_v57 = vand.u32 2147483647, %v5872_v24  ;;  %vm5878_vm12 = vweird.f32 %v5872_v24 }
 0xcd4   :  { %v5866_v18 = vor.u32 1.1754944e-38, %v5865_v49  ;;  %vm5864_vm15 = vcmp.eq.f32.partialorder %v5863_v29, 8.507059e+37 }
 0xcd5   :  { %v5885_v61 = vor.u32 1.1754944e-38, %v5884_v32  ;;  %vm5883_vm0 = vcmp.eq.f32.partialorder %v5882_v57, 8.507059e+37 }
 0xcd6   :  { %v7804_v3 = vpop.eup %7803 }
 0xcd7   :  { %v5892_v33 = vadd.f32 1.0, %v7804_v3 }
 0xcd8   :  { %v7806_v0 = vpop.eup %7805 }
 0xcd9   :  { %v7808_v31 = vpop.eup %7807  ;;  %v5855_v38 = vmul.f32 %v7806_v0, %v5853_v40  ;;  %7809 = vrcp.f32 %v5892_v33  ;;  %vm5860_vm9 = vweird.f32 %v7806_v0  ;;  %v5904_v34 = vand.u32 2147483648, %v5892_v33 }
 0xcda   :  { %v5874_v62 = vmul.f32 %v7808_v31, %v5872_v24  ;;  %7811 = vtanh.f32 %v5848_v4  ;;  %vm5879_vm10 = vweird.f32 %v7808_v31  ;;  %vm5861_vm13 = vmor %vm5859_vm11, %vm5860_vm9  ;;  %vm5898_vm2 = vweird.f32 %v5892_v33 }
 0xcdb   :  { %v5856_v12 = vsub.f32 1.0, %v5855_v38  ;;  %vm5880_vm14 = vmor %vm5878_vm12, %vm5879_vm10  ;;  %v5902_v51 = vand.u32 2147483647, %v5892_v33  ;;  %v5905_v42 = vor.u32 1.1754944e-38, %v5904_v34 }
 0xcdc   :  { %v5875_v28 = vsub.f32 1.0, %v5874_v62  ;;  %v13619_v62 = vld [vmem:[#allocation117_spill] sm:$0xff] }
 0xcdd   :  { %v5857_v37 = vmul.f32 %v7806_v0, %v5856_v12  ;;  %vm5903_vm4 = vcmp.eq.f32.partialorder %v5902_v51, 8.507059e+37 }
 0xcde   :  { %v5876_v43 = vmul.f32 %v7808_v31, %v5875_v28 }
 0xcdf   :  { %v7810_v5 = vpop.eup %7809  ;;  %v5858_v20 = vadd.f32 %v7806_v0, %v5857_v37 }
 0xce0   :  { %v5877_v41 = vadd.f32 %v7808_v31, %v5876_v43  ;;  %v5894_v13 = vmul.f32 %v7810_v5, %v5892_v33  ;;  %v7812_v23 = vpop.eup %7811  ;;  %vm5899_vm1 = vweird.f32 %v7810_v5 }
 0xce1   :  { %v5862_v60 = vsel %vm5861_vm13, %v7806_v0, %v5858_v20  ;;  %vm5900_vm3 = vmor %vm5898_vm2, %vm5899_vm1 }
 0xce2   :  { %v5867_v46 = vsel %vm5864_vm15, %v5866_v18, %v5862_v60  ;;  %v5881_v22 = vsel %vm5880_vm14, %v7808_v31, %v5877_v41  ;;  %v5895_v25 = vsub.f32 1.0, %v5894_v13 }
 0xce3   :  { %v5886_v16 = vsel %vm5883_vm0, %v5885_v61, %v5881_v22  ;;  %v5909_v19 = vmul.f32 %v7812_v23, %v5867_v46 }
 0xce4   :  { %v5908_v44 = vmul.f32 %v5886_v16, %v12259_v21  ;;  %v5896_v26 = vmul.f32 %v7810_v5, %v5895_v25  ;;  %v13614_v21 = vld [vmem:[#allocation91_spill] sm:$0xff] }
 0xce5   :  { %v4617_v27 = vadd.f32 %v13614_v21, %v11550_v35 }
 0xce6   :  { %v12267_v2 = vadd.f32 %v5909_v19, %v5908_v44  ;;  %v5897_v39 = vadd.f32 %v7810_v5, %v5896_v26 }
 0xce7   :  { %v4646_v63 = vadd.f32 %v13616_v56, %v4617_v27 }
 0xce8   :  { %7813 = vtanh.f32 %v12267_v2  ;;  %v5901_v52 = vsel %vm5900_vm3, %v7810_v5, %v5897_v39 }
 0xce9   :  { %v5906_v53 = vsel %vm5903_vm4, %v5905_v42, %v5901_v52 }
 0xcee   :  { %v7814_v7 = vpop.eup %7813 }
 0xcef   :  { %v5912_v6 = vmul.f32 %v7814_v7, %v5906_v53 }
 0xcf1   :  { %v5917_v17 = vpack.c.bf16 %v5912_v6, %v5912_v6 }
 0xcf3   :  { %5926 = vmatmul.bf16.vlgmr.msrb.gmra.mxu0 %v5917_v17  ;;  %5939 = vmatmul.bf16.vlgmr.msrb.gmra.mxu1 %v5917_v17 }
 0xcf4   :  { %5952 = vmatmul.bf16.vlgmr.msrb.gmra.mxu2 %v5917_v17  ;;  %5965 = vmatmul.bf16.vlgmr.msrb.gmra.mxu3 %v5917_v17 }
 0xd70   :  { %v5927_v54 = vpop.f32.mrf.mxu0  ;;  %v5940_v10 = vpop.f32.mrf.mxu1 }
 0xd71   :  { %v5970_v9 = vadd.f32 %v5927_v54, %v4646_v63  ;;  %v5971_v55 = vadd.f32 %v5940_v10, %v4704_v48 }
 0xd73   :  { %v7183_v1 = vmul.f32 -1.442695, %v5970_v9  ;;  %v7184_v15 = vmul.f32 -1.442695, %v5971_v55 }
 0xd75   :  { %7815 = vpow2.f32 %v7183_v1 }
 0xd76   :  { %7817 = vpow2.f32 %v7184_v15 }
 0xd77   :  { %v5953_v30 = vpop.f32.mrf.mxu2  ;;  %v5966_v14 = vpop.f32.mrf.mxu3 }
 0xd78   :  { %v5973_v40 = vadd.f32 %v5966_v14, %v13618_v47  ;;  %v5929_v35 = vpop.f32.mrf.mxu0  ;;  %v5942_v24 = vpop.f32.mrf.mxu1  ;;  %v5972_v12 = vadd.f32 %v5953_v30, %v13619_v62 }
 0xd7a   :  { %v7185_v11 = vmul.f32 -1.442695, %v5973_v40 }
 0xd7b   :  { %v7816_v59 = vpop.eup %7815 }
 0xd7c   :  { %v7818_v36 = vpop.eup %7817  ;;  %v5977_v3 = vadd.f32 1.0, %v7816_v59  ;;  %7819 = vpow2.f32 %v7185_v11 }
 0xd7d   :  { %v5996_v33 = vadd.f32 1.0, %v7818_v36 }
 0xd7e   :  { %7821 = vrcp.f32 %v5977_v3  ;;  %v5989_v43 = vand.u32 2147483648, %v5977_v3  ;;  %v5987_v20 = vand.u32 2147483647, %v5977_v3  ;;  %vm5983_vm7 = vweird.f32 %v5977_v3 }
 0xd7f   :  { %7823 = vrcp.f32 %v5996_v33  ;;  %v5955_v0 = vpop.f32.mrf.mxu2  ;;  %v5968_v50 = vpop.f32.mrf.mxu3  ;;  %v6008_v57 = vand.u32 2147483648, %v5996_v33  ;;  %v6006_v41 = vand.u32 2147483647, %v5996_v33  ;;  %vm6002_vm8 = vweird.f32 %v5996_v33 }
 0xd80   :  { %v5990_v60 = vor.u32 1.1754944e-38, %v5989_v43  ;;  %vm5988_vm11 = vcmp.eq.f32.partialorder %v5987_v20, 8.507059e+37 }
 0xd81   :  { %v6009_v22 = vor.u32 1.1754944e-38, %v6008_v57  ;;  %vm6007_vm12 = vcmp.eq.f32.partialorder %v6006_v41, 8.507059e+37 }
 0xd82   :  { %v7820_v4 = vpop.eup %7819 }
 0xd83   :  { %v6016_v31 = vadd.f32 1.0, %v7820_v4 }
 0xd84   :  { %v7822_v38 = vpop.eup %7821 }
 0xd85   :  { %v7824_v28 = vpop.eup %7823  ;;  %v5979_v49 = vmul.f32 %v7822_v38, %v5977_v3  ;;  %7825 = vrcp.f32 %v6016_v31  ;;  %vm5984_vm5 = vweird.f32 %v7822_v38  ;;  %v6028_v53 = vand.u32 2147483648, %v6016_v31 }
 0xd86   :  { %v5998_v32 = vmul.f32 %v7824_v28, %v5996_v33  ;;  %7827 = vtanh.f32 %v5972_v12  ;;  %vm6003_vm6 = vweird.f32 %v7824_v28  ;;  %vm5985_vm9 = vmor %vm5983_vm7, %vm5984_vm5  ;;  %vm6022_vm14 = vweird.f32 %v6016_v31 }
 0xd87   :  { %v5980_v37 = vsub.f32 1.0, %v5979_v49  ;;  %vm6004_vm10 = vmor %vm6002_vm8, %vm6003_vm6  ;;  %v6026_v6 = vand.u32 2147483647, %v6016_v31  ;;  %v6029_v21 = vor.u32 1.1754944e-38, %v6028_v53 }
 0xd88   :  { %v5999_v29 = vsub.f32 1.0, %v5998_v32 }
 0xd89   :  { %v5981_v5 = vmul.f32 %v7822_v38, %v5980_v37  ;;  %vm6027_vm0 = vcmp.eq.f32.partialorder %v6026_v6, 8.507059e+37 }
 0xd8a   :  { %v6000_v18 = vmul.f32 %v7824_v28, %v5999_v29 }
 0xd8b   :  { %v7826_v13 = vpop.eup %7825  ;;  %v5982_v61 = vadd.f32 %v7822_v38, %v5981_v5 }
 0xd8c   :  { %v6001_v23 = vadd.f32 %v7824_v28, %v6000_v18  ;;  %v6018_v46 = vmul.f32 %v7826_v13, %v6016_v31  ;;  %v7828_v16 = vpop.eup %7827  ;;  %vm6023_vm13 = vweird.f32 %v7826_v13 }
 0xd8d   :  { %v5986_v25 = vsel %vm5985_vm9, %v7822_v38, %v5982_v61  ;;  %vm6024_vm15 = vmor %vm6022_vm14, %vm6023_vm13 }
 0xd8e   :  { %v5991_v19 = vsel %vm5988_vm11, %v5990_v60, %v5986_v25  ;;  %v6005_v44 = vsel %vm6004_vm10, %v7824_v28, %v6001_v23  ;;  %v6019_v26 = vsub.f32 1.0, %v6018_v46 }
 0xd8f   :  { %v6010_v39 = vsel %vm6007_vm12, %v6009_v22, %v6005_v44  ;;  %v6033_v34 = vmul.f32 %v7828_v16, %v5991_v19 }
 0xd90   :  { %v6032_v51 = vmul.f32 %v6010_v39, %v12267_v2  ;;  %v6020_v52 = vmul.f32 %v7826_v13, %v6019_v26 }
 0xd92   :  { %v6034_v42 = vadd.f32 %v6033_v34, %v6032_v51  ;;  %v6021_v7 = vadd.f32 %v7826_v13, %v6020_v52 }
 0xd94   :  { %7829 = vtanh.f32 %v6034_v42  ;;  %v6025_v17 = vsel %vm6024_vm15, %v7826_v13, %v6021_v7 }
 0xd95   :  { %v6030_v45 = vsel %vm6027_vm0, %v6029_v21, %v6025_v17 }
 0xd9a   :  { %v7830_v27 = vpop.eup %7829 }
 0xd9b   :  { %v6036_v8 = vmul.f32 %v7830_v27, %v6030_v45 }
 0xd9d   :  { %6037 = vst [vmem:[%s12289_s7] sm:$0xff] %v6036_v8 }

</bundles_post_ra>
